<compile_context>
chip_gen: v6e
topology: v6e:2x2x1
jax: 0.10.0
libtpu: 0.0.40
codegen_flags: <defaults>
</compile_context>

<pallas_src>
import functools

import jax
import jax.numpy as jnp
from jax import lax
from jax.experimental import pallas as pl
from jax.experimental.pallas import tpu as pltpu


# ----------------------------------------------------------------------------
# helpers
# ----------------------------------------------------------------------------
def _round_up(x, m):
    return (x + m - 1) // m * m


def _tile(dim, base, max_tile):
    """Pick a tile (multiple of `base`, <= max_tile) and the padded dim."""
    dp = _round_up(dim, base)
    t = min(dp, max_tile)
    return t, _round_up(dim, t)


def _tile_m(m):
    """Tile the M dimension: <=128 rows per block, >=2 blocks when possible."""
    mp = _round_up(m, 8)
    if mp <= 128:
        return mp, mp
    nblk = -(-mp // 128)                       # ceil
    tm = _round_up(-(-mp // nblk), 8)
    return tm, tm * nblk


# ----------------------------------------------------------------------------
# Pallas kernels
# ----------------------------------------------------------------------------
def _matmul_bias_kernel(a_ref, b_ref, bias_ref, o_ref, *, apply_tanh):
    """out[i,j] = sum_k a[i,k] @ b[k,j] + bias[j] (tanh optional).

    Accumulates directly into the f32 output block (resident across k).
    """
    @pl.when(pl.program_id(2) == 0)
    def _():
        o_ref[...] = jnp.zeros_like(o_ref)

    o_ref[...] += jnp.dot(a_ref[...], b_ref[...],
                          preferred_element_type=jnp.float32)

    @pl.when(pl.program_id(2) == pl.num_programs(2) - 1)
    def _():
        r = o_ref[...] + bias_ref[...]
        if apply_tanh:
            r = jnp.tanh(r)
        o_ref[...] = r


def _mulv_reparam_kernel(a_ref, w_ref, bias_ref, eps_ref, mulv_ref, z_ref, *,
                         lat_pad):
    """Fused [mu | logvar] = h @ [Wmu | Wlv] + [bmu | blv] and
    z = mu + eps * exp(0.5 * logvar) in the epilogue."""
    k = pl.program_id(1)

    @pl.when(k == 0)
    def _():
        mulv_ref[...] = jnp.zeros_like(mulv_ref)

    mulv_ref[...] += jnp.dot(a_ref[...], w_ref[...],
                             preferred_element_type=jnp.float32)

    @pl.when(k == pl.num_programs(1) - 1)
    def _():
        r = mulv_ref[...] + bias_ref[...]
        mulv_ref[...] = r
        mu = r[:, :lat_pad]
        lv = r[:, lat_pad:]
        z_ref[...] = mu + eps_ref[...] * jnp.exp(0.5 * lv)


# ----------------------------------------------------------------------------
# Pallas wrappers
# ----------------------------------------------------------------------------
def matmul_bias(a, wp, meta, apply_tanh=False):
    """a: (M, K) -> (M, N) f32, using pre-padded bf16 weight wp['w'] (Kp,Np)."""
    M, K = a.shape
    Kp, Np, tk, tn = meta["Kp"], meta["Np"], meta["tk"], meta["tn"]
    tm, Mp = _tile_m(M)

    a_p = jnp.zeros((Mp, Kp), jnp.bfloat16).at[:M, :K].set(
        a.astype(jnp.bfloat16))

    grid = (Mp // tm, Np // tn, Kp // tk)
    out = pl.pallas_call(
        functools.partial(_matmul_bias_kernel, apply_tanh=apply_tanh),
        out_shape=jax.ShapeDtypeStruct((Mp, Np), jnp.float32),
        grid_spec=pltpu.PrefetchScalarGridSpec(
            num_scalar_prefetch=0,
            grid=grid,
            in_specs=[
                pl.BlockSpec((tm, tk), lambda i, j, k: (i, k)),
                pl.BlockSpec((tk, tn), lambda i, j, k: (k, j)),
                pl.BlockSpec((1, tn), lambda i, j, k: (0, j)),
            ],
            out_specs=pl.BlockSpec((tm, tn), lambda i, j, k: (i, j)),
        ),
        compiler_params=pltpu.CompilerParams(
            dimension_semantics=("parallel", "parallel", "arbitrary")),
    )(a_p, wp["w"], wp["b"])
    return out[:M, :meta["N"]]


def mulv_reparam(h, eps, wp, meta):
    """Fused mu/logvar projection + reparameterization."""
    M, K = h.shape
    Kp, tk, L, Lp = meta["Kp"], meta["tk"], meta["L"], meta["Lp"]
    tm, Mp = _tile_m(M)

    a_p = jnp.zeros((Mp, Kp), jnp.bfloat16).at[:M, :K].set(
        h.astype(jnp.bfloat16))
    eps_p = jnp.zeros((Mp, Lp), jnp.float32).at[:M, :L].set(
        eps.astype(jnp.float32))

    grid = (Mp // tm, Kp // tk)
    mulv, z = pl.pallas_call(
        functools.partial(_mulv_reparam_kernel, lat_pad=Lp),
        out_shape=(jax.ShapeDtypeStruct((Mp, 2 * Lp), jnp.float32),
                   jax.ShapeDtypeStruct((Mp, Lp), jnp.float32)),
        grid_spec=pltpu.PrefetchScalarGridSpec(
            num_scalar_prefetch=0,
            grid=grid,
            in_specs=[
                pl.BlockSpec((tm, tk), lambda i, k: (i, k)),
                pl.BlockSpec((tk, 2 * Lp), lambda i, k: (k, 0)),
                pl.BlockSpec((1, 2 * Lp), lambda i, k: (0, 0)),
                pl.BlockSpec((tm, Lp), lambda i, k: (i, 0)),
            ],
            out_specs=[
                pl.BlockSpec((tm, 2 * Lp), lambda i, k: (i, 0)),
                pl.BlockSpec((tm, Lp), lambda i, k: (i, 0)),
            ],
        ),
        compiler_params=pltpu.CompilerParams(
            dimension_semantics=("parallel", "arbitrary")),
    )(a_p, wp["w"], wp["b"], eps_p)

    mu = mulv[:M, :L]
    logvar = mulv[:M, Lp:Lp + L]
    return mu, logvar, z[:M, :L]


# ----------------------------------------------------------------------------
# weight preprocessing (hoisted out of the forward path, done once)
# ----------------------------------------------------------------------------
def prep_linear(w, b):
    """w: (K, N), b: (N,). bf16 zero-padded weight, f32 padded bias."""
    K, N = w.shape
    tk, Kp = _tile(K, 128, 512)
    tn, Np = _tile(N, 128, 2048)
    w_p = jnp.zeros((Kp, Np), jnp.bfloat16).at[:K, :N].set(
        w.astype(jnp.bfloat16))
    b_p = jnp.zeros((1, Np), jnp.float32).at[0, :N].set(b.astype(jnp.float32))
    meta = dict(K=K, N=N, Kp=Kp, Np=Np, tk=tk, tn=tn)
    return dict(w=w_p, b=b_p), meta


def prep_conv(w, b):
    """PyTorch Conv2d weight (C_out, C_in, kh, kw) -> im2col matmul weight."""
    C_out = w.shape[0]
    w2 = w.reshape(C_out, -1).T        # (C_in*kh*kw, C_out)
    return prep_linear(w2, b)


def prep_conv_transpose(w, b):
    """PyTorch ConvTranspose2d weight (C_in, C_out, kh, kw) -> flipped conv."""
    w_conv = jnp.flip(w, axis=(2, 3)).transpose(1, 0, 2, 3)  # (C_out,C_in,kh,kw)
    return prep_conv(w_conv, b)


def prep_mulv(mu_w, mu_b, lv_w, lv_b):
    """Concatenate mu / logvar weights along N (each padded to 128 lanes)."""
    K, L = mu_w.shape
    Lp = _round_up(L, 128)
    tk, Kp = _tile(K, 128, 512)
    w_p = jnp.zeros((Kp, 2 * Lp), jnp.bfloat16)
    w_p = w_p.at[:K, :L].set(mu_w.astype(jnp.bfloat16))
    w_p = w_p.at[:K, Lp:Lp + L].set(lv_w.astype(jnp.bfloat16))
    b_p = jnp.zeros((1, 2 * Lp), jnp.float32)
    b_p = b_p.at[0, :L].set(mu_b.astype(jnp.float32))
    b_p = b_p.at[0, Lp:Lp + L].set(lv_b.astype(jnp.float32))
    meta = dict(K=K, L=L, Kp=Kp, tk=tk, Lp=Lp)
    return dict(w=w_p, b=b_p), meta


# ----------------------------------------------------------------------------
# conv / conv-transpose on top of the Pallas matmul
# ----------------------------------------------------------------------------
def conv2d(x, wp, meta, kh, kw, strides, padding, lhs_dilation, apply_tanh):
    """x: (B, C, H, W) NCHW.  Patch extraction via a single XLA op, matmul in
    Pallas.  `lhs_dilation` implements ConvTranspose2d zero-insertion without
    materializing the zero-inserted tensor."""
    B = x.shape[0]
    # TODO(synk): patch extraction (im2col) stays in XLA; only the matmul
    # (all the FLOPs) runs in Pallas.
    patches = lax.conv_general_dilated_patches(
        x, filter_shape=(kh, kw), window_strides=strides, padding=padding,
        lhs_dilation=lhs_dilation,
        dimension_numbers=("NCHW", "OIHW", "NCHW"))       # (B, C*kh*kw, OH, OW)
    _, CKK, OH, OW = patches.shape
    p = patches.transpose(0, 2, 3, 1).reshape(B * OH * OW, CKK)
    out = matmul_bias(p, wp, meta, apply_tanh)            # (B*OH*OW, C_out)
    C_out = meta["N"]
    return out.reshape(B, OH, OW, C_out).transpose(0, 3, 1, 2)


# ----------------------------------------------------------------------------
# AE model
# ----------------------------------------------------------------------------
def calc_feature_size(h, w):
    h = (h - 5 + 2 * 2) // 2 + 1
    w = (w - 3 + 2 * 1) // 1 + 1
    h = (h - 5 + 2 * 2) // 2 + 1
    w = (w - 3 + 2 * 1) // 1 + 1
    h = (h - 5 + 2 * 2) // 2 + 1
    w = (w - 3 + 2 * 1) // 1 + 1
    return h, w


def _uniform(key, shape, fan_in):
    bound = 1.0 / jnp.sqrt(jnp.float32(fan_in))
    return jax.random.uniform(key, shape, jnp.float32, -bound, bound)


def init_params(key, input_channels, latent_dim, feature_dim):
    ks = jax.random.split(key, 20)
    p = {}
    # encoder convs: (C_out, C_in, kh, kw)
    p["enc1_w"] = _uniform(ks[0], (16, input_channels, 5, 3), input_channels * 15)
    p["enc1_b"] = _uniform(ks[1], (16,), input_channels * 15)
    p["enc2_w"] = _uniform(ks[2], (32, 16, 5, 3), 16 * 15)
    p["enc2_b"] = _uniform(ks[3], (32,), 16 * 15)
    p["enc3_w"] = _uniform(ks[4], (64, 32, 5, 3), 32 * 15)
    p["enc3_b"] = _uniform(ks[5], (64,), 32 * 15)
    # linear layers stored as (in, out)
    p["fc_w"] = _uniform(ks[6], (feature_dim, 4096), feature_dim)
    p["fc_b"] = _uniform(ks[7], (4096,), feature_dim)
    p["mu_w"] = _uniform(ks[8], (4096, latent_dim), 4096)
    p["mu_b"] = _uniform(ks[9], (latent_dim,), 4096)
    p["lv_w"] = _uniform(ks[10], (4096, latent_dim), 4096)
    p["lv_b"] = _uniform(ks[11], (latent_dim,), 4096)
    p["dec_in_w"] = _uniform(ks[12], (latent_dim, feature_dim), latent_dim)
    p["dec_in_b"] = _uniform(ks[13], (feature_dim,), latent_dim)
    # decoder transposed convs: (C_in, C_out, kh, kw)
    p["dec1_w"] = _uniform(ks[14], (64, 32, 5, 3), 32 * 15)
    p["dec1_b"] = _uniform(ks[15], (32,), 32 * 15)
    p["dec2_w"] = _uniform(ks[16], (32, 16, 5, 3), 16 * 15)
    p["dec2_b"] = _uniform(ks[17], (16,), 16 * 15)
    p["dec3_w"] = _uniform(ks[18], (16, input_channels, 5, 3), input_channels * 15)
    p["dec3_b"] = _uniform(ks[19], (input_channels,), input_channels * 15)
    return p


def prepare_params(params):
    """One-time weight prep: reshape/flip/transpose, pad, cast to bf16."""
    pp, meta = {}, {}
    pp["enc1"], meta["enc1"] = prep_conv(params["enc1_w"], params["enc1_b"])
    pp["enc2"], meta["enc2"] = prep_conv(params["enc2_w"], params["enc2_b"])
    pp["enc3"], meta["enc3"] = prep_conv(params["enc3_w"], params["enc3_b"])
    pp["fc"], meta["fc"] = prep_linear(params["fc_w"], params["fc_b"])
    pp["mulv"], meta["mulv"] = prep_mulv(params["mu_w"], params["mu_b"],
                                         params["lv_w"], params["lv_b"])
    pp["dec_in"], meta["dec_in"] = prep_linear(params["dec_in_w"],
                                               params["dec_in_b"])
    pp["dec1"], meta["dec1"] = prep_conv_transpose(params["dec1_w"],
                                                   params["dec1_b"])
    pp["dec2"], meta["dec2"] = prep_conv_transpose(params["dec2_w"],
                                                   params["dec2_b"])
    pp["dec3"], meta["dec3"] = prep_conv_transpose(params["dec3_w"],
                                                   params["dec3_b"])
    return pp, meta


def make_forward(meta, feat_h, feat_w):
    """Returns a jitted forward(pp, x, eps) -> (recon, mu, logvar)."""
    def fwd(pp, x, eps):
        B = x.shape[0]
        # ---------------- encode ----------------
        h = conv2d(x, pp["enc1"], meta["enc1"], 5, 3, (2, 1),
                   [(2, 2), (1, 1)], None, True)
        h = conv2d(h, pp["enc2"], meta["enc2"], 5, 3, (2, 1),
                   [(2, 2), (1, 1)], None, True)
        h = conv2d(h, pp["enc3"], meta["enc3"], 5, 3, (2, 1),
                   [(2, 2), (1, 1)], None, True)
        h = h.reshape(B, -1)                                 # Flatten (NCHW)
        h = matmul_bias(h, pp["fc"], meta["fc"], True)
        # --------- mu / logvar / reparameterize (fused) ---------
        mu, logvar, z = mulv_reparam(h, eps, pp["mulv"], meta["mulv"])
        # ---------------- decode ----------------
        d = matmul_bias(z, pp["dec_in"], meta["dec_in"], False)
        d = d.reshape(B, 64, feat_h, feat_w)                 # Unflatten
        # ConvTranspose2d(k=(5,3), s=(2,1), p=(2,1)) == conv over lhs-dilated
        # input with flipped kernel, padding (k-1-p, k-1-p+output_padding).
        d = conv2d(d, pp["dec1"], meta["dec1"], 5, 3, (1, 1),
                   [(2, 2), (1, 1)], (2, 1), True)           # out_pad (0,0)
        d = conv2d(d, pp["dec2"], meta["dec2"], 5, 3, (1, 1),
                   [(2, 3), (1, 1)], (2, 1), True)           # out_pad (1,0)
        d = conv2d(d, pp["dec3"], meta["dec3"], 5, 3, (1, 1),
                   [(2, 3), (1, 1)], (2, 1), True)           # out_pad (1,0)
        return d, mu, logvar

    return jax.jit(fwd)


# ----------------------------------------------------------------------------
# main
# ----------------------------------------------------------------------------
if __name__ == "__main__":
    # Small, self-consistent shapes (img_height=20 satisfies the same
    # reconstruction constraint the default 300 does).
    batch = 2
    input_channels = 2
    latent_dim = 16
    img_height = 20
    img_width = 8

    feat_h, feat_w = calc_feature_size(img_height, img_width)
    feature_dim = 64 * feat_h * feat_w

    key = jax.random.PRNGKey(0)
    k_x, k_eps, k_params = jax.random.split(key, 3)

    x = jax.random.normal(k_x, (batch, input_channels, img_height, img_width),
                          jnp.float32)
    eps = jax.random.normal(k_eps, (batch, latent_dim), jnp.float32)
    params = init_params(k_params, input_channels, latent_dim, feature_dim)

    pp, meta = prepare_params(params)          # one-time weight prep (hoisted)
    forward = make_forward(meta, feat_h, feat_w)

    recon, mu, logvar = forward(pp, x, eps)
    recon = jax.block_until_ready(recon)
    mu = jax.block_until_ready(mu)
    logvar = jax.block_until_ready(logvar)

    assert recon.shape == (batch, input_channels, img_height, img_width), recon.shape
    assert mu.shape == (batch, latent_dim), mu.shape
    assert logvar.shape == (batch, latent_dim), logvar.shape
    assert bool(jnp.all(jnp.isfinite(recon)))
    print("KERNEL_OK")
</pallas_src>

<mosaic_0001>
module attributes {stable_mosaic.version = 11 : i64} {
  func.func @_matmul_bias_kernel(%arg0: i32, %arg1: i32, %arg2: i32, %arg3: memref<80x128xbf16, #tpu.memory_space<vmem>>, %arg4: memref<128x128xbf16, #tpu.memory_space<vmem>>, %arg5: memref<1x128xf32, #tpu.memory_space<vmem>>, %arg6: memref<80x128xf32, #tpu.memory_space<vmem>>) attributes {dimension_semantics = [#tpu.dimension_semantics<parallel>, #tpu.dimension_semantics<parallel>, #tpu.dimension_semantics<arbitrary>], iteration_bounds = array<i64: 2, 1, 1>, scalar_prefetch = 0 : i64, scratch_operands = 0 : i64, tpu.core_type = #tpu.core_type<tc>, window_params = [{transform_indices = @transform_0, window_bounds = array<i64: 80, 128>}, {transform_indices = @transform_1, window_bounds = array<i64: 128, 128>}, {transform_indices = @transform_2, window_bounds = array<i64: 1, 128>}, {transform_indices = @transform_3, window_bounds = array<i64: 80, 128>}]} {
    %c0_i32 = arith.constant 0 : i32
    %0 = arith.cmpi eq, %arg2, %c0_i32 : i32
    %1 = arith.extui %0 : i1 to i32
    %c0_i32_0 = arith.constant 0 : i32
    %2 = arith.cmpi ne, %1, %c0_i32_0 : i32
    scf.if %2 {
      %cst_10 = arith.constant 0.000000e+00 : f32
      %12 = vector.broadcast %cst_10 : f32 to vector<80x128xf32>
      %c0_11 = arith.constant 0 : index
      %c0_12 = arith.constant 0 : index
      %13 = vector.load %arg6[%c0_11, %c0_12] : memref<80x128xf32, #tpu.memory_space<vmem>>, vector<80x128xf32>
      tpu.vector_store %arg6[%c0_11, %c0_12], %12 {strides = array<i32>} : memref<80x128xf32, #tpu.memory_space<vmem>>, vector<80x128xf32>,
    } else {
    }
    %c0 = arith.constant 0 : index
    %c0_1 = arith.constant 0 : index
    %3 = vector.load %arg6[%c0, %c0_1] : memref<80x128xf32, #tpu.memory_space<vmem>>, vector<80x128xf32>
    %c0_2 = arith.constant 0 : index
    %c0_3 = arith.constant 0 : index
    %4 = vector.load %arg3[%c0_2, %c0_3] : memref<80x128xbf16, #tpu.memory_space<vmem>>, vector<80x128xbf16>
    %c0_4 = arith.constant 0 : index
    %c0_5 = arith.constant 0 : index
    %5 = vector.load %arg4[%c0_4, %c0_5] : memref<128x128xbf16, #tpu.memory_space<vmem>>, vector<128x128xbf16>
    %cst = arith.constant dense<0.000000e+00> : vector<80x128xf32>
    %6 = tpu.matmul %4, %5, %cst {dimension_numbers = #tpu.dot_dimension_numbers<[1], [0], [0], [1], [0, 0, 1, 1], [], []>} : vector<80x128xbf16>, vector<128x128xbf16>, vector<80x128xf32> -> vector<80x128xf32>
    %7 = arith.addf %3, %6 : vector<80x128xf32>
    %c0_6 = arith.constant 0 : index
    %c0_7 = arith.constant 0 : index
    %8 = vector.load %arg6[%c0_6, %c0_7] : memref<80x128xf32, #tpu.memory_space<vmem>>, vector<80x128xf32>
    tpu.vector_store %arg6[%c0_6, %c0_7], %7 {strides = array<i32>} : memref<80x128xf32, #tpu.memory_space<vmem>>, vector<80x128xf32>,
    %c0_i32_8 = arith.constant 0 : i32
    %9 = arith.cmpi eq, %arg2, %c0_i32_8 : i32
    %10 = arith.extui %9 : i1 to i32
    %c0_i32_9 = arith.constant 0 : i32
    %11 = arith.cmpi ne, %10, %c0_i32_9 : i32
    scf.if %11 {
      %c0_10 = arith.constant 0 : index
      %c0_11 = arith.constant 0 : index
      %12 = vector.load %arg6[%c0_10, %c0_11] : memref<80x128xf32, #tpu.memory_space<vmem>>, vector<80x128xf32>
      %c0_12 = arith.constant 0 : index
      %c0_13 = arith.constant 0 : index
      %13 = vector.load %arg5[%c0_12, %c0_13] : memref<1x128xf32, #tpu.memory_space<vmem>>, vector<1x128xf32>
      %14 = vector.broadcast %13 : vector<1x128xf32> to vector<80x128xf32>
      %15 = arith.addf %12, %14 : vector<80x128xf32>
      %16 = math.tanh %15 : vector<80x128xf32>
      %c0_14 = arith.constant 0 : index
      %c0_15 = arith.constant 0 : index
      %17 = vector.load %arg6[%c0_14, %c0_15] : memref<80x128xf32, #tpu.memory_space<vmem>>, vector<80x128xf32>
      tpu.vector_store %arg6[%c0_14, %c0_15], %16 {strides = array<i32>} : memref<80x128xf32, #tpu.memory_space<vmem>>, vector<80x128xf32>,
    } else {
    }
    return
  }
  func.func @transform_0(%arg0: i32, %arg1: i32, %arg2: i32) -> (i32, i32) {
    %c0_i32 = arith.constant 0 : i32
    return %arg0, %arg2 : i32, i32
  }
  func.func @transform_1(%arg0: i32, %arg1: i32, %arg2: i32) -> (i32, i32) {
    %c0_i32 = arith.constant 0 : i32
    return %arg2, %arg1 : i32, i32
  }
  func.func @transform_2(%arg0: i32, %arg1: i32, %arg2: i32) -> (i32, i32) {
    %c0_i32 = arith.constant 0 : i32
    %c0_i32_0 = arith.constant 0 : i32
    return %c0_i32, %arg1 : i32, i32
  }
  func.func @transform_3(%arg0: i32, %arg1: i32, %arg2: i32) -> (i32, i32) {
    %c0_i32 = arith.constant 0 : i32
    return %arg0, %arg1 : i32, i32
  }
}

module attributes {stable_mosaic.version = 11 : i64} {
  func.func @_matmul_bias_kernel(%arg0: i32, %arg1: i32, %arg2: i32, %arg3: memref<80x256xbf16, #tpu.memory_space<vmem>>, %arg4: memref<256x128xbf16, #tpu.memory_space<vmem>>, %arg5: memref<1x128xf32, #tpu.memory_space<vmem>>, %arg6: memref<80x128xf32, #tpu.memory_space<vmem>>) attributes {dimension_semantics = [#tpu.dimension_semantics<parallel>, #tpu.dimension_semantics<parallel>, #tpu.dimension_semantics<arbitrary>], iteration_bounds = array<i64: 1, 1, 1>, scalar_prefetch = 0 : i64, scratch_operands = 0 : i64, tpu.core_type = #tpu.core_type<tc>, window_params = [{transform_indices = @transform_0, window_bounds = array<i64: 80, 256>}, {transform_indices = @transform_1, window_bounds = array<i64: 256, 128>}, {transform_indices = @transform_2, window_bounds = array<i64: 1, 128>}, {transform_indices = @transform_3, window_bounds = array<i64: 80, 128>}]} {
    %c0_i32 = arith.constant 0 : i32
    %0 = arith.cmpi eq, %arg2, %c0_i32 : i32
    %1 = arith.extui %0 : i1 to i32
    %c0_i32_0 = arith.constant 0 : i32
    %2 = arith.cmpi ne, %1, %c0_i32_0 : i32
    scf.if %2 {
      %cst_10 = arith.constant 0.000000e+00 : f32
      %12 = vector.broadcast %cst_10 : f32 to vector<80x128xf32>
      %c0_11 = arith.constant 0 : index
      %c0_12 = arith.constant 0 : index
      %13 = vector.load %arg6[%c0_11, %c0_12] : memref<80x128xf32, #tpu.memory_space<vmem>>, vector<80x128xf32>
      tpu.vector_store %arg6[%c0_11, %c0_12], %12 {strides = array<i32>} : memref<80x128xf32, #tpu.memory_space<vmem>>, vector<80x128xf32>,
    } else {
    }
    %c0 = arith.constant 0 : index
    %c0_1 = arith.constant 0 : index
    %3 = vector.load %arg6[%c0, %c0_1] : memref<80x128xf32, #tpu.memory_space<vmem>>, vector<80x128xf32>
    %c0_2 = arith.constant 0 : index
    %c0_3 = arith.constant 0 : index
    %4 = vector.load %arg3[%c0_2, %c0_3] : memref<80x256xbf16, #tpu.memory_space<vmem>>, vector<80x256xbf16>
    %c0_4 = arith.constant 0 : index
    %c0_5 = arith.constant 0 : index
    %5 = vector.load %arg4[%c0_4, %c0_5] : memref<256x128xbf16, #tpu.memory_space<vmem>>, vector<256x128xbf16>
    %cst = arith.constant dense<0.000000e+00> : vector<80x128xf32>
    %6 = tpu.matmul %4, %5, %cst {dimension_numbers = #tpu.dot_dimension_numbers<[1], [0], [0], [1], [0, 0, 1, 1], [], []>} : vector<80x256xbf16>, vector<256x128xbf16>, vector<80x128xf32> -> vector<80x128xf32>
    %7 = arith.addf %3, %6 : vector<80x128xf32>
    %c0_6 = arith.constant 0 : index
    %c0_7 = arith.constant 0 : index
    %8 = vector.load %arg6[%c0_6, %c0_7] : memref<80x128xf32, #tpu.memory_space<vmem>>, vector<80x128xf32>
    tpu.vector_store %arg6[%c0_6, %c0_7], %7 {strides = array<i32>} : memref<80x128xf32, #tpu.memory_space<vmem>>, vector<80x128xf32>,
    %c0_i32_8 = arith.constant 0 : i32
    %9 = arith.cmpi eq, %arg2, %c0_i32_8 : i32
    %10 = arith.extui %9 : i1 to i32
    %c0_i32_9 = arith.constant 0 : i32
    %11 = arith.cmpi ne, %10, %c0_i32_9 : i32
    scf.if %11 {
      %c0_10 = arith.constant 0 : index
      %c0_11 = arith.constant 0 : index
      %12 = vector.load %arg6[%c0_10, %c0_11] : memref<80x128xf32, #tpu.memory_space<vmem>>, vector<80x128xf32>
      %c0_12 = arith.constant 0 : index
      %c0_13 = arith.constant 0 : index
      %13 = vector.load %arg5[%c0_12, %c0_13] : memref<1x128xf32, #tpu.memory_space<vmem>>, vector<1x128xf32>
      %14 = vector.broadcast %13 : vector<1x128xf32> to vector<80x128xf32>
      %15 = arith.addf %12, %14 : vector<80x128xf32>
      %16 = math.tanh %15 : vector<80x128xf32>
      %c0_14 = arith.constant 0 : index
      %c0_15 = arith.constant 0 : index
      %17 = vector.load %arg6[%c0_14, %c0_15] : memref<80x128xf32, #tpu.memory_space<vmem>>, vector<80x128xf32>
      tpu.vector_store %arg6[%c0_14, %c0_15], %16 {strides = array<i32>} : memref<80x128xf32, #tpu.memory_space<vmem>>, vector<80x128xf32>,
    } else {
    }
    return
  }
  func.func @transform_0(%arg0: i32, %arg1: i32, %arg2: i32) -> (i32, i32) {
    %c0_i32 = arith.constant 0 : i32
    return %arg0, %arg2 : i32, i32
  }
  func.func @transform_1(%arg0: i32, %arg1: i32, %arg2: i32) -> (i32, i32) {
    %c0_i32 = arith.constant 0 : i32
    return %arg2, %arg1 : i32, i32
  }
  func.func @transform_2(%arg0: i32, %arg1: i32, %arg2: i32) -> (i32, i32) {
    %c0_i32 = arith.constant 0 : i32
    %c0_i32_0 = arith.constant 0 : i32
    return %c0_i32, %arg1 : i32, i32
  }
  func.func @transform_3(%arg0: i32, %arg1: i32, %arg2: i32) -> (i32, i32) {
    %c0_i32 = arith.constant 0 : i32
    return %arg0, %arg1 : i32, i32
  }
}

module attributes {stable_mosaic.version = 11 : i64} {
  func.func @_matmul_bias_kernel(%arg0: i32, %arg1: i32, %arg2: i32, %arg3: memref<48x512xbf16, #tpu.memory_space<vmem>>, %arg4: memref<512x128xbf16, #tpu.memory_space<vmem>>, %arg5: memref<1x128xf32, #tpu.memory_space<vmem>>, %arg6: memref<48x128xf32, #tpu.memory_space<vmem>>) attributes {dimension_semantics = [#tpu.dimension_semantics<parallel>, #tpu.dimension_semantics<parallel>, #tpu.dimension_semantics<arbitrary>], iteration_bounds = array<i64: 1, 1, 1>, scalar_prefetch = 0 : i64, scratch_operands = 0 : i64, tpu.core_type = #tpu.core_type<tc>, window_params = [{transform_indices = @transform_0, window_bounds = array<i64: 48, 512>}, {transform_indices = @transform_1, window_bounds = array<i64: 512, 128>}, {transform_indices = @transform_2, window_bounds = array<i64: 1, 128>}, {transform_indices = @transform_3, window_bounds = array<i64: 48, 128>}]} {
    %c0_i32 = arith.constant 0 : i32
    %0 = arith.cmpi eq, %arg2, %c0_i32 : i32
    %1 = arith.extui %0 : i1 to i32
    %c0_i32_0 = arith.constant 0 : i32
    %2 = arith.cmpi ne, %1, %c0_i32_0 : i32
    scf.if %2 {
      %cst_10 = arith.constant 0.000000e+00 : f32
      %12 = vector.broadcast %cst_10 : f32 to vector<48x128xf32>
      %c0_11 = arith.constant 0 : index
      %c0_12 = arith.constant 0 : index
      %13 = vector.load %arg6[%c0_11, %c0_12] : memref<48x128xf32, #tpu.memory_space<vmem>>, vector<48x128xf32>
      tpu.vector_store %arg6[%c0_11, %c0_12], %12 {strides = array<i32>} : memref<48x128xf32, #tpu.memory_space<vmem>>, vector<48x128xf32>,
    } else {
    }
    %c0 = arith.constant 0 : index
    %c0_1 = arith.constant 0 : index
    %3 = vector.load %arg6[%c0, %c0_1] : memref<48x128xf32, #tpu.memory_space<vmem>>, vector<48x128xf32>
    %c0_2 = arith.constant 0 : index
    %c0_3 = arith.constant 0 : index
    %4 = vector.load %arg3[%c0_2, %c0_3] : memref<48x512xbf16, #tpu.memory_space<vmem>>, vector<48x512xbf16>
    %c0_4 = arith.constant 0 : index
    %c0_5 = arith.constant 0 : index
    %5 = vector.load %arg4[%c0_4, %c0_5] : memref<512x128xbf16, #tpu.memory_space<vmem>>, vector<512x128xbf16>
    %cst = arith.constant dense<0.000000e+00> : vector<48x128xf32>
    %6 = tpu.matmul %4, %5, %cst {dimension_numbers = #tpu.dot_dimension_numbers<[1], [0], [0], [1], [0, 0, 1, 1], [], []>} : vector<48x512xbf16>, vector<512x128xbf16>, vector<48x128xf32> -> vector<48x128xf32>
    %7 = arith.addf %3, %6 : vector<48x128xf32>
    %c0_6 = arith.constant 0 : index
    %c0_7 = arith.constant 0 : index
    %8 = vector.load %arg6[%c0_6, %c0_7] : memref<48x128xf32, #tpu.memory_space<vmem>>, vector<48x128xf32>
    tpu.vector_store %arg6[%c0_6, %c0_7], %7 {strides = array<i32>} : memref<48x128xf32, #tpu.memory_space<vmem>>, vector<48x128xf32>,
    %c0_i32_8 = arith.constant 0 : i32
    %9 = arith.cmpi eq, %arg2, %c0_i32_8 : i32
    %10 = arith.extui %9 : i1 to i32
    %c0_i32_9 = arith.constant 0 : i32
    %11 = arith.cmpi ne, %10, %c0_i32_9 : i32
    scf.if %11 {
      %c0_10 = arith.constant 0 : index
      %c0_11 = arith.constant 0 : index
      %12 = vector.load %arg6[%c0_10, %c0_11] : memref<48x128xf32, #tpu.memory_space<vmem>>, vector<48x128xf32>
      %c0_12 = arith.constant 0 : index
      %c0_13 = arith.constant 0 : index
      %13 = vector.load %arg5[%c0_12, %c0_13] : memref<1x128xf32, #tpu.memory_space<vmem>>, vector<1x128xf32>
      %14 = vector.broadcast %13 : vector<1x128xf32> to vector<48x128xf32>
      %15 = arith.addf %12, %14 : vector<48x128xf32>
      %16 = math.tanh %15 : vector<48x128xf32>
      %c0_14 = arith.constant 0 : index
      %c0_15 = arith.constant 0 : index
      %17 = vector.load %arg6[%c0_14, %c0_15] : memref<48x128xf32, #tpu.memory_space<vmem>>, vector<48x128xf32>
      tpu.vector_store %arg6[%c0_14, %c0_15], %16 {strides = array<i32>} : memref<48x128xf32, #tpu.memory_space<vmem>>, vector<48x128xf32>,
    } else {
    }
    return
  }
  func.func @transform_0(%arg0: i32, %arg1: i32, %arg2: i32) -> (i32, i32) {
    %c0_i32 = arith.constant 0 : i32
    return %arg0, %arg2 : i32, i32
  }
  func.func @transform_1(%arg0: i32, %arg1: i32, %arg2: i32) -> (i32, i32) {
    %c0_i32 = arith.constant 0 : i32
    return %arg2, %arg1 : i32, i32
  }
  func.func @transform_2(%arg0: i32, %arg1: i32, %arg2: i32) -> (i32, i32) {
    %c0_i32 = arith.constant 0 : i32
    %c0_i32_0 = arith.constant 0 : i32
    return %c0_i32, %arg1 : i32, i32
  }
  func.func @transform_3(%arg0: i32, %arg1: i32, %arg2: i32) -> (i32, i32) {
    %c0_i32 = arith.constant 0 : i32
    return %arg0, %arg1 : i32, i32
  }
}

module attributes {stable_mosaic.version = 11 : i64} {
  func.func @_matmul_bias_kernel(%arg0: i32, %arg1: i32, %arg2: i32, %arg3: memref<8x512xbf16, #tpu.memory_space<vmem>>, %arg4: memref<512x2048xbf16, #tpu.memory_space<vmem>>, %arg5: memref<1x2048xf32, #tpu.memory_space<vmem>>, %arg6: memref<8x2048xf32, #tpu.memory_space<vmem>>) attributes {dimension_semantics = [#tpu.dimension_semantics<parallel>, #tpu.dimension_semantics<parallel>, #tpu.dimension_semantics<arbitrary>], iteration_bounds = array<i64: 1, 2, 3>, scalar_prefetch = 0 : i64, scratch_operands = 0 : i64, tpu.core_type = #tpu.core_type<tc>, window_params = [{transform_indices = @transform_0, window_bounds = array<i64: 8, 512>}, {transform_indices = @transform_1, window_bounds = array<i64: 512, 2048>}, {transform_indices = @transform_2, window_bounds = array<i64: 1, 2048>}, {transform_indices = @transform_3, window_bounds = array<i64: 8, 2048>}]} {
    %c0_i32 = arith.constant 0 : i32
    %0 = arith.cmpi eq, %arg2, %c0_i32 : i32
    %1 = arith.extui %0 : i1 to i32
    %c0_i32_0 = arith.constant 0 : i32
    %2 = arith.cmpi ne, %1, %c0_i32_0 : i32
    scf.if %2 {
      %cst_9 = arith.constant 0.000000e+00 : f32
      %12 = vector.broadcast %cst_9 : f32 to vector<8x2048xf32>
      %c0_10 = arith.constant 0 : index
      %c0_11 = arith.constant 0 : index
      %13 = vector.load %arg6[%c0_10, %c0_11] : memref<8x2048xf32, #tpu.memory_space<vmem>>, vector<8x2048xf32>
      tpu.vector_store %arg6[%c0_10, %c0_11], %12 {strides = array<i32>} : memref<8x2048xf32, #tpu.memory_space<vmem>>, vector<8x2048xf32>,
    } else {
    }
    %c0 = arith.constant 0 : index
    %c0_1 = arith.constant 0 : index
    %3 = vector.load %arg6[%c0, %c0_1] : memref<8x2048xf32, #tpu.memory_space<vmem>>, vector<8x2048xf32>
    %c0_2 = arith.constant 0 : index
    %c0_3 = arith.constant 0 : index
    %4 = vector.load %arg3[%c0_2, %c0_3] : memref<8x512xbf16, #tpu.memory_space<vmem>>, vector<8x512xbf16>
    %c0_4 = arith.constant 0 : index
    %c0_5 = arith.constant 0 : index
    %5 = vector.load %arg4[%c0_4, %c0_5] : memref<512x2048xbf16, #tpu.memory_space<vmem>>, vector<512x2048xbf16>
    %cst = arith.constant dense<0.000000e+00> : vector<8x2048xf32>
    %6 = tpu.matmul %4, %5, %cst {dimension_numbers = #tpu.dot_dimension_numbers<[1], [0], [0], [1], [0, 0, 1, 1], [], []>} : vector<8x512xbf16>, vector<512x2048xbf16>, vector<8x2048xf32> -> vector<8x2048xf32>
    %7 = arith.addf %3, %6 : vector<8x2048xf32>
    %c0_6 = arith.constant 0 : index
    %c0_7 = arith.constant 0 : index
    %8 = vector.load %arg6[%c0_6, %c0_7] : memref<8x2048xf32, #tpu.memory_space<vmem>>, vector<8x2048xf32>
    tpu.vector_store %arg6[%c0_6, %c0_7], %7 {strides = array<i32>} : memref<8x2048xf32, #tpu.memory_space<vmem>>, vector<8x2048xf32>,
    %c2_i32 = arith.constant 2 : i32
    %9 = arith.cmpi eq, %arg2, %c2_i32 : i32
    %10 = arith.extui %9 : i1 to i32
    %c0_i32_8 = arith.constant 0 : i32
    %11 = arith.cmpi ne, %10, %c0_i32_8 : i32
    scf.if %11 {
      %c0_9 = arith.constant 0 : index
      %c0_10 = arith.constant 0 : index
      %12 = vector.load %arg6[%c0_9, %c0_10] : memref<8x2048xf32, #tpu.memory_space<vmem>>, vector<8x2048xf32>
      %c0_11 = arith.constant 0 : index
      %c0_12 = arith.constant 0 : index
      %13 = vector.load %arg5[%c0_11, %c0_12] : memref<1x2048xf32, #tpu.memory_space<vmem>>, vector<1x2048xf32>
      %14 = vector.broadcast %13 : vector<1x2048xf32> to vector<8x2048xf32>
      %15 = arith.addf %12, %14 : vector<8x2048xf32>
      %16 = math.tanh %15 : vector<8x2048xf32>
      %c0_13 = arith.constant 0 : index
      %c0_14 = arith.constant 0 : index
      %17 = vector.load %arg6[%c0_13, %c0_14] : memref<8x2048xf32, #tpu.memory_space<vmem>>, vector<8x2048xf32>
      tpu.vector_store %arg6[%c0_13, %c0_14], %16 {strides = array<i32>} : memref<8x2048xf32, #tpu.memory_space<vmem>>, vector<8x2048xf32>,
    } else {
    }
    return
  }
  func.func @transform_0(%arg0: i32, %arg1: i32, %arg2: i32) -> (i32, i32) {
    %c0_i32 = arith.constant 0 : i32
    return %arg0, %arg2 : i32, i32
  }
  func.func @transform_1(%arg0: i32, %arg1: i32, %arg2: i32) -> (i32, i32) {
    %c0_i32 = arith.constant 0 : i32
    return %arg2, %arg1 : i32, i32
  }
  func.func @transform_2(%arg0: i32, %arg1: i32, %arg2: i32) -> (i32, i32) {
    %c0_i32 = arith.constant 0 : i32
    %c0_i32_0 = arith.constant 0 : i32
    return %c0_i32, %arg1 : i32, i32
  }
  func.func @transform_3(%arg0: i32, %arg1: i32, %arg2: i32) -> (i32, i32) {
    %c0_i32 = arith.constant 0 : i32
    return %arg0, %arg1 : i32, i32
  }
}

module attributes {stable_mosaic.version = 11 : i64} {
  func.func @_mulv_reparam_kernel(%arg0: i32, %arg1: i32, %arg2: memref<8x512xbf16, #tpu.memory_space<vmem>>, %arg3: memref<512x256xbf16, #tpu.memory_space<vmem>>, %arg4: memref<1x256xf32, #tpu.memory_space<vmem>>, %arg5: memref<8x128xf32, #tpu.memory_space<vmem>>, %arg6: memref<8x256xf32, #tpu.memory_space<vmem>>, %arg7: memref<8x128xf32, #tpu.memory_space<vmem>>) attributes {dimension_semantics = [#tpu.dimension_semantics<parallel>, #tpu.dimension_semantics<arbitrary>], iteration_bounds = array<i64: 1, 8>, scalar_prefetch = 0 : i64, scratch_operands = 0 : i64, tpu.core_type = #tpu.core_type<tc>, window_params = [{transform_indices = @transform_0, window_bounds = array<i64: 8, 512>}, {transform_indices = @transform_1, window_bounds = array<i64: 512, 256>}, {pipeline_mode = #tpu.pipeline_mode<synchronous>, transform_indices = @transform_2, window_bounds = array<i64: 1, 256>}, {transform_indices = @transform_3, window_bounds = array<i64: 8, 128>}, {transform_indices = @transform_4, window_bounds = array<i64: 8, 256>}, {transform_indices = @transform_5, window_bounds = array<i64: 8, 128>}]} {
    %c0_i32 = arith.constant 0 : i32
    %0 = arith.cmpi eq, %arg1, %c0_i32 : i32
    %1 = arith.extui %0 : i1 to i32
    %c0_i32_0 = arith.constant 0 : i32
    %2 = arith.cmpi ne, %1, %c0_i32_0 : i32
    scf.if %2 {
      %cst_9 = arith.constant 0.000000e+00 : f32
      %12 = vector.broadcast %cst_9 : f32 to vector<8x256xf32>
      %c0_10 = arith.constant 0 : index
      %c0_11 = arith.constant 0 : index
      %13 = vector.load %arg6[%c0_10, %c0_11] : memref<8x256xf32, #tpu.memory_space<vmem>>, vector<8x256xf32>
      tpu.vector_store %arg6[%c0_10, %c0_11], %12 {strides = array<i32>} : memref<8x256xf32, #tpu.memory_space<vmem>>, vector<8x256xf32>,
    } else {
    }
    %c0 = arith.constant 0 : index
    %c0_1 = arith.constant 0 : index
    %3 = vector.load %arg6[%c0, %c0_1] : memref<8x256xf32, #tpu.memory_space<vmem>>, vector<8x256xf32>
    %c0_2 = arith.constant 0 : index
    %c0_3 = arith.constant 0 : index
    %4 = vector.load %arg2[%c0_2, %c0_3] : memref<8x512xbf16, #tpu.memory_space<vmem>>, vector<8x512xbf16>
    %c0_4 = arith.constant 0 : index
    %c0_5 = arith.constant 0 : index
    %5 = vector.load %arg3[%c0_4, %c0_5] : memref<512x256xbf16, #tpu.memory_space<vmem>>, vector<512x256xbf16>
    %cst = arith.constant dense<0.000000e+00> : vector<8x256xf32>
    %6 = tpu.matmul %4, %5, %cst {dimension_numbers = #tpu.dot_dimension_numbers<[1], [0], [0], [1], [0, 0, 1, 1], [], []>} : vector<8x512xbf16>, vector<512x256xbf16>, vector<8x256xf32> -> vector<8x256xf32>
    %7 = arith.addf %3, %6 : vector<8x256xf32>
    %c0_6 = arith.constant 0 : index
    %c0_7 = arith.constant 0 : index
    %8 = vector.load %arg6[%c0_6, %c0_7] : memref<8x256xf32, #tpu.memory_space<vmem>>, vector<8x256xf32>
    tpu.vector_store %arg6[%c0_6, %c0_7], %7 {strides = array<i32>} : memref<8x256xf32, #tpu.memory_space<vmem>>, vector<8x256xf32>,
    %c7_i32 = arith.constant 7 : i32
    %9 = arith.cmpi eq, %arg1, %c7_i32 : i32
    %10 = arith.extui %9 : i1 to i32
    %c0_i32_8 = arith.constant 0 : i32
    %11 = arith.cmpi ne, %10, %c0_i32_8 : i32
    scf.if %11 {
      %c0_9 = arith.constant 0 : index
      %c0_10 = arith.constant 0 : index
      %12 = vector.load %arg6[%c0_9, %c0_10] : memref<8x256xf32, #tpu.memory_space<vmem>>, vector<8x256xf32>
      %c0_11 = arith.constant 0 : index
      %c0_12 = arith.constant 0 : index
      %13 = vector.load %arg4[%c0_11, %c0_12] : memref<1x256xf32, #tpu.memory_space<vmem>>, vector<1x256xf32>
      %14 = vector.broadcast %13 : vector<1x256xf32> to vector<8x256xf32>
      %15 = arith.addf %12, %14 : vector<8x256xf32>
      %c0_13 = arith.constant 0 : index
      %c0_14 = arith.constant 0 : index
      %16 = vector.load %arg6[%c0_13, %c0_14] : memref<8x256xf32, #tpu.memory_space<vmem>>, vector<8x256xf32>
      tpu.vector_store %arg6[%c0_13, %c0_14], %15 {strides = array<i32>} : memref<8x256xf32, #tpu.memory_space<vmem>>, vector<8x256xf32>,
      %17 = vector.extract_strided_slice %15 {offsets = [0, 0], sizes = [8, 128], strides = [1, 1]} : vector<8x256xf32> to vector<8x128xf32>
      %18 = vector.extract_strided_slice %15 {offsets = [0, 128], sizes = [8, 128], strides = [1, 1]} : vector<8x256xf32> to vector<8x128xf32>
      %c0_15 = arith.constant 0 : index
      %c0_16 = arith.constant 0 : index
      %19 = vector.load %arg5[%c0_15, %c0_16] : memref<8x128xf32, #tpu.memory_space<vmem>>, vector<8x128xf32>
      %cst_17 = arith.constant 5.000000e-01 : f32
      %20 = vector.broadcast %cst_17 : f32 to vector<8x128xf32>
      %21 = arith.mulf %20, %18 : vector<8x128xf32>
      %22 = math.exp %21 : vector<8x128xf32>
      %23 = arith.mulf %19, %22 : vector<8x128xf32>
      %24 = arith.addf %17, %23 : vector<8x128xf32>
      %c0_18 = arith.constant 0 : index
      %c0_19 = arith.constant 0 : index
      %25 = vector.load %arg7[%c0_18, %c0_19] : memref<8x128xf32, #tpu.memory_space<vmem>>, vector<8x128xf32>
      tpu.vector_store %arg7[%c0_18, %c0_19], %24 {strides = array<i32>} : memref<8x128xf32, #tpu.memory_space<vmem>>, vector<8x128xf32>,
    } else {
    }
    return
  }
  func.func @transform_0(%arg0: i32, %arg1: i32) -> (i32, i32) {
    %c0_i32 = arith.constant 0 : i32
    return %arg0, %arg1 : i32, i32
  }
  func.func @transform_1(%arg0: i32, %arg1: i32) -> (i32, i32) {
    %c0_i32 = arith.constant 0 : i32
    %c0_i32_0 = arith.constant 0 : i32
    return %arg1, %c0_i32 : i32, i32
  }
  func.func @transform_2(%arg0: i32, %arg1: i32) -> (i32, i32) {
    %c0_i32 = arith.constant 0 : i32
    %c0_i32_0 = arith.constant 0 : i32
    %c0_i32_1 = arith.constant 0 : i32
    return %c0_i32, %c0_i32_0 : i32, i32
  }
  func.func @transform_3(%arg0: i32, %arg1: i32) -> (i32, i32) {
    %c0_i32 = arith.constant 0 : i32
    %c0_i32_0 = arith.constant 0 : i32
    return %arg0, %c0_i32 : i32, i32
  }
  func.func @transform_4(%arg0: i32, %arg1: i32) -> (i32, i32) {
    %c0_i32 = arith.constant 0 : i32
    %c0_i32_0 = arith.constant 0 : i32
    return %arg0, %c0_i32 : i32, i32
  }
  func.func @transform_5(%arg0: i32, %arg1: i32) -> (i32, i32) {
    %c0_i32 = arith.constant 0 : i32
    %c0_i32_0 = arith.constant 0 : i32
    return %arg0, %c0_i32 : i32, i32
  }
}

module attributes {stable_mosaic.version = 11 : i64} {
  func.func @_matmul_bias_kernel(%arg0: i32, %arg1: i32, %arg2: i32, %arg3: memref<8x128xbf16, #tpu.memory_space<vmem>>, %arg4: memref<128x1536xbf16, #tpu.memory_space<vmem>>, %arg5: memref<1x1536xf32, #tpu.memory_space<vmem>>, %arg6: memref<8x1536xf32, #tpu.memory_space<vmem>>) attributes {dimension_semantics = [#tpu.dimension_semantics<parallel>, #tpu.dimension_semantics<parallel>, #tpu.dimension_semantics<arbitrary>], iteration_bounds = array<i64: 1, 1, 1>, scalar_prefetch = 0 : i64, scratch_operands = 0 : i64, tpu.core_type = #tpu.core_type<tc>, window_params = [{transform_indices = @transform_0, window_bounds = array<i64: 8, 128>}, {transform_indices = @transform_1, window_bounds = array<i64: 128, 1536>}, {transform_indices = @transform_2, window_bounds = array<i64: 1, 1536>}, {transform_indices = @transform_3, window_bounds = array<i64: 8, 1536>}]} {
    %c0_i32 = arith.constant 0 : i32
    %0 = arith.cmpi eq, %arg2, %c0_i32 : i32
    %1 = arith.extui %0 : i1 to i32
    %c0_i32_0 = arith.constant 0 : i32
    %2 = arith.cmpi ne, %1, %c0_i32_0 : i32
    scf.if %2 {
      %cst_10 = arith.constant 0.000000e+00 : f32
      %12 = vector.broadcast %cst_10 : f32 to vector<8x1536xf32>
      %c0_11 = arith.constant 0 : index
      %c0_12 = arith.constant 0 : index
      %13 = vector.load %arg6[%c0_11, %c0_12] : memref<8x1536xf32, #tpu.memory_space<vmem>>, vector<8x1536xf32>
      tpu.vector_store %arg6[%c0_11, %c0_12], %12 {strides = array<i32>} : memref<8x1536xf32, #tpu.memory_space<vmem>>, vector<8x1536xf32>,
    } else {
    }
    %c0 = arith.constant 0 : index
    %c0_1 = arith.constant 0 : index
    %3 = vector.load %arg6[%c0, %c0_1] : memref<8x1536xf32, #tpu.memory_space<vmem>>, vector<8x1536xf32>
    %c0_2 = arith.constant 0 : index
    %c0_3 = arith.constant 0 : index
    %4 = vector.load %arg3[%c0_2, %c0_3] : memref<8x128xbf16, #tpu.memory_space<vmem>>, vector<8x128xbf16>
    %c0_4 = arith.constant 0 : index
    %c0_5 = arith.constant 0 : index
    %5 = vector.load %arg4[%c0_4, %c0_5] : memref<128x1536xbf16, #tpu.memory_space<vmem>>, vector<128x1536xbf16>
    %cst = arith.constant dense<0.000000e+00> : vector<8x1536xf32>
    %6 = tpu.matmul %4, %5, %cst {dimension_numbers = #tpu.dot_dimension_numbers<[1], [0], [0], [1], [0, 0, 1, 1], [], []>} : vector<8x128xbf16>, vector<128x1536xbf16>, vector<8x1536xf32> -> vector<8x1536xf32>
    %7 = arith.addf %3, %6 : vector<8x1536xf32>
    %c0_6 = arith.constant 0 : index
    %c0_7 = arith.constant 0 : index
    %8 = vector.load %arg6[%c0_6, %c0_7] : memref<8x1536xf32, #tpu.memory_space<vmem>>, vector<8x1536xf32>
    tpu.vector_store %arg6[%c0_6, %c0_7], %7 {strides = array<i32>} : memref<8x1536xf32, #tpu.memory_space<vmem>>, vector<8x1536xf32>,
    %c0_i32_8 = arith.constant 0 : i32
    %9 = arith.cmpi eq, %arg2, %c0_i32_8 : i32
    %10 = arith.extui %9 : i1 to i32
    %c0_i32_9 = arith.constant 0 : i32
    %11 = arith.cmpi ne, %10, %c0_i32_9 : i32
    scf.if %11 {
      %c0_10 = arith.constant 0 : index
      %c0_11 = arith.constant 0 : index
      %12 = vector.load %arg6[%c0_10, %c0_11] : memref<8x1536xf32, #tpu.memory_space<vmem>>, vector<8x1536xf32>
      %c0_12 = arith.constant 0 : index
      %c0_13 = arith.constant 0 : index
      %13 = vector.load %arg5[%c0_12, %c0_13] : memref<1x1536xf32, #tpu.memory_space<vmem>>, vector<1x1536xf32>
      %14 = vector.broadcast %13 : vector<1x1536xf32> to vector<8x1536xf32>
      %15 = arith.addf %12, %14 : vector<8x1536xf32>
      %c0_14 = arith.constant 0 : index
      %c0_15 = arith.constant 0 : index
      %16 = vector.load %arg6[%c0_14, %c0_15] : memref<8x1536xf32, #tpu.memory_space<vmem>>, vector<8x1536xf32>
      tpu.vector_store %arg6[%c0_14, %c0_15], %15 {strides = array<i32>} : memref<8x1536xf32, #tpu.memory_space<vmem>>, vector<8x1536xf32>,
    } else {
    }
    return
  }
  func.func @transform_0(%arg0: i32, %arg1: i32, %arg2: i32) -> (i32, i32) {
    %c0_i32 = arith.constant 0 : i32
    return %arg0, %arg2 : i32, i32
  }
  func.func @transform_1(%arg0: i32, %arg1: i32, %arg2: i32) -> (i32, i32) {
    %c0_i32 = arith.constant 0 : i32
    return %arg2, %arg1 : i32, i32
  }
  func.func @transform_2(%arg0: i32, %arg1: i32, %arg2: i32) -> (i32, i32) {
    %c0_i32 = arith.constant 0 : i32
    %c0_i32_0 = arith.constant 0 : i32
    return %c0_i32, %arg1 : i32, i32
  }
  func.func @transform_3(%arg0: i32, %arg1: i32, %arg2: i32) -> (i32, i32) {
    %c0_i32 = arith.constant 0 : i32
    return %arg0, %arg1 : i32, i32
  }
}

module attributes {stable_mosaic.version = 11 : i64} {
  func.func @_matmul_bias_kernel(%arg0: i32, %arg1: i32, %arg2: i32, %arg3: memref<80x512xbf16, #tpu.memory_space<vmem>>, %arg4: memref<512x128xbf16, #tpu.memory_space<vmem>>, %arg5: memref<1x128xf32, #tpu.memory_space<vmem>>, %arg6: memref<80x128xf32, #tpu.memory_space<vmem>>) attributes {dimension_semantics = [#tpu.dimension_semantics<parallel>, #tpu.dimension_semantics<parallel>, #tpu.dimension_semantics<arbitrary>], iteration_bounds = array<i64: 1, 1, 2>, scalar_prefetch = 0 : i64, scratch_operands = 0 : i64, tpu.core_type = #tpu.core_type<tc>, window_params = [{transform_indices = @transform_0, window_bounds = array<i64: 80, 512>}, {transform_indices = @transform_1, window_bounds = array<i64: 512, 128>}, {transform_indices = @transform_2, window_bounds = array<i64: 1, 128>}, {transform_indices = @transform_3, window_bounds = array<i64: 80, 128>}]} {
    %c0_i32 = arith.constant 0 : i32
    %0 = arith.cmpi eq, %arg2, %c0_i32 : i32
    %1 = arith.extui %0 : i1 to i32
    %c0_i32_0 = arith.constant 0 : i32
    %2 = arith.cmpi ne, %1, %c0_i32_0 : i32
    scf.if %2 {
      %cst_9 = arith.constant 0.000000e+00 : f32
      %12 = vector.broadcast %cst_9 : f32 to vector<80x128xf32>
      %c0_10 = arith.constant 0 : index
      %c0_11 = arith.constant 0 : index
      %13 = vector.load %arg6[%c0_10, %c0_11] : memref<80x128xf32, #tpu.memory_space<vmem>>, vector<80x128xf32>
      tpu.vector_store %arg6[%c0_10, %c0_11], %12 {strides = array<i32>} : memref<80x128xf32, #tpu.memory_space<vmem>>, vector<80x128xf32>,
    } else {
    }
    %c0 = arith.constant 0 : index
    %c0_1 = arith.constant 0 : index
    %3 = vector.load %arg6[%c0, %c0_1] : memref<80x128xf32, #tpu.memory_space<vmem>>, vector<80x128xf32>
    %c0_2 = arith.constant 0 : index
    %c0_3 = arith.constant 0 : index
    %4 = vector.load %arg3[%c0_2, %c0_3] : memref<80x512xbf16, #tpu.memory_space<vmem>>, vector<80x512xbf16>
    %c0_4 = arith.constant 0 : index
    %c0_5 = arith.constant 0 : index
    %5 = vector.load %arg4[%c0_4, %c0_5] : memref<512x128xbf16, #tpu.memory_space<vmem>>, vector<512x128xbf16>
    %cst = arith.constant dense<0.000000e+00> : vector<80x128xf32>
    %6 = tpu.matmul %4, %5, %cst {dimension_numbers = #tpu.dot_dimension_numbers<[1], [0], [0], [1], [0, 0, 1, 1], [], []>} : vector<80x512xbf16>, vector<512x128xbf16>, vector<80x128xf32> -> vector<80x128xf32>
    %7 = arith.addf %3, %6 : vector<80x128xf32>
    %c0_6 = arith.constant 0 : index
    %c0_7 = arith.constant 0 : index
    %8 = vector.load %arg6[%c0_6, %c0_7] : memref<80x128xf32, #tpu.memory_space<vmem>>, vector<80x128xf32>
    tpu.vector_store %arg6[%c0_6, %c0_7], %7 {strides = array<i32>} : memref<80x128xf32, #tpu.memory_space<vmem>>, vector<80x128xf32>,
    %c1_i32 = arith.constant 1 : i32
    %9 = arith.cmpi eq, %arg2, %c1_i32 : i32
    %10 = arith.extui %9 : i1 to i32
    %c0_i32_8 = arith.constant 0 : i32
    %11 = arith.cmpi ne, %10, %c0_i32_8 : i32
    scf.if %11 {
      %c0_9 = arith.constant 0 : index
      %c0_10 = arith.constant 0 : index
      %12 = vector.load %arg6[%c0_9, %c0_10] : memref<80x128xf32, #tpu.memory_space<vmem>>, vector<80x128xf32>
      %c0_11 = arith.constant 0 : index
      %c0_12 = arith.constant 0 : index
      %13 = vector.load %arg5[%c0_11, %c0_12] : memref<1x128xf32, #tpu.memory_space<vmem>>, vector<1x128xf32>
      %14 = vector.broadcast %13 : vector<1x128xf32> to vector<80x128xf32>
      %15 = arith.addf %12, %14 : vector<80x128xf32>
      %16 = math.tanh %15 : vector<80x128xf32>
      %c0_13 = arith.constant 0 : index
      %c0_14 = arith.constant 0 : index
      %17 = vector.load %arg6[%c0_13, %c0_14] : memref<80x128xf32, #tpu.memory_space<vmem>>, vector<80x128xf32>
      tpu.vector_store %arg6[%c0_13, %c0_14], %16 {strides = array<i32>} : memref<80x128xf32, #tpu.memory_space<vmem>>, vector<80x128xf32>,
    } else {
    }
    return
  }
  func.func @transform_0(%arg0: i32, %arg1: i32, %arg2: i32) -> (i32, i32) {
    %c0_i32 = arith.constant 0 : i32
    return %arg0, %arg2 : i32, i32
  }
  func.func @transform_1(%arg0: i32, %arg1: i32, %arg2: i32) -> (i32, i32) {
    %c0_i32 = arith.constant 0 : i32
    return %arg2, %arg1 : i32, i32
  }
  func.func @transform_2(%arg0: i32, %arg1: i32, %arg2: i32) -> (i32, i32) {
    %c0_i32 = arith.constant 0 : i32
    %c0_i32_0 = arith.constant 0 : i32
    return %c0_i32, %arg1 : i32, i32
  }
  func.func @transform_3(%arg0: i32, %arg1: i32, %arg2: i32) -> (i32, i32) {
    %c0_i32 = arith.constant 0 : i32
    return %arg0, %arg1 : i32, i32
  }
}

module attributes {stable_mosaic.version = 11 : i64} {
  func.func @_matmul_bias_kernel(%arg0: i32, %arg1: i32, %arg2: i32, %arg3: memref<80x512xbf16, #tpu.memory_space<vmem>>, %arg4: memref<512x128xbf16, #tpu.memory_space<vmem>>, %arg5: memref<1x128xf32, #tpu.memory_space<vmem>>, %arg6: memref<80x128xf32, #tpu.memory_space<vmem>>) attributes {dimension_semantics = [#tpu.dimension_semantics<parallel>, #tpu.dimension_semantics<parallel>, #tpu.dimension_semantics<arbitrary>], iteration_bounds = array<i64: 2, 1, 1>, scalar_prefetch = 0 : i64, scratch_operands = 0 : i64, tpu.core_type = #tpu.core_type<tc>, window_params = [{transform_indices = @transform_0, window_bounds = array<i64: 80, 512>}, {transform_indices = @transform_1, window_bounds = array<i64: 512, 128>}, {transform_indices = @transform_2, window_bounds = array<i64: 1, 128>}, {transform_indices = @transform_3, window_bounds = array<i64: 80, 128>}]} {
    %c0_i32 = arith.constant 0 : i32
    %0 = arith.cmpi eq, %arg2, %c0_i32 : i32
    %1 = arith.extui %0 : i1 to i32
    %c0_i32_0 = arith.constant 0 : i32
    %2 = arith.cmpi ne, %1, %c0_i32_0 : i32
    scf.if %2 {
      %cst_10 = arith.constant 0.000000e+00 : f32
      %12 = vector.broadcast %cst_10 : f32 to vector<80x128xf32>
      %c0_11 = arith.constant 0 : index
      %c0_12 = arith.constant 0 : index
      %13 = vector.load %arg6[%c0_11, %c0_12] : memref<80x128xf32, #tpu.memory_space<vmem>>, vector<80x128xf32>
      tpu.vector_store %arg6[%c0_11, %c0_12], %12 {strides = array<i32>} : memref<80x128xf32, #tpu.memory_space<vmem>>, vector<80x128xf32>,
    } else {
    }
    %c0 = arith.constant 0 : index
    %c0_1 = arith.constant 0 : index
    %3 = vector.load %arg6[%c0, %c0_1] : memref<80x128xf32, #tpu.memory_space<vmem>>, vector<80x128xf32>
    %c0_2 = arith.constant 0 : index
    %c0_3 = arith.constant 0 : index
    %4 = vector.load %arg3[%c0_2, %c0_3] : memref<80x512xbf16, #tpu.memory_space<vmem>>, vector<80x512xbf16>
    %c0_4 = arith.constant 0 : index
    %c0_5 = arith.constant 0 : index
    %5 = vector.load %arg4[%c0_4, %c0_5] : memref<512x128xbf16, #tpu.memory_space<vmem>>, vector<512x128xbf16>
    %cst = arith.constant dense<0.000000e+00> : vector<80x128xf32>
    %6 = tpu.matmul %4, %5, %cst {dimension_numbers = #tpu.dot_dimension_numbers<[1], [0], [0], [1], [0, 0, 1, 1], [], []>} : vector<80x512xbf16>, vector<512x128xbf16>, vector<80x128xf32> -> vector<80x128xf32>
    %7 = arith.addf %3, %6 : vector<80x128xf32>
    %c0_6 = arith.constant 0 : index
    %c0_7 = arith.constant 0 : index
    %8 = vector.load %arg6[%c0_6, %c0_7] : memref<80x128xf32, #tpu.memory_space<vmem>>, vector<80x128xf32>
    tpu.vector_store %arg6[%c0_6, %c0_7], %7 {strides = array<i32>} : memref<80x128xf32, #tpu.memory_space<vmem>>, vector<80x128xf32>,
    %c0_i32_8 = arith.constant 0 : i32
    %9 = arith.cmpi eq, %arg2, %c0_i32_8 : i32
    %10 = arith.extui %9 : i1 to i32
    %c0_i32_9 = arith.constant 0 : i32
    %11 = arith.cmpi ne, %10, %c0_i32_9 : i32
    scf.if %11 {
      %c0_10 = arith.constant 0 : index
      %c0_11 = arith.constant 0 : index
      %12 = vector.load %arg6[%c0_10, %c0_11] : memref<80x128xf32, #tpu.memory_space<vmem>>, vector<80x128xf32>
      %c0_12 = arith.constant 0 : index
      %c0_13 = arith.constant 0 : index
      %13 = vector.load %arg5[%c0_12, %c0_13] : memref<1x128xf32, #tpu.memory_space<vmem>>, vector<1x128xf32>
      %14 = vector.broadcast %13 : vector<1x128xf32> to vector<80x128xf32>
      %15 = arith.addf %12, %14 : vector<80x128xf32>
      %16 = math.tanh %15 : vector<80x128xf32>
      %c0_14 = arith.constant 0 : index
      %c0_15 = arith.constant 0 : index
      %17 = vector.load %arg6[%c0_14, %c0_15] : memref<80x128xf32, #tpu.memory_space<vmem>>, vector<80x128xf32>
      tpu.vector_store %arg6[%c0_14, %c0_15], %16 {strides = array<i32>} : memref<80x128xf32, #tpu.memory_space<vmem>>, vector<80x128xf32>,
    } else {
    }
    return
  }
  func.func @transform_0(%arg0: i32, %arg1: i32, %arg2: i32) -> (i32, i32) {
    %c0_i32 = arith.constant 0 : i32
    return %arg0, %arg2 : i32, i32
  }
  func.func @transform_1(%arg0: i32, %arg1: i32, %arg2: i32) -> (i32, i32) {
    %c0_i32 = arith.constant 0 : i32
    return %arg2, %arg1 : i32, i32
  }
  func.func @transform_2(%arg0: i32, %arg1: i32, %arg2: i32) -> (i32, i32) {
    %c0_i32 = arith.constant 0 : i32
    %c0_i32_0 = arith.constant 0 : i32
    return %c0_i32, %arg1 : i32, i32
  }
  func.func @transform_3(%arg0: i32, %arg1: i32, %arg2: i32) -> (i32, i32) {
    %c0_i32 = arith.constant 0 : i32
    return %arg0, %arg1 : i32, i32
  }
}

module attributes {stable_mosaic.version = 11 : i64} {
  func.func @_matmul_bias_kernel(%arg0: i32, %arg1: i32, %arg2: i32, %arg3: memref<112x256xbf16, #tpu.memory_space<vmem>>, %arg4: memref<256x128xbf16, #tpu.memory_space<vmem>>, %arg5: memref<1x128xf32, #tpu.memory_space<vmem>>, %arg6: memref<112x128xf32, #tpu.memory_space<vmem>>) attributes {dimension_semantics = [#tpu.dimension_semantics<parallel>, #tpu.dimension_semantics<parallel>, #tpu.dimension_semantics<arbitrary>], iteration_bounds = array<i64: 3, 1, 1>, scalar_prefetch = 0 : i64, scratch_operands = 0 : i64, tpu.core_type = #tpu.core_type<tc>, window_params = [{transform_indices = @transform_0, window_bounds = array<i64: 112, 256>}, {transform_indices = @transform_1, window_bounds = array<i64: 256, 128>}, {transform_indices = @transform_2, window_bounds = array<i64: 1, 128>}, {transform_indices = @transform_3, window_bounds = array<i64: 112, 128>}]} {
    %c0_i32 = arith.constant 0 : i32
    %0 = arith.cmpi eq, %arg2, %c0_i32 : i32
    %1 = arith.extui %0 : i1 to i32
    %c0_i32_0 = arith.constant 0 : i32
    %2 = arith.cmpi ne, %1, %c0_i32_0 : i32
    scf.if %2 {
      %cst_10 = arith.constant 0.000000e+00 : f32
      %12 = vector.broadcast %cst_10 : f32 to vector<112x128xf32>
      %c0_11 = arith.constant 0 : index
      %c0_12 = arith.constant 0 : index
      %13 = vector.load %arg6[%c0_11, %c0_12] : memref<112x128xf32, #tpu.memory_space<vmem>>, vector<112x128xf32>
      tpu.vector_store %arg6[%c0_11, %c0_12], %12 {strides = array<i32>} : memref<112x128xf32, #tpu.memory_space<vmem>>, vector<112x128xf32>,
    } else {
    }
    %c0 = arith.constant 0 : index
    %c0_1 = arith.constant 0 : index
    %3 = vector.load %arg6[%c0, %c0_1] : memref<112x128xf32, #tpu.memory_space<vmem>>, vector<112x128xf32>
    %c0_2 = arith.constant 0 : index
    %c0_3 = arith.constant 0 : index
    %4 = vector.load %arg3[%c0_2, %c0_3] : memref<112x256xbf16, #tpu.memory_space<vmem>>, vector<112x256xbf16>
    %c0_4 = arith.constant 0 : index
    %c0_5 = arith.constant 0 : index
    %5 = vector.load %arg4[%c0_4, %c0_5] : memref<256x128xbf16, #tpu.memory_space<vmem>>, vector<256x128xbf16>
    %cst = arith.constant dense<0.000000e+00> : vector<112x128xf32>
    %6 = tpu.matmul %4, %5, %cst {dimension_numbers = #tpu.dot_dimension_numbers<[1], [0], [0], [1], [0, 0, 1, 1], [], []>} : vector<112x256xbf16>, vector<256x128xbf16>, vector<112x128xf32> -> vector<112x128xf32>
    %7 = arith.addf %3, %6 : vector<112x128xf32>
    %c0_6 = arith.constant 0 : index
    %c0_7 = arith.constant 0 : index
    %8 = vector.load %arg6[%c0_6, %c0_7] : memref<112x128xf32, #tpu.memory_space<vmem>>, vector<112x128xf32>
    tpu.vector_store %arg6[%c0_6, %c0_7], %7 {strides = array<i32>} : memref<112x128xf32, #tpu.memory_space<vmem>>, vector<112x128xf32>,
    %c0_i32_8 = arith.constant 0 : i32
    %9 = arith.cmpi eq, %arg2, %c0_i32_8 : i32
    %10 = arith.extui %9 : i1 to i32
    %c0_i32_9 = arith.constant 0 : i32
    %11 = arith.cmpi ne, %10, %c0_i32_9 : i32
    scf.if %11 {
      %c0_10 = arith.constant 0 : index
      %c0_11 = arith.constant 0 : index
      %12 = vector.load %arg6[%c0_10, %c0_11] : memref<112x128xf32, #tpu.memory_space<vmem>>, vector<112x128xf32>
      %c0_12 = arith.constant 0 : index
      %c0_13 = arith.constant 0 : index
      %13 = vector.load %arg5[%c0_12, %c0_13] : memref<1x128xf32, #tpu.memory_space<vmem>>, vector<1x128xf32>
      %14 = vector.broadcast %13 : vector<1x128xf32> to vector<112x128xf32>
      %15 = arith.addf %12, %14 : vector<112x128xf32>
      %16 = math.tanh %15 : vector<112x128xf32>
      %c0_14 = arith.constant 0 : index
      %c0_15 = arith.constant 0 : index
      %17 = vector.load %arg6[%c0_14, %c0_15] : memref<112x128xf32, #tpu.memory_space<vmem>>, vector<112x128xf32>
      tpu.vector_store %arg6[%c0_14, %c0_15], %16 {strides = array<i32>} : memref<112x128xf32, #tpu.memory_space<vmem>>, vector<112x128xf32>,
    } else {
    }
    return
  }
  func.func @transform_0(%arg0: i32, %arg1: i32, %arg2: i32) -> (i32, i32) {
    %c0_i32 = arith.constant 0 : i32
    return %arg0, %arg2 : i32, i32
  }
  func.func @transform_1(%arg0: i32, %arg1: i32, %arg2: i32) -> (i32, i32) {
    %c0_i32 = arith.constant 0 : i32
    return %arg2, %arg1 : i32, i32
  }
  func.func @transform_2(%arg0: i32, %arg1: i32, %arg2: i32) -> (i32, i32) {
    %c0_i32 = arith.constant 0 : i32
    %c0_i32_0 = arith.constant 0 : i32
    return %c0_i32, %arg1 : i32, i32
  }
  func.func @transform_3(%arg0: i32, %arg1: i32, %arg2: i32) -> (i32, i32) {
    %c0_i32 = arith.constant 0 : i32
    return %arg0, %arg1 : i32, i32
  }
}

</mosaic_0001>

<bundles_post_ra>
// kernel: fwd.9
= control target key start
LH: loop header
LB: loop body
LE: loop exit
PB: predicated region body
PF: predicated region fallthrough
CT: control target
= control target key end

     0   :  { %8 = vsyncpa [#allocation3], 0  ;;  %s1021_s0 = inlined_call_operand.vmem [shape: bf16[160,128], index: 0, kind: input, shape index: {}]   ;;  %s1022_s1 = inlined_call_operand.hbm [shape: bf16[128,128], index: 1, kind: input, shape index: {}]   ;;  %s1023_s2 = inlined_call_operand.hbm [shape: f32[1,128], index: 2, kind: input, shape index: {}]   ;;  %s1024_s3 = inlined_call_operand.vmem [shape: f32[160,128], index: 3, kind: output, shape index: {}]  }
   0x1   :  { %9 = vsyncpa [#allocation5], 0  ;;  %s924_s12 = smov 0   ;;  %s926_s13 = smov 0  }
   0x2   :  { %s928_s14 = smov 0  }
   0x3 LB: > { %s640_s15 = sadd.s32 4294967295, %s896_s14   ;;  %s34_s16 = sadd.s32 1, %s892_s13  ;;  %s896_s14 = sphi %s928_s14, %s15_s14   ;;  %s892_s13 = sphi %s926_s13, %s1029_s13   ;;  %s888_s12 = sphi %s924_s12, %s1028_s12  }
   0x4   : > { %p36_p0 = scmp.ge.s32.totalorder %s34_s16, 2  ;;  %p642_p1 = scmp.ge.s32.totalorder %s896_s14, 1 }
   0x5   : > { %p149_p2 = scmp.lt.s32.totalorder %s896_s14, 3  ;;  %p949_p4 = scmp.eq.s32.totalorder %s640_s15, 0 }
   0x6   : > { %s1031_s16 = smov (%p36_p0, %s34_s16), 0  ;;  %s898_s19 = smov [#allocation2]  }
   0x7   : > { %p945_p3 = pnand %p642_p1, %p149_p2  ;;  %s165_s20 = sshll.u32 %s898_s19, 4  ;;  %s166_s20 = int_to_ptr.vmem [resolvable:$true] %s165_s20 }
   0x8   : > { %s899_s22 = smov [#allocation4]   ;;  %s825_s24 = scalar_lea.vmem %s166_s20, 1024 }
   0x9   : > { %p740_p5 = pneg %p945_p3  ;;  %s181_s23 = sshll.u32 %s899_s22, 4  ;;  %s182_s23 = int_to_ptr.vmem [resolvable:$true] %s181_s23 }
   0xa   : > { %p826_p8 = scmp.ne.s32.totalorder %s166_s20, %s825_s24  ;;  %p833_p11 = scmp.lt.s32.totalorder %s166_s20, %s166_s20 }
   0xb   : > { %p957_p6 = pnand %p949_p4, %p740_p5  ;;  %p834_p12 = scmp.lt.s32.totalorder %s825_s24, %s825_s24 }
   0xd   : > { %p816_p7 = pneg %p957_p6  ;;  %p835_p13 = por %p834_p12, %p833_p11 }
   0xf   : > { %p828_p9 = pnand %p826_p8, %p816_p7 }
  0x11   : > { %p829_p10 = pneg %p828_p9 }
  0x13   : > { %p836_p0 = pnand %p835_p13, %p829_p10 }
  0x15   : > { %839 = shalt.err (!%p836_p0)
}
  0x16   : > { %s900_s25 = smov 64   ;;  %s901_s26 = smov 4  }
  0x17   : > { %743 = dma.hbm_to_vmem [thread:$0]  (!%p957_p6), %s1022_s1, 1024, %s166_s20, [#allocation3], %s900_s25, %s900_s25, %s901_s26  }
  0x18   : > { %s851_s29 = scalar_lea.vmem %s182_s23, 16  ;;  %s858_s30 = scalar_lea.vmem %s182_s23, 32 }
  0x19   : > { %p852_p1 = scmp.ne.s32.totalorder %s182_s23, %s851_s29  ;;  %p859_p8 = scmp.lt.s32.totalorder %s182_s23, %s182_s23 }
  0x1a   : > { %p860_p9 = scmp.lt.s32.totalorder %s858_s30, %s851_s29 }
  0x1b   : > { %p854_p2 = pnand %p852_p1, %p816_p7 }
  0x1c   : > { %p861_p10 = por %p860_p9, %p859_p8 }
  0x1d   : > { %p855_p5 = pneg %p854_p2 }
  0x1f   : > { %p862_p11 = pnand %p861_p10, %p855_p5 }
  0x21   : > { %865 = shalt.err (!%p862_p11)
}
  0x22   : > { %746 = dma.hbm_to_vmem [thread:$0]  (!%p957_p6), %s1023_s2, 16, %s182_s23, [#allocation5]  }
  0x23   : > { %206 = sbr.rel (%p945_p3) target bundleno = 307 (0x133), region = 32 }
  0x28   : > { %879 = dma.done.wait (%p949_p4), [#allocation3], 1024  }
  0x29   : > { %881 = vsyncadd (%p949_p4), [#allocation3], 4294966272 }
  0x2a   : > { %883 = dma.done.wait (%p949_p4), [#allocation5], 16  }
  0x2b   : > { %885 = vsyncadd (%p949_p4), [#allocation5], 4294967280  ;;  %s240_s6 = smul.u32 10, %s888_s12  ;;  %v902_v0 = vmov 0.0   ;;  %vm903_vm0 = vmmov 0   ;;  %v781_v1 = vld [vmem:[#allocation2 + $0x38] sm:$0xff]  }
  0x2c   : > { %680 = vmatprep.subr.bf16.mxu0 %v902_v0  ;;  %716 = vmatprep.subr.bf16.mxu1 %v902_v0  ;;  %v782_v2 = vld [vmem:[#allocation2 + $0x30] sm:$0xff]   ;;  %v783_v3 = vld [vmem:[#allocation2 + $0x28] sm:$0xff]   ;;  %v784_v4 = vld [vmem:[#allocation2 + $0x20] sm:$0xff]  }
  0x2d   : > { %696 = vmatprep.mubr.msk.bf16.mxu0 %vm903_vm0, %v902_v0  ;;  %708 = vmatprep.mubr.msk.bf16.mxu1 %vm903_vm0, %v902_v0  ;;  %p241_p3 = scmp.lt.s32.totalorder %s240_s6, 19  ;;  %v785_v5 = vld [vmem:[#allocation2 + $0x18] sm:$0xff]   ;;  %v786_v6 = vld [vmem:[#allocation2 + $0x10] sm:$0xff]   ;;  %v787_v7 = vld [vmem:[#allocation2 + $0x8] sm:$0xff]  }
  0x2e   : > { %681 = vmatpush3.bf16.msra.mxu0 %v781_v1  ;;  %724 = vmatpush3.bf16.msra.mxu1 %v781_v1  ;;  %v788_v8 = vld [vmem:[#allocation2] sm:$0xff]  }
  0x2f   : > { %s1033_s6 = smov (!%p241_p3, %s240_s6), 19  ;;  %682 = vmatprep.subr.bf16.mxu0 %v902_v0  ;;  %717 = vmatprep.subr.bf16.mxu1 %v902_v0  ;;  %v664_v15 = vld [vmem:[#allocation4] ss:$0 sm:$0xff] }
  0x30   : > { %s649_s7 = sshll.u32 %s1033_s6, 2  ;;  %s650_s11 = sshll.u32 %s1033_s6, 3 }
  0x31   : > { %s998_s10 = scalar_lea.vmem %s1021_s0, %s649_s7  ;;  %s257_s17 = scalar_lea.vmem %s1024_s3, %s650_s11 }
  0x32   : > { %683 = vmatpush3.bf16.msra.mxu0 %v782_v2  ;;  %725 = vmatpush3.bf16.msra.mxu1 %v782_v2  ;;  %v789_v9 = vld [vmem:[%s998_s10] sm:$0xff]   ;;  %v790_v10 = vld [vmem:[%s998_s10 + $0x18] sm:$0xff]   ;;  %v791_v11 = vld [vmem:[%s998_s10 + $0x8] sm:$0xff]  }
  0x33   : > { %684 = vmatprep.subr.bf16.mxu0 %v902_v0  ;;  %718 = vmatprep.subr.bf16.mxu1 %v902_v0  ;;  %v792_v12 = vld [vmem:[%s998_s10 + $0x20] sm:$0xff]   ;;  %v793_v13 = vld [vmem:[%s998_s10 + $0x10] sm:$0xff]  }
  0x36   : > { %685 = vmatpush3.bf16.msra.mxu0 %v783_v3  ;;  %726 = vmatpush3.bf16.msra.mxu1 %v783_v3 }
  0x37   : > { %686 = vmatprep.subr.bf16.mxu0 %v902_v0  ;;  %719 = vmatprep.subr.bf16.mxu1 %v902_v0 }
  0x3a   : > { %687 = vmatpush3.bf16.msra.mxu0 %v784_v4  ;;  %727 = vmatpush3.bf16.msra.mxu1 %v784_v4 }
  0x3b   : > { %688 = vmatprep.subr.bf16.mxu0 %v902_v0  ;;  %720 = vmatprep.subr.bf16.mxu1 %v902_v0 }
  0x3e   : > { %689 = vmatpush3.bf16.msra.mxu0 %v785_v5  ;;  %728 = vmatpush3.bf16.msra.mxu1 %v785_v5 }
  0x3f   : > { %690 = vmatprep.subr.bf16.mxu0 %v902_v0  ;;  %721 = vmatprep.subr.bf16.mxu1 %v902_v0 }
  0x42   : > { %691 = vmatpush3.bf16.msra.mxu0 %v786_v6  ;;  %729 = vmatpush3.bf16.msra.mxu1 %v786_v6 }
  0x43   : > { %692 = vmatprep.subr.bf16.mxu0 %v902_v0  ;;  %722 = vmatprep.subr.bf16.mxu1 %v902_v0 }
  0x46   : > { %693 = vmatpush3.bf16.msra.mxu0 %v787_v7  ;;  %730 = vmatpush3.bf16.msra.mxu1 %v787_v7 }
  0x47   : > { %694 = vmatprep.subr.bf16.mxu0 %v902_v0  ;;  %723 = vmatprep.subr.bf16.mxu1 %v902_v0 }
  0x4a   : > { %695 = vmatpush3.bf16.msra.mxu0 %v788_v8  ;;  %731 = vmatpush3.bf16.msra.mxu1 %v788_v8 }
  0x4d   : > { %697 = vmatmul.mubr.bf16.vlgmr.msra.gmra.mxu0 %v789_v9  ;;  %709 = vmatmul.mubr.bf16.vlgmr.msra.gmra.mxu1 %v790_v10 }
  0x4e   : > { %700 = vmatprep.mubr.msk.bf16.mxu0 %vm903_vm0, %v902_v0  ;;  %712 = vmatprep.mubr.msk.bf16.mxu1 %vm903_vm0, %v902_v0 }
  0x55   : > { %701 = vmatmul.mubr.bf16.gmra.mxu0 %v791_v11  ;;  %713 = vmatmul.mubr.bf16.gmra.mxu1 %v792_v12 }
  0x56   : > { %704 = vmatprep.mubr.msk.bf16.mxu0 %vm903_vm0, %v902_v0 }
  0x5d   : > { %705 = vmatmul.mubr.bf16.gmra.mxu0 %v793_v13 }
 0x10d   : > { %v422_v14 = vpop.f32.mrf.mxu0  ;;  %v446_v16 = vpop.f32.mrf.mxu1 }
 0x10e   : > { %v501_v19 = vadd.f32 %v664_v15, %v422_v14  ;;  %v507_v20 = vadd.f32 %v664_v15, %v446_v16 }
 0x10f   : > { %v698_v17 = vpop.f32.mrf.mxu0  ;;  %v710_v18 = vpop.f32.mrf.mxu1 }
 0x110   : > { %794 = vtanh.f32 %v501_v19 }
 0x111   : > { %v425_v21 = vpop.f32.mrf.mxu0  ;;  %v449_v22 = vpop.f32.mrf.mxu1  ;;  %796 = vtanh.f32 %v507_v20 }
 0x112   : > { %v502_v25 = vadd.f32 %v664_v15, %v425_v21  ;;  %v508_v26 = vadd.f32 %v664_v15, %v449_v22 }
 0x113   : > { %v699_v23 = vpop.f32.mrf.mxu0  ;;  %v711_v24 = vpop.f32.mrf.mxu1 }
 0x114   : > { %798 = vtanh.f32 %v502_v25 }
 0x115   : > { %v430_v27 = vpop.f32.mrf.mxu0  ;;  %v454_v28 = vpop.f32.mrf.mxu1  ;;  %800 = vtanh.f32 %v508_v26 }
 0x116   : > { %v503_v31 = vadd.f32 %v664_v15, %v430_v27  ;;  %v509_v32 = vadd.f32 %v664_v15, %v454_v28 }
 0x117   : > { %v702_v29 = vpop.f32.mrf.mxu0  ;;  %v714_v30 = vpop.f32.mrf.mxu1 }
 0x118   : > { %802 = vtanh.f32 %v503_v31 }
 0x119   : > { %v433_v33 = vpop.f32.mrf.mxu0  ;;  %v457_v34 = vpop.f32.mrf.mxu1  ;;  %804 = vtanh.f32 %v509_v32 }
 0x11a   : > { %v504_v37 = vadd.f32 %v664_v15, %v433_v33  ;;  %v510_v38 = vadd.f32 %v664_v15, %v457_v34 }
 0x11b   : > { %v703_v35 = vpop.f32.mrf.mxu0  ;;  %v715_v36 = vpop.f32.mrf.mxu1 }
 0x11c   : > { %806 = vtanh.f32 %v504_v37 }
 0x11d   : > { %v438_v39 = vpop.f32.mrf.mxu0  ;;  %v795_v40 = vpop.eup %794  ;;  %808 = vtanh.f32 %v510_v38 }
 0x11e   : > { %v797_v42 = vpop.eup %796  ;;  %521 = vst [vmem:[%s257_s17] sm:$0xff] %v795_v40  ;;  %v505_v43 = vadd.f32 %v664_v15, %v438_v39 }
 0x11f   : > { %v706_v41 = vpop.f32.mrf.mxu0  ;;  %527 = vst [vmem:[%s257_s17 + $0x30] sm:$0xff] %v797_v42 }
 0x120   : > { %810 = vtanh.f32 %v505_v43 }
 0x121   : > { %v441_v44 = vpop.f32.mrf.mxu0  ;;  %v799_v45 = vpop.eup %798 }
 0x122   : > { %v801_v47 = vpop.eup %800  ;;  %522 = vst [vmem:[%s257_s17 + $0x8] sm:$0xff] %v799_v45  ;;  %v506_v48 = vadd.f32 %v664_v15, %v441_v44 }
 0x123   : > { %v707_v46 = vpop.f32.mrf.mxu0  ;;  %528 = vst [vmem:[%s257_s17 + $0x38] sm:$0xff] %v801_v47 }
 0x124   : > { %812 = vtanh.f32 %v506_v48 }
 0x125   : > { %v803_v49 = vpop.eup %802 }
 0x126   : > { %v805_v50 = vpop.eup %804  ;;  %523 = vst [vmem:[%s257_s17 + $0x10] sm:$0xff] %v803_v49 }
 0x127   : > { %529 = vst [vmem:[%s257_s17 + $0x40] sm:$0xff] %v805_v50 }
 0x129   : > { %v807_v51 = vpop.eup %806 }
 0x12a   : > { %v809_v52 = vpop.eup %808  ;;  %524 = vst [vmem:[%s257_s17 + $0x18] sm:$0xff] %v807_v51 }
 0x12b   : > { %530 = vst [vmem:[%s257_s17 + $0x48] sm:$0xff] %v809_v52 }
 0x12d   : > { %v811_v53 = vpop.eup %810 }
 0x12e   : > { %525 = vst [vmem:[%s257_s17 + $0x20] sm:$0xff] %v811_v53 }
 0x131   : > { %v813_v54 = vpop.eup %812 }
 0x132   : > { %526 = vst [vmem:[%s257_s17 + $0x28] sm:$0xff] %v813_v54 }
 0x133 PF: > { %s15_s14 = sadd.s32 1, %s896_s14   ;;  %s1028_s12 = smov %s892_s13 }
 0x134   : > { %p12_p4 = scmp.ge.s32.totalorder %s15_s14, 4   ;;  %s1029_s13 = smov %s1031_s16 }
 0x136   :  { %14 = sbr.rel (!%p12_p4) target bundleno = 3 (0x3), region = 81 }
 0x13b   :  { %559 = vsyncpa [#allocation3], 1 }
 0x13c   :  { %561 = vsyncpa [#allocation3 + $0x1], 1 }
 0x13d   :  { %562 = vsyncpa [#allocation5], 1 }

// kernel: fwd.10
= control target key start
LH: loop header
LB: loop body
LE: loop exit
PB: predicated region body
PF: predicated region fallthrough
CT: control target
= control target key end

     0   :  { %8 = vsyncpa [#allocation3], 0  ;;  %s681_s0 = inlined_call_operand.vmem [shape: bf16[80,256], index: 0, kind: input, shape index: {}]   ;;  %s682_s1 = inlined_call_operand.hbm [shape: bf16[256,128], index: 1, kind: input, shape index: {}]   ;;  %s683_s2 = inlined_call_operand.hbm [shape: f32[1,128], index: 2, kind: input, shape index: {}]   ;;  %s684_s3 = inlined_call_operand.vmem [shape: f32[80,128], index: 3, kind: output, shape index: {}]  }
   0x1   :  { %9 = vsyncpa [#allocation5], 0  ;;  %s591_s12 = smov [#allocation2]  }
   0x2   :  { %s17_s13 = sshll.u32 %s591_s12, 4  ;;  %s18_s13 = int_to_ptr.vmem [resolvable:$true] %s17_s13 }
   0x3   :  { %s555_s14 = scalar_lea.vmem %s18_s13, 2048  ;;  %p560_p1 = scmp.lt.s32.totalorder %s18_s13, %s18_s13 }
   0x4   :  { %p556_p0 = scmp.ne.s32.totalorder %s18_s13, %s555_s14  ;;  %p561_p2 = scmp.lt.s32.totalorder %s555_s14, %s555_s14 }
   0x6   :  { %p562_p3 = por %p561_p2, %p560_p1 }
   0x8   :  { %p563_p4 = pnand %p562_p3, %p556_p0 }
   0xa   :  { %566 = shalt.err (!%p563_p4)
}
   0xb   :  { %s592_s15 = smov 64   ;;  %s593_s16 = smov 4  }
   0xc   :  { %23 = dma.hbm_to_vmem [thread:$0]  %s682_s1, 2048, %s18_s13, [#allocation3], %s592_s15, %s592_s15, %s593_s16  }
   0xd   :  { %s594_s19 = smov [#allocation4]  }
   0xe   :  { %s30_s20 = sshll.u32 %s594_s19, 4  ;;  %s31_s20 = int_to_ptr.vmem [resolvable:$true] %s30_s20 }
   0xf   :  { %s575_s21 = scalar_lea.vmem %s31_s20, 16  ;;  %s579_s22 = scalar_lea.vmem %s31_s20, 32 }
  0x10   :  { %p576_p5 = scmp.ne.s32.totalorder %s31_s20, %s575_s21  ;;  %p580_p6 = scmp.lt.s32.totalorder %s31_s20, %s31_s20 }
  0x11   :  { %p581_p7 = scmp.lt.s32.totalorder %s579_s22, %s575_s21 }
  0x13   :  { %p582_p8 = por %p581_p7, %p580_p6 }
  0x15   :  { %p583_p9 = pnand %p582_p8, %p576_p5 }
  0x17   :  { %586 = shalt.err (!%p583_p9)
}
  0x18   :  { %33 = dma.hbm_to_vmem [thread:$0]  %s683_s2, 16, %s31_s20, [#allocation5]  }
  0x19   :  { %587 = dma.done.wait [#allocation3], 2048  }
  0x1a   :  { %588 = vsyncadd [#allocation3], 4294965248 }
  0x1b   :  { %589 = dma.done.wait [#allocation5], 16  }
  0x1c   :  { %590 = vsyncadd [#allocation5], 4294967280  ;;  %v496_v0 = vld [vmem:[#allocation2 + $0x78] sm:$0xff]   ;;  %v498_v2 = vld [vmem:[#allocation2 + $0x70] sm:$0xff]  }
  0x1d   :  { %v497_v1 = vld [vmem:[#allocation2 + $0x38] sm:$0xff]   ;;  %429 = vmatprep.subr.bf16.mxu0 %v496_v0  ;;  %475 = vmatprep.subr.bf16.mxu1 %v496_v0  ;;  %v499_v3 = vld [vmem:[#allocation2 + $0x30] sm:$0xff]   ;;  %v500_v4 = vld [vmem:[#allocation2 + $0x68] sm:$0xff]  }
  0x1e   :  { %430 = vmatpush3.bf16.msra.mxu0 %v497_v1  ;;  %483 = vmatpush3.bf16.msra.mxu1 %v497_v1  ;;  %v501_v5 = vld [vmem:[#allocation2 + $0x28] sm:$0xff]   ;;  %v502_v6 = vld [vmem:[#allocation2 + $0x60] sm:$0xff]   ;;  %v504_v8 = vld [vmem:[#allocation2 + $0x58] sm:$0xff]  }
  0x1f   :  { %431 = vmatprep.subr.bf16.mxu0 %v498_v2  ;;  %476 = vmatprep.subr.bf16.mxu1 %v498_v2  ;;  %v503_v7 = vld [vmem:[#allocation2 + $0x20] sm:$0xff]   ;;  %v505_v9 = vld [vmem:[#allocation2 + $0x18] sm:$0xff]   ;;  %v506_v10 = vld [vmem:[#allocation2 + $0x50] sm:$0xff]  }
  0x20   :  { %v514_v11 = vld [vmem:[%s681_s0 + $0x4] ss:$8 sps:$4 sm:$0xff]   ;;  %v517_v12 = vld [vmem:[%s681_s0 + $0x34] ss:$8 sps:$4 sm:$0xff]   ;;  %v512_v18 = vld [vmem:[%s681_s0] ss:$8 sps:$4 sm:$0xff]  }
  0x21   :  { %v507_v13 = vld [vmem:[#allocation2 + $0x10] sm:$0xff]   ;;  %v508_v14 = vld [vmem:[#allocation2 + $0x48] sm:$0xff]   ;;  %285 = vmatprep.mubr.bf16.mxu0 %v514_v11  ;;  %309 = vmatprep.mubr.bf16.mxu1 %v517_v12  ;;  %v510_v16 = vld [vmem:[#allocation2 + $0x40] sm:$0xff]  }
  0x22   :  { %432 = vmatpush3.bf16.msra.mxu0 %v499_v3  ;;  %484 = vmatpush3.bf16.msra.mxu1 %v499_v3  ;;  %v509_v15 = vld [vmem:[#allocation2 + $0x8] sm:$0xff]   ;;  %v511_v17 = vld [vmem:[#allocation2] sm:$0xff]   ;;  %v515_v19 = vld [vmem:[%s681_s0 + $0x30] ss:$8 sps:$4 sm:$0xff]  }
  0x23   :  { %433 = vmatprep.subr.bf16.mxu0 %v500_v4  ;;  %477 = vmatprep.subr.bf16.mxu1 %v500_v4  ;;  %v518_v20 = vld [vmem:[%s681_s0 + $0x14] ss:$8 sps:$4 sm:$0xff]   ;;  %v521_v21 = vld [vmem:[%s681_s0 + $0x44] ss:$8 sps:$4 sm:$0xff]   ;;  %v520_v22 = vld [vmem:[%s681_s0 + $0x10] ss:$8 sps:$4 sm:$0xff]  }
  0x24   :  { %v523_v23 = vld [vmem:[%s681_s0 + $0x40] ss:$8 sps:$4 sm:$0xff]   ;;  %v524_v24 = vld [vmem:[%s681_s0 + $0x24] ss:$8 sps:$4 sm:$0xff]  }
  0x25   :  { %v526_v25 = vld [vmem:[%s681_s0 + $0x20] ss:$8 sps:$4 sm:$0xff]  }
  0x26   :  { %434 = vmatpush3.bf16.msra.mxu0 %v501_v5  ;;  %485 = vmatpush3.bf16.msra.mxu1 %v501_v5  ;;  %v428_v32 = vld [vmem:[#allocation4] ss:$0 sm:$0xff] }
  0x27   :  { %435 = vmatprep.subr.bf16.mxu0 %v502_v6  ;;  %478 = vmatprep.subr.bf16.mxu1 %v502_v6 }
  0x2a   :  { %436 = vmatpush3.bf16.msra.mxu0 %v503_v7  ;;  %486 = vmatpush3.bf16.msra.mxu1 %v503_v7 }
  0x2b   :  { %437 = vmatprep.subr.bf16.mxu0 %v504_v8  ;;  %479 = vmatprep.subr.bf16.mxu1 %v504_v8 }
  0x2e   :  { %438 = vmatpush3.bf16.msra.mxu0 %v505_v9  ;;  %487 = vmatpush3.bf16.msra.mxu1 %v505_v9 }
  0x2f   :  { %439 = vmatprep.subr.bf16.mxu0 %v506_v10  ;;  %480 = vmatprep.subr.bf16.mxu1 %v506_v10 }
  0x32   :  { %440 = vmatpush3.bf16.msra.mxu0 %v507_v13  ;;  %488 = vmatpush3.bf16.msra.mxu1 %v507_v13 }
  0x33   :  { %441 = vmatprep.subr.bf16.mxu0 %v508_v14  ;;  %481 = vmatprep.subr.bf16.mxu1 %v508_v14 }
  0x36   :  { %442 = vmatpush3.bf16.msra.mxu0 %v509_v15  ;;  %489 = vmatpush3.bf16.msra.mxu1 %v509_v15 }
  0x37   :  { %443 = vmatprep.subr.bf16.mxu0 %v510_v16  ;;  %482 = vmatprep.subr.bf16.mxu1 %v510_v16 }
  0x3a   :  { %444 = vmatpush3.bf16.msra.mxu0 %v511_v17  ;;  %490 = vmatpush3.bf16.msra.mxu1 %v511_v17 }
  0x3d   :  { %286 = vmatmul.mubr.bf16.vlgmr.msra.gmra.mxu0 %v512_v18  ;;  %310 = vmatmul.mubr.bf16.vlgmr.msra.gmra.mxu1 %v515_v19 }
  0x3e   :  { %293 = vmatprep.mubr.bf16.mxu0 %v518_v20  ;;  %317 = vmatprep.mubr.bf16.mxu1 %v521_v21 }
  0x45   :  { %294 = vmatmul.mubr.bf16.gmra.mxu0 %v520_v22  ;;  %318 = vmatmul.mubr.bf16.gmra.mxu1 %v523_v23 }
  0x46   :  { %301 = vmatprep.mubr.bf16.mxu0 %v524_v24 }
  0x4d   :  { %302 = vmatmul.mubr.bf16.gmra.mxu0 %v526_v25 }
  0xfd   :  { %v445_v26 = vpop.f32.mrf.mxu0  ;;  %v463_v27 = vpop.f32.mrf.mxu1 }
  0xff   :  { %v446_v28 = vpop.f32.mrf.mxu0  ;;  %v464_v29 = vpop.f32.mrf.mxu1 }
 0x100   :  { %v447_v30 = vadd.f32 %v446_v28, %v445_v26  ;;  %v465_v31 = vadd.f32 %v464_v29, %v463_v27 }
 0x101   :  { %v448_v33 = vpop.f32.mrf.mxu0  ;;  %v466_v34 = vpop.f32.mrf.mxu1 }
 0x102   :  { %v366_v37 = vadd.f32 %v447_v30, %v428_v32  ;;  %v372_v38 = vadd.f32 %v465_v31, %v428_v32 }
 0x103   :  { %v449_v35 = vpop.f32.mrf.mxu0  ;;  %v467_v36 = vpop.f32.mrf.mxu1 }
 0x104   :  { %v450_v39 = vadd.f32 %v449_v35, %v448_v33  ;;  %v468_v40 = vadd.f32 %v467_v36, %v466_v34  ;;  %527 = vtanh.f32 %v366_v37 }
 0x105   :  { %v451_v41 = vpop.f32.mrf.mxu0  ;;  %v469_v42 = vpop.f32.mrf.mxu1  ;;  %529 = vtanh.f32 %v372_v38 }
 0x106   :  { %v367_v45 = vadd.f32 %v450_v39, %v428_v32  ;;  %v373_v46 = vadd.f32 %v468_v40, %v428_v32 }
 0x107   :  { %v452_v43 = vpop.f32.mrf.mxu0  ;;  %v470_v44 = vpop.f32.mrf.mxu1 }
 0x108   :  { %v453_v47 = vadd.f32 %v452_v43, %v451_v41  ;;  %v471_v48 = vadd.f32 %v470_v44, %v469_v42  ;;  %531 = vtanh.f32 %v367_v45 }
 0x109   :  { %v454_v49 = vpop.f32.mrf.mxu0  ;;  %v472_v50 = vpop.f32.mrf.mxu1  ;;  %533 = vtanh.f32 %v373_v46 }
 0x10a   :  { %v368_v53 = vadd.f32 %v453_v47, %v428_v32  ;;  %v374_v54 = vadd.f32 %v471_v48, %v428_v32 }
 0x10b   :  { %v455_v51 = vpop.f32.mrf.mxu0  ;;  %v473_v52 = vpop.f32.mrf.mxu1 }
 0x10c   :  { %v456_v55 = vadd.f32 %v455_v51, %v454_v49  ;;  %v474_v56 = vadd.f32 %v473_v52, %v472_v50  ;;  %535 = vtanh.f32 %v368_v53 }
 0x10d   :  { %v457_v57 = vpop.f32.mrf.mxu0  ;;  %537 = vtanh.f32 %v374_v54 }
 0x10e   :  { %v369_v59 = vadd.f32 %v456_v55, %v428_v32  ;;  %v375_v60 = vadd.f32 %v474_v56, %v428_v32 }
 0x10f   :  { %v458_v58 = vpop.f32.mrf.mxu0 }
 0x110   :  { %v459_v61 = vadd.f32 %v458_v58, %v457_v57  ;;  %539 = vtanh.f32 %v369_v59 }
 0x111   :  { %v460_v62 = vpop.f32.mrf.mxu0  ;;  %v528_v63 = vpop.eup %527  ;;  %541 = vtanh.f32 %v375_v60 }
 0x112   :  { %v530_v1 = vpop.eup %529  ;;  %386 = vst [vmem:[%s684_s3] sm:$0xff] %v528_v63  ;;  %v370_v2 = vadd.f32 %v459_v61, %v428_v32 }
 0x113   :  { %v461_v0 = vpop.f32.mrf.mxu0  ;;  %392 = vst [vmem:[%s684_s3 + $0x30] sm:$0xff] %v530_v1 }
 0x114   :  { %v462_v3 = vadd.f32 %v461_v0, %v460_v62  ;;  %543 = vtanh.f32 %v370_v2 }
 0x115   :  { %v532_v4 = vpop.eup %531 }
 0x116   :  { %v534_v5 = vpop.eup %533  ;;  %387 = vst [vmem:[%s684_s3 + $0x8] sm:$0xff] %v532_v4  ;;  %v371_v6 = vadd.f32 %v462_v3, %v428_v32 }
 0x117   :  { %393 = vst [vmem:[%s684_s3 + $0x38] sm:$0xff] %v534_v5 }
 0x118   :  { %545 = vtanh.f32 %v371_v6 }
 0x119   :  { %v536_v7 = vpop.eup %535 }
 0x11a   :  { %v538_v8 = vpop.eup %537  ;;  %388 = vst [vmem:[%s684_s3 + $0x10] sm:$0xff] %v536_v7 }
 0x11b   :  { %394 = vst [vmem:[%s684_s3 + $0x40] sm:$0xff] %v538_v8 }
 0x11d   :  { %v540_v9 = vpop.eup %539 }
 0x11e   :  { %v542_v10 = vpop.eup %541  ;;  %389 = vst [vmem:[%s684_s3 + $0x18] sm:$0xff] %v540_v9 }
 0x11f   :  { %395 = vst [vmem:[%s684_s3 + $0x48] sm:$0xff] %v542_v10 }
 0x121   :  { %v544_v11 = vpop.eup %543 }
 0x122   :  { %390 = vst [vmem:[%s684_s3 + $0x20] sm:$0xff] %v544_v11 }
 0x125   :  { %v546_v12 = vpop.eup %545 }
 0x126   :  { %391 = vst [vmem:[%s684_s3 + $0x28] sm:$0xff] %v546_v12 }
 0x127   :  { %400 = vsyncpa [#allocation3], 1 }
 0x128   :  { %401 = vsyncpa [#allocation5], 1 }

// kernel: fwd.11
= control target key start
LH: loop header
LB: loop body
LE: loop exit
PB: predicated region body
PF: predicated region fallthrough
CT: control target
= control target key end

     0   :  { %8 = vsyncpa [#allocation3], 0  ;;  %s859_s0 = inlined_call_operand.vmem [shape: bf16[48,512], index: 0, kind: input, shape index: {}]   ;;  %s860_s1 = inlined_call_operand.hbm [shape: bf16[512,128], index: 1, kind: input, shape index: {}]   ;;  %s861_s2 = inlined_call_operand.hbm [shape: f32[1,128], index: 2, kind: input, shape index: {}]   ;;  %s862_s3 = inlined_call_operand.vmem [shape: f32[48,128], index: 3, kind: output, shape index: {}]  }
   0x1   :  { %9 = vsyncpa [#allocation5], 0  ;;  %s775_s12 = smov [#allocation2]  }
   0x2   :  { %s17_s13 = sshll.u32 %s775_s12, 4  ;;  %s18_s13 = int_to_ptr.vmem [resolvable:$true] %s17_s13 }
   0x3   :  { %s739_s14 = scalar_lea.vmem %s18_s13, 4096  ;;  %p744_p1 = scmp.lt.s32.totalorder %s18_s13, %s18_s13 }
   0x4   :  { %p740_p0 = scmp.ne.s32.totalorder %s18_s13, %s739_s14  ;;  %p745_p2 = scmp.lt.s32.totalorder %s739_s14, %s739_s14 }
   0x6   :  { %p746_p3 = por %p745_p2, %p744_p1 }
   0x8   :  { %p747_p4 = pnand %p746_p3, %p740_p0 }
   0xa   :  { %750 = shalt.err (!%p747_p4)
}
   0xb   :  { %s776_s15 = smov 64   ;;  %s777_s16 = smov 4  }
   0xc   :  { %23 = dma.hbm_to_vmem [thread:$0]  %s860_s1, 4096, %s18_s13, [#allocation3], %s776_s15, %s776_s15, %s777_s16  }
   0xd   :  { %s778_s19 = smov [#allocation4]  }
   0xe   :  { %s30_s20 = sshll.u32 %s778_s19, 4  ;;  %s31_s20 = int_to_ptr.vmem [resolvable:$true] %s30_s20 }
   0xf   :  { %s759_s21 = scalar_lea.vmem %s31_s20, 16  ;;  %s763_s22 = scalar_lea.vmem %s31_s20, 32 }
  0x10   :  { %p760_p5 = scmp.ne.s32.totalorder %s31_s20, %s759_s21  ;;  %p764_p6 = scmp.lt.s32.totalorder %s31_s20, %s31_s20 }
  0x11   :  { %p765_p7 = scmp.lt.s32.totalorder %s763_s22, %s759_s21 }
  0x13   :  { %p766_p8 = por %p765_p7, %p764_p6 }
  0x15   :  { %p767_p9 = pnand %p766_p8, %p760_p5 }
  0x17   :  { %770 = shalt.err (!%p767_p9)
}
  0x18   :  { %33 = dma.hbm_to_vmem [thread:$0]  %s861_s2, 16, %s31_s20, [#allocation5]  }
  0x19   :  { %771 = dma.done.wait [#allocation3], 4096  }
  0x1a   :  { %772 = vsyncadd [#allocation3], 4294963200 }
  0x1b   :  { %773 = dma.done.wait [#allocation5], 16  }
  0x1c   :  { %774 = vsyncadd [#allocation5], 4294967280  ;;  %v669_v0 = vld [vmem:[#allocation2 + $0x78] sm:$0xff]   ;;  %v673_v4 = vld [vmem:[#allocation2 + $0x70] sm:$0xff]  }
  0x1d   :  { %v670_v1 = vld [vmem:[#allocation2 + $0xf8] sm:$0xff]   ;;  %596 = vmatprep.subr.bf16.mxu0 %v669_v0  ;;  %v674_v5 = vld [vmem:[#allocation2 + $0xf0] sm:$0xff]   ;;  %v677_v8 = vld [vmem:[#allocation2 + $0x68] sm:$0xff]  }
  0x1e   :  { %v671_v2 = vld [vmem:[#allocation2 + $0x38] sm:$0xff]   ;;  %630 = vmatprep.subr.bf16.mxu1 %v670_v1  ;;  %v675_v6 = vld [vmem:[#allocation2 + $0x30] sm:$0xff]   ;;  %v678_v9 = vld [vmem:[#allocation2 + $0xe8] sm:$0xff]  }
  0x1f   :  { %v672_v3 = vld [vmem:[#allocation2 + $0xb8] sm:$0xff]   ;;  %597 = vmatpush3.bf16.msra.mxu0 %v671_v2  ;;  %v676_v7 = vld [vmem:[#allocation2 + $0xb0] sm:$0xff]   ;;  %v679_v10 = vld [vmem:[#allocation2 + $0x28] sm:$0xff]  }
  0x20   :  { %631 = vmatpush3.bf16.msra.mxu1 %v672_v3  ;;  %598 = vmatprep.subr.bf16.mxu0 %v673_v4  ;;  %v680_v11 = vld [vmem:[#allocation2 + $0xa8] sm:$0xff]   ;;  %v681_v12 = vld [vmem:[#allocation2 + $0x60] sm:$0xff]   ;;  %v685_v16 = vld [vmem:[#allocation2 + $0x58] sm:$0xff]  }
  0x21   :  { %632 = vmatprep.subr.bf16.mxu1 %v674_v5  ;;  %v682_v13 = vld [vmem:[#allocation2 + $0xe0] sm:$0xff]   ;;  %v686_v17 = vld [vmem:[#allocation2 + $0xd8] sm:$0xff]   ;;  %v689_v20 = vld [vmem:[#allocation2 + $0x50] sm:$0xff]  }
  0x22   :  { %v683_v14 = vld [vmem:[#allocation2 + $0x20] sm:$0xff]   ;;  %v687_v18 = vld [vmem:[#allocation2 + $0x18] sm:$0xff]   ;;  %v690_v21 = vld [vmem:[#allocation2 + $0xd0] sm:$0xff]  }
  0x23   :  { %599 = vmatpush3.bf16.msra.mxu0 %v675_v6  ;;  %v684_v15 = vld [vmem:[#allocation2 + $0xa0] sm:$0xff]   ;;  %v688_v19 = vld [vmem:[#allocation2 + $0x98] sm:$0xff]   ;;  %v691_v22 = vld [vmem:[#allocation2 + $0x10] sm:$0xff]  }
  0x24   :  { %633 = vmatpush3.bf16.msra.mxu1 %v676_v7  ;;  %600 = vmatprep.subr.bf16.mxu0 %v677_v8  ;;  %v692_v23 = vld [vmem:[#allocation2 + $0x90] sm:$0xff]   ;;  %v693_v24 = vld [vmem:[#allocation2 + $0x48] sm:$0xff]   ;;  %v697_v28 = vld [vmem:[#allocation2 + $0x40] sm:$0xff]  }
  0x25   :  { %634 = vmatprep.subr.bf16.mxu1 %v678_v9  ;;  %v694_v25 = vld [vmem:[#allocation2 + $0xc8] sm:$0xff]   ;;  %v698_v29 = vld [vmem:[#allocation2 + $0xc0] sm:$0xff]  }
  0x26   :  { %v695_v26 = vld [vmem:[#allocation2 + $0x8] sm:$0xff]   ;;  %v699_v30 = vld [vmem:[#allocation2] sm:$0xff]  }
  0x27   :  { %601 = vmatpush3.bf16.msra.mxu0 %v679_v10  ;;  %v696_v27 = vld [vmem:[#allocation2 + $0x88] sm:$0xff]   ;;  %v700_v31 = vld [vmem:[#allocation2 + $0x80] sm:$0xff]  }
  0x28   :  { %635 = vmatpush3.bf16.msra.mxu1 %v680_v11  ;;  %602 = vmatprep.subr.bf16.mxu0 %v681_v12  ;;  %v701_v32 = vld [vmem:[%s859_s0] ss:$16 sps:$4 sm:$0xff]   ;;  %v703_v33 = vld [vmem:[%s859_s0 + $0x4] ss:$16 sps:$4 sm:$0xff]   ;;  %v704_v34 = vld [vmem:[%s859_s0 + $0x8] ss:$16 sps:$4 sm:$0xff]  }
  0x29   :  { %636 = vmatprep.subr.bf16.mxu1 %v682_v13  ;;  %v706_v35 = vld [vmem:[%s859_s0 + $0xc] ss:$16 sps:$4 sm:$0xff]   ;;  %417 = vmatprep.mubr.bf16.mxu0 %v703_v33  ;;  %v707_v36 = vld [vmem:[%s859_s0 + $0x24] ss:$16 sps:$4 sm:$0xff]   ;;  %v711_v38 = vld [vmem:[%s859_s0 + $0x20] ss:$16 sps:$4 sm:$0xff]  }
  0x2a   :  { %474 = vmatprep.mubr.bf16.mxu1 %v706_v35  ;;  %v709_v37 = vld [vmem:[%s859_s0 + $0x2c] ss:$16 sps:$4 sm:$0xff]   ;;  %v712_v39 = vld [vmem:[%s859_s0 + $0x28] ss:$16 sps:$4 sm:$0xff]   ;;  %v713_v40 = vld [vmem:[%s859_s0 + $0x44] ss:$16 sps:$4 sm:$0xff]  }
  0x2b   :  { %603 = vmatpush3.bf16.msra.mxu0 %v683_v14  ;;  %v715_v41 = vld [vmem:[%s859_s0 + $0x4c] ss:$16 sps:$4 sm:$0xff]   ;;  %v717_v42 = vld [vmem:[%s859_s0 + $0x40] ss:$16 sps:$4 sm:$0xff]   ;;  %v718_v43 = vld [vmem:[%s859_s0 + $0x48] ss:$16 sps:$4 sm:$0xff]  }
  0x2c   :  { %637 = vmatpush3.bf16.msra.mxu1 %v684_v15  ;;  %604 = vmatprep.subr.bf16.mxu0 %v685_v16  ;;  %v595_v54 = vld [vmem:[#allocation4] ss:$0 sm:$0xff] }
  0x2d   :  { %638 = vmatprep.subr.bf16.mxu1 %v686_v17 }
  0x2f   :  { %605 = vmatpush3.bf16.msra.mxu0 %v687_v18 }
  0x30   :  { %639 = vmatpush3.bf16.msra.mxu1 %v688_v19  ;;  %606 = vmatprep.subr.bf16.mxu0 %v689_v20 }
  0x31   :  { %640 = vmatprep.subr.bf16.mxu1 %v690_v21 }
  0x33   :  { %607 = vmatpush3.bf16.msra.mxu0 %v691_v22 }
  0x34   :  { %641 = vmatpush3.bf16.msra.mxu1 %v692_v23  ;;  %608 = vmatprep.subr.bf16.mxu0 %v693_v24 }
  0x35   :  { %642 = vmatprep.subr.bf16.mxu1 %v694_v25 }
  0x37   :  { %609 = vmatpush3.bf16.msra.mxu0 %v695_v26 }
  0x38   :  { %643 = vmatpush3.bf16.msra.mxu1 %v696_v27  ;;  %610 = vmatprep.subr.bf16.mxu0 %v697_v28 }
  0x39   :  { %644 = vmatprep.subr.bf16.mxu1 %v698_v29 }
  0x3b   :  { %611 = vmatpush3.bf16.msra.mxu0 %v699_v30 }
  0x3c   :  { %645 = vmatpush3.bf16.msra.mxu1 %v700_v31 }
  0x3e   :  { %418 = vmatmul.mubr.bf16.vlgmr.msra.gmra.mxu0 %v701_v32 }
  0x3f   :  { %475 = vmatmul.mubr.bf16.vlgmr.msra.gmra.mxu1 %v704_v34  ;;  %425 = vmatprep.mubr.bf16.mxu0 %v707_v36 }
  0x40   :  { %482 = vmatprep.mubr.bf16.mxu1 %v709_v37 }
  0x46   :  { %426 = vmatmul.mubr.bf16.gmra.mxu0 %v711_v38 }
  0x47   :  { %483 = vmatmul.mubr.bf16.gmra.mxu1 %v712_v39  ;;  %433 = vmatprep.mubr.bf16.mxu0 %v713_v40 }
  0x48   :  { %490 = vmatprep.mubr.bf16.mxu1 %v715_v41 }
  0x4e   :  { %434 = vmatmul.mubr.bf16.gmra.mxu0 %v717_v42 }
  0x4f   :  { %491 = vmatmul.mubr.bf16.gmra.mxu1 %v718_v43 }
  0xfe   :  { %v612_v44 = vpop.f32.mrf.mxu0 }
  0xff   :  { %v646_v45 = vpop.f32.mrf.mxu1 }
 0x100   :  { %v613_v46 = vpop.f32.mrf.mxu0 }
 0x101   :  { %v614_v47 = vadd.f32 %v613_v46, %v612_v44  ;;  %v647_v48 = vpop.f32.mrf.mxu1 }
 0x102   :  { %v648_v49 = vadd.f32 %v647_v48, %v646_v45  ;;  %v615_v50 = vpop.f32.mrf.mxu0 }
 0x103   :  { %v649_v51 = vpop.f32.mrf.mxu1 }
 0x104   :  { %v477_v52 = vadd.f32 %v648_v49, %v614_v47  ;;  %v616_v53 = vpop.f32.mrf.mxu0 }
 0x105   :  { %v617_v55 = vadd.f32 %v616_v53, %v615_v50  ;;  %v650_v56 = vpop.f32.mrf.mxu1 }
 0x106   :  { %v651_v57 = vadd.f32 %v650_v56, %v649_v51  ;;  %v618_v58 = vpop.f32.mrf.mxu0  ;;  %v527_v60 = vadd.f32 %v595_v54, %v477_v52 }
 0x107   :  { %v652_v59 = vpop.f32.mrf.mxu1 }
 0x108   :  { %v480_v61 = vadd.f32 %v651_v57, %v617_v55  ;;  %v619_v62 = vpop.f32.mrf.mxu0  ;;  %719 = vtanh.f32 %v527_v60 }
 0x109   :  { %v620_v63 = vadd.f32 %v619_v62, %v618_v58  ;;  %v653_v0 = vpop.f32.mrf.mxu1 }
 0x10a   :  { %v654_v1 = vadd.f32 %v653_v0, %v652_v59  ;;  %v621_v2 = vpop.f32.mrf.mxu0  ;;  %v528_v4 = vadd.f32 %v595_v54, %v480_v61 }
 0x10b   :  { %v655_v3 = vpop.f32.mrf.mxu1 }
 0x10c   :  { %v485_v5 = vadd.f32 %v654_v1, %v620_v63  ;;  %v622_v6 = vpop.f32.mrf.mxu0  ;;  %721 = vtanh.f32 %v528_v4 }
 0x10d   :  { %v623_v7 = vadd.f32 %v622_v6, %v621_v2  ;;  %v656_v8 = vpop.f32.mrf.mxu1 }
 0x10e   :  { %v657_v9 = vadd.f32 %v656_v8, %v655_v3  ;;  %v624_v10 = vpop.f32.mrf.mxu0  ;;  %v529_v12 = vadd.f32 %v595_v54, %v485_v5 }
 0x10f   :  { %v658_v11 = vpop.f32.mrf.mxu1 }
 0x110   :  { %v488_v13 = vadd.f32 %v657_v9, %v623_v7  ;;  %v625_v14 = vpop.f32.mrf.mxu0  ;;  %723 = vtanh.f32 %v529_v12 }
 0x111   :  { %v626_v15 = vadd.f32 %v625_v14, %v624_v10  ;;  %v659_v16 = vpop.f32.mrf.mxu1 }
 0x112   :  { %v660_v17 = vadd.f32 %v659_v16, %v658_v11  ;;  %v627_v18 = vpop.f32.mrf.mxu0  ;;  %v530_v20 = vadd.f32 %v595_v54, %v488_v13 }
 0x113   :  { %v661_v19 = vpop.f32.mrf.mxu1 }
 0x114   :  { %v493_v21 = vadd.f32 %v660_v17, %v626_v15  ;;  %v628_v22 = vpop.f32.mrf.mxu0  ;;  %725 = vtanh.f32 %v530_v20 }
 0x115   :  { %v629_v23 = vadd.f32 %v628_v22, %v627_v18  ;;  %v662_v24 = vpop.f32.mrf.mxu1  ;;  %v720_v26 = vpop.eup %719 }
 0x116   :  { %v663_v25 = vadd.f32 %v662_v24, %v661_v19  ;;  %539 = vst [vmem:[%s862_s3] sm:$0xff] %v720_v26  ;;  %v531_v27 = vadd.f32 %v595_v54, %v493_v21 }
 0x118   :  { %v496_v28 = vadd.f32 %v663_v25, %v629_v23  ;;  %727 = vtanh.f32 %v531_v27 }
 0x119   :  { %v722_v29 = vpop.eup %721 }
 0x11a   :  { %540 = vst [vmem:[%s862_s3 + $0x8] sm:$0xff] %v722_v29  ;;  %v532_v30 = vadd.f32 %v595_v54, %v496_v28 }
 0x11c   :  { %729 = vtanh.f32 %v532_v30 }
 0x11d   :  { %v724_v31 = vpop.eup %723 }
 0x11e   :  { %541 = vst [vmem:[%s862_s3 + $0x10] sm:$0xff] %v724_v31 }
 0x121   :  { %v726_v32 = vpop.eup %725 }
 0x122   :  { %542 = vst [vmem:[%s862_s3 + $0x18] sm:$0xff] %v726_v32 }
 0x125   :  { %v728_v33 = vpop.eup %727 }
 0x126   :  { %543 = vst [vmem:[%s862_s3 + $0x20] sm:$0xff] %v728_v33 }
 0x129   :  { %v730_v34 = vpop.eup %729 }
 0x12a   :  { %544 = vst [vmem:[%s862_s3 + $0x28] sm:$0xff] %v730_v34 }
 0x12b   :  { %549 = vsyncpa [#allocation3], 1 }
 0x12c   :  { %550 = vsyncpa [#allocation5], 1 }

// kernel: fwd.13
= control target key start
LH: loop header
LB: loop body
LE: loop exit
PB: predicated region body
PF: predicated region fallthrough
CT: control target
= control target key end

     0   :  { %s1218_s18 = smov 0   ;;  %s1220_s19 = smov 0   ;;  %s1366_s0 = inlined_call_operand.vmem [shape: bf16[8,4096], index: 0, kind: input, shape index: {}]   ;;  %s1367_s1 = inlined_call_operand.vmem [shape: bf16[4096,256], index: 1, kind: input, shape index: {}]   ;;  %s1368_s2 = inlined_call_operand.vmem [shape: f32[1,256], index: 2, kind: input, shape index: {}]   ;;  %s1369_s3 = inlined_call_operand.vmem [shape: f32[8,128], index: 3, kind: input, shape index: {}]   ;;  %s1370_s4 = inlined_call_operand.vmem [shape: f32[8,256], index: 4, kind: output, shape index: {0}]   ;;  %s1371_s5 = inlined_call_operand.vmem [shape: f32[8,128], index: 5, kind: output, shape index: {1}]  }
   0x1   :  { %s1222_s20 = smov 0  }
   0x2 LB: > { %s25_s21 = sadd.s32 1, %s1181_s19  ;;  %p955_p0 = scmp.ge.s32.totalorder %s1185_s20, 1  ;;  %s1185_s20 = sphi %s1222_s20, %s16_s20   ;;  %s1181_s19 = sphi %s1220_s19, %s1373_s19   ;;  %s1177_s18 = sphi %s1218_s18, %s1372_s18  }
   0x3   : > { %p26_p1 = scmp.ge.s32.totalorder %s25_s21, 8  ;;  %p230_p2 = scmp.lt.s32.totalorder %s1185_s20, 9 }
   0x5   : > { %s1375_s21 = smov (%p26_p1, %s25_s21), 0  ;;  %p231_p3 = pnand %p955_p0, %p230_p2 }
   0x6   : > { %s956_s22 = sshll.u32 (!%p231_p3), %s1177_s18, 2  ;;  %s958_s23 = sshll.u32 (!%p231_p3), %s1177_s18, 6 }
   0x7   : > { %234 = sbr.rel (%p231_p3) target bundleno = 321 (0x141), region = 36  ;;  %p279_p4 = scmp.lt.s32.totalorder (!%p231_p3), %s956_s22, 31 }
   0x8   : > { %p287_p5 = scmp.lt.s32.totalorder (!%p231_p3), %s958_s23, 511  ;;  %p961_p6 = scmp.ne.s32.totalorder (!%p231_p3), %s1177_s18, 0 }
   0xc   : > { %s1377_s22 = smov (!%p279_p4, %s956_s22), 31  ;;  %s1379_s23 = smov (!%p287_p5, %s958_s23), 511 }
   0xd   : > { %s957_s24 = sshll.u32 %s1377_s22, 2  ;;  %s1035_s28 = sshll.u32 %s1379_s23, 3 }
   0xe   : > { %s1243_s27 = scalar_lea.vmem %s1366_s0, %s957_s24  ;;  %s1248_s6 = scalar_lea.vmem %s1367_s1, %s1035_s28 }
   0xf   : > { %309 = sbr.rel (%p961_p6) target bundleno = 22 (0x16), region = 40 }
  0x14   : > { %v1187_v0 = vmov 0.0  }
  0x15   : > { %310 = vst [vmem:[%s1370_s4] sm:$0xff] %v1187_v0  ;;  %311 = vst [vmem:[%s1370_s4 + $0x8] sm:$0xff] %v1187_v0 }
  0x16 PF: > { %v1061_v1 = vld [vmem:[%s1248_s6 + $0x74] ss:$8 sps:$4 sm:$0xff]   ;;  %v1065_v3 = vld [vmem:[%s1248_s6 + $0x70] ss:$8 sps:$4 sm:$0xff]   ;;  %v1067_v5 = vld [vmem:[%s1248_s6 + $0x64] ss:$8 sps:$4 sm:$0xff]  }
  0x17   : > { %v1063_v2 = vld [vmem:[%s1248_s6 + $0x174] ss:$8 sps:$4 sm:$0xff]   ;;  %714 = vmatprep.subr.bf16.mxu0 %v1061_v1  ;;  %v1066_v4 = vld [vmem:[%s1248_s6 + $0x170] ss:$8 sps:$4 sm:$0xff]   ;;  %v1069_v6 = vld [vmem:[%s1248_s6 + $0x164] ss:$8 sps:$4 sm:$0xff]  }
  0x18   : > { %755 = vmatprep.subr.bf16.mxu1 %v1063_v2  ;;  %715 = vmatpush1.bf16.msra.mxu0 %v1065_v3  ;;  %v1071_v7 = vld [vmem:[%s1248_s6 + $0x60] ss:$8 sps:$4 sm:$0xff]   ;;  %v1073_v9 = vld [vmem:[%s1248_s6 + $0x54] ss:$8 sps:$4 sm:$0xff]   ;;  %v1077_v11 = vld [vmem:[%s1248_s6 + $0x50] ss:$8 sps:$4 sm:$0xff]  }
  0x19   : > { %756 = vmatpush1.bf16.msra.mxu1 %v1066_v4  ;;  %716 = vmatprep.subr.bf16.mxu0 %v1067_v5  ;;  %v1072_v8 = vld [vmem:[%s1248_s6 + $0x160] ss:$8 sps:$4 sm:$0xff]   ;;  %v1075_v10 = vld [vmem:[%s1248_s6 + $0x154] ss:$8 sps:$4 sm:$0xff]   ;;  %v1078_v12 = vld [vmem:[%s1248_s6 + $0x150] ss:$8 sps:$4 sm:$0xff]  }
  0x1a   : > { %757 = vmatprep.subr.bf16.mxu1 %v1069_v6  ;;  %v1079_v13 = vld [vmem:[%s1248_s6 + $0x44] ss:$8 sps:$4 sm:$0xff]   ;;  %v1083_v15 = vld [vmem:[%s1248_s6 + $0x40] ss:$8 sps:$4 sm:$0xff]   ;;  %v1085_v17 = vld [vmem:[%s1248_s6 + $0x34] ss:$8 sps:$4 sm:$0xff]  }
  0x1b   : > { %v1081_v14 = vld [vmem:[%s1248_s6 + $0x144] ss:$8 sps:$4 sm:$0xff]   ;;  %v1084_v16 = vld [vmem:[%s1248_s6 + $0x140] ss:$8 sps:$4 sm:$0xff]   ;;  %v1087_v18 = vld [vmem:[%s1248_s6 + $0x134] ss:$8 sps:$4 sm:$0xff]  }
  0x1c   : > { %717 = vmatpush1.bf16.msra.mxu0 %v1071_v7  ;;  %v1089_v19 = vld [vmem:[%s1248_s6 + $0x30] ss:$8 sps:$4 sm:$0xff]   ;;  %v1091_v21 = vld [vmem:[%s1248_s6 + $0x24] ss:$8 sps:$4 sm:$0xff]   ;;  %v1095_v23 = vld [vmem:[%s1248_s6 + $0x20] ss:$8 sps:$4 sm:$0xff]  }
  0x1d   : > { %758 = vmatpush1.bf16.msra.mxu1 %v1072_v8  ;;  %718 = vmatprep.subr.bf16.mxu0 %v1073_v9  ;;  %v1090_v20 = vld [vmem:[%s1248_s6 + $0x130] ss:$8 sps:$4 sm:$0xff]   ;;  %v1093_v22 = vld [vmem:[%s1248_s6 + $0x124] ss:$8 sps:$4 sm:$0xff]   ;;  %v1096_v24 = vld [vmem:[%s1248_s6 + $0x120] ss:$8 sps:$4 sm:$0xff]  }
  0x1e   : > { %759 = vmatprep.subr.bf16.mxu1 %v1075_v10  ;;  %v1097_v25 = vld [vmem:[%s1248_s6 + $0x14] ss:$8 sps:$4 sm:$0xff]   ;;  %v1101_v27 = vld [vmem:[%s1248_s6 + $0x10] ss:$8 sps:$4 sm:$0xff]   ;;  %v1103_v29 = vld [vmem:[%s1248_s6 + $0x4] ss:$8 sps:$4 sm:$0xff]  }
  0x1f   : > { %v1099_v26 = vld [vmem:[%s1248_s6 + $0x114] ss:$8 sps:$4 sm:$0xff]   ;;  %v1102_v28 = vld [vmem:[%s1248_s6 + $0x110] ss:$8 sps:$4 sm:$0xff]   ;;  %v1105_v30 = vld [vmem:[%s1248_s6 + $0x104] ss:$8 sps:$4 sm:$0xff]  }
  0x20   : > { %719 = vmatpush1.bf16.msra.mxu0 %v1077_v11  ;;  %v1107_v31 = vld [vmem:[%s1248_s6] ss:$8 sps:$4 sm:$0xff]   ;;  %v1109_v33 = vld [vmem:[%s1248_s6 + $0xf4] ss:$8 sps:$4 sm:$0xff]   ;;  %v1113_v35 = vld [vmem:[%s1248_s6 + $0xf0] ss:$8 sps:$4 sm:$0xff]  }
  0x21   : > { %760 = vmatpush1.bf16.msra.mxu1 %v1078_v12  ;;  %720 = vmatprep.subr.bf16.mxu0 %v1079_v13  ;;  %v1108_v32 = vld [vmem:[%s1248_s6 + $0x100] ss:$8 sps:$4 sm:$0xff]   ;;  %v1111_v34 = vld [vmem:[%s1248_s6 + $0x1f4] ss:$8 sps:$4 sm:$0xff]   ;;  %v1114_v36 = vld [vmem:[%s1248_s6 + $0x1f0] ss:$8 sps:$4 sm:$0xff]  }
  0x22   : > { %761 = vmatprep.subr.bf16.mxu1 %v1081_v14  ;;  %v1115_v37 = vld [vmem:[%s1248_s6 + $0xe4] ss:$8 sps:$4 sm:$0xff]   ;;  %v1119_v39 = vld [vmem:[%s1248_s6 + $0xe0] ss:$8 sps:$4 sm:$0xff]   ;;  %v1121_v41 = vld [vmem:[%s1248_s6 + $0xd4] ss:$8 sps:$4 sm:$0xff]  }
  0x23   : > { %v1117_v38 = vld [vmem:[%s1248_s6 + $0x1e4] ss:$8 sps:$4 sm:$0xff]   ;;  %v1120_v40 = vld [vmem:[%s1248_s6 + $0x1e0] ss:$8 sps:$4 sm:$0xff]   ;;  %v1123_v42 = vld [vmem:[%s1248_s6 + $0x1d4] ss:$8 sps:$4 sm:$0xff]  }
  0x24   : > { %721 = vmatpush1.bf16.msra.mxu0 %v1083_v15  ;;  %v1125_v43 = vld [vmem:[%s1248_s6 + $0xd0] ss:$8 sps:$4 sm:$0xff]   ;;  %v1127_v45 = vld [vmem:[%s1248_s6 + $0xc4] ss:$8 sps:$4 sm:$0xff]   ;;  %v1131_v50 = vld [vmem:[%s1248_s6 + $0xc0] ss:$8 sps:$4 sm:$0xff]  }
  0x25   : > { %762 = vmatpush1.bf16.msra.mxu1 %v1084_v16  ;;  %722 = vmatprep.subr.bf16.mxu0 %v1085_v17  ;;  %v1126_v44 = vld [vmem:[%s1248_s6 + $0x1d0] ss:$8 sps:$4 sm:$0xff]   ;;  %v1129_v46 = vld [vmem:[%s1248_s6 + $0x1c4] ss:$8 sps:$4 sm:$0xff]   ;;  %v1132_v51 = vld [vmem:[%s1248_s6 + $0x1c0] ss:$8 sps:$4 sm:$0xff]  }
  0x26   : > { %763 = vmatprep.subr.bf16.mxu1 %v1087_v18  ;;  %v314_v47 = vld [vmem:[%s1243_s27] sm:$0xff]  ;;  %v315_v49 = vld [vmem:[%s1243_s27 + $0x8] sm:$0xff]  ;;  %v1133_v53 = vld [vmem:[%s1248_s6 + $0xb4] ss:$8 sps:$4 sm:$0xff]   ;;  %p1030_p7 = scmp.ne.s32.totalorder %s1177_s18, 7 }
  0x27   : > { %v963_v48 = vcombine.high %v314_v47, %v314_v47  ;;  %v965_v52 = vcombine.high %v315_v49, %v315_v49  ;;  %v1135_v54 = vld [vmem:[%s1248_s6 + $0x1b4] ss:$8 sps:$4 sm:$0xff]   ;;  %v1137_v55 = vld [vmem:[%s1248_s6 + $0xb0] ss:$8 sps:$4 sm:$0xff]   ;;  %v1139_v57 = vld [vmem:[%s1248_s6 + $0xa4] ss:$8 sps:$4 sm:$0xff]   ;;  %v962_v5 = vcombine.low %v314_v47, %v314_v47  ;;  %v964_v6 = vcombine.low %v315_v49, %v315_v49 }
  0x28   : > { %723 = vmatpush1.bf16.msra.mxu0 %v1089_v19  ;;  %v1138_v56 = vld [vmem:[%s1248_s6 + $0x1b0] ss:$8 sps:$4 sm:$0xff]   ;;  %v1141_v58 = vld [vmem:[%s1248_s6 + $0x1a4] ss:$8 sps:$4 sm:$0xff]   ;;  %v1143_v59 = vld [vmem:[%s1248_s6 + $0xa0] ss:$8 sps:$4 sm:$0xff]  }
  0x29   : > { %764 = vmatpush1.bf16.msra.mxu1 %v1090_v20  ;;  %724 = vmatprep.subr.bf16.mxu0 %v1091_v21  ;;  %v1144_v60 = vld [vmem:[%s1248_s6 + $0x1a0] ss:$8 sps:$4 sm:$0xff]   ;;  %v1145_v61 = vld [vmem:[%s1248_s6 + $0x94] ss:$8 sps:$4 sm:$0xff]   ;;  %v1149_v63 = vld [vmem:[%s1248_s6 + $0x90] ss:$8 sps:$4 sm:$0xff]  }
  0x2a   : > { %765 = vmatprep.subr.bf16.mxu1 %v1093_v22  ;;  %746 = vmatprep.mubr.bf16.mxu0 %v963_v48  ;;  %v1147_v62 = vld [vmem:[%s1248_s6 + $0x194] ss:$8 sps:$4 sm:$0xff]   ;;  %v1150_v0 = vld [vmem:[%s1248_s6 + $0x190] ss:$8 sps:$4 sm:$0xff]   ;;  %v1151_v1 = vld [vmem:[%s1248_s6 + $0x84] ss:$8 sps:$4 sm:$0xff]  }
  0x2b   : > { %787 = vmatprep.mubr.bf16.mxu1 %v965_v52  ;;  %v1153_v2 = vld [vmem:[%s1248_s6 + $0x184] ss:$8 sps:$4 sm:$0xff]   ;;  %v1155_v3 = vld [vmem:[%s1248_s6 + $0x80] ss:$8 sps:$4 sm:$0xff]  }
  0x2c   : > { %725 = vmatpush1.bf16.msra.mxu0 %v1095_v23  ;;  %v1156_v4 = vld [vmem:[%s1248_s6 + $0x180] ss:$8 sps:$4 sm:$0xff]  }
  0x2d   : > { %766 = vmatpush1.bf16.msra.mxu1 %v1096_v24  ;;  %726 = vmatprep.subr.bf16.mxu0 %v1097_v25  ;;  %v312_v8 = vld [vmem:[%s1370_s4] sm:$0xff]  ;;  %v313_v12 = vld [vmem:[%s1370_s4 + $0x8] sm:$0xff] }
  0x2e   : > { %767 = vmatprep.subr.bf16.mxu1 %v1099_v26 }
  0x30   : > { %727 = vmatpush1.bf16.msra.mxu0 %v1101_v27 }
  0x31   : > { %768 = vmatpush1.bf16.msra.mxu1 %v1102_v28  ;;  %728 = vmatprep.subr.bf16.mxu0 %v1103_v29 }
  0x32   : > { %769 = vmatprep.subr.bf16.mxu1 %v1105_v30 }
  0x34   : > { %729 = vmatpush1.bf16.msra.mxu0 %v1107_v31 }
  0x35   : > { %770 = vmatpush1.bf16.msra.mxu1 %v1108_v32  ;;  %730 = vmatprep.subr.bf16.mxu0 %v1109_v33 }
  0x36   : > { %771 = vmatprep.subr.bf16.mxu1 %v1111_v34 }
  0x38   : > { %731 = vmatpush2.bf16.msra.mxu0 %v1113_v35 }
  0x39   : > { %772 = vmatpush2.bf16.msra.mxu1 %v1114_v36  ;;  %732 = vmatprep.subr.bf16.mxu0 %v1115_v37 }
  0x3a   : > { %773 = vmatprep.subr.bf16.mxu1 %v1117_v38 }
  0x3c   : > { %733 = vmatpush2.bf16.msra.mxu0 %v1119_v39 }
  0x3d   : > { %774 = vmatpush2.bf16.msra.mxu1 %v1120_v40  ;;  %734 = vmatprep.subr.bf16.mxu0 %v1121_v41 }
  0x3e   : > { %775 = vmatprep.subr.bf16.mxu1 %v1123_v42 }
  0x40   : > { %735 = vmatpush2.bf16.msra.mxu0 %v1125_v43 }
  0x41   : > { %776 = vmatpush2.bf16.msra.mxu1 %v1126_v44  ;;  %736 = vmatprep.subr.bf16.mxu0 %v1127_v45 }
  0x42   : > { %777 = vmatprep.subr.bf16.mxu1 %v1129_v46 }
  0x44   : > { %737 = vmatpush2.bf16.msra.mxu0 %v1131_v50 }
  0x45   : > { %778 = vmatpush2.bf16.msra.mxu1 %v1132_v51  ;;  %738 = vmatprep.subr.bf16.mxu0 %v1133_v53 }
  0x46   : > { %779 = vmatprep.subr.bf16.mxu1 %v1135_v54 }
  0x48   : > { %739 = vmatpush2.bf16.msra.mxu0 %v1137_v55 }
  0x49   : > { %780 = vmatpush2.bf16.msra.mxu1 %v1138_v56  ;;  %740 = vmatprep.subr.bf16.mxu0 %v1139_v57 }
  0x4a   : > { %781 = vmatprep.subr.bf16.mxu1 %v1141_v58 }
  0x4c   : > { %741 = vmatpush2.bf16.msra.mxu0 %v1143_v59 }
  0x4d   : > { %782 = vmatpush2.bf16.msra.mxu1 %v1144_v60  ;;  %742 = vmatprep.subr.bf16.mxu0 %v1145_v61 }
  0x4e   : > { %783 = vmatprep.subr.bf16.mxu1 %v1147_v62 }
  0x50   : > { %743 = vmatpush2.bf16.msra.mxu0 %v1149_v63 }
  0x51   : > { %784 = vmatpush2.bf16.msra.mxu1 %v1150_v0  ;;  %744 = vmatprep.subr.bf16.mxu0 %v1151_v1 }
  0x52   : > { %785 = vmatprep.subr.bf16.mxu1 %v1153_v2 }
  0x54   : > { %745 = vmatpush2.bf16.msra.mxu0 %v1155_v3 }
  0x55   : > { %786 = vmatpush2.bf16.msra.mxu1 %v1156_v4 }
  0x57   : > { %747 = vmatmul.mubr.bf16.vlgmr.msra.gmra.mxu0 %v962_v5 }
  0x58   : > { %788 = vmatmul.mubr.bf16.vlgmr.msra.gmra.mxu1 %v964_v6 }
 0x117   : > { %v748_v7 = vpop.f32.mrf.mxu0 }
 0x118   : > { %v789_v9 = vpop.f32.mrf.mxu1 }
 0x119   : > { %v790_v10 = vadd.f32 %v789_v9, %v748_v7  ;;  %v750_v11 = vpop.f32.mrf.mxu0 }
 0x11a   : > { %v791_v13 = vpop.f32.mrf.mxu1 }
 0x11b   : > { %v796_v14 = vadd.f32 %v790_v10, %v312_v8  ;;  %v792_v15 = vadd.f32 %v791_v13, %v750_v11  ;;  %v752_v16 = vpop.f32.mrf.mxu0  ;;  %803 = sbr.rel (%p1030_p7) target bundleno = 321 (0x141), region = 44 }
 0x11c   : > { %v793_v17 = vpop.f32.mrf.mxu1 }
 0x11d   : > { %798 = vst [vmem:[%s1370_s4] sm:$0xff] %v796_v14  ;;  %v797_v18 = vadd.f32 %v792_v15, %v313_v12  ;;  %v753_v19 = vpop.f32.mrf.mxu0 }
 0x11e   : > { %v794_v20 = vpop.f32.mrf.mxu1 }
 0x11f   : > { %799 = vst [vmem:[%s1370_s4 + $0x8] sm:$0xff] %v797_v18 }
 0x120   : > { %v808_v21 = vlaneseq  ;;  %v806_v23 = vld [vmem:[%s1368_s2] sm:$0x3] }
 0x121   : > { %v822_v34 = vld [vmem:[%s1369_s3] sm:$0xff] }
 0x122   : > { %v809_v22 = vshrl.u32 %v808_v21, 7 }
 0x124   : > { %v810_v24 = vsub.s32 0, %v809_v22  ;;  %v814_v25 = vsub.s32 1, %v809_v22  ;;  %v804_v26 = vld [vmem:[%s1370_s4] sm:$0xff] }
 0x126   : > { %v805_v27 = vld [vmem:[%s1370_s4 + $0x8] sm:$0xff]  ;;  %v811_v28 = vrot.slane %v806_v23, %v810_v24  ;;  %v815_v29 = vrot.slane %v806_v23, %v814_v25 }
 0x128   : > { %v818_v30 = vadd.f32 %v811_v28, %v804_v26  ;;  %v819_v31 = vadd.f32 %v815_v29, %v805_v27 }
 0x12a   : > { %820 = vst [vmem:[%s1370_s4] sm:$0xff] %v818_v30  ;;  %821 = vst [vmem:[%s1370_s4 + $0x8] sm:$0xff] %v819_v31  ;;  %v823_v32 = vmul.f32 0.5, %v819_v31 }
 0x12c   : > { %v824_v33 = vmul.f32 1.442695, %v823_v32 }
 0x12e   : > { %1161 = vpow2.f32 %v824_v33 }
 0x13b   : > { %v1162_v35 = vpop.eup %1161 }
 0x13c   : > { %v826_v36 = vmul.f32 %v1162_v35, %v822_v34 }
 0x13e   : > { %v827_v37 = vadd.f32 %v826_v36, %v818_v30 }
 0x140   : > { %828 = vst [vmem:[%s1371_s5] sm:$0xff] %v827_v37 }
 0x141 PF: > { %s16_s20 = sadd.s32 1, %s1185_s20   ;;  %s1372_s18 = smov %s1181_s19 }
 0x142   : > { %p13_p8 = scmp.ge.s32.totalorder %s16_s20, 10   ;;  %s1373_s19 = smov %s1375_s21 }
 0x144   :  { %15 = sbr.rel (!%p13_p8) target bundleno = 2 (0x2), region = 92 }

// kernel: fwd.14
= control target key start
LH: loop header
LB: loop body
LE: loop exit
PB: predicated region body
PF: predicated region fallthrough
CT: control target
= control target key end

     0   :  { %v1239_v1 = vmov 0   ;;  %s1607_s1 = inlined_call_operand.vmem [shape: bf16[128,1536], index: 1, kind: input, shape index: {}]   ;;  %s1608_s0 = inlined_call_operand.vmem [shape: bf16[8,128], index: 0, kind: input, shape index: {}]   ;;  %s1609_s2 = inlined_call_operand.vmem [shape: f32[1,1536], index: 2, kind: input, shape index: {}]   ;;  %s1610_s3 = inlined_call_operand.vmem [shape: f32[8,1536], index: 3, kind: output, shape index: {}]  }
   0x1   :  { %v1095_v0 = vld [vmem:[%s1607_s1 + $0x2a4] ss:$48 sps:$4 sm:$0xff]   ;;  %652 = vmatprep.mubr.bf16.mxu0 %v1239_v1  ;;  %693 = vmatprep.mubr.bf16.mxu1 %v1239_v1  ;;  %v1097_v2 = vld [vmem:[%s1607_s1 + $0x2ac] ss:$48 sps:$4 sm:$0xff]   ;;  %v1099_v3 = vld [vmem:[%s1607_s1 + $0x2a0] ss:$48 sps:$4 sm:$0xff]  }
   0x2   :  { %620 = vmatprep.subr.bf16.mxu0 %v1095_v0  ;;  %v1100_v4 = vld [vmem:[%s1607_s1 + $0x2a8] ss:$48 sps:$4 sm:$0xff]   ;;  %661 = vmatprep.subr.bf16.mxu1 %v1097_v2  ;;  %v1101_v5 = vld [vmem:[%s1607_s1 + $0x244] ss:$48 sps:$4 sm:$0xff]   ;;  %v1103_v6 = vld [vmem:[%s1607_s1 + $0x24c] ss:$48 sps:$4 sm:$0xff]  }
   0x3   :  { %621 = vmatpush1.bf16.msra.mxu0 %v1099_v3  ;;  %662 = vmatpush1.bf16.msra.mxu1 %v1100_v4  ;;  %v1105_v7 = vld [vmem:[%s1607_s1 + $0x240] ss:$48 sps:$4 sm:$0xff]   ;;  %v1106_v8 = vld [vmem:[%s1607_s1 + $0x248] ss:$48 sps:$4 sm:$0xff]   ;;  %v1107_v9 = vld [vmem:[%s1607_s1 + $0x1e4] ss:$48 sps:$4 sm:$0xff]  }
   0x4   :  { %622 = vmatprep.subr.bf16.mxu0 %v1101_v5  ;;  %663 = vmatprep.subr.bf16.mxu1 %v1103_v6  ;;  %v1109_v10 = vld [vmem:[%s1607_s1 + $0x1ec] ss:$48 sps:$4 sm:$0xff]   ;;  %v1111_v11 = vld [vmem:[%s1607_s1 + $0x1e0] ss:$48 sps:$4 sm:$0xff]   ;;  %v1112_v12 = vld [vmem:[%s1607_s1 + $0x1e8] ss:$48 sps:$4 sm:$0xff]  }
   0x5   :  { %v1113_v13 = vld [vmem:[%s1607_s1 + $0x184] ss:$48 sps:$4 sm:$0xff]   ;;  %v1115_v14 = vld [vmem:[%s1607_s1 + $0x18c] ss:$48 sps:$4 sm:$0xff]   ;;  %v1117_v15 = vld [vmem:[%s1607_s1 + $0x180] ss:$48 sps:$4 sm:$0xff]  }
   0x6   :  { %v1118_v16 = vld [vmem:[%s1607_s1 + $0x188] ss:$48 sps:$4 sm:$0xff]   ;;  %v1119_v17 = vld [vmem:[%s1607_s1 + $0x124] ss:$48 sps:$4 sm:$0xff]   ;;  %v1121_v18 = vld [vmem:[%s1607_s1 + $0x12c] ss:$48 sps:$4 sm:$0xff]  }
   0x7   :  { %623 = vmatpush1.bf16.msra.mxu0 %v1105_v7  ;;  %664 = vmatpush1.bf16.msra.mxu1 %v1106_v8  ;;  %v1123_v19 = vld [vmem:[%s1607_s1 + $0x120] ss:$48 sps:$4 sm:$0xff]   ;;  %v1124_v20 = vld [vmem:[%s1607_s1 + $0x128] ss:$48 sps:$4 sm:$0xff]   ;;  %v1125_v21 = vld [vmem:[%s1607_s1 + $0xc4] ss:$48 sps:$4 sm:$0xff]  }
   0x8   :  { %624 = vmatprep.subr.bf16.mxu0 %v1107_v9  ;;  %665 = vmatprep.subr.bf16.mxu1 %v1109_v10  ;;  %v1127_v22 = vld [vmem:[%s1607_s1 + $0xcc] ss:$48 sps:$4 sm:$0xff]   ;;  %v1129_v23 = vld [vmem:[%s1607_s1 + $0xc0] ss:$48 sps:$4 sm:$0xff]   ;;  %v1130_v24 = vld [vmem:[%s1607_s1 + $0xc8] ss:$48 sps:$4 sm:$0xff]  }
   0x9   :  { %v1131_v25 = vld [vmem:[%s1607_s1 + $0x64] ss:$48 sps:$4 sm:$0xff]   ;;  %v1133_v26 = vld [vmem:[%s1607_s1 + $0x6c] ss:$48 sps:$4 sm:$0xff]   ;;  %v1135_v27 = vld [vmem:[%s1607_s1 + $0x60] ss:$48 sps:$4 sm:$0xff]  }
   0xa   :  { %v1136_v28 = vld [vmem:[%s1607_s1 + $0x68] ss:$48 sps:$4 sm:$0xff]   ;;  %v1137_v29 = vld [vmem:[%s1607_s1 + $0x4] ss:$48 sps:$4 sm:$0xff]   ;;  %v1139_v30 = vld [vmem:[%s1607_s1 + $0xc] ss:$48 sps:$4 sm:$0xff]  }
   0xb   :  { %625 = vmatpush1.bf16.msra.mxu0 %v1111_v11  ;;  %666 = vmatpush1.bf16.msra.mxu1 %v1112_v12  ;;  %v1141_v31 = vld [vmem:[%s1607_s1] ss:$48 sps:$4 sm:$0xff]   ;;  %v1142_v32 = vld [vmem:[%s1607_s1 + $0x8] ss:$48 sps:$4 sm:$0xff]   ;;  %v1145_v33 = vld [vmem:[%s1607_s1 + $0x2b4] ss:$48 sps:$4 sm:$0xff]  }
   0xc   :  { %626 = vmatprep.subr.bf16.mxu0 %v1113_v13  ;;  %667 = vmatprep.subr.bf16.mxu1 %v1115_v14  ;;  %v1148_v34 = vld [vmem:[%s1607_s1 + $0x2bc] ss:$48 sps:$4 sm:$0xff]   ;;  %v1367_v35 = vld [vmem:[%s1608_s0] sm:$0xf]  ;;  %v1146_v37 = vld [vmem:[%s1607_s1 + $0x2b8] ss:$48 sps:$4 sm:$0xff]  }
   0xd   :  { %v1143_v36 = vld [vmem:[%s1607_s1 + $0x2b0] ss:$48 sps:$4 sm:$0xff]   ;;  %v1151_v38 = vld [vmem:[%s1607_s1 + $0x254] ss:$48 sps:$4 sm:$0xff]   ;;  %v1154_v39 = vld [vmem:[%s1607_s1 + $0x25c] ss:$48 sps:$4 sm:$0xff]  }
   0xe   :  { %v1149_v40 = vld [vmem:[%s1607_s1 + $0x250] ss:$48 sps:$4 sm:$0xff]   ;;  %v1152_v41 = vld [vmem:[%s1607_s1 + $0x258] ss:$48 sps:$4 sm:$0xff]   ;;  %v1157_v42 = vld [vmem:[%s1607_s1 + $0x1f4] ss:$48 sps:$4 sm:$0xff]  }
   0xf   :  { %627 = vmatpush1.bf16.msra.mxu0 %v1117_v15  ;;  %668 = vmatpush1.bf16.msra.mxu1 %v1118_v16  ;;  %v1160_v43 = vld [vmem:[%s1607_s1 + $0x1fc] ss:$48 sps:$4 sm:$0xff]   ;;  %v1155_v44 = vld [vmem:[%s1607_s1 + $0x1f0] ss:$48 sps:$4 sm:$0xff]   ;;  %v1158_v45 = vld [vmem:[%s1607_s1 + $0x1f8] ss:$48 sps:$4 sm:$0xff]  }
  0x10   :  { %628 = vmatprep.subr.bf16.mxu0 %v1119_v17  ;;  %669 = vmatprep.subr.bf16.mxu1 %v1121_v18  ;;  %v1163_v46 = vld [vmem:[%s1607_s1 + $0x194] ss:$48 sps:$4 sm:$0xff]   ;;  %v1166_v47 = vld [vmem:[%s1607_s1 + $0x19c] ss:$48 sps:$4 sm:$0xff]   ;;  %v1161_v48 = vld [vmem:[%s1607_s1 + $0x190] ss:$48 sps:$4 sm:$0xff]  }
  0x11   :  { %v1164_v49 = vld [vmem:[%s1607_s1 + $0x198] ss:$48 sps:$4 sm:$0xff]   ;;  %v1169_v50 = vld [vmem:[%s1607_s1 + $0x134] ss:$48 sps:$4 sm:$0xff]   ;;  %v1172_v51 = vld [vmem:[%s1607_s1 + $0x13c] ss:$48 sps:$4 sm:$0xff]  }
  0x12   :  { %v1167_v52 = vld [vmem:[%s1607_s1 + $0x130] ss:$48 sps:$4 sm:$0xff]   ;;  %v1170_v53 = vld [vmem:[%s1607_s1 + $0x138] ss:$48 sps:$4 sm:$0xff]   ;;  %v1175_v54 = vld [vmem:[%s1607_s1 + $0xd4] ss:$48 sps:$4 sm:$0xff]  }
  0x13   :  { %629 = vmatpush1.bf16.msra.mxu0 %v1123_v19  ;;  %670 = vmatpush1.bf16.msra.mxu1 %v1124_v20  ;;  %v1178_v55 = vld [vmem:[%s1607_s1 + $0xdc] ss:$48 sps:$4 sm:$0xff]   ;;  %v1173_v56 = vld [vmem:[%s1607_s1 + $0xd0] ss:$48 sps:$4 sm:$0xff]   ;;  %v1176_v57 = vld [vmem:[%s1607_s1 + $0xd8] ss:$48 sps:$4 sm:$0xff]  }
  0x14   :  { %630 = vmatprep.subr.bf16.mxu0 %v1125_v21  ;;  %671 = vmatprep.subr.bf16.mxu1 %v1127_v22  ;;  %v1181_v58 = vld [vmem:[%s1607_s1 + $0x74] ss:$48 sps:$4 sm:$0xff]   ;;  %v1184_v59 = vld [vmem:[%s1607_s1 + $0x7c] ss:$48 sps:$4 sm:$0xff]   ;;  %v1179_v60 = vld [vmem:[%s1607_s1 + $0x70] ss:$48 sps:$4 sm:$0xff]  }
  0x15   :  { %v1182_v61 = vld [vmem:[%s1607_s1 + $0x78] ss:$48 sps:$4 sm:$0xff]   ;;  %v1187_v62 = vld [vmem:[%s1607_s1 + $0x14] ss:$48 sps:$4 sm:$0xff]   ;;  %v1190_v63 = vld [vmem:[%s1607_s1 + $0x1c] ss:$48 sps:$4 sm:$0xff]  }
  0x16   :  { %v1185_v0 = vld [vmem:[%s1607_s1 + $0x10] ss:$48 sps:$4 sm:$0xff]   ;;  %v1188_v2 = vld [vmem:[%s1607_s1 + $0x18] ss:$48 sps:$4 sm:$0xff]   ;;  %v1193_v3 = vld [vmem:[%s1607_s1 + $0x2c4] ss:$48 sps:$4 sm:$0xff]  }
  0x17   :  { %631 = vmatpush1.bf16.msra.mxu0 %v1129_v23  ;;  %672 = vmatpush1.bf16.msra.mxu1 %v1130_v24  ;;  %v1196_v4 = vld [vmem:[%s1607_s1 + $0x2cc] ss:$48 sps:$4 sm:$0xff]   ;;  %v1191_v5 = vld [vmem:[%s1607_s1 + $0x2c0] ss:$48 sps:$4 sm:$0xff]   ;;  %v1194_v6 = vld [vmem:[%s1607_s1 + $0x2c8] ss:$48 sps:$4 sm:$0xff]  }
  0x18   :  { %632 = vmatprep.subr.bf16.mxu0 %v1131_v25  ;;  %673 = vmatprep.subr.bf16.mxu1 %v1133_v26  ;;  %v1199_v7 = vld [vmem:[%s1607_s1 + $0x264] ss:$48 sps:$4 sm:$0xff]   ;;  %v1202_v8 = vld [vmem:[%s1607_s1 + $0x26c] ss:$48 sps:$4 sm:$0xff]   ;;  %v1197_v9 = vld [vmem:[%s1607_s1 + $0x260] ss:$48 sps:$4 sm:$0xff]  }
  0x19   :  { %v1200_v10 = vld [vmem:[%s1607_s1 + $0x268] ss:$48 sps:$4 sm:$0xff]   ;;  %v1205_v11 = vld [vmem:[%s1607_s1 + $0x204] ss:$48 sps:$4 sm:$0xff]   ;;  %v1208_v12 = vld [vmem:[%s1607_s1 + $0x20c] ss:$48 sps:$4 sm:$0xff]  }
  0x1a   :  { %v1203_v13 = vld [vmem:[%s1607_s1 + $0x200] ss:$48 sps:$4 sm:$0xff]   ;;  %v1206_v14 = vld [vmem:[%s1607_s1 + $0x208] ss:$48 sps:$4 sm:$0xff]   ;;  %v1211_v15 = vld [vmem:[%s1607_s1 + $0x1a4] ss:$48 sps:$4 sm:$0xff]  }
  0x1b   :  { %633 = vmatpush1.bf16.msra.mxu0 %v1135_v27  ;;  %674 = vmatpush1.bf16.msra.mxu1 %v1136_v28  ;;  %v1209_v16 = vld [vmem:[%s1607_s1 + $0x1a0] ss:$48 sps:$4 sm:$0xff]   ;;  %v1212_v17 = vld [vmem:[%s1607_s1 + $0x1a8] ss:$48 sps:$4 sm:$0xff]   ;;  %v1217_v18 = vld [vmem:[%s1607_s1 + $0x144] ss:$48 sps:$4 sm:$0xff]  }
  0x1c   :  { %634 = vmatprep.subr.bf16.mxu0 %v1137_v29  ;;  %675 = vmatprep.subr.bf16.mxu1 %v1139_v30  ;;  %v1220_v19 = vld [vmem:[%s1607_s1 + $0x14c] ss:$48 sps:$4 sm:$0xff]   ;;  %v1215_v20 = vld [vmem:[%s1607_s1 + $0x140] ss:$48 sps:$4 sm:$0xff]   ;;  %v1218_v21 = vld [vmem:[%s1607_s1 + $0x148] ss:$48 sps:$4 sm:$0xff]  }
  0x1d   :  { %v1223_v22 = vld [vmem:[%s1607_s1 + $0xe4] ss:$48 sps:$4 sm:$0xff]   ;;  %v1226_v23 = vld [vmem:[%s1607_s1 + $0xec] ss:$48 sps:$4 sm:$0xff]   ;;  %v1221_v24 = vld [vmem:[%s1607_s1 + $0xe0] ss:$48 sps:$4 sm:$0xff]  }
  0x1e   :  { %v1224_v25 = vld [vmem:[%s1607_s1 + $0xe8] ss:$48 sps:$4 sm:$0xff]   ;;  %v1229_v26 = vld [vmem:[%s1607_s1 + $0x84] ss:$48 sps:$4 sm:$0xff]   ;;  %v1232_v27 = vld [vmem:[%s1607_s1 + $0x8c] ss:$48 sps:$4 sm:$0xff]  }
  0x1f   :  { %635 = vmatpush1.bf16.msra.mxu0 %v1141_v31  ;;  %676 = vmatpush1.bf16.msra.mxu1 %v1142_v32  ;;  %v1227_v28 = vld [vmem:[%s1607_s1 + $0x80] ss:$48 sps:$4 sm:$0xff]   ;;  %v1230_v29 = vld [vmem:[%s1607_s1 + $0x88] ss:$48 sps:$4 sm:$0xff]   ;;  %v1235_v30 = vld [vmem:[%s1607_s1 + $0x24] ss:$48 sps:$4 sm:$0xff]  }
  0x20   :  { %702 = vmatprep.subr.bf16.mxu0 %v1145_v33  ;;  %743 = vmatprep.subr.bf16.mxu1 %v1148_v34  ;;  %v1238_v31 = vld [vmem:[%s1607_s1 + $0x2c] ss:$48 sps:$4 sm:$0xff]   ;;  %v1233_v32 = vld [vmem:[%s1607_s1 + $0x20] ss:$48 sps:$4 sm:$0xff]   ;;  %v1236_v33 = vld [vmem:[%s1607_s1 + $0x28] ss:$48 sps:$4 sm:$0xff]   ;;  %v909_v34 = vlaneseq }
  0x22   :  { %653 = vmatmul.mubr.bf16.vlgmr.msra.gmra.mxu0 %v1367_v35  ;;  %694 = vmatmul.mubr.bf16.vlgmr.msra.gmra.mxu1 %v1367_v35 }
  0x23   :  { %703 = vmatpush1.bf16.msra.mxu0 %v1143_v36  ;;  %744 = vmatpush1.bf16.msra.mxu1 %v1146_v37  ;;  %v910_v36 = vshrl.u32 %v909_v34, 7 }
  0x24   :  { %704 = vmatprep.subr.bf16.mxu0 %v1151_v38  ;;  %745 = vmatprep.subr.bf16.mxu1 %v1154_v39  ;;  %v906_v39 = vld [vmem:[%s1609_s2 + $0x8] sm:$0xf] }
  0x25   :  { %734 = vmatprep.mubr.bf16.mxu0 %v1239_v1  ;;  %775 = vmatprep.mubr.bf16.mxu1 %v1239_v1  ;;  %v911_v37 = vsub.s32 0, %v910_v36  ;;  %v919_v38 = vsub.s32 2, %v910_v36 }
  0x27   :  { %705 = vmatpush1.bf16.msra.mxu0 %v1149_v40  ;;  %746 = vmatpush1.bf16.msra.mxu1 %v1152_v41  ;;  %v915_v40 = vsub.s32 1, %v910_v36  ;;  %v923_v41 = vsub.s32 3, %v910_v36 }
  0x28   :  { %706 = vmatprep.subr.bf16.mxu0 %v1157_v42  ;;  %747 = vmatprep.subr.bf16.mxu1 %v1160_v43  ;;  %v944_v42 = vrot.slane %v906_v39, %v911_v37  ;;  %v952_v43 = vrot.slane %v906_v39, %v919_v38 }
  0x2b   :  { %707 = vmatpush1.bf16.msra.mxu0 %v1155_v44  ;;  %748 = vmatpush1.bf16.msra.mxu1 %v1158_v45  ;;  %v948_v44 = vrot.slane %v906_v39, %v915_v40  ;;  %v956_v45 = vrot.slane %v906_v39, %v923_v41 }
  0x2c   :  { %708 = vmatprep.subr.bf16.mxu0 %v1163_v46  ;;  %749 = vmatprep.subr.bf16.mxu1 %v1166_v47  ;;  %v905_v46 = vld [vmem:[%s1609_s2] sm:$0xff] }
  0x2d   :  { %v912_v47 = vrot.slane %v905_v46, %v911_v37 }
  0x2f   :  { %709 = vmatpush1.bf16.msra.mxu0 %v1161_v48  ;;  %750 = vmatpush1.bf16.msra.mxu1 %v1164_v49 }
  0x30   :  { %710 = vmatprep.subr.bf16.mxu0 %v1169_v50  ;;  %751 = vmatprep.subr.bf16.mxu1 %v1172_v51  ;;  %v916_v50 = vrot.slane %v905_v46, %v915_v40  ;;  %v924_v51 = vrot.slane %v905_v46, %v923_v41 }
  0x33   :  { %711 = vmatpush1.bf16.msra.mxu0 %v1167_v52  ;;  %752 = vmatpush1.bf16.msra.mxu1 %v1170_v53 }
  0x34   :  { %712 = vmatprep.subr.bf16.mxu0 %v1175_v54  ;;  %753 = vmatprep.subr.bf16.mxu1 %v1178_v55 }
  0x37   :  { %713 = vmatpush1.bf16.msra.mxu0 %v1173_v56  ;;  %754 = vmatpush1.bf16.msra.mxu1 %v1176_v57 }
  0x38   :  { %714 = vmatprep.subr.bf16.mxu0 %v1181_v58  ;;  %755 = vmatprep.subr.bf16.mxu1 %v1184_v59 }
  0x3b   :  { %715 = vmatpush1.bf16.msra.mxu0 %v1179_v60  ;;  %756 = vmatpush1.bf16.msra.mxu1 %v1182_v61 }
  0x3c   :  { %716 = vmatprep.subr.bf16.mxu0 %v1187_v62  ;;  %757 = vmatprep.subr.bf16.mxu1 %v1190_v63  ;;  %v927_v62 = vsub.s32 4, %v910_v36  ;;  %v935_v63 = vsub.s32 6, %v910_v36 }
  0x3f   :  { %717 = vmatpush1.bf16.msra.mxu0 %v1185_v0  ;;  %758 = vmatpush1.bf16.msra.mxu1 %v1188_v2  ;;  %v931_v0 = vsub.s32 5, %v910_v36  ;;  %v939_v2 = vsub.s32 7, %v910_v36 }
  0x40   :  { %784 = vmatprep.subr.bf16.mxu0 %v1193_v3  ;;  %825 = vmatprep.subr.bf16.mxu1 %v1196_v4  ;;  %v928_v3 = vrot.slane %v905_v46, %v927_v62  ;;  %v936_v4 = vrot.slane %v905_v46, %v935_v63 }
  0x42   :  { %735 = vmatmul.mubr.bf16.vlgmr.msra.gmra.mxu0 %v1367_v35  ;;  %776 = vmatmul.mubr.bf16.vlgmr.msra.gmra.mxu1 %v1367_v35 }
  0x43   :  { %785 = vmatpush1.bf16.msra.mxu0 %v1191_v5  ;;  %826 = vmatpush1.bf16.msra.mxu1 %v1194_v6 }
  0x44   :  { %786 = vmatprep.subr.bf16.mxu0 %v1199_v7  ;;  %827 = vmatprep.subr.bf16.mxu1 %v1202_v8  ;;  %v932_v7 = vrot.slane %v905_v46, %v931_v0  ;;  %v940_v8 = vrot.slane %v905_v46, %v939_v2 }
  0x45   :  { %816 = vmatprep.mubr.bf16.mxu0 %v1239_v1  ;;  %857 = vmatprep.mubr.bf16.mxu1 %v1239_v1  ;;  %v1214_v1 = vld [vmem:[%s1607_s1 + $0x1ac] ss:$48 sps:$4 sm:$0xff]  }
  0x47   :  { %787 = vmatpush1.bf16.msra.mxu0 %v1197_v9  ;;  %828 = vmatpush1.bf16.msra.mxu1 %v1200_v10 }
  0x48   :  { %788 = vmatprep.subr.bf16.mxu0 %v1205_v11  ;;  %829 = vmatprep.subr.bf16.mxu1 %v1208_v12 }
  0x4b   :  { %789 = vmatpush1.bf16.msra.mxu0 %v1203_v13  ;;  %830 = vmatpush1.bf16.msra.mxu1 %v1206_v14 }
  0x4c   :  { %790 = vmatprep.subr.bf16.mxu0 %v1211_v15  ;;  %831 = vmatprep.subr.bf16.mxu1 %v1214_v1 }
  0x4f   :  { %791 = vmatpush1.bf16.msra.mxu0 %v1209_v16  ;;  %832 = vmatpush1.bf16.msra.mxu1 %v1212_v17 }
  0x50   :  { %792 = vmatprep.subr.bf16.mxu0 %v1217_v18  ;;  %833 = vmatprep.subr.bf16.mxu1 %v1220_v19 }
  0x53   :  { %793 = vmatpush1.bf16.msra.mxu0 %v1215_v20  ;;  %834 = vmatpush1.bf16.msra.mxu1 %v1218_v21 }
  0x54   :  { %794 = vmatprep.subr.bf16.mxu0 %v1223_v22  ;;  %835 = vmatprep.subr.bf16.mxu1 %v1226_v23 }
  0x57   :  { %795 = vmatpush1.bf16.msra.mxu0 %v1221_v24  ;;  %836 = vmatpush1.bf16.msra.mxu1 %v1224_v25 }
  0x58   :  { %796 = vmatprep.subr.bf16.mxu0 %v1229_v26  ;;  %837 = vmatprep.subr.bf16.mxu1 %v1232_v27 }
  0x5b   :  { %797 = vmatpush1.bf16.msra.mxu0 %v1227_v28  ;;  %838 = vmatpush1.bf16.msra.mxu1 %v1230_v29 }
  0x5c   :  { %798 = vmatprep.subr.bf16.mxu0 %v1235_v30  ;;  %839 = vmatprep.subr.bf16.mxu1 %v1238_v31 }
  0x5f   :  { %799 = vmatpush1.bf16.msra.mxu0 %v1233_v32  ;;  %840 = vmatpush1.bf16.msra.mxu1 %v1236_v33 }
  0x62   :  { %817 = vmatmul.mubr.bf16.vlgmr.msra.gmra.mxu0 %v1367_v35  ;;  %858 = vmatmul.mubr.bf16.vlgmr.msra.gmra.mxu1 %v1367_v35  ;;  %v920_v35 = vrot.slane %v905_v46, %v919_v38 }
  0xe2   :  { %v654_v48 = vpop.f32.mrf.mxu0  ;;  %v695_v49 = vpop.f32.mrf.mxu1 }
  0xe3   :  { %v969_v54 = vadd.f32 %v912_v47, %v654_v48  ;;  %v971_v55 = vadd.f32 %v920_v35, %v695_v49 }
  0xe4   :  { %v656_v52 = vpop.f32.mrf.mxu0  ;;  %v697_v53 = vpop.f32.mrf.mxu1 }
  0xe5   :  { %981 = vst [vmem:[%s1610_s3] sm:$0xff] %v969_v54  ;;  %983 = vst [vmem:[%s1610_s3 + $0x10] sm:$0xff] %v971_v55  ;;  %v970_v58 = vadd.f32 %v916_v50, %v656_v52  ;;  %v972_v59 = vadd.f32 %v924_v51, %v697_v53 }
  0xe6   :  { %v658_v56 = vpop.f32.mrf.mxu0  ;;  %v699_v57 = vpop.f32.mrf.mxu1 }
  0xe7   :  { %982 = vst [vmem:[%s1610_s3 + $0x8] sm:$0xff] %v970_v58  ;;  %984 = vst [vmem:[%s1610_s3 + $0x18] sm:$0xff] %v972_v59 }
  0xe8   :  { %v659_v60 = vpop.f32.mrf.mxu0  ;;  %v700_v61 = vpop.f32.mrf.mxu1 }
 0x102   :  { %v736_v5 = vpop.f32.mrf.mxu0  ;;  %v777_v6 = vpop.f32.mrf.mxu1 }
 0x103   :  { %v973_v11 = vadd.f32 %v928_v3, %v736_v5  ;;  %v975_v12 = vadd.f32 %v936_v4, %v777_v6 }
 0x104   :  { %v738_v9 = vpop.f32.mrf.mxu0  ;;  %v779_v10 = vpop.f32.mrf.mxu1 }
 0x105   :  { %985 = vst [vmem:[%s1610_s3 + $0x20] sm:$0xff] %v973_v11  ;;  %987 = vst [vmem:[%s1610_s3 + $0x30] sm:$0xff] %v975_v12  ;;  %v974_v15 = vadd.f32 %v932_v7, %v738_v9  ;;  %v976_v1 = vadd.f32 %v940_v8, %v779_v10 }
 0x106   :  { %v740_v13 = vpop.f32.mrf.mxu0  ;;  %v781_v14 = vpop.f32.mrf.mxu1 }
 0x107   :  { %986 = vst [vmem:[%s1610_s3 + $0x28] sm:$0xff] %v974_v15  ;;  %988 = vst [vmem:[%s1610_s3 + $0x38] sm:$0xff] %v976_v1 }
 0x108   :  { %v741_v16 = vpop.f32.mrf.mxu0  ;;  %v782_v17 = vpop.f32.mrf.mxu1 }
 0x122   :  { %v818_v18 = vpop.f32.mrf.mxu0  ;;  %v859_v19 = vpop.f32.mrf.mxu1 }
 0x123   :  { %v977_v22 = vadd.f32 %v944_v42, %v818_v18  ;;  %v979_v23 = vadd.f32 %v952_v43, %v859_v19 }
 0x124   :  { %v820_v20 = vpop.f32.mrf.mxu0  ;;  %v861_v21 = vpop.f32.mrf.mxu1 }
 0x125   :  { %989 = vst [vmem:[%s1610_s3 + $0x40] sm:$0xff] %v977_v22  ;;  %991 = vst [vmem:[%s1610_s3 + $0x50] sm:$0xff] %v979_v23  ;;  %v978_v26 = vadd.f32 %v948_v44, %v820_v20  ;;  %v980_v27 = vadd.f32 %v956_v45, %v861_v21 }
 0x126   :  { %v822_v24 = vpop.f32.mrf.mxu0  ;;  %v863_v25 = vpop.f32.mrf.mxu1 }
 0x127   :  { %990 = vst [vmem:[%s1610_s3 + $0x48] sm:$0xff] %v978_v26  ;;  %992 = vst [vmem:[%s1610_s3 + $0x58] sm:$0xff] %v980_v27 }
 0x128   :  { %v823_v28 = vpop.f32.mrf.mxu0  ;;  %v864_v29 = vpop.f32.mrf.mxu1 }

// kernel: fwd.12
= control target key start
LH: loop header
LB: loop body
LE: loop exit
PB: predicated region body
PF: predicated region fallthrough
CT: control target
= control target key end

     0   :  { %s6145_s0 = inlined_call_operand.vmem [shape: bf16[8,1536], index: 0, kind: input, shape index: {}]   ;;  %s6146_s1 = inlined_call_operand.hbm [shape: bf16[1536,4096], index: 1, kind: input, shape index: {}]   ;;  %s6147_s2 = inlined_call_operand.hbm [shape: f32[1,4096], index: 2, kind: input, shape index: {}]   ;;  %s6148_s3 = inlined_call_operand.vmem [shape: f32[8,4096], index: 3, kind: output, shape index: {}]  }
   0x1   :  { %6151 = sst [smem:[#allocation10_spill]] %s6146_s1 }
   0x2   :  { %8 = vsyncpa [#allocation3], 0 }
   0x3   :  { %10 = vsyncpa [#allocation3 + $0x1], 0 }
   0x4   :  { %11 = vsyncpa [#allocation5], 0 }
   0x5   :  { %13 = vsyncpa [#allocation5 + $0x1], 0  ;;  %s5268_s12 = smov 0   ;;  %s5270_s13 = smov 0  }
   0x6   :  { %s5272_s14 = smov 0   ;;  %s5274_s15 = smov 0  }
   0x7   :  { %s5276_s16 = smov 0   ;;  %s5278_s17 = smov 0  }
   0x8   :  { %s5280_s18 = smov 0   ;;  %s5282_s19 = smov 0  }
   0x9   :  { %s5284_s20 = smov 0   ;;  %s5286_s21 = smov 0  }
   0xa   :  { %s5288_s22 = smov 0  }
   0xb LB: > { %s31_s23 = sadd.s32 1, %s5232_s20  ;;  %p82_p1 = scmp.ne.s32.totalorder %s5220_s17, %s5216_s16  ;;  %s5240_s22 = sphi %s5288_s22, %s19_s22   ;;  %s5236_s21 = sphi %s5286_s21, %s6176_s21   ;;  %s5232_s20 = sphi %s5284_s20, %s6175_s20   ;;  %s5228_s19 = sphi %s5282_s19, %s6174_s19   ;;  %s5224_s18 = sphi %s5280_s18, %s6173_s18   ;;  %s5220_s17 = sphi %s5278_s17, %s6172_s17   ;;  %s5216_s16 = sphi %s5276_s16, %s6171_s16   ;;  %s5212_s15 = sphi %s5274_s15, %s6170_s15   ;;  %s5208_s14 = sphi %s5272_s14, %s6169_s14   ;;  %s5204_s13 = sphi %s5270_s13, %s6168_s13   ;;  %s5200_s12 = sphi %s5268_s12, %s6167_s12  }
   0xc   : > { %p5325_p0 = scmp.ge.s32.totalorder %s31_s23, 3  ;;  %p83_p2 = scmp.eq.s32.totalorder %s5240_s22, 0 }
   0xd   : > { %p4961_p4 = scmp.lt.s32.totalorder %s5240_s22, 6  ;;  %s179_s27 = sand.u32 1, %s5220_s17  }
   0xe   : > { %s6178_s23 = smov (%p5325_p0, %s31_s23), 0  ;;  %p84_p3 = por %p83_p2, %p82_p1 }
   0xf   : > { %6153 = sst [smem:[#allocation8_spill]] %s6178_s23  ;;  %s4413_s28 = sshll.u32 %s179_s27, 12 }
  0x10   : > { %s4415_s29 = sshll.u32 %s5236_s21, 4  ;;  %s4948_s30 = sshll.u32 %s5232_s20, 11 }
  0x11   : > { %s183_s4 = scalar_lea.vmem [#allocation2], %s4413_s28  ;;  %s190_s6 = sadd.s32 %s4948_s30, %s4415_s29 }
  0x12   : > { %s193_s5 = sshll.u32 %s183_s4, 4  ;;  %s4417_s7 = sshll.u32 %s190_s6, 6  ;;  %s194_s5 = int_to_ptr.vmem [resolvable:$true] %s193_s5 }
  0x13   : > { %p5346_p5 = pnand %p4961_p4, %p84_p3  ;;  %s6155_s1 = sld [smem:[#allocation10_spill]] }
  0x14   : > { %p4421_p6 = scmp.ge.s32.totalorder %s5240_s22, 1  ;;  %s180_s24 = scalar_lea.sflag [#allocation3], %s179_s27 }
  0x15   : > { %p5092_p7 = pneg %p5346_p5  ;;  %s5103_s26 = scalar_lea.vmem %s194_s5, 65536 }
  0x16   : > { %p5104_p8 = scmp.ne.s32.totalorder %s194_s5, %s5103_s26  ;;  %s5242_s28 = smov [#allocation2]  }
  0x17   : > { %s5108_s29 = sshll.u32 %s5242_s28, 4  ;;  %s5109_s29 = int_to_ptr.vmem [resolvable:$false] %s5108_s29 }
  0x18   : > { %p5106_p9 = pnand %p5104_p8, %p5092_p7  ;;  %s5110_s30 = scalar_lea.vmem %s5109_s29, 131072 }
  0x19   : > { %s192_s11 = scalar_lea.hbm %s6155_s1, %s4417_s7  ;;  %p5111_p11 = scmp.lt.s32.totalorder %s194_s5, %s5109_s29 }
  0x1a   : > { %p5107_p10 = pneg %p5106_p9  ;;  %p5112_p12 = scmp.lt.s32.totalorder %s5110_s30, %s5103_s26 }
  0x1c   : > { %p5113_p13 = por %p5112_p12, %p5111_p11 }
  0x1e   : > { %p5114_p1 = pnand %p5113_p13, %p5107_p10 }
  0x20   : > { %5117 = shalt.err (!%p5114_p1)
}
  0x21   : > { %s5243_s4 = smov 2048   ;;  %s5244_s27 = smov 1024  }
  0x22   : > { %s5245_s26 = smov 64   ;;  %p220_p3 = scmp.lt.s32.totalorder %s5240_s22, 7 }
  0x23   : > { %4957 = dma.hbm_to_vmem [thread:$0]  (!%p5346_p5), %s192_s11, 65536, %s194_s5, %s180_s24, %s5243_s4, %s5244_s27, %s5245_s26  }
  0x24   : > { %p5361_p7 = pnand %p4421_p6, %p220_p3  ;;  %s4409_s7 = sadd.s32 4294967295, %s5240_s22  }
  0x25   : > { %s34_s9 = sadd.s32 1, %s5236_s21  ;;  %p88_p8 = scmp.ne.s32.totalorder %s5216_s16, %s5212_s15 }
  0x26   : > { %s6180_s9 = smov (!%p5325_p0, %s34_s9), %s5236_s21  ;;  %p5372_p9 = scmp.eq.s32.totalorder %s4409_s7, 0 }
  0x27   : > { %p36_p5 = scmp.ge.s32.totalorder %s6180_s9, 2  ;;  %s101_s24 = sadd.s32 1, %s5208_s14 }
  0x28   : > { %p5379_p6 = por %p5372_p9, %p88_p8  ;;  %p108_p10 = scmp.ne.s32.totalorder %s5208_s14, %s5204_s13 }
  0x29   : > { %s6182_s9 = smov (%p36_p5, %s6180_s9), 0  ;;  %p114_p11 = scmp.ne.s32.totalorder %s5204_s13, %s5200_s12 }
  0x2a   : > { %6159 = sst [smem:[#allocation9_spill]] %s6182_s9  ;;  %p5389_p0 = por %p108_p10, %p83_p2 }
  0x2b   : > { %s71_s25 = ssub.s32 %s5236_s21, %s6182_s9  ;;  %s203_s10 = sand.u32 1, %s5208_s14  }
  0x2c   : > { %s6161_s11 = ssub.s32 %s5232_s20, %s6178_s23  ;;  %p99_p12 = scmp.eq.s32.totalorder %s71_s25, 0 }
  0x2d   : > { %s72_s28 = sor.u32 %s71_s25, %s6161_s11  ;;  %p5403_p1 = por %p114_p11, %p5372_p9 }
  0x2e   : > { %p73_p13 = scmp.eq.s32.totalorder %s72_s28, 0  ;;  %s6163_s4 = sadd.s32 1, %s5220_s17 }
  0x2f   : > { %s5408_s30 = scalar_select %p99_p12, %s5208_s14, %s101_s24  }
  0x30   : > { %s5413_s27 = scalar_select %p73_p13, %s5220_s17, %s6163_s4  }
  0x31   : > { %s4418_s26 = sshll.u32 %s203_s10, 4  ;;  %s4949_s7 = sshll.u32 %s5236_s21, 8 }
  0x32   : > { %s213_s9 = scalar_lea.hbm %s6147_s2, %s4949_s7  ;;  %s207_s23 = scalar_lea.vmem [#allocation4], %s4418_s26 }
  0x33   : > { %s215_s11 = sshll.u32 %s207_s23, 4  ;;  %p5423_p2 = pnand %p4961_p4, %p5389_p0  ;;  %s216_s11 = int_to_ptr.vmem [resolvable:$true] %s215_s11 }
  0x34   : > { %s204_s24 = scalar_lea.sflag [#allocation5], %s203_s10  ;;  %s5131_s25 = scalar_lea.vmem %s216_s11, 256 }
  0x35   : > { %p5120_p3 = pneg %p5423_p2  ;;  %p5132_p8 = scmp.ne.s32.totalorder %s216_s11, %s5131_s25 }
  0x36   : > { %s5246_s28 = smov [#allocation4]  }
  0x37   : > { %p5134_p9 = pnand %p5132_p8, %p5120_p3  ;;  %s5136_s1 = sshll.u32 %s5246_s28, 4  ;;  %s5137_s1 = int_to_ptr.vmem [resolvable:$false] %s5136_s1 }
  0x38   : > { %s5138_s4 = scalar_lea.vmem %s5137_s1, 512  ;;  %p5139_p10 = scmp.lt.s32.totalorder %s216_s11, %s5137_s1 }
  0x39   : > { %p5135_p5 = pneg %p5134_p9  ;;  %p5140_p11 = scmp.lt.s32.totalorder %s5138_s4, %s5131_s25 }
  0x3b   : > { %p5141_p12 = por %p5140_p11, %p5139_p10 }
  0x3d   : > { %p5142_p13 = pnand %p5141_p12, %p5135_p5 }
  0x3f   : > { %5145 = shalt.err (!%p5142_p13)
}
  0x40   : > { %4960 = dma.hbm_to_vmem [thread:$0]  (!%p5423_p2), %s213_s9, 256, %s216_s11, %s204_s24  }
  0x41   : > { %224 = sbr.rel (%p5361_p7) target bundleno = 854 (0x356), region = 32  ;;  %s226_s23 = sand.u32 (!%p5361_p7), 1, %s5216_s16  }
  0x42   : > { %s4422_s15 = sshll.u32 (!%p5361_p7), %s226_s23, 12  ;;  %s227_s10 = scalar_lea.sflag (!%p5361_p7), [#allocation3], %s226_s23 }
  0x43   : > { %s5434_s26 = scalar_lea.vmem (!%p5361_p7), [#allocation2], %s4422_s15 }
  0x46   : > { %5191 = dma.done.wait (%p5379_p6), %s227_s10, 65536  }
  0x47   : > { %5193 = vsyncadd (%p5379_p6), %s227_s10, 4294901760  ;;  %s235_s7 = sand.u32 1, %s5204_s13  }
  0x48   : > { %s5441_s12 = sshll.u32 %s235_s7, 4  ;;  %s236_s6 = scalar_lea.sflag [#allocation5], %s235_s7 }
  0x49   : > { %s239_s9 = scalar_lea.vmem [#allocation4], %s5441_s12 }
  0x4a   : > { %5195 = dma.done.wait (%p5403_p1), %s236_s6, 256  }
  0x4b   : > { %5197 = vsyncadd (%p5403_p1), %s236_s6, 4294967040  ;;  %s4424_s11 = sshll.u32 %s5224_s18, 2  ;;  %s4426_s8 = sshll.u32 %s5228_s19, 4 }
  0x4c   : > { %p283_p4 = scmp.lt.s32.totalorder %s4424_s11, 11  ;;  %p296_p7 = scmp.lt.s32.totalorder %s4426_s8, 31 }
  0x4d   : > { %p4428_p6 = scmp.ne.s32.totalorder %s5224_s18, 0 }
  0x4e   : > { %s6184_s11 = smov (!%p283_p4, %s4424_s11), 11  ;;  %s6186_s8 = smov (!%p296_p7, %s4426_s8), 31 }
  0x4f   : > { %s4425_s5 = sshll.u32 %s6184_s11, 2  ;;  %s4427_s1 = sshll.u32 %s6186_s8, 3 }
  0x50   : > { %s5453_s28 = scalar_lea.vmem %s6145_s0, %s4425_s5  ;;  %s5458_s29 = scalar_lea.vmem %s6148_s3, %s4427_s1 }
  0x51   : > { %306 = sbr.rel (%p4428_p6) target bundleno = 95 (0x5f), region = 44 }
  0x56   : > { %v5247_v0 = vmov 0.0  }
  0x57   : > { %307 = vst [vmem:[%s5458_s29] sm:$0xff] %v5247_v0  ;;  %308 = vst [vmem:[%s5458_s29 + $0x8] sm:$0xff] %v5247_v0 }
  0x58   : > { %309 = vst [vmem:[%s5458_s29 + $0x10] sm:$0xff] %v5247_v0  ;;  %310 = vst [vmem:[%s5458_s29 + $0x18] sm:$0xff] %v5247_v0 }
  0x59   : > { %311 = vst [vmem:[%s5458_s29 + $0x20] sm:$0xff] %v5247_v0  ;;  %312 = vst [vmem:[%s5458_s29 + $0x28] sm:$0xff] %v5247_v0 }
  0x5a   : > { %313 = vst [vmem:[%s5458_s29 + $0x30] sm:$0xff] %v5247_v0  ;;  %314 = vst [vmem:[%s5458_s29 + $0x38] sm:$0xff] %v5247_v0 }
  0x5b   : > { %315 = vst [vmem:[%s5458_s29 + $0x40] sm:$0xff] %v5247_v0  ;;  %316 = vst [vmem:[%s5458_s29 + $0x48] sm:$0xff] %v5247_v0 }
  0x5c   : > { %317 = vst [vmem:[%s5458_s29 + $0x50] sm:$0xff] %v5247_v0  ;;  %318 = vst [vmem:[%s5458_s29 + $0x58] sm:$0xff] %v5247_v0 }
  0x5d   : > { %319 = vst [vmem:[%s5458_s29 + $0x60] sm:$0xff] %v5247_v0  ;;  %320 = vst [vmem:[%s5458_s29 + $0x68] sm:$0xff] %v5247_v0 }
  0x5e   : > { %321 = vst [vmem:[%s5458_s29 + $0x70] sm:$0xff] %v5247_v0  ;;  %322 = vst [vmem:[%s5458_s29 + $0x78] sm:$0xff] %v5247_v0 }
  0x5f PF: > { %v453_v1 = vld [vmem:[%s5434_s26 + $0x380] sm:$0xff]  ;;  %v5509_v55 = vld [vmem:[%s5453_s28 + $0x8] sm:$0xff]  ;;  %p4945_p0 = scmp.ne.s32.totalorder %s5224_s18, 2 }
  0x60   : > { %v461_v2 = vld [vmem:[%s5434_s26 + $0x3c0] sm:$0xff]  ;;  %v5519_v60 = vcombine.high %v5509_v55, %v5509_v55 }
  0x61   : > { %v709_v3 = vld [vmem:[%s5434_s26 + $0xb80] sm:$0xff]  ;;  %v4546_v4 = vcombine.high %v453_v1, %v461_v2  ;;  %v4545_v6 = vcombine.low %v453_v1, %v461_v2 }
  0x62   : > { %v717_v5 = vld [vmem:[%s5434_s26 + $0xbc0] sm:$0xff]  ;;  %3500 = vmatprep.mubr.bf16.mxu1 %v5519_v60 }
  0x63   : > { %v437_v7 = vld [vmem:[%s5434_s26 + $0x300] sm:$0xff]  ;;  %v4802_v9 = vcombine.high %v709_v3, %v717_v5  ;;  %v4801_v10 = vcombine.low %v709_v3, %v717_v5  ;;  %3427 = vmatprep.subr.bf16.mxu0 %v4546_v4 }
  0x64   : > { %v445_v8 = vld [vmem:[%s5434_s26 + $0x340] sm:$0xff]  ;;  %3428 = vmatpush1.bf16.msra.mxu0 %v4545_v6 }
  0x65   : > { %v4530_v11 = vcombine.high %v437_v7, %v445_v8  ;;  %v693_v12 = vld [vmem:[%s5434_s26 + $0xb00] sm:$0xff]  ;;  %3468 = vmatprep.subr.bf16.mxu1 %v4802_v9  ;;  %v4529_v19 = vcombine.low %v437_v7, %v445_v8 }
  0x66   : > { %v701_v13 = vld [vmem:[%s5434_s26 + $0xb40] sm:$0xff]  ;;  %3469 = vmatpush1.bf16.msra.mxu1 %v4801_v10 }
  0x67   : > { %v421_v14 = vld [vmem:[%s5434_s26 + $0x280] sm:$0xff]  ;;  %v4786_v15 = vcombine.high %v693_v12, %v701_v13  ;;  %3429 = vmatprep.subr.bf16.mxu0 %v4530_v11  ;;  %v4785_v20 = vcombine.low %v693_v12, %v701_v13 }
  0x68   : > { %v429_v16 = vld [vmem:[%s5434_s26 + $0x2c0] sm:$0xff]  ;;  %3430 = vmatpush1.bf16.msra.mxu0 %v4529_v19 }
  0x69   : > { %v677_v17 = vld [vmem:[%s5434_s26 + $0xa80] sm:$0xff]  ;;  %v4514_v21 = vcombine.high %v421_v14, %v429_v16  ;;  %3470 = vmatprep.subr.bf16.mxu1 %v4786_v15  ;;  %v4513_v27 = vcombine.low %v421_v14, %v429_v16 }
  0x6a   : > { %v685_v18 = vld [vmem:[%s5434_s26 + $0xac0] sm:$0xff]  ;;  %3471 = vmatpush1.bf16.msra.mxu1 %v4785_v20 }
  0x6b   : > { %v4770_v22 = vcombine.high %v677_v17, %v685_v18  ;;  %v405_v23 = vld [vmem:[%s5434_s26 + $0x200] sm:$0xff]  ;;  %3431 = vmatprep.subr.bf16.mxu0 %v4514_v21  ;;  %v4769_v28 = vcombine.low %v677_v17, %v685_v18 }
  0x6c   : > { %v413_v24 = vld [vmem:[%s5434_s26 + $0x240] sm:$0xff]  ;;  %3432 = vmatpush1.bf16.msra.mxu0 %v4513_v27 }
  0x6d   : > { %v661_v25 = vld [vmem:[%s5434_s26 + $0xa00] sm:$0xff]  ;;  %v4498_v29 = vcombine.high %v405_v23, %v413_v24  ;;  %3472 = vmatprep.subr.bf16.mxu1 %v4770_v22  ;;  %v4497_v35 = vcombine.low %v405_v23, %v413_v24 }
  0x6e   : > { %v669_v26 = vld [vmem:[%s5434_s26 + $0xa40] sm:$0xff]  ;;  %3473 = vmatpush1.bf16.msra.mxu1 %v4769_v28 }
  0x6f   : > { %v4754_v30 = vcombine.high %v661_v25, %v669_v26  ;;  %v389_v31 = vld [vmem:[%s5434_s26 + $0x180] sm:$0xff]  ;;  %3433 = vmatprep.subr.bf16.mxu0 %v4498_v29  ;;  %v4753_v36 = vcombine.low %v661_v25, %v669_v26 }
  0x70   : > { %v397_v32 = vld [vmem:[%s5434_s26 + $0x1c0] sm:$0xff]  ;;  %3434 = vmatpush1.bf16.msra.mxu0 %v4497_v35 }
  0x71   : > { %v645_v33 = vld [vmem:[%s5434_s26 + $0x980] sm:$0xff]  ;;  %v4482_v37 = vcombine.high %v389_v31, %v397_v32  ;;  %3474 = vmatprep.subr.bf16.mxu1 %v4754_v30  ;;  %v4481_v43 = vcombine.low %v389_v31, %v397_v32 }
  0x72   : > { %v653_v34 = vld [vmem:[%s5434_s26 + $0x9c0] sm:$0xff]  ;;  %3475 = vmatpush1.bf16.msra.mxu1 %v4753_v36 }
  0x73   : > { %v4738_v38 = vcombine.high %v645_v33, %v653_v34  ;;  %v373_v39 = vld [vmem:[%s5434_s26 + $0x100] sm:$0xff]  ;;  %3435 = vmatprep.subr.bf16.mxu0 %v4482_v37  ;;  %v4737_v44 = vcombine.low %v645_v33, %v653_v34 }
  0x74   : > { %v381_v40 = vld [vmem:[%s5434_s26 + $0x140] sm:$0xff]  ;;  %3436 = vmatpush1.bf16.msra.mxu0 %v4481_v43 }
  0x75   : > { %v629_v41 = vld [vmem:[%s5434_s26 + $0x900] sm:$0xff]  ;;  %v4466_v45 = vcombine.high %v373_v39, %v381_v40  ;;  %3476 = vmatprep.subr.bf16.mxu1 %v4738_v38  ;;  %v4465_v51 = vcombine.low %v373_v39, %v381_v40 }
  0x76   : > { %v637_v42 = vld [vmem:[%s5434_s26 + $0x940] sm:$0xff]  ;;  %3477 = vmatpush1.bf16.msra.mxu1 %v4737_v44 }
  0x77   : > { %v4722_v46 = vcombine.high %v629_v41, %v637_v42  ;;  %v357_v47 = vld [vmem:[%s5434_s26 + $0x80] sm:$0xff]  ;;  %3437 = vmatprep.subr.bf16.mxu0 %v4466_v45  ;;  %v4721_v52 = vcombine.low %v629_v41, %v637_v42 }
  0x78   : > { %v365_v48 = vld [vmem:[%s5434_s26 + $0xc0] sm:$0xff]  ;;  %3438 = vmatpush1.bf16.msra.mxu0 %v4465_v51 }
  0x79   : > { %v613_v49 = vld [vmem:[%s5434_s26 + $0x880] sm:$0xff]  ;;  %v4450_v53 = vcombine.high %v357_v47, %v365_v48  ;;  %3478 = vmatprep.subr.bf16.mxu1 %v4722_v46  ;;  %v4449_v63 = vcombine.low %v357_v47, %v365_v48 }
  0x7a   : > { %v621_v50 = vld [vmem:[%s5434_s26 + $0x8c0] sm:$0xff]  ;;  %3479 = vmatpush1.bf16.msra.mxu1 %v4721_v52 }
  0x7b   : > { %v5506_v54 = vld [vmem:[%s5453_s28] sm:$0xff]  ;;  %v4706_v56 = vcombine.high %v613_v49, %v621_v50  ;;  %3439 = vmatprep.subr.bf16.mxu0 %v4450_v53  ;;  %v4705_v0 = vcombine.low %v613_v49, %v621_v50 }
  0x7c   : > { %v341_v57 = vld [vmem:[%s5434_s26] sm:$0xff]  ;;  %v5515_v59 = vcombine.high %v5506_v54, %v5506_v54  ;;  %3440 = vmatpush1.bf16.msra.mxu0 %v4449_v63 }
  0x7d   : > { %v349_v58 = vld [vmem:[%s5434_s26 + $0x40] sm:$0xff]  ;;  %3480 = vmatprep.subr.bf16.mxu1 %v4706_v56 }
  0x7e   : > { %v597_v61 = vld [vmem:[%s5434_s26 + $0x800] sm:$0xff]  ;;  %3459 = vmatprep.mubr.bf16.mxu0 %v5515_v59  ;;  %v4434_v1 = vcombine.high %v341_v57, %v349_v58  ;;  %v4433_v7 = vcombine.low %v341_v57, %v349_v58  ;;  %3481 = vmatpush1.bf16.msra.mxu1 %v4705_v0 }
  0x7f   : > { %v605_v62 = vld [vmem:[%s5434_s26 + $0x840] sm:$0xff] }
  0x80   : > { %v4690_v2 = vcombine.high %v597_v61, %v605_v62  ;;  %v581_v3 = vld [vmem:[%s5434_s26 + $0x780] sm:$0xff]  ;;  %3441 = vmatprep.subr.bf16.mxu0 %v4434_v1  ;;  %v4689_v8 = vcombine.low %v597_v61, %v605_v62 }
  0x81   : > { %v589_v4 = vld [vmem:[%s5434_s26 + $0x7c0] sm:$0xff]  ;;  %3442 = vmatpush1.bf16.msra.mxu0 %v4433_v7  ;;  %v454_v7 = vld [vmem:[%s5434_s26 + $0x388] sm:$0xff] }
  0x82   : > { %v837_v5 = vld [vmem:[%s5434_s26 + $0xf80] sm:$0xff]  ;;  %v4674_v9 = vcombine.high %v581_v3, %v589_v4  ;;  %3482 = vmatprep.subr.bf16.mxu1 %v4690_v2  ;;  %v4673_v15 = vcombine.low %v581_v3, %v589_v4 }
  0x83   : > { %v845_v6 = vld [vmem:[%s5434_s26 + $0xfc0] sm:$0xff]  ;;  %3483 = vmatpush1.bf16.msra.mxu1 %v4689_v8  ;;  %v462_v8 = vld [vmem:[%s5434_s26 + $0x3c8] sm:$0xff] }
  0x84   : > { %v4930_v10 = vcombine.high %v837_v5, %v845_v6  ;;  %v565_v11 = vld [vmem:[%s5434_s26 + $0x700] sm:$0xff]  ;;  %3443 = vmatprep.subr.bf16.mxu0 %v4674_v9  ;;  %v4929_v16 = vcombine.low %v837_v5, %v845_v6  ;;  %v710_v9 = vld [vmem:[%s5434_s26 + $0xb88] sm:$0xff] }
  0x85   : > { %v573_v12 = vld [vmem:[%s5434_s26 + $0x740] sm:$0xff]  ;;  %3444 = vmatpush2.bf16.msra.mxu0 %v4673_v15  ;;  %v438_v15 = vld [vmem:[%s5434_s26 + $0x308] sm:$0xff] }
  0x86   : > { %v821_v13 = vld [vmem:[%s5434_s26 + $0xf00] sm:$0xff]  ;;  %v4658_v17 = vcombine.high %v565_v11, %v573_v12  ;;  %3484 = vmatprep.subr.bf16.mxu1 %v4930_v10  ;;  %v4657_v23 = vcombine.low %v565_v11, %v573_v12  ;;  %v718_v10 = vld [vmem:[%s5434_s26 + $0xbc8] sm:$0xff] }
  0x87   : > { %v829_v14 = vld [vmem:[%s5434_s26 + $0xf40] sm:$0xff]  ;;  %3485 = vmatpush2.bf16.msra.mxu1 %v4929_v16  ;;  %v446_v16 = vld [vmem:[%s5434_s26 + $0x348] sm:$0xff] }
  0x88   : > { %v4914_v18 = vcombine.high %v821_v13, %v829_v14  ;;  %v549_v19 = vld [vmem:[%s5434_s26 + $0x680] sm:$0xff]  ;;  %3445 = vmatprep.subr.bf16.mxu0 %v4658_v17  ;;  %v4913_v24 = vcombine.low %v821_v13, %v829_v14  ;;  %v4548_v13 = vcombine.high %v454_v7, %v462_v8  ;;  %v4804_v14 = vcombine.high %v710_v9, %v718_v10 }
  0x89   : > { %v557_v20 = vld [vmem:[%s5434_s26 + $0x6c0] sm:$0xff]  ;;  %3446 = vmatpush2.bf16.msra.mxu0 %v4657_v23  ;;  %v5565_v17 = vcombine.low %v5506_v54, %v5506_v54  ;;  %v4532_v23 = vcombine.high %v438_v15, %v446_v16  ;;  %v430_v54 = vld [vmem:[%s5434_s26 + $0x2c8] sm:$0xff] }
  0x8a   : > { %v805_v21 = vld [vmem:[%s5434_s26 + $0xe80] sm:$0xff]  ;;  %v4642_v25 = vcombine.high %v549_v19, %v557_v20  ;;  %3486 = vmatprep.subr.bf16.mxu1 %v4914_v18  ;;  %v4641_v31 = vcombine.low %v549_v19, %v557_v20  ;;  %v694_v18 = vld [vmem:[%s5434_s26 + $0xb08] sm:$0xff]  ;;  %v5571_v20 = vcombine.low %v5509_v55, %v5509_v55  ;;  %v4531_v55 = vcombine.low %v438_v15, %v446_v16 }
  0x8b   : > { %v813_v22 = vld [vmem:[%s5434_s26 + $0xec0] sm:$0xff]  ;;  %3487 = vmatpush2.bf16.msra.mxu1 %v4913_v24  ;;  %v702_v19 = vld [vmem:[%s5434_s26 + $0xb48] sm:$0xff] }
  0x8c   : > { %v4898_v26 = vcombine.high %v805_v21, %v813_v22  ;;  %v533_v27 = vld [vmem:[%s5434_s26 + $0x600] sm:$0xff]  ;;  %3447 = vmatprep.subr.bf16.mxu0 %v4642_v25  ;;  %v4897_v32 = vcombine.low %v805_v21, %v813_v22  ;;  %v4547_v21 = vcombine.low %v454_v7, %v462_v8  ;;  %v4803_v22 = vcombine.low %v710_v9, %v718_v10  ;;  %v422_v25 = vld [vmem:[%s5434_s26 + $0x288] sm:$0xff] }
  0x8d   : > { %v541_v28 = vld [vmem:[%s5434_s26 + $0x640] sm:$0xff]  ;;  %3448 = vmatpush2.bf16.msra.mxu0 %v4641_v31  ;;  %v4788_v24 = vcombine.high %v694_v18, %v702_v19  ;;  %v406_v31 = vld [vmem:[%s5434_s26 + $0x208] sm:$0xff] }
  0x8e   : > { %v789_v29 = vld [vmem:[%s5434_s26 + $0xe00] sm:$0xff]  ;;  %v4626_v33 = vcombine.high %v533_v27, %v541_v28  ;;  %3488 = vmatprep.subr.bf16.mxu1 %v4898_v26  ;;  %v4625_v39 = vcombine.low %v533_v27, %v541_v28  ;;  %v678_v26 = vld [vmem:[%s5434_s26 + $0xa88] sm:$0xff]  ;;  %v4787_v28 = vcombine.low %v694_v18, %v702_v19 }
  0x8f   : > { %v797_v30 = vld [vmem:[%s5434_s26 + $0xe40] sm:$0xff]  ;;  %3489 = vmatpush2.bf16.msra.mxu1 %v4897_v32  ;;  %v686_v27 = vld [vmem:[%s5434_s26 + $0xac8] sm:$0xff] }
  0x90   : > { %v4882_v34 = vcombine.high %v789_v29, %v797_v30  ;;  %v517_v35 = vld [vmem:[%s5434_s26 + $0x580] sm:$0xff]  ;;  %3449 = vmatprep.subr.bf16.mxu0 %v4626_v33  ;;  %v4881_v40 = vcombine.low %v789_v29, %v797_v30  ;;  %v4516_v29 = vcombine.high %v422_v25, %v430_v54  ;;  %v4772_v30 = vcombine.high %v678_v26, %v686_v27  ;;  %v414_v32 = vld [vmem:[%s5434_s26 + $0x248] sm:$0xff] }
  0x91   : > { %v525_v36 = vld [vmem:[%s5434_s26 + $0x5c0] sm:$0xff]  ;;  %3450 = vmatpush2.bf16.msra.mxu0 %v4625_v39  ;;  %v662_v33 = vld [vmem:[%s5434_s26 + $0xa08] sm:$0xff] }
  0x92   : > { %v773_v37 = vld [vmem:[%s5434_s26 + $0xd80] sm:$0xff]  ;;  %v4610_v41 = vcombine.high %v517_v35, %v525_v36  ;;  %3490 = vmatprep.subr.bf16.mxu1 %v4882_v34  ;;  %v4609_v47 = vcombine.low %v517_v35, %v525_v36  ;;  %v670_v34 = vld [vmem:[%s5434_s26 + $0xa48] sm:$0xff]  ;;  %v4515_v35 = vcombine.low %v422_v25, %v430_v54  ;;  %v4771_v36 = vcombine.low %v678_v26, %v686_v27 }
  0x93   : > { %v781_v38 = vld [vmem:[%s5434_s26 + $0xdc0] sm:$0xff]  ;;  %3491 = vmatpush2.bf16.msra.mxu1 %v4881_v40  ;;  %v390_v39 = vld [vmem:[%s5434_s26 + $0x188] sm:$0xff] }
  0x94   : > { %v4866_v42 = vcombine.high %v773_v37, %v781_v38  ;;  %v501_v43 = vld [vmem:[%s5434_s26 + $0x500] sm:$0xff]  ;;  %3451 = vmatprep.subr.bf16.mxu0 %v4610_v41  ;;  %v4865_v48 = vcombine.low %v773_v37, %v781_v38  ;;  %v4500_v37 = vcombine.high %v406_v31, %v414_v32  ;;  %v4756_v38 = vcombine.high %v662_v33, %v670_v34  ;;  %v398_v40 = vld [vmem:[%s5434_s26 + $0x1c8] sm:$0xff] }
  0x95   : > { %v509_v44 = vld [vmem:[%s5434_s26 + $0x540] sm:$0xff]  ;;  %3452 = vmatpush2.bf16.msra.mxu0 %v4609_v47  ;;  %v646_v41 = vld [vmem:[%s5434_s26 + $0x988] sm:$0xff] }
  0x96   : > { %v757_v45 = vld [vmem:[%s5434_s26 + $0xd00] sm:$0xff]  ;;  %v4594_v49 = vcombine.high %v501_v43, %v509_v44  ;;  %3492 = vmatprep.subr.bf16.mxu1 %v4866_v42  ;;  %v4593_v57 = vcombine.low %v501_v43, %v509_v44  ;;  %v654_v42 = vld [vmem:[%s5434_s26 + $0x9c8] sm:$0xff]  ;;  %v4499_v43 = vcombine.low %v406_v31, %v414_v32  ;;  %v4755_v44 = vcombine.low %v662_v33, %v670_v34 }
  0x97   : > { %v765_v46 = vld [vmem:[%s5434_s26 + $0xd40] sm:$0xff]  ;;  %3493 = vmatpush2.bf16.msra.mxu1 %v4865_v48  ;;  %v374_v47 = vld [vmem:[%s5434_s26 + $0x108] sm:$0xff] }
  0x98   : > { %v4850_v50 = vcombine.high %v757_v45, %v765_v46  ;;  %v485_v51 = vld [vmem:[%s5434_s26 + $0x480] sm:$0xff]  ;;  %3453 = vmatprep.subr.bf16.mxu0 %v4594_v49  ;;  %v4849_v58 = vcombine.low %v757_v45, %v765_v46  ;;  %v4484_v45 = vcombine.high %v390_v39, %v398_v40  ;;  %v4740_v46 = vcombine.high %v646_v41, %v654_v42  ;;  %v382_v48 = vld [vmem:[%s5434_s26 + $0x148] sm:$0xff] }
  0x99   : > { %v493_v52 = vld [vmem:[%s5434_s26 + $0x4c0] sm:$0xff]  ;;  %3454 = vmatpush2.bf16.msra.mxu0 %v4593_v57  ;;  %v630_v49 = vld [vmem:[%s5434_s26 + $0x908] sm:$0xff] }
  0x9a   : > { %v741_v53 = vld [vmem:[%s5434_s26 + $0xc80] sm:$0xff]  ;;  %v4578_v61 = vcombine.high %v485_v51, %v493_v52  ;;  %3494 = vmatprep.subr.bf16.mxu1 %v4850_v50  ;;  %v4577_v3 = vcombine.low %v485_v51, %v493_v52  ;;  %v638_v50 = vld [vmem:[%s5434_s26 + $0x948] sm:$0xff]  ;;  %v4483_v51 = vcombine.low %v390_v39, %v398_v40  ;;  %v4739_v52 = vcombine.low %v646_v41, %v654_v42 }
  0x9b   : > { %v749_v56 = vld [vmem:[%s5434_s26 + $0xcc0] sm:$0xff]  ;;  %3495 = vmatpush2.bf16.msra.mxu1 %v4849_v58  ;;  %v358_v57 = vld [vmem:[%s5434_s26 + $0x88] sm:$0xff] }
  0x9c   : > { %v4834_v62 = vcombine.high %v741_v53, %v749_v56  ;;  %v469_v63 = vld [vmem:[%s5434_s26 + $0x400] sm:$0xff]  ;;  %3455 = vmatprep.subr.bf16.mxu0 %v4578_v61  ;;  %v4833_v4 = vcombine.low %v741_v53, %v749_v56  ;;  %v4468_v53 = vcombine.high %v374_v47, %v382_v48  ;;  %v4724_v56 = vcombine.high %v630_v49, %v638_v50  ;;  %v366_v58 = vld [vmem:[%s5434_s26 + $0xc8] sm:$0xff] }
  0x9d   : > { %v477_v0 = vld [vmem:[%s5434_s26 + $0x440] sm:$0xff]  ;;  %3456 = vmatpush2.bf16.msra.mxu0 %v4577_v3  ;;  %v614_v61 = vld [vmem:[%s5434_s26 + $0x888] sm:$0xff]  ;;  %v4451_v7 = vcombine.low %v358_v57, %v366_v58 }
  0x9e   : > { %v725_v1 = vld [vmem:[%s5434_s26 + $0xc00] sm:$0xff]  ;;  %v4562_v5 = vcombine.high %v469_v63, %v477_v0  ;;  %3496 = vmatprep.subr.bf16.mxu1 %v4834_v62  ;;  %v4561_v11 = vcombine.low %v469_v63, %v477_v0  ;;  %v622_v62 = vld [vmem:[%s5434_s26 + $0x8c8] sm:$0xff]  ;;  %v4467_v63 = vcombine.low %v374_v47, %v382_v48  ;;  %v4723_v0 = vcombine.low %v630_v49, %v638_v50 }
  0x9f   : > { %v733_v2 = vld [vmem:[%s5434_s26 + $0xc40] sm:$0xff]  ;;  %3497 = vmatpush2.bf16.msra.mxu1 %v4833_v4  ;;  %v342_v3 = vld [vmem:[%s5434_s26 + $0x8] sm:$0xff]  ;;  %v4707_v8 = vcombine.low %v614_v61, %v622_v62 }
  0xa0   : > { %v4818_v6 = vcombine.high %v725_v1, %v733_v2  ;;  %3457 = vmatprep.subr.bf16.mxu0 %v4562_v5  ;;  %v4817_v12 = vcombine.low %v725_v1, %v733_v2  ;;  %v4452_v1 = vcombine.high %v358_v57, %v366_v58  ;;  %v4708_v2 = vcombine.high %v614_v61, %v622_v62  ;;  %v350_v4 = vld [vmem:[%s5434_s26 + $0x48] sm:$0xff] }
  0xa1   : > { %3458 = vmatpush2.bf16.msra.mxu0 %v4561_v11  ;;  %v598_v5 = vld [vmem:[%s5434_s26 + $0x808] sm:$0xff]  ;;  %v4436_v9 = vcombine.high %v342_v3, %v350_v4  ;;  %v4435_v15 = vcombine.low %v342_v3, %v350_v4 }
  0xa2   : > { %3498 = vmatprep.subr.bf16.mxu1 %v4818_v6  ;;  %3509 = vmatprep.subr.bf16.mxu0 %v4548_v13  ;;  %v606_v6 = vld [vmem:[%s5434_s26 + $0x848] sm:$0xff] }
  0xa3   : > { %3499 = vmatpush2.bf16.msra.mxu1 %v4817_v12  ;;  %v4692_v10 = vcombine.high %v598_v5, %v606_v6  ;;  %v582_v11 = vld [vmem:[%s5434_s26 + $0x788] sm:$0xff]  ;;  %v4691_v16 = vcombine.low %v598_v5, %v606_v6 }
  0xa4   : > { %3550 = vmatprep.subr.bf16.mxu1 %v4804_v14  ;;  %3460 = vmatmul.mubr.bf16.vlgmr.msra.gmra.mxu0 %v5565_v17  ;;  %v590_v12 = vld [vmem:[%s5434_s26 + $0x7c8] sm:$0xff] }
  0xa5   : > { %3510 = vmatpush1.bf16.msra.mxu0 %v4547_v21  ;;  %3541 = vmatprep.mubr.bf16.mxu0 %v5515_v59  ;;  %v838_v13 = vld [vmem:[%s5434_s26 + $0xf88] sm:$0xff]  ;;  %v4676_v18 = vcombine.high %v582_v11, %v590_v12  ;;  %v4675_v25 = vcombine.low %v582_v11, %v590_v12 }
  0xa6   : > { %3501 = vmatmul.mubr.bf16.vlgmr.msra.gmra.mxu1 %v5571_v20  ;;  %3511 = vmatprep.subr.bf16.mxu0 %v4532_v23  ;;  %v846_v14 = vld [vmem:[%s5434_s26 + $0xfc8] sm:$0xff] }
  0xa7   : > { %3551 = vmatpush1.bf16.msra.mxu1 %v4803_v22  ;;  %3582 = vmatprep.mubr.bf16.mxu1 %v5519_v60  ;;  %v4932_v19 = vcombine.high %v838_v13, %v846_v14  ;;  %v566_v21 = vld [vmem:[%s5434_s26 + $0x708] sm:$0xff]  ;;  %v4931_v54 = vcombine.low %v838_v13, %v846_v14 }
  0xa8   : > { %3552 = vmatprep.subr.bf16.mxu1 %v4788_v24  ;;  %v574_v22 = vld [vmem:[%s5434_s26 + $0x748] sm:$0xff] }
  0xa9   : > { %3512 = vmatpush1.bf16.msra.mxu0 %v4531_v55  ;;  %v822_v23 = vld [vmem:[%s5434_s26 + $0xf08] sm:$0xff]  ;;  %v4660_v26 = vcombine.high %v566_v21, %v574_v22  ;;  %v4659_v31 = vcombine.low %v566_v21, %v574_v22 }
  0xaa   : > { %3513 = vmatprep.subr.bf16.mxu0 %v4516_v29  ;;  %v830_v24 = vld [vmem:[%s5434_s26 + $0xf48] sm:$0xff] }
  0xab   : > { %3553 = vmatpush1.bf16.msra.mxu1 %v4787_v28  ;;  %v4916_v27 = vcombine.high %v822_v23, %v830_v24  ;;  %v550_v55 = vld [vmem:[%s5434_s26 + $0x688] sm:$0xff]  ;;  %v4915_v32 = vcombine.low %v822_v23, %v830_v24 }
  0xac   : > { %3554 = vmatprep.subr.bf16.mxu1 %v4772_v30  ;;  %v558_v28 = vld [vmem:[%s5434_s26 + $0x6c8] sm:$0xff] }
  0xad   : > { %3514 = vmatpush1.bf16.msra.mxu0 %v4515_v35  ;;  %v806_v29 = vld [vmem:[%s5434_s26 + $0xe88] sm:$0xff]  ;;  %v4644_v33 = vcombine.high %v550_v55, %v558_v28  ;;  %v4643_v39 = vcombine.low %v550_v55, %v558_v28 }
  0xae   : > { %3515 = vmatprep.subr.bf16.mxu0 %v4500_v37  ;;  %v814_v30 = vld [vmem:[%s5434_s26 + $0xec8] sm:$0xff] }
  0xaf   : > { %3555 = vmatpush1.bf16.msra.mxu1 %v4771_v36  ;;  %v4900_v34 = vcombine.high %v806_v29, %v814_v30  ;;  %v534_v35 = vld [vmem:[%s5434_s26 + $0x608] sm:$0xff]  ;;  %v4899_v40 = vcombine.low %v806_v29, %v814_v30 }
  0xb0   : > { %3556 = vmatprep.subr.bf16.mxu1 %v4756_v38  ;;  %v542_v36 = vld [vmem:[%s5434_s26 + $0x648] sm:$0xff] }
  0xb1   : > { %3516 = vmatpush1.bf16.msra.mxu0 %v4499_v43  ;;  %v790_v37 = vld [vmem:[%s5434_s26 + $0xe08] sm:$0xff]  ;;  %v4628_v41 = vcombine.high %v534_v35, %v542_v36  ;;  %v4627_v47 = vcombine.low %v534_v35, %v542_v36 }
  0xb2   : > { %3517 = vmatprep.subr.bf16.mxu0 %v4484_v45  ;;  %v798_v38 = vld [vmem:[%s5434_s26 + $0xe48] sm:$0xff] }
  0xb3   : > { %3557 = vmatpush1.bf16.msra.mxu1 %v4755_v44  ;;  %v4884_v42 = vcombine.high %v790_v37, %v798_v38  ;;  %v518_v43 = vld [vmem:[%s5434_s26 + $0x588] sm:$0xff]  ;;  %v4883_v48 = vcombine.low %v790_v37, %v798_v38 }
  0xb4   : > { %3558 = vmatprep.subr.bf16.mxu1 %v4740_v46  ;;  %v526_v44 = vld [vmem:[%s5434_s26 + $0x5c8] sm:$0xff] }
  0xb5   : > { %3518 = vmatpush1.bf16.msra.mxu0 %v4483_v51  ;;  %v774_v45 = vld [vmem:[%s5434_s26 + $0xd88] sm:$0xff]  ;;  %v4612_v49 = vcombine.high %v518_v43, %v526_v44  ;;  %v4611_v57 = vcombine.low %v518_v43, %v526_v44 }
  0xb6   : > { %3519 = vmatprep.subr.bf16.mxu0 %v4468_v53  ;;  %v782_v46 = vld [vmem:[%s5434_s26 + $0xdc8] sm:$0xff] }
  0xb7   : > { %3559 = vmatpush1.bf16.msra.mxu1 %v4739_v52  ;;  %v4868_v50 = vcombine.high %v774_v45, %v782_v46  ;;  %v502_v51 = vld [vmem:[%s5434_s26 + $0x508] sm:$0xff]  ;;  %v4867_v58 = vcombine.low %v774_v45, %v782_v46 }
  0xb8   : > { %3560 = vmatprep.subr.bf16.mxu1 %v4724_v56  ;;  %v510_v52 = vld [vmem:[%s5434_s26 + $0x548] sm:$0xff] }
  0xb9   : > { %3520 = vmatpush1.bf16.msra.mxu0 %v4467_v63  ;;  %v758_v53 = vld [vmem:[%s5434_s26 + $0xd08] sm:$0xff]  ;;  %v4596_v61 = vcombine.high %v502_v51, %v510_v52  ;;  %v4595_v3 = vcombine.low %v502_v51, %v510_v52 }
  0xba   : > { %3521 = vmatprep.subr.bf16.mxu0 %v4452_v1  ;;  %v766_v56 = vld [vmem:[%s5434_s26 + $0xd48] sm:$0xff] }
  0xbb   : > { %3561 = vmatpush1.bf16.msra.mxu1 %v4723_v0  ;;  %v4852_v62 = vcombine.high %v758_v53, %v766_v56  ;;  %v486_v63 = vld [vmem:[%s5434_s26 + $0x488] sm:$0xff]  ;;  %v4851_v4 = vcombine.low %v758_v53, %v766_v56 }
  0xbc   : > { %3562 = vmatprep.subr.bf16.mxu1 %v4708_v2  ;;  %v494_v0 = vld [vmem:[%s5434_s26 + $0x4c8] sm:$0xff] }
  0xbd   : > { %3522 = vmatpush1.bf16.msra.mxu0 %v4451_v7  ;;  %v742_v1 = vld [vmem:[%s5434_s26 + $0xc88] sm:$0xff]  ;;  %v4580_v5 = vcombine.high %v486_v63, %v494_v0  ;;  %v4579_v11 = vcombine.low %v486_v63, %v494_v0 }
  0xbe   : > { %3523 = vmatprep.subr.bf16.mxu0 %v4436_v9  ;;  %v750_v2 = vld [vmem:[%s5434_s26 + $0xcc8] sm:$0xff] }
  0xbf   : > { %3563 = vmatpush1.bf16.msra.mxu1 %v4707_v8  ;;  %v4836_v6 = vcombine.high %v742_v1, %v750_v2  ;;  %v470_v7 = vld [vmem:[%s5434_s26 + $0x408] sm:$0xff]  ;;  %v4835_v12 = vcombine.low %v742_v1, %v750_v2 }
  0xc0   : > { %3564 = vmatprep.subr.bf16.mxu1 %v4692_v10  ;;  %v478_v8 = vld [vmem:[%s5434_s26 + $0x448] sm:$0xff] }
  0xc1   : > { %3524 = vmatpush1.bf16.msra.mxu0 %v4435_v15  ;;  %v726_v9 = vld [vmem:[%s5434_s26 + $0xc08] sm:$0xff]  ;;  %v4564_v13 = vcombine.high %v470_v7, %v478_v8  ;;  %v455_v15 = vld [vmem:[%s5434_s26 + $0x390] sm:$0xff]  ;;  %v4563_v21 = vcombine.low %v470_v7, %v478_v8 }
  0xc2   : > { %3525 = vmatprep.subr.bf16.mxu0 %v4676_v18  ;;  %v734_v10 = vld [vmem:[%s5434_s26 + $0xc48] sm:$0xff]  ;;  %v711_v18 = vld [vmem:[%s5434_s26 + $0xb90] sm:$0xff] }
  0xc3   : > { %3565 = vmatpush1.bf16.msra.mxu1 %v4691_v16  ;;  %v4820_v14 = vcombine.high %v726_v9, %v734_v10  ;;  %v463_v16 = vld [vmem:[%s5434_s26 + $0x3d0] sm:$0xff]  ;;  %v4819_v22 = vcombine.low %v726_v9, %v734_v10 }
  0xc4   : > { %3566 = vmatprep.subr.bf16.mxu1 %v4932_v19  ;;  %v719_v19 = vld [vmem:[%s5434_s26 + $0xbd0] sm:$0xff]  ;;  %v4550_v23 = vcombine.high %v455_v15, %v463_v16  ;;  %v4549_v55 = vcombine.low %v455_v15, %v463_v16 }
  0xc5   : > { %3526 = vmatpush2.bf16.msra.mxu0 %v4675_v25  ;;  %v4806_v24 = vcombine.high %v711_v18, %v719_v19  ;;  %v439_v25 = vld [vmem:[%s5434_s26 + $0x310] sm:$0xff]  ;;  %v4805_v28 = vcombine.low %v711_v18, %v719_v19 }
  0xc6   : > { %3527 = vmatprep.subr.bf16.mxu0 %v4660_v26  ;;  %v695_v26 = vld [vmem:[%s5434_s26 + $0xb10] sm:$0xff] }
  0xc7   : > { %3567 = vmatpush2.bf16.msra.mxu1 %v4931_v54  ;;  %v447_v54 = vld [vmem:[%s5434_s26 + $0x350] sm:$0xff] }
  0xc8   : > { %3568 = vmatprep.subr.bf16.mxu1 %v4916_v27  ;;  %v703_v27 = vld [vmem:[%s5434_s26 + $0xb50] sm:$0xff]  ;;  %v4534_v29 = vcombine.high %v439_v25, %v447_v54  ;;  %v4533_v35 = vcombine.low %v439_v25, %v447_v54 }
  0xc9   : > { %3528 = vmatpush2.bf16.msra.mxu0 %v4659_v31  ;;  %v4790_v30 = vcombine.high %v695_v26, %v703_v27  ;;  %v423_v31 = vld [vmem:[%s5434_s26 + $0x290] sm:$0xff]  ;;  %v4789_v36 = vcombine.low %v695_v26, %v703_v27 }
  0xca   : > { %3529 = vmatprep.subr.bf16.mxu0 %v4644_v33  ;;  %v679_v33 = vld [vmem:[%s5434_s26 + $0xa90] sm:$0xff] }
  0xcb   : > { %3569 = vmatpush2.bf16.msra.mxu1 %v4915_v32  ;;  %v431_v32 = vld [vmem:[%s5434_s26 + $0x2d0] sm:$0xff] }
  0xcc   : > { %3570 = vmatprep.subr.bf16.mxu1 %v4900_v34  ;;  %v687_v34 = vld [vmem:[%s5434_s26 + $0xad0] sm:$0xff]  ;;  %v4518_v37 = vcombine.high %v423_v31, %v431_v32  ;;  %v4517_v43 = vcombine.low %v423_v31, %v431_v32 }
  0xcd   : > { %3530 = vmatpush2.bf16.msra.mxu0 %v4643_v39  ;;  %v4774_v38 = vcombine.high %v679_v33, %v687_v34  ;;  %v407_v39 = vld [vmem:[%s5434_s26 + $0x210] sm:$0xff]  ;;  %v4773_v44 = vcombine.low %v679_v33, %v687_v34 }
  0xce   : > { %3531 = vmatprep.subr.bf16.mxu0 %v4628_v41  ;;  %v663_v41 = vld [vmem:[%s5434_s26 + $0xa10] sm:$0xff] }
  0xcf   : > { %3571 = vmatpush2.bf16.msra.mxu1 %v4899_v40  ;;  %v415_v40 = vld [vmem:[%s5434_s26 + $0x250] sm:$0xff] }
  0xd0   : > { %3572 = vmatprep.subr.bf16.mxu1 %v4884_v42  ;;  %v671_v42 = vld [vmem:[%s5434_s26 + $0xa50] sm:$0xff]  ;;  %v4502_v45 = vcombine.high %v407_v39, %v415_v40  ;;  %v4501_v51 = vcombine.low %v407_v39, %v415_v40 }
  0xd1   : > { %3532 = vmatpush2.bf16.msra.mxu0 %v4627_v47  ;;  %v4758_v46 = vcombine.high %v663_v41, %v671_v42  ;;  %v391_v47 = vld [vmem:[%s5434_s26 + $0x190] sm:$0xff]  ;;  %v4757_v52 = vcombine.low %v663_v41, %v671_v42 }
  0xd2   : > { %3533 = vmatprep.subr.bf16.mxu0 %v4612_v49  ;;  %v647_v49 = vld [vmem:[%s5434_s26 + $0x990] sm:$0xff] }
  0xd3   : > { %3573 = vmatpush2.bf16.msra.mxu1 %v4883_v48  ;;  %v399_v48 = vld [vmem:[%s5434_s26 + $0x1d0] sm:$0xff] }
  0xd4   : > { %3574 = vmatprep.subr.bf16.mxu1 %v4868_v50  ;;  %v655_v50 = vld [vmem:[%s5434_s26 + $0x9d0] sm:$0xff]  ;;  %v4486_v53 = vcombine.high %v391_v47, %v399_v48  ;;  %v4485_v63 = vcombine.low %v391_v47, %v399_v48 }
  0xd5   : > { %3534 = vmatpush2.bf16.msra.mxu0 %v4611_v57  ;;  %v4742_v56 = vcombine.high %v647_v49, %v655_v50  ;;  %v375_v57 = vld [vmem:[%s5434_s26 + $0x110] sm:$0xff]  ;;  %v4741_v0 = vcombine.low %v647_v49, %v655_v50 }
  0xd6   : > { %3535 = vmatprep.subr.bf16.mxu0 %v4596_v61  ;;  %v631_v61 = vld [vmem:[%s5434_s26 + $0x910] sm:$0xff] }
  0xd7   : > { %3575 = vmatpush2.bf16.msra.mxu1 %v4867_v58  ;;  %v383_v58 = vld [vmem:[%s5434_s26 + $0x150] sm:$0xff] }
  0xd8   : > { %3576 = vmatprep.subr.bf16.mxu1 %v4852_v62  ;;  %v639_v62 = vld [vmem:[%s5434_s26 + $0x950] sm:$0xff]  ;;  %v4470_v1 = vcombine.high %v375_v57, %v383_v58  ;;  %v4469_v7 = vcombine.low %v375_v57, %v383_v58 }
  0xd9   : > { %3536 = vmatpush2.bf16.msra.mxu0 %v4595_v3  ;;  %v4726_v2 = vcombine.high %v631_v61, %v639_v62  ;;  %v359_v3 = vld [vmem:[%s5434_s26 + $0x90] sm:$0xff]  ;;  %v4725_v8 = vcombine.low %v631_v61, %v639_v62 }
  0xda   : > { %3537 = vmatprep.subr.bf16.mxu0 %v4580_v5  ;;  %v615_v5 = vld [vmem:[%s5434_s26 + $0x890] sm:$0xff] }
  0xdb   : > { %3577 = vmatpush2.bf16.msra.mxu1 %v4851_v4  ;;  %v367_v4 = vld [vmem:[%s5434_s26 + $0xd0] sm:$0xff] }
  0xdc   : > { %3578 = vmatprep.subr.bf16.mxu1 %v4836_v6  ;;  %v623_v6 = vld [vmem:[%s5434_s26 + $0x8d0] sm:$0xff]  ;;  %v4454_v9 = vcombine.high %v359_v3, %v367_v4  ;;  %v4453_v15 = vcombine.low %v359_v3, %v367_v4 }
  0xdd   : > { %3538 = vmatpush2.bf16.msra.mxu0 %v4579_v11  ;;  %v4710_v10 = vcombine.high %v615_v5, %v623_v6  ;;  %v343_v11 = vld [vmem:[%s5434_s26 + $0x10] sm:$0xff]  ;;  %v4709_v16 = vcombine.low %v615_v5, %v623_v6 }
  0xde   : > { %3539 = vmatprep.subr.bf16.mxu0 %v4564_v13  ;;  %v599_v13 = vld [vmem:[%s5434_s26 + $0x810] sm:$0xff] }
  0xdf   : > { %3579 = vmatpush2.bf16.msra.mxu1 %v4835_v12  ;;  %v351_v12 = vld [vmem:[%s5434_s26 + $0x50] sm:$0xff] }
  0xe0   : > { %3580 = vmatprep.subr.bf16.mxu1 %v4820_v14  ;;  %v607_v14 = vld [vmem:[%s5434_s26 + $0x850] sm:$0xff]  ;;  %v4438_v18 = vcombine.high %v343_v11, %v351_v12  ;;  %v4437_v25 = vcombine.low %v343_v11, %v351_v12 }
  0xe1   : > { %3540 = vmatpush2.bf16.msra.mxu0 %v4563_v21  ;;  %v4694_v19 = vcombine.high %v599_v13, %v607_v14  ;;  %v583_v21 = vld [vmem:[%s5434_s26 + $0x790] sm:$0xff]  ;;  %v4693_v54 = vcombine.low %v599_v13, %v607_v14 }
  0xe2   : > { %3591 = vmatprep.subr.bf16.mxu0 %v4550_v23  ;;  %v839_v23 = vld [vmem:[%s5434_s26 + $0xf90] sm:$0xff] }
  0xe3   : > { %3581 = vmatpush2.bf16.msra.mxu1 %v4819_v22  ;;  %v591_v22 = vld [vmem:[%s5434_s26 + $0x7d0] sm:$0xff] }
  0xe4   : > { %3632 = vmatprep.subr.bf16.mxu1 %v4806_v24  ;;  %3542 = vmatmul.mubr.bf16.vlgmr.msra.gmra.mxu0 %v5565_v17  ;;  %v847_v24 = vld [vmem:[%s5434_s26 + $0xfd0] sm:$0xff]  ;;  %v4678_v26 = vcombine.high %v583_v21, %v591_v22  ;;  %v4677_v31 = vcombine.low %v583_v21, %v591_v22 }
  0xe5   : > { %3592 = vmatpush1.bf16.msra.mxu0 %v4549_v55  ;;  %3623 = vmatprep.mubr.bf16.mxu0 %v5515_v59  ;;  %v4934_v27 = vcombine.high %v839_v23, %v847_v24  ;;  %v567_v55 = vld [vmem:[%s5434_s26 + $0x710] sm:$0xff]  ;;  %v4933_v32 = vcombine.low %v839_v23, %v847_v24 }
  0xe6   : > { %3583 = vmatmul.mubr.bf16.vlgmr.msra.gmra.mxu1 %v5571_v20  ;;  %3593 = vmatprep.subr.bf16.mxu0 %v4534_v29  ;;  %v823_v29 = vld [vmem:[%s5434_s26 + $0xf10] sm:$0xff] }
  0xe7   : > { %3633 = vmatpush1.bf16.msra.mxu1 %v4805_v28  ;;  %3664 = vmatprep.mubr.bf16.mxu1 %v5519_v60  ;;  %v575_v28 = vld [vmem:[%s5434_s26 + $0x750] sm:$0xff] }
  0xe8   : > { %3634 = vmatprep.subr.bf16.mxu1 %v4790_v30  ;;  %v831_v30 = vld [vmem:[%s5434_s26 + $0xf50] sm:$0xff]  ;;  %v4662_v33 = vcombine.high %v567_v55, %v575_v28  ;;  %v4661_v39 = vcombine.low %v567_v55, %v575_v28 }
  0xe9   : > { %3594 = vmatpush1.bf16.msra.mxu0 %v4533_v35  ;;  %v4918_v34 = vcombine.high %v823_v29, %v831_v30  ;;  %v551_v35 = vld [vmem:[%s5434_s26 + $0x690] sm:$0xff]  ;;  %v4917_v40 = vcombine.low %v823_v29, %v831_v30 }
  0xea   : > { %3595 = vmatprep.subr.bf16.mxu0 %v4518_v37  ;;  %v807_v37 = vld [vmem:[%s5434_s26 + $0xe90] sm:$0xff] }
  0xeb   : > { %3635 = vmatpush1.bf16.msra.mxu1 %v4789_v36  ;;  %v559_v36 = vld [vmem:[%s5434_s26 + $0x6d0] sm:$0xff] }
  0xec   : > { %3636 = vmatprep.subr.bf16.mxu1 %v4774_v38  ;;  %v815_v38 = vld [vmem:[%s5434_s26 + $0xed0] sm:$0xff]  ;;  %v4646_v41 = vcombine.high %v551_v35, %v559_v36  ;;  %v4645_v47 = vcombine.low %v551_v35, %v559_v36 }
  0xed   : > { %3596 = vmatpush1.bf16.msra.mxu0 %v4517_v43  ;;  %v4902_v42 = vcombine.high %v807_v37, %v815_v38  ;;  %v535_v43 = vld [vmem:[%s5434_s26 + $0x610] sm:$0xff]  ;;  %v4901_v48 = vcombine.low %v807_v37, %v815_v38 }
  0xee   : > { %3597 = vmatprep.subr.bf16.mxu0 %v4502_v45  ;;  %v791_v45 = vld [vmem:[%s5434_s26 + $0xe10] sm:$0xff] }
  0xef   : > { %3637 = vmatpush1.bf16.msra.mxu1 %v4773_v44  ;;  %v543_v44 = vld [vmem:[%s5434_s26 + $0x650] sm:$0xff] }
  0xf0   : > { %3638 = vmatprep.subr.bf16.mxu1 %v4758_v46  ;;  %v799_v46 = vld [vmem:[%s5434_s26 + $0xe50] sm:$0xff]  ;;  %v4630_v49 = vcombine.high %v535_v43, %v543_v44  ;;  %v4629_v57 = vcombine.low %v535_v43, %v543_v44 }
  0xf1   : > { %3598 = vmatpush1.bf16.msra.mxu0 %v4501_v51  ;;  %v4886_v50 = vcombine.high %v791_v45, %v799_v46  ;;  %v519_v51 = vld [vmem:[%s5434_s26 + $0x590] sm:$0xff]  ;;  %v4885_v58 = vcombine.low %v791_v45, %v799_v46 }
  0xf2   : > { %3599 = vmatprep.subr.bf16.mxu0 %v4486_v53  ;;  %v775_v53 = vld [vmem:[%s5434_s26 + $0xd90] sm:$0xff] }
  0xf3   : > { %3639 = vmatpush1.bf16.msra.mxu1 %v4757_v52  ;;  %v527_v52 = vld [vmem:[%s5434_s26 + $0x5d0] sm:$0xff] }
  0xf4   : > { %3640 = vmatprep.subr.bf16.mxu1 %v4742_v56  ;;  %v783_v56 = vld [vmem:[%s5434_s26 + $0xdd0] sm:$0xff]  ;;  %v4614_v61 = vcombine.high %v519_v51, %v527_v52  ;;  %v4613_v3 = vcombine.low %v519_v51, %v527_v52 }
  0xf5   : > { %3600 = vmatpush1.bf16.msra.mxu0 %v4485_v63  ;;  %v4870_v62 = vcombine.high %v775_v53, %v783_v56  ;;  %v503_v63 = vld [vmem:[%s5434_s26 + $0x510] sm:$0xff]  ;;  %v4869_v4 = vcombine.low %v775_v53, %v783_v56 }
  0xf6   : > { %3601 = vmatprep.subr.bf16.mxu0 %v4470_v1  ;;  %v759_v1 = vld [vmem:[%s5434_s26 + $0xd10] sm:$0xff] }
  0xf7   : > { %3641 = vmatpush1.bf16.msra.mxu1 %v4741_v0  ;;  %v511_v0 = vld [vmem:[%s5434_s26 + $0x550] sm:$0xff] }
  0xf8   : > { %3642 = vmatprep.subr.bf16.mxu1 %v4726_v2  ;;  %v767_v2 = vld [vmem:[%s5434_s26 + $0xd50] sm:$0xff]  ;;  %v4598_v5 = vcombine.high %v503_v63, %v511_v0  ;;  %v4597_v11 = vcombine.low %v503_v63, %v511_v0 }
  0xf9   : > { %3602 = vmatpush1.bf16.msra.mxu0 %v4469_v7  ;;  %v4854_v6 = vcombine.high %v759_v1, %v767_v2  ;;  %v487_v7 = vld [vmem:[%s5434_s26 + $0x490] sm:$0xff]  ;;  %v4853_v12 = vcombine.low %v759_v1, %v767_v2 }
  0xfa   : > { %3603 = vmatprep.subr.bf16.mxu0 %v4454_v9  ;;  %v743_v9 = vld [vmem:[%s5434_s26 + $0xc90] sm:$0xff] }
  0xfb   : > { %3643 = vmatpush1.bf16.msra.mxu1 %v4725_v8  ;;  %v495_v8 = vld [vmem:[%s5434_s26 + $0x4d0] sm:$0xff] }
  0xfc   : > { %3644 = vmatprep.subr.bf16.mxu1 %v4710_v10  ;;  %v751_v10 = vld [vmem:[%s5434_s26 + $0xcd0] sm:$0xff]  ;;  %v4582_v13 = vcombine.high %v487_v7, %v495_v8  ;;  %v4581_v21 = vcombine.low %v487_v7, %v495_v8 }
  0xfd   : > { %3604 = vmatpush1.bf16.msra.mxu0 %v4453_v15  ;;  %v4838_v14 = vcombine.high %v743_v9, %v751_v10  ;;  %v471_v15 = vld [vmem:[%s5434_s26 + $0x410] sm:$0xff]  ;;  %v4837_v22 = vcombine.low %v743_v9, %v751_v10 }
  0xfe   : > { %3605 = vmatprep.subr.bf16.mxu0 %v4438_v18  ;;  %v727_v18 = vld [vmem:[%s5434_s26 + $0xc10] sm:$0xff] }
  0xff   : > { %3645 = vmatpush1.bf16.msra.mxu1 %v4709_v16  ;;  %v479_v16 = vld [vmem:[%s5434_s26 + $0x450] sm:$0xff] }
 0x100   : > { %3646 = vmatprep.subr.bf16.mxu1 %v4694_v19  ;;  %v735_v19 = vld [vmem:[%s5434_s26 + $0xc50] sm:$0xff]  ;;  %v4566_v23 = vcombine.high %v471_v15, %v479_v16  ;;  %v4565_v55 = vcombine.low %v471_v15, %v479_v16 }
 0x101   : > { %3606 = vmatpush1.bf16.msra.mxu0 %v4437_v25  ;;  %v4822_v24 = vcombine.high %v727_v18, %v735_v19  ;;  %v456_v25 = vld [vmem:[%s5434_s26 + $0x398] sm:$0xff]  ;;  %v4821_v28 = vcombine.low %v727_v18, %v735_v19 }
 0x102   : > { %3607 = vmatprep.subr.bf16.mxu0 %v4678_v26  ;;  %v712_v26 = vld [vmem:[%s5434_s26 + $0xb98] sm:$0xff] }
 0x103   : > { %3647 = vmatpush1.bf16.msra.mxu1 %v4693_v54  ;;  %v464_v54 = vld [vmem:[%s5434_s26 + $0x3d8] sm:$0xff] }
 0x104   : > { %3648 = vmatprep.subr.bf16.mxu1 %v4934_v27  ;;  %v720_v27 = vld [vmem:[%s5434_s26 + $0xbd8] sm:$0xff]  ;;  %v4552_v29 = vcombine.high %v456_v25, %v464_v54  ;;  %v4551_v35 = vcombine.low %v456_v25, %v464_v54 }
 0x105   : > { %3608 = vmatpush2.bf16.msra.mxu0 %v4677_v31  ;;  %v4808_v30 = vcombine.high %v712_v26, %v720_v27  ;;  %v440_v31 = vld [vmem:[%s5434_s26 + $0x318] sm:$0xff]  ;;  %v4807_v36 = vcombine.low %v712_v26, %v720_v27 }
 0x106   : > { %3609 = vmatprep.subr.bf16.mxu0 %v4662_v33  ;;  %v696_v33 = vld [vmem:[%s5434_s26 + $0xb18] sm:$0xff] }
 0x107   : > { %3649 = vmatpush2.bf16.msra.mxu1 %v4933_v32  ;;  %v448_v32 = vld [vmem:[%s5434_s26 + $0x358] sm:$0xff] }
 0x108   : > { %3650 = vmatprep.subr.bf16.mxu1 %v4918_v34  ;;  %v704_v34 = vld [vmem:[%s5434_s26 + $0xb58] sm:$0xff]  ;;  %v4536_v37 = vcombine.high %v440_v31, %v448_v32  ;;  %v4535_v43 = vcombine.low %v440_v31, %v448_v32 }
 0x109   : > { %3610 = vmatpush2.bf16.msra.mxu0 %v4661_v39  ;;  %v4792_v38 = vcombine.high %v696_v33, %v704_v34  ;;  %v424_v39 = vld [vmem:[%s5434_s26 + $0x298] sm:$0xff]  ;;  %v4791_v44 = vcombine.low %v696_v33, %v704_v34 }
 0x10a   : > { %3611 = vmatprep.subr.bf16.mxu0 %v4646_v41  ;;  %v680_v41 = vld [vmem:[%s5434_s26 + $0xa98] sm:$0xff] }
 0x10b   : > { %3651 = vmatpush2.bf16.msra.mxu1 %v4917_v40  ;;  %v432_v40 = vld [vmem:[%s5434_s26 + $0x2d8] sm:$0xff] }
 0x10c   : > { %3652 = vmatprep.subr.bf16.mxu1 %v4902_v42  ;;  %v688_v42 = vld [vmem:[%s5434_s26 + $0xad8] sm:$0xff]  ;;  %v4520_v45 = vcombine.high %v424_v39, %v432_v40  ;;  %v4519_v51 = vcombine.low %v424_v39, %v432_v40 }
 0x10d   : > { %3612 = vmatpush2.bf16.msra.mxu0 %v4645_v47  ;;  %v4776_v46 = vcombine.high %v680_v41, %v688_v42  ;;  %v408_v47 = vld [vmem:[%s5434_s26 + $0x218] sm:$0xff]  ;;  %v4775_v52 = vcombine.low %v680_v41, %v688_v42 }
 0x10e   : > { %3613 = vmatprep.subr.bf16.mxu0 %v4630_v49  ;;  %v664_v49 = vld [vmem:[%s5434_s26 + $0xa18] sm:$0xff] }
 0x10f   : > { %3653 = vmatpush2.bf16.msra.mxu1 %v4901_v48  ;;  %v416_v48 = vld [vmem:[%s5434_s26 + $0x258] sm:$0xff] }
 0x110   : > { %3654 = vmatprep.subr.bf16.mxu1 %v4886_v50  ;;  %v672_v50 = vld [vmem:[%s5434_s26 + $0xa58] sm:$0xff]  ;;  %v4504_v53 = vcombine.high %v408_v47, %v416_v48  ;;  %v4503_v63 = vcombine.low %v408_v47, %v416_v48 }
 0x111   : > { %3614 = vmatpush2.bf16.msra.mxu0 %v4629_v57  ;;  %v4760_v56 = vcombine.high %v664_v49, %v672_v50  ;;  %v392_v57 = vld [vmem:[%s5434_s26 + $0x198] sm:$0xff]  ;;  %v4759_v0 = vcombine.low %v664_v49, %v672_v50 }
 0x112   : > { %3615 = vmatprep.subr.bf16.mxu0 %v4614_v61  ;;  %v648_v61 = vld [vmem:[%s5434_s26 + $0x998] sm:$0xff] }
 0x113   : > { %3655 = vmatpush2.bf16.msra.mxu1 %v4885_v58  ;;  %v400_v58 = vld [vmem:[%s5434_s26 + $0x1d8] sm:$0xff] }
 0x114   : > { %3656 = vmatprep.subr.bf16.mxu1 %v4870_v62  ;;  %v656_v62 = vld [vmem:[%s5434_s26 + $0x9d8] sm:$0xff]  ;;  %v4488_v1 = vcombine.high %v392_v57, %v400_v58  ;;  %v4487_v7 = vcombine.low %v392_v57, %v400_v58 }
 0x115   : > { %3616 = vmatpush2.bf16.msra.mxu0 %v4613_v3  ;;  %v4744_v2 = vcombine.high %v648_v61, %v656_v62  ;;  %v376_v3 = vld [vmem:[%s5434_s26 + $0x118] sm:$0xff]  ;;  %v4743_v8 = vcombine.low %v648_v61, %v656_v62 }
 0x116   : > { %3617 = vmatprep.subr.bf16.mxu0 %v4598_v5  ;;  %v632_v5 = vld [vmem:[%s5434_s26 + $0x918] sm:$0xff] }
 0x117   : > { %3657 = vmatpush2.bf16.msra.mxu1 %v4869_v4  ;;  %v384_v4 = vld [vmem:[%s5434_s26 + $0x158] sm:$0xff] }
 0x118   : > { %3658 = vmatprep.subr.bf16.mxu1 %v4854_v6  ;;  %v640_v6 = vld [vmem:[%s5434_s26 + $0x958] sm:$0xff]  ;;  %v4472_v9 = vcombine.high %v376_v3, %v384_v4  ;;  %v4471_v15 = vcombine.low %v376_v3, %v384_v4 }
 0x119   : > { %3618 = vmatpush2.bf16.msra.mxu0 %v4597_v11  ;;  %v4728_v10 = vcombine.high %v632_v5, %v640_v6  ;;  %v360_v11 = vld [vmem:[%s5434_s26 + $0x98] sm:$0xff]  ;;  %v4727_v16 = vcombine.low %v632_v5, %v640_v6 }
 0x11a   : > { %3619 = vmatprep.subr.bf16.mxu0 %v4582_v13  ;;  %v616_v13 = vld [vmem:[%s5434_s26 + $0x898] sm:$0xff] }
 0x11b   : > { %3659 = vmatpush2.bf16.msra.mxu1 %v4853_v12  ;;  %v368_v12 = vld [vmem:[%s5434_s26 + $0xd8] sm:$0xff] }
 0x11c   : > { %3660 = vmatprep.subr.bf16.mxu1 %v4838_v14  ;;  %v624_v14 = vld [vmem:[%s5434_s26 + $0x8d8] sm:$0xff]  ;;  %v4456_v18 = vcombine.high %v360_v11, %v368_v12  ;;  %v4455_v25 = vcombine.low %v360_v11, %v368_v12 }
 0x11d   : > { %3620 = vmatpush2.bf16.msra.mxu0 %v4581_v21  ;;  %v4712_v19 = vcombine.high %v616_v13, %v624_v14  ;;  %v344_v21 = vld [vmem:[%s5434_s26 + $0x18] sm:$0xff]  ;;  %v4711_v54 = vcombine.low %v616_v13, %v624_v14 }
 0x11e   : > { %3621 = vmatprep.subr.bf16.mxu0 %v4566_v23  ;;  %v600_v23 = vld [vmem:[%s5434_s26 + $0x818] sm:$0xff] }
 0x11f   : > { %3661 = vmatpush2.bf16.msra.mxu1 %v4837_v22  ;;  %v352_v22 = vld [vmem:[%s5434_s26 + $0x58] sm:$0xff] }
 0x120   : > { %3662 = vmatprep.subr.bf16.mxu1 %v4822_v24  ;;  %v608_v24 = vld [vmem:[%s5434_s26 + $0x858] sm:$0xff]  ;;  %v4440_v26 = vcombine.high %v344_v21, %v352_v22  ;;  %v4439_v31 = vcombine.low %v344_v21, %v352_v22 }
 0x121   : > { %3622 = vmatpush2.bf16.msra.mxu0 %v4565_v55  ;;  %v4696_v27 = vcombine.high %v600_v23, %v608_v24  ;;  %v584_v55 = vld [vmem:[%s5434_s26 + $0x798] sm:$0xff]  ;;  %v4695_v32 = vcombine.low %v600_v23, %v608_v24 }
 0x122   : > { %3673 = vmatprep.subr.bf16.mxu0 %v4552_v29  ;;  %v840_v29 = vld [vmem:[%s5434_s26 + $0xf98] sm:$0xff] }
 0x123   : > { %3663 = vmatpush2.bf16.msra.mxu1 %v4821_v28  ;;  %v592_v28 = vld [vmem:[%s5434_s26 + $0x7d8] sm:$0xff] }
 0x124   : > { %3714 = vmatprep.subr.bf16.mxu1 %v4808_v30  ;;  %3624 = vmatmul.mubr.bf16.vlgmr.msra.gmra.mxu0 %v5565_v17  ;;  %v848_v30 = vld [vmem:[%s5434_s26 + $0xfd8] sm:$0xff]  ;;  %v4680_v33 = vcombine.high %v584_v55, %v592_v28  ;;  %v4679_v39 = vcombine.low %v584_v55, %v592_v28 }
 0x125   : > { %3674 = vmatpush1.bf16.msra.mxu0 %v4551_v35  ;;  %3705 = vmatprep.mubr.bf16.mxu0 %v5515_v59  ;;  %v4936_v34 = vcombine.high %v840_v29, %v848_v30  ;;  %v568_v35 = vld [vmem:[%s5434_s26 + $0x718] sm:$0xff]  ;;  %v4935_v40 = vcombine.low %v840_v29, %v848_v30 }
 0x126   : > { %3665 = vmatmul.mubr.bf16.vlgmr.msra.gmra.mxu1 %v5571_v20  ;;  %3675 = vmatprep.subr.bf16.mxu0 %v4536_v37  ;;  %v824_v37 = vld [vmem:[%s5434_s26 + $0xf18] sm:$0xff] }
 0x127   : > { %3715 = vmatpush1.bf16.msra.mxu1 %v4807_v36  ;;  %3746 = vmatprep.mubr.bf16.mxu1 %v5519_v60  ;;  %v576_v36 = vld [vmem:[%s5434_s26 + $0x758] sm:$0xff] }
 0x128   : > { %3716 = vmatprep.subr.bf16.mxu1 %v4792_v38  ;;  %v832_v38 = vld [vmem:[%s5434_s26 + $0xf58] sm:$0xff]  ;;  %v4664_v41 = vcombine.high %v568_v35, %v576_v36  ;;  %v4663_v47 = vcombine.low %v568_v35, %v576_v36 }
 0x129   : > { %3676 = vmatpush1.bf16.msra.mxu0 %v4535_v43  ;;  %v4920_v42 = vcombine.high %v824_v37, %v832_v38  ;;  %v552_v43 = vld [vmem:[%s5434_s26 + $0x698] sm:$0xff]  ;;  %v4919_v48 = vcombine.low %v824_v37, %v832_v38 }
 0x12a   : > { %3677 = vmatprep.subr.bf16.mxu0 %v4520_v45  ;;  %v808_v45 = vld [vmem:[%s5434_s26 + $0xe98] sm:$0xff] }
 0x12b   : > { %3717 = vmatpush1.bf16.msra.mxu1 %v4791_v44  ;;  %v560_v44 = vld [vmem:[%s5434_s26 + $0x6d8] sm:$0xff] }
 0x12c   : > { %3718 = vmatprep.subr.bf16.mxu1 %v4776_v46  ;;  %v816_v46 = vld [vmem:[%s5434_s26 + $0xed8] sm:$0xff]  ;;  %v4648_v49 = vcombine.high %v552_v43, %v560_v44  ;;  %v4647_v57 = vcombine.low %v552_v43, %v560_v44 }
 0x12d   : > { %3678 = vmatpush1.bf16.msra.mxu0 %v4519_v51  ;;  %v4904_v50 = vcombine.high %v808_v45, %v816_v46  ;;  %v536_v51 = vld [vmem:[%s5434_s26 + $0x618] sm:$0xff]  ;;  %v4903_v58 = vcombine.low %v808_v45, %v816_v46 }
 0x12e   : > { %3679 = vmatprep.subr.bf16.mxu0 %v4504_v53  ;;  %v792_v53 = vld [vmem:[%s5434_s26 + $0xe18] sm:$0xff] }
 0x12f   : > { %3719 = vmatpush1.bf16.msra.mxu1 %v4775_v52  ;;  %v544_v52 = vld [vmem:[%s5434_s26 + $0x658] sm:$0xff] }
 0x130   : > { %3720 = vmatprep.subr.bf16.mxu1 %v4760_v56  ;;  %v800_v56 = vld [vmem:[%s5434_s26 + $0xe58] sm:$0xff]  ;;  %v4632_v61 = vcombine.high %v536_v51, %v544_v52  ;;  %v4631_v3 = vcombine.low %v536_v51, %v544_v52  ;;  %v689_v51 = vld [vmem:[%s5434_s26 + $0xae0] sm:$0xff] }
 0x131   : > { %3680 = vmatpush1.bf16.msra.mxu0 %v4503_v63  ;;  %v4888_v62 = vcombine.high %v792_v53, %v800_v56  ;;  %v520_v63 = vld [vmem:[%s5434_s26 + $0x598] sm:$0xff]  ;;  %v4887_v4 = vcombine.low %v792_v53, %v800_v56  ;;  %v323_v52 = vld [vmem:[%s5458_s29] sm:$0xff] }
 0x132   : > { %3681 = vmatprep.subr.bf16.mxu0 %v4488_v1  ;;  %v776_v1 = vld [vmem:[%s5434_s26 + $0xd98] sm:$0xff] }
 0x133   : > { %3721 = vmatpush1.bf16.msra.mxu1 %v4759_v0  ;;  %v528_v0 = vld [vmem:[%s5434_s26 + $0x5d8] sm:$0xff] }
 0x134   : > { %3722 = vmatprep.subr.bf16.mxu1 %v4744_v2  ;;  %v784_v2 = vld [vmem:[%s5434_s26 + $0xdd8] sm:$0xff]  ;;  %v4616_v5 = vcombine.high %v520_v63, %v528_v0  ;;  %v4615_v11 = vcombine.low %v520_v63, %v528_v0  ;;  %v324_v63 = vld [vmem:[%s5458_s29 + $0x8] sm:$0xff] }
 0x135   : > { %3682 = vmatpush1.bf16.msra.mxu0 %v4487_v7  ;;  %v4872_v6 = vcombine.high %v776_v1, %v784_v2  ;;  %v504_v7 = vld [vmem:[%s5434_s26 + $0x518] sm:$0xff]  ;;  %v4871_v12 = vcombine.low %v776_v1, %v784_v2  ;;  %v409_v2 = vld [vmem:[%s5434_s26 + $0x220] sm:$0xff] }
 0x136   : > { %3683 = vmatprep.subr.bf16.mxu0 %v4472_v9  ;;  %v760_v9 = vld [vmem:[%s5434_s26 + $0xd18] sm:$0xff] }
 0x137   : > { %3723 = vmatpush1.bf16.msra.mxu1 %v4743_v8  ;;  %v512_v8 = vld [vmem:[%s5434_s26 + $0x558] sm:$0xff] }
 0x138   : > { %3724 = vmatprep.subr.bf16.mxu1 %v4728_v10  ;;  %v768_v10 = vld [vmem:[%s5434_s26 + $0xd58] sm:$0xff]  ;;  %v4600_v13 = vcombine.high %v504_v7, %v512_v8  ;;  %v4599_v21 = vcombine.low %v504_v7, %v512_v8  ;;  %v665_v7 = vld [vmem:[%s5434_s26 + $0xa20] sm:$0xff] }
 0x139   : > { %3684 = vmatpush1.bf16.msra.mxu0 %v4471_v15  ;;  %v4856_v14 = vcombine.high %v760_v9, %v768_v10  ;;  %v488_v15 = vld [vmem:[%s5434_s26 + $0x498] sm:$0xff]  ;;  %v4855_v22 = vcombine.low %v760_v9, %v768_v10  ;;  %v673_v8 = vld [vmem:[%s5434_s26 + $0xa60] sm:$0xff] }
 0x13a   : > { %3685 = vmatprep.subr.bf16.mxu0 %v4456_v18  ;;  %v744_v18 = vld [vmem:[%s5434_s26 + $0xc98] sm:$0xff] }
 0x13b   : > { %3725 = vmatpush1.bf16.msra.mxu1 %v4727_v16  ;;  %v496_v16 = vld [vmem:[%s5434_s26 + $0x4d8] sm:$0xff] }
 0x13c   : > { %3726 = vmatprep.subr.bf16.mxu1 %v4712_v19  ;;  %v752_v19 = vld [vmem:[%s5434_s26 + $0xcd8] sm:$0xff]  ;;  %v4584_v23 = vcombine.high %v488_v15, %v496_v16  ;;  %v4583_v55 = vcombine.low %v488_v15, %v496_v16  ;;  %v4762_v16 = vcombine.high %v665_v7, %v673_v8 }
 0x13d   : > { %3686 = vmatpush1.bf16.msra.mxu0 %v4455_v25  ;;  %v4840_v24 = vcombine.high %v744_v18, %v752_v19  ;;  %v472_v25 = vld [vmem:[%s5434_s26 + $0x418] sm:$0xff]  ;;  %v4839_v28 = vcombine.low %v744_v18, %v752_v19  ;;  %v393_v18 = vld [vmem:[%s5434_s26 + $0x1a0] sm:$0xff] }
 0x13e   : > { %3687 = vmatprep.subr.bf16.mxu0 %v4440_v26  ;;  %v728_v26 = vld [vmem:[%s5434_s26 + $0xc18] sm:$0xff]  ;;  %v401_v19 = vld [vmem:[%s5434_s26 + $0x1e0] sm:$0xff] }
 0x13f   : > { %3727 = vmatpush1.bf16.msra.mxu1 %v4711_v54  ;;  %v480_v54 = vld [vmem:[%s5434_s26 + $0x458] sm:$0xff] }
 0x140   : > { %3728 = vmatprep.subr.bf16.mxu1 %v4696_v27  ;;  %v736_v27 = vld [vmem:[%s5434_s26 + $0xc58] sm:$0xff]  ;;  %v4568_v29 = vcombine.high %v472_v25, %v480_v54  ;;  %v4567_v35 = vcombine.low %v472_v25, %v480_v54  ;;  %v4490_v25 = vcombine.high %v393_v18, %v401_v19 }
 0x141   : > { %3688 = vmatpush1.bf16.msra.mxu0 %v4439_v31  ;;  %v4824_v30 = vcombine.high %v728_v26, %v736_v27  ;;  %v457_v31 = vld [vmem:[%s5434_s26 + $0x3a0] sm:$0xff]  ;;  %v4823_v36 = vcombine.low %v728_v26, %v736_v27 }
 0x142   : > { %3689 = vmatprep.subr.bf16.mxu0 %v4680_v33  ;;  %v713_v33 = vld [vmem:[%s5434_s26 + $0xba0] sm:$0xff] }
 0x143   : > { %3729 = vmatpush1.bf16.msra.mxu1 %v4695_v32  ;;  %v465_v32 = vld [vmem:[%s5434_s26 + $0x3e0] sm:$0xff] }
 0x144   : > { %3730 = vmatprep.subr.bf16.mxu1 %v4936_v34  ;;  %v721_v34 = vld [vmem:[%s5434_s26 + $0xbe0] sm:$0xff]  ;;  %v4554_v37 = vcombine.high %v457_v31, %v465_v32  ;;  %v4553_v43 = vcombine.low %v457_v31, %v465_v32 }
 0x145   : > { %3690 = vmatpush2.bf16.msra.mxu0 %v4679_v39  ;;  %v4810_v38 = vcombine.high %v713_v33, %v721_v34  ;;  %v441_v39 = vld [vmem:[%s5434_s26 + $0x320] sm:$0xff]  ;;  %v4809_v44 = vcombine.low %v713_v33, %v721_v34 }
 0x146   : > { %3691 = vmatprep.subr.bf16.mxu0 %v4664_v41  ;;  %v697_v41 = vld [vmem:[%s5434_s26 + $0xb20] sm:$0xff] }
 0x147   : > { %3731 = vmatpush2.bf16.msra.mxu1 %v4935_v40  ;;  %v449_v40 = vld [vmem:[%s5434_s26 + $0x360] sm:$0xff] }
 0x148   : > { %3732 = vmatprep.subr.bf16.mxu1 %v4920_v42  ;;  %v705_v42 = vld [vmem:[%s5434_s26 + $0xb60] sm:$0xff]  ;;  %v4538_v45 = vcombine.high %v441_v39, %v449_v40  ;;  %v4537_v56 = vcombine.low %v441_v39, %v449_v40 }
 0x149   : > { %3692 = vmatpush2.bf16.msra.mxu0 %v4663_v47  ;;  %v4794_v46 = vcombine.high %v697_v41, %v705_v42  ;;  %v425_v47 = vld [vmem:[%s5434_s26 + $0x2a0] sm:$0xff] }
 0x14a   : > { %3693 = vmatprep.subr.bf16.mxu0 %v4648_v49  ;;  %v377_v26 = vld [vmem:[%s5434_s26 + $0x120] sm:$0xff] }
 0x14b   : > { %3733 = vmatpush2.bf16.msra.mxu1 %v4919_v48  ;;  %v433_v48 = vld [vmem:[%s5434_s26 + $0x2e0] sm:$0xff] }
 0x14c   : > { %3734 = vmatprep.subr.bf16.mxu1 %v4904_v50  ;;  %v681_v50 = vld [vmem:[%s5434_s26 + $0xaa0] sm:$0xff]  ;;  %v4521_v10 = vcombine.low %v425_v47, %v433_v48 }
 0x14d   : > { %3694 = vmatpush2.bf16.msra.mxu0 %v4647_v57  ;;  %v4778_v1 = vcombine.high %v681_v50, %v689_v51  ;;  %v385_v27 = vld [vmem:[%s5434_s26 + $0x160] sm:$0xff] }
 0x14e   : > { %3695 = vmatprep.subr.bf16.mxu0 %v4632_v61  ;;  %v4793_v61 = vcombine.low %v697_v41, %v705_v42  ;;  %v4474_v31 = vcombine.high %v377_v26, %v385_v27  ;;  %v361_v33 = vld [vmem:[%s5434_s26 + $0xa0] sm:$0xff] }
 0x14f   : > { %3735 = vmatpush2.bf16.msra.mxu1 %v4903_v58  ;;  %v369_v34 = vld [vmem:[%s5434_s26 + $0xe0] sm:$0xff] }
 0x150   : > { %3736 = vmatprep.subr.bf16.mxu1 %v4888_v62  ;;  %v4522_v62 = vcombine.high %v425_v47, %v433_v48  ;;  %v4458_v39 = vcombine.high %v361_v33, %v369_v34  ;;  %v345_v41 = vld [vmem:[%s5434_s26 + $0x20] sm:$0xff] }
 0x151   : > { %3696 = vmatpush2.bf16.msra.mxu0 %v4631_v3  ;;  %v417_v3 = vld [vmem:[%s5434_s26 + $0x260] sm:$0xff] }
 0x152   : > { %3697 = vmatprep.subr.bf16.mxu0 %v4616_v5  ;;  %v353_v42 = vld [vmem:[%s5434_s26 + $0x60] sm:$0xff] }
 0x153   : > { %3737 = vmatpush2.bf16.msra.mxu1 %v4887_v4  ;;  %v4442_v47 = vcombine.high %v345_v41, %v353_v42 }
 0x154   : > { %3738 = vmatprep.subr.bf16.mxu1 %v4872_v6 }
 0x155   : > { %3698 = vmatpush2.bf16.msra.mxu0 %v4615_v11 }
 0x156   : > { %3699 = vmatprep.subr.bf16.mxu0 %v4600_v13  ;;  %v4777_v13 = vcombine.low %v681_v50, %v689_v51  ;;  %v593_v50 = vld [vmem:[%s5434_s26 + $0x7e0] sm:$0xff] }
 0x157   : > { %3739 = vmatpush2.bf16.msra.mxu1 %v4871_v12  ;;  %v841_v51 = vld [vmem:[%s5434_s26 + $0xfa0] sm:$0xff] }
 0x158   : > { %3740 = vmatprep.subr.bf16.mxu1 %v4856_v14  ;;  %v4506_v14 = vcombine.high %v409_v2, %v417_v3 }
 0x159   : > { %3700 = vmatpush2.bf16.msra.mxu0 %v4599_v21  ;;  %v649_v21 = vld [vmem:[%s5434_s26 + $0x9a0] sm:$0xff] }
 0x15a   : > { %3701 = vmatprep.subr.bf16.mxu0 %v4584_v23  ;;  %v4505_v23 = vcombine.low %v409_v2, %v417_v3 }
 0x15b   : > { %3741 = vmatpush2.bf16.msra.mxu1 %v4855_v22  ;;  %v657_v22 = vld [vmem:[%s5434_s26 + $0x9e0] sm:$0xff] }
 0x15c   : > { %3742 = vmatprep.subr.bf16.mxu1 %v4840_v24  ;;  %v4761_v24 = vcombine.low %v665_v7, %v673_v8  ;;  %v4746_v54 = vcombine.high %v649_v21, %v657_v22  ;;  %v809_v7 = vld [vmem:[%s5434_s26 + $0xea0] sm:$0xff] }
 0x15d   : > { %3702 = vmatpush2.bf16.msra.mxu0 %v4583_v55  ;;  %v633_v55 = vld [vmem:[%s5434_s26 + $0x920] sm:$0xff] }
 0x15e   : > { %3703 = vmatprep.subr.bf16.mxu0 %v4568_v29  ;;  %v4489_v29 = vcombine.low %v393_v18, %v401_v19  ;;  %v817_v8 = vld [vmem:[%s5434_s26 + $0xee0] sm:$0xff] }
 0x15f   : > { %3743 = vmatpush2.bf16.msra.mxu1 %v4839_v28  ;;  %v641_v28 = vld [vmem:[%s5434_s26 + $0x960] sm:$0xff]  ;;  %v4905_v19 = vcombine.low %v809_v7, %v817_v8 }
 0x160   : > { %3744 = vmatprep.subr.bf16.mxu1 %v4824_v30  ;;  %v4745_v30 = vcombine.low %v649_v21, %v657_v22  ;;  %v4730_v32 = vcombine.high %v633_v55, %v641_v28 }
 0x161   : > { %3704 = vmatpush2.bf16.msra.mxu0 %v4567_v35  ;;  %v617_v35 = vld [vmem:[%s5434_s26 + $0x8a0] sm:$0xff] }
 0x162   : > { %3755 = vmatprep.subr.bf16.mxu0 %v4554_v37  ;;  %v4473_v37 = vcombine.low %v377_v26, %v385_v27 }
 0x163   : > { %3745 = vmatpush2.bf16.msra.mxu1 %v4823_v36  ;;  %v625_v36 = vld [vmem:[%s5434_s26 + $0x8e0] sm:$0xff] }
 0x164   : > { %3796 = vmatprep.subr.bf16.mxu1 %v4810_v38  ;;  %v3461_v49 = vpop.f32.mrf.mxu0  ;;  %3706 = vmatmul.mubr.bf16.vlgmr.msra.gmra.mxu0 %v5565_v17  ;;  %v4729_v38 = vcombine.low %v633_v55, %v641_v28  ;;  %v4714_v40 = vcombine.high %v617_v35, %v625_v36 }
 0x165   : > { %3756 = vmatpush1.bf16.msra.mxu0 %v4553_v43  ;;  %3787 = vmatprep.mubr.bf16.mxu0 %v5515_v59  ;;  %v601_v43 = vld [vmem:[%s5434_s26 + $0x820] sm:$0xff] }
 0x166   : > { %v3502_v53 = vpop.f32.mrf.mxu1  ;;  %3747 = vmatmul.mubr.bf16.vlgmr.msra.gmra.mxu1 %v5571_v20  ;;  %v3463_v58 = vpop.f32.mrf.mxu0  ;;  %3757 = vmatprep.subr.bf16.mxu0 %v4538_v45  ;;  %v4457_v45 = vcombine.low %v361_v33, %v369_v34 }
 0x167   : > { %v3503_v57 = vadd.f32 %v3502_v53, %v3461_v49  ;;  %3797 = vmatpush1.bf16.msra.mxu1 %v4809_v44  ;;  %3828 = vmatprep.mubr.bf16.mxu1 %v5519_v60  ;;  %v609_v44 = vld [vmem:[%s5434_s26 + $0x860] sm:$0xff]  ;;  %v4441_v53 = vcombine.low %v345_v41, %v353_v42 }
 0x168   : > { %v3504_v0 = vpop.f32.mrf.mxu1  ;;  %3798 = vmatprep.subr.bf16.mxu1 %v4794_v46  ;;  %v3465_v6 = vpop.f32.mrf.mxu0  ;;  %v4713_v46 = vcombine.low %v617_v35, %v625_v36  ;;  %v4698_v48 = vcombine.high %v601_v43, %v609_v44  ;;  %v585_v49 = vld [vmem:[%s5434_s26 + $0x7a0] sm:$0xff] }
 0x169   : > { %v4083_v4 = vadd.f32 %v3503_v57, %v323_v52  ;;  %v3505_v5 = vadd.f32 %v3504_v0, %v3463_v58  ;;  %3758 = vmatpush1.bf16.msra.mxu0 %v4537_v56  ;;  %v849_v52 = vld [vmem:[%s5434_s26 + $0xfe0] sm:$0xff]  ;;  %v4697_v56 = vcombine.low %v601_v43, %v609_v44  ;;  %v4682_v57 = vcombine.high %v585_v49, %v593_v50 }
 0x16a   : > { %v3506_v9 = vpop.f32.mrf.mxu1  ;;  %v3466_v12 = vpop.f32.mrf.mxu0  ;;  %3759 = vmatprep.subr.bf16.mxu0 %v4522_v62  ;;  %v4938_v58 = vcombine.high %v841_v51, %v849_v52  ;;  %v577_v62 = vld [vmem:[%s5434_s26 + $0x760] sm:$0xff]  ;;  %v4937_v2 = vcombine.low %v841_v51, %v849_v52 }
 0x16b   : > { %4099 = vst [vmem:[%s5458_s29] sm:$0xff] %v4083_v4  ;;  %v4084_v11 = vadd.f32 %v3505_v5, %v324_v63  ;;  %3799 = vmatpush1.bf16.msra.mxu1 %v4793_v61  ;;  %v569_v61 = vld [vmem:[%s5434_s26 + $0x720] sm:$0xff]  ;;  %v4906_v12 = vcombine.high %v809_v7, %v817_v8 }
 0x16c   : > { %v3507_v15 = vpop.f32.mrf.mxu1  ;;  %3800 = vmatprep.subr.bf16.mxu1 %v4778_v1  ;;  %v825_v63 = vld [vmem:[%s5434_s26 + $0xf20] sm:$0xff]  ;;  %v4681_v1 = vcombine.low %v585_v49, %v593_v50  ;;  %v4666_v3 = vcombine.high %v569_v61, %v577_v62  ;;  %v4665_v9 = vcombine.low %v569_v61, %v577_v62 }
 0x16d   : > { %4100 = vst [vmem:[%s5458_s29 + $0x8] sm:$0xff] %v4084_v11  ;;  %3760 = vmatpush1.bf16.msra.mxu0 %v4521_v10  ;;  %v833_v0 = vld [vmem:[%s5434_s26 + $0xf60] sm:$0xff] }
 0x16e   : > { %3761 = vmatprep.subr.bf16.mxu0 %v4506_v14  ;;  %v4922_v4 = vcombine.high %v825_v63, %v833_v0  ;;  %v553_v5 = vld [vmem:[%s5434_s26 + $0x6a0] sm:$0xff]  ;;  %v4921_v10 = vcombine.low %v825_v63, %v833_v0 }
 0x16f   : > { %3801 = vmatpush1.bf16.msra.mxu1 %v4777_v13  ;;  %v561_v6 = vld [vmem:[%s5434_s26 + $0x6e0] sm:$0xff] }
 0x170   : > { %3802 = vmatprep.subr.bf16.mxu1 %v4762_v16  ;;  %v4650_v11 = vcombine.high %v553_v5, %v561_v6  ;;  %v537_v13 = vld [vmem:[%s5434_s26 + $0x620] sm:$0xff]  ;;  %v4649_v18 = vcombine.low %v553_v5, %v561_v6 }
 0x171   : > { %3762 = vmatpush1.bf16.msra.mxu0 %v4505_v23  ;;  %v545_v14 = vld [vmem:[%s5434_s26 + $0x660] sm:$0xff] }
 0x172   : > { %3763 = vmatprep.subr.bf16.mxu0 %v4490_v25  ;;  %v793_v15 = vld [vmem:[%s5434_s26 + $0xe20] sm:$0xff]  ;;  %v4634_v21 = vcombine.high %v537_v13, %v545_v14  ;;  %v4633_v26 = vcombine.low %v537_v13, %v545_v14  ;;  %v690_v13 = vld [vmem:[%s5434_s26 + $0xae8] sm:$0xff]  ;;  %v325_v14 = vld [vmem:[%s5458_s29 + $0x10] sm:$0xff] }
 0x173   : > { %3803 = vmatpush1.bf16.msra.mxu1 %v4761_v24  ;;  %v801_v16 = vld [vmem:[%s5434_s26 + $0xe60] sm:$0xff] }
 0x174   : > { %3804 = vmatprep.subr.bf16.mxu1 %v4746_v54  ;;  %v4890_v22 = vcombine.high %v793_v15, %v801_v16  ;;  %v521_v23 = vld [vmem:[%s5434_s26 + $0x5a0] sm:$0xff]  ;;  %v4889_v27 = vcombine.low %v793_v15, %v801_v16 }
 0x175   : > { %3764 = vmatpush1.bf16.msra.mxu0 %v4489_v29  ;;  %v529_v24 = vld [vmem:[%s5434_s26 + $0x5e0] sm:$0xff] }
 0x176   : > { %3765 = vmatprep.subr.bf16.mxu0 %v4474_v31  ;;  %v777_v25 = vld [vmem:[%s5434_s26 + $0xda0] sm:$0xff]  ;;  %v4618_v55 = vcombine.high %v521_v23, %v529_v24  ;;  %v4617_v33 = vcombine.low %v521_v23, %v529_v24  ;;  %v326_v23 = vld [vmem:[%s5458_s29 + $0x18] sm:$0xff] }
 0x177   : > { %3805 = vmatpush1.bf16.msra.mxu1 %v4745_v30  ;;  %v785_v54 = vld [vmem:[%s5434_s26 + $0xde0] sm:$0xff] }
 0x178   : > { %3806 = vmatprep.subr.bf16.mxu1 %v4730_v32  ;;  %v4874_v28 = vcombine.high %v777_v25, %v785_v54  ;;  %v505_v29 = vld [vmem:[%s5434_s26 + $0x520] sm:$0xff]  ;;  %v4873_v34 = vcombine.low %v777_v25, %v785_v54  ;;  %v410_v54 = vld [vmem:[%s5434_s26 + $0x228] sm:$0xff] }
 0x179   : > { %3766 = vmatpush1.bf16.msra.mxu0 %v4473_v37  ;;  %v513_v30 = vld [vmem:[%s5434_s26 + $0x560] sm:$0xff] }
 0x17a   : > { %3767 = vmatprep.subr.bf16.mxu0 %v4458_v39  ;;  %v761_v31 = vld [vmem:[%s5434_s26 + $0xd20] sm:$0xff]  ;;  %v4602_v35 = vcombine.high %v505_v29, %v513_v30  ;;  %v4601_v41 = vcombine.low %v505_v29, %v513_v30  ;;  %v666_v29 = vld [vmem:[%s5434_s26 + $0xa28] sm:$0xff] }
 0x17b   : > { %3807 = vmatpush1.bf16.msra.mxu1 %v4729_v38  ;;  %v769_v32 = vld [vmem:[%s5434_s26 + $0xd60] sm:$0xff]  ;;  %v674_v30 = vld [vmem:[%s5434_s26 + $0xa68] sm:$0xff] }
 0x17c   : > { %3808 = vmatprep.subr.bf16.mxu1 %v4714_v40  ;;  %v4858_v36 = vcombine.high %v761_v31, %v769_v32  ;;  %v489_v37 = vld [vmem:[%s5434_s26 + $0x4a0] sm:$0xff]  ;;  %v4857_v42 = vcombine.low %v761_v31, %v769_v32 }
 0x17d   : > { %3768 = vmatpush1.bf16.msra.mxu0 %v4457_v45  ;;  %v497_v38 = vld [vmem:[%s5434_s26 + $0x4e0] sm:$0xff] }
 0x17e   : > { %3769 = vmatprep.subr.bf16.mxu0 %v4442_v47  ;;  %v745_v39 = vld [vmem:[%s5434_s26 + $0xca0] sm:$0xff]  ;;  %v4586_v43 = vcombine.high %v489_v37, %v497_v38  ;;  %v4585_v49 = vcombine.low %v489_v37, %v497_v38  ;;  %v4764_v38 = vcombine.high %v666_v29, %v674_v30 }
 0x17f   : > { %3809 = vmatpush1.bf16.msra.mxu1 %v4713_v46  ;;  %v753_v40 = vld [vmem:[%s5434_s26 + $0xce0] sm:$0xff] }
 0x180   : > { %3810 = vmatprep.subr.bf16.mxu1 %v4698_v48  ;;  %v4842_v44 = vcombine.high %v745_v39, %v753_v40  ;;  %v473_v45 = vld [vmem:[%s5434_s26 + $0x420] sm:$0xff]  ;;  %v4841_v50 = vcombine.low %v745_v39, %v753_v40  ;;  %v394_v39 = vld [vmem:[%s5434_s26 + $0x1a8] sm:$0xff] }
 0x181   : > { %3770 = vmatpush1.bf16.msra.mxu0 %v4441_v53  ;;  %v481_v46 = vld [vmem:[%s5434_s26 + $0x460] sm:$0xff]  ;;  %v458_v53 = vld [vmem:[%s5434_s26 + $0x3a8] sm:$0xff] }
 0x182   : > { %3771 = vmatprep.subr.bf16.mxu0 %v4682_v57  ;;  %v729_v47 = vld [vmem:[%s5434_s26 + $0xc20] sm:$0xff]  ;;  %v4570_v51 = vcombine.high %v473_v45, %v481_v46  ;;  %v714_v57 = vld [vmem:[%s5434_s26 + $0xba8] sm:$0xff]  ;;  %v4569_v61 = vcombine.low %v473_v45, %v481_v46 }
 0x183   : > { %3811 = vmatpush1.bf16.msra.mxu1 %v4697_v56  ;;  %v737_v48 = vld [vmem:[%s5434_s26 + $0xc60] sm:$0xff]  ;;  %v466_v56 = vld [vmem:[%s5434_s26 + $0x3e8] sm:$0xff] }
 0x184   : > { %3812 = vmatprep.subr.bf16.mxu1 %v4938_v58  ;;  %v4826_v52 = vcombine.high %v729_v47, %v737_v48  ;;  %v722_v58 = vld [vmem:[%s5434_s26 + $0xbe8] sm:$0xff]  ;;  %v4825_v62 = vcombine.low %v729_v47, %v737_v48  ;;  %v4556_v63 = vcombine.high %v458_v53, %v466_v56  ;;  %v4555_v5 = vcombine.low %v458_v53, %v466_v56 }
 0x185   : > { %3772 = vmatpush2.bf16.msra.mxu0 %v4681_v1  ;;  %v4812_v0 = vcombine.high %v714_v57, %v722_v58  ;;  %v442_v1 = vld [vmem:[%s5434_s26 + $0x328] sm:$0xff]  ;;  %v4811_v6 = vcombine.low %v714_v57, %v722_v58 }
 0x186   : > { %3773 = vmatprep.subr.bf16.mxu0 %v4666_v3  ;;  %v698_v3 = vld [vmem:[%s5434_s26 + $0xb28] sm:$0xff] }
 0x187   : > { %3813 = vmatpush2.bf16.msra.mxu1 %v4937_v2  ;;  %v450_v2 = vld [vmem:[%s5434_s26 + $0x368] sm:$0xff] }
 0x188   : > { %3814 = vmatprep.subr.bf16.mxu1 %v4922_v4  ;;  %v706_v4 = vld [vmem:[%s5434_s26 + $0xb68] sm:$0xff]  ;;  %v4540_v7 = vcombine.high %v442_v1, %v450_v2  ;;  %v4539_v16 = vcombine.low %v442_v1, %v450_v2 }
 0x189   : > { %3774 = vmatpush2.bf16.msra.mxu0 %v4665_v9  ;;  %v4796_v8 = vcombine.high %v698_v3, %v706_v4  ;;  %v426_v9 = vld [vmem:[%s5434_s26 + $0x2a8] sm:$0xff] }
 0x18a   : > { %3775 = vmatprep.subr.bf16.mxu0 %v4650_v11  ;;  %v402_v40 = vld [vmem:[%s5434_s26 + $0x1e8] sm:$0xff] }
 0x18b   : > { %3815 = vmatpush2.bf16.msra.mxu1 %v4921_v10  ;;  %v434_v10 = vld [vmem:[%s5434_s26 + $0x2e8] sm:$0xff]  ;;  %v4492_v45 = vcombine.high %v394_v39, %v402_v40 }
 0x18c   : > { %3816 = vmatprep.subr.bf16.mxu1 %v4906_v12  ;;  %v682_v12 = vld [vmem:[%s5434_s26 + $0xaa8] sm:$0xff]  ;;  %v4523_v32 = vcombine.low %v426_v9, %v434_v10 }
 0x18d   : > { %3776 = vmatpush2.bf16.msra.mxu0 %v4649_v18  ;;  %v4780_v25 = vcombine.high %v682_v12, %v690_v13  ;;  %v378_v47 = vld [vmem:[%s5434_s26 + $0x128] sm:$0xff] }
 0x18e   : > { %3777 = vmatprep.subr.bf16.mxu0 %v4634_v21  ;;  %v4795_v21 = vcombine.low %v698_v3, %v706_v4  ;;  %v386_v48 = vld [vmem:[%s5434_s26 + $0x168] sm:$0xff] }
 0x18f   : > { %3817 = vmatpush2.bf16.msra.mxu1 %v4905_v19  ;;  %v4476_v53 = vcombine.high %v378_v47, %v386_v48  ;;  %v362_v57 = vld [vmem:[%s5434_s26 + $0xa8] sm:$0xff] }
 0x190   : > { %3818 = vmatprep.subr.bf16.mxu1 %v4890_v22  ;;  %v4524_v22 = vcombine.high %v426_v9, %v434_v10  ;;  %v370_v58 = vld [vmem:[%s5434_s26 + $0xe8] sm:$0xff] }
 0x191   : > { %3778 = vmatpush2.bf16.msra.mxu0 %v4633_v26  ;;  %v418_v26 = vld [vmem:[%s5434_s26 + $0x268] sm:$0xff]  ;;  %v4460_v1 = vcombine.high %v362_v57, %v370_v58 }
 0x192   : > { %3779 = vmatprep.subr.bf16.mxu0 %v4618_v55  ;;  %v346_v3 = vld [vmem:[%s5434_s26 + $0x28] sm:$0xff] }
 0x193   : > { %3819 = vmatpush2.bf16.msra.mxu1 %v4889_v27  ;;  %v354_v4 = vld [vmem:[%s5434_s26 + $0x68] sm:$0xff] }
 0x194   : > { %3820 = vmatprep.subr.bf16.mxu1 %v4874_v28  ;;  %v4444_v9 = vcombine.high %v346_v3, %v354_v4 }
 0x195   : > { %3780 = vmatpush2.bf16.msra.mxu0 %v4617_v33 }
 0x196   : > { %3781 = vmatprep.subr.bf16.mxu0 %v4602_v35  ;;  %v4779_v35 = vcombine.low %v682_v12, %v690_v13  ;;  %v594_v12 = vld [vmem:[%s5434_s26 + $0x7e8] sm:$0xff] }
 0x197   : > { %3821 = vmatpush2.bf16.msra.mxu1 %v4873_v34  ;;  %v842_v13 = vld [vmem:[%s5434_s26 + $0xfa8] sm:$0xff] }
 0x198   : > { %3822 = vmatprep.subr.bf16.mxu1 %v4858_v36  ;;  %v4508_v36 = vcombine.high %v410_v54, %v418_v26 }
 0x199   : > { %3782 = vmatpush2.bf16.msra.mxu0 %v4601_v41  ;;  %v650_v41 = vld [vmem:[%s5434_s26 + $0x9a8] sm:$0xff] }
 0x19a   : > { %3783 = vmatprep.subr.bf16.mxu0 %v4586_v43  ;;  %v4507_v43 = vcombine.low %v410_v54, %v418_v26 }
 0x19b   : > { %3823 = vmatpush2.bf16.msra.mxu1 %v4857_v42  ;;  %v658_v42 = vld [vmem:[%s5434_s26 + $0x9e8] sm:$0xff] }
 0x19c   : > { %3824 = vmatprep.subr.bf16.mxu1 %v4842_v44  ;;  %v4763_v44 = vcombine.low %v666_v29, %v674_v30  ;;  %v4748_v46 = vcombine.high %v650_v41, %v658_v42  ;;  %v810_v29 = vld [vmem:[%s5434_s26 + $0xea8] sm:$0xff] }
 0x19d   : > { %3784 = vmatpush2.bf16.msra.mxu0 %v4585_v49  ;;  %v634_v49 = vld [vmem:[%s5434_s26 + $0x928] sm:$0xff] }
 0x19e   : > { %3785 = vmatprep.subr.bf16.mxu0 %v4570_v51  ;;  %v4491_v51 = vcombine.low %v394_v39, %v402_v40  ;;  %v818_v30 = vld [vmem:[%s5434_s26 + $0xee8] sm:$0xff] }
 0x19f   : > { %3825 = vmatpush2.bf16.msra.mxu1 %v4841_v50  ;;  %v642_v50 = vld [vmem:[%s5434_s26 + $0x968] sm:$0xff]  ;;  %v4907_v40 = vcombine.low %v810_v29, %v818_v30 }
 0x1a0   : > { %3826 = vmatprep.subr.bf16.mxu1 %v4826_v52  ;;  %v4747_v52 = vcombine.low %v650_v41, %v658_v42  ;;  %v4732_v56 = vcombine.high %v634_v49, %v642_v50 }
 0x1a1   : > { %3786 = vmatpush2.bf16.msra.mxu0 %v4569_v61  ;;  %v618_v61 = vld [vmem:[%s5434_s26 + $0x8a8] sm:$0xff] }
 0x1a2   : > { %3837 = vmatprep.subr.bf16.mxu0 %v4556_v63  ;;  %v4475_v63 = vcombine.low %v378_v47, %v386_v48 }
 0x1a3   : > { %3827 = vmatpush2.bf16.msra.mxu1 %v4825_v62  ;;  %v626_v62 = vld [vmem:[%s5434_s26 + $0x8e8] sm:$0xff] }
 0x1a4   : > { %3878 = vmatprep.subr.bf16.mxu1 %v4812_v0  ;;  %v3543_v11 = vpop.f32.mrf.mxu0  ;;  %3788 = vmatmul.mubr.bf16.vlgmr.msra.gmra.mxu0 %v5565_v17  ;;  %v4731_v0 = vcombine.low %v634_v49, %v642_v50  ;;  %v4716_v2 = vcombine.high %v618_v61, %v626_v62 }
 0x1a5   : > { %3838 = vmatpush1.bf16.msra.mxu0 %v4555_v5  ;;  %3869 = vmatprep.mubr.bf16.mxu0 %v5515_v59  ;;  %v602_v5 = vld [vmem:[%s5434_s26 + $0x828] sm:$0xff] }
 0x1a6   : > { %v3584_v15 = vpop.f32.mrf.mxu1  ;;  %3829 = vmatmul.mubr.bf16.vlgmr.msra.gmra.mxu1 %v5571_v20  ;;  %v3545_v19 = vpop.f32.mrf.mxu0  ;;  %3839 = vmatprep.subr.bf16.mxu0 %v4540_v7  ;;  %v4459_v7 = vcombine.low %v362_v57, %v370_v58 }
 0x1a7   : > { %v3585_v18 = vadd.f32 %v3584_v15, %v3543_v11  ;;  %3879 = vmatpush1.bf16.msra.mxu1 %v4811_v6  ;;  %3910 = vmatprep.mubr.bf16.mxu1 %v5519_v60  ;;  %v610_v6 = vld [vmem:[%s5434_s26 + $0x868] sm:$0xff]  ;;  %v4443_v15 = vcombine.low %v346_v3, %v354_v4 }
 0x1a8   : > { %v3586_v24 = vpop.f32.mrf.mxu1  ;;  %3880 = vmatprep.subr.bf16.mxu1 %v4796_v8  ;;  %v3547_v28 = vpop.f32.mrf.mxu0  ;;  %v4715_v8 = vcombine.low %v618_v61, %v626_v62  ;;  %v4700_v10 = vcombine.high %v602_v5, %v610_v6  ;;  %v586_v11 = vld [vmem:[%s5434_s26 + $0x7a8] sm:$0xff] }
 0x1a9   : > { %v4085_v27 = vadd.f32 %v3585_v18, %v325_v14  ;;  %v3587_v55 = vadd.f32 %v3586_v24, %v3545_v19  ;;  %3840 = vmatpush1.bf16.msra.mxu0 %v4539_v16  ;;  %v850_v14 = vld [vmem:[%s5434_s26 + $0xfe8] sm:$0xff]  ;;  %v4699_v16 = vcombine.low %v602_v5, %v610_v6  ;;  %v4684_v18 = vcombine.high %v586_v11, %v594_v12 }
 0x1aa   : > { %v3588_v31 = vpop.f32.mrf.mxu1  ;;  %v3548_v34 = vpop.f32.mrf.mxu0  ;;  %3841 = vmatprep.subr.bf16.mxu0 %v4524_v22  ;;  %v4940_v19 = vcombine.high %v842_v13, %v850_v14  ;;  %v578_v22 = vld [vmem:[%s5434_s26 + $0x768] sm:$0xff]  ;;  %v4939_v54 = vcombine.low %v842_v13, %v850_v14 }
 0x1ab   : > { %4101 = vst [vmem:[%s5458_s29 + $0x10] sm:$0xff] %v4085_v27  ;;  %v4086_v33 = vadd.f32 %v3587_v55, %v326_v23  ;;  %3881 = vmatpush1.bf16.msra.mxu1 %v4795_v21  ;;  %v570_v21 = vld [vmem:[%s5434_s26 + $0x728] sm:$0xff]  ;;  %v4908_v34 = vcombine.high %v810_v29, %v818_v30 }
 0x1ac   : > { %v3589_v37 = vpop.f32.mrf.mxu1  ;;  %3882 = vmatprep.subr.bf16.mxu1 %v4780_v25  ;;  %v826_v23 = vld [vmem:[%s5434_s26 + $0xf28] sm:$0xff]  ;;  %v4683_v25 = vcombine.low %v586_v11, %v594_v12  ;;  %v4668_v26 = vcombine.high %v570_v21, %v578_v22  ;;  %v4667_v31 = vcombine.low %v570_v21, %v578_v22 }
 0x1ad   : > { %4102 = vst [vmem:[%s5458_s29 + $0x18] sm:$0xff] %v4086_v33  ;;  %3842 = vmatpush1.bf16.msra.mxu0 %v4523_v32  ;;  %v834_v24 = vld [vmem:[%s5434_s26 + $0xf68] sm:$0xff] }
 0x1ae   : > { %3843 = vmatprep.subr.bf16.mxu0 %v4508_v36  ;;  %v4924_v27 = vcombine.high %v826_v23, %v834_v24  ;;  %v554_v55 = vld [vmem:[%s5434_s26 + $0x6a8] sm:$0xff]  ;;  %v4923_v32 = vcombine.low %v826_v23, %v834_v24 }
 0x1af   : > { %3883 = vmatpush1.bf16.msra.mxu1 %v4779_v35  ;;  %v562_v28 = vld [vmem:[%s5434_s26 + $0x6e8] sm:$0xff] }
 0x1b0   : > { %3884 = vmatprep.subr.bf16.mxu1 %v4764_v38  ;;  %v4652_v33 = vcombine.high %v554_v55, %v562_v28  ;;  %v538_v35 = vld [vmem:[%s5434_s26 + $0x628] sm:$0xff]  ;;  %v4651_v39 = vcombine.low %v554_v55, %v562_v28 }
 0x1b1   : > { %3844 = vmatpush1.bf16.msra.mxu0 %v4507_v43  ;;  %v546_v36 = vld [vmem:[%s5434_s26 + $0x668] sm:$0xff] }
 0x1b2   : > { %3845 = vmatprep.subr.bf16.mxu0 %v4492_v45  ;;  %v794_v37 = vld [vmem:[%s5434_s26 + $0xe28] sm:$0xff]  ;;  %v4636_v41 = vcombine.high %v538_v35, %v546_v36  ;;  %v4635_v47 = vcombine.low %v538_v35, %v546_v36  ;;  %v691_v35 = vld [vmem:[%s5434_s26 + $0xaf0] sm:$0xff]  ;;  %v327_v36 = vld [vmem:[%s5458_s29 + $0x20] sm:$0xff] }
 0x1b3   : > { %3885 = vmatpush1.bf16.msra.mxu1 %v4763_v44  ;;  %v802_v38 = vld [vmem:[%s5434_s26 + $0xe68] sm:$0xff] }
 0x1b4   : > { %3886 = vmatprep.subr.bf16.mxu1 %v4748_v46  ;;  %v4892_v42 = vcombine.high %v794_v37, %v802_v38  ;;  %v522_v43 = vld [vmem:[%s5434_s26 + $0x5a8] sm:$0xff]  ;;  %v4891_v48 = vcombine.low %v794_v37, %v802_v38 }
 0x1b5   : > { %3846 = vmatpush1.bf16.msra.mxu0 %v4491_v51  ;;  %v530_v44 = vld [vmem:[%s5434_s26 + $0x5e8] sm:$0xff] }
 0x1b6   : > { %3847 = vmatprep.subr.bf16.mxu0 %v4476_v53  ;;  %v778_v45 = vld [vmem:[%s5434_s26 + $0xda8] sm:$0xff]  ;;  %v4620_v49 = vcombine.high %v522_v43, %v530_v44  ;;  %v4619_v57 = vcombine.low %v522_v43, %v530_v44 }
 0x1b7   : > { %3887 = vmatpush1.bf16.msra.mxu1 %v4747_v52  ;;  %v786_v46 = vld [vmem:[%s5434_s26 + $0xde8] sm:$0xff] }
 0x1b8   : > { %3888 = vmatprep.subr.bf16.mxu1 %v4732_v56  ;;  %v4876_v50 = vcombine.high %v778_v45, %v786_v46  ;;  %v506_v51 = vld [vmem:[%s5434_s26 + $0x528] sm:$0xff]  ;;  %v4875_v58 = vcombine.low %v778_v45, %v786_v46  ;;  %v411_v46 = vld [vmem:[%s5434_s26 + $0x230] sm:$0xff] }
 0x1b9   : > { %3848 = vmatpush1.bf16.msra.mxu0 %v4475_v63  ;;  %v514_v52 = vld [vmem:[%s5434_s26 + $0x568] sm:$0xff] }
 0x1ba   : > { %3849 = vmatprep.subr.bf16.mxu0 %v4460_v1  ;;  %v762_v53 = vld [vmem:[%s5434_s26 + $0xd28] sm:$0xff]  ;;  %v4604_v61 = vcombine.high %v506_v51, %v514_v52  ;;  %v4603_v3 = vcombine.low %v506_v51, %v514_v52  ;;  %v667_v51 = vld [vmem:[%s5434_s26 + $0xa30] sm:$0xff] }
 0x1bb   : > { %3889 = vmatpush1.bf16.msra.mxu1 %v4731_v0  ;;  %v770_v56 = vld [vmem:[%s5434_s26 + $0xd68] sm:$0xff]  ;;  %v675_v52 = vld [vmem:[%s5434_s26 + $0xa70] sm:$0xff] }
 0x1bc   : > { %3890 = vmatprep.subr.bf16.mxu1 %v4716_v2  ;;  %v4860_v62 = vcombine.high %v762_v53, %v770_v56  ;;  %v490_v63 = vld [vmem:[%s5434_s26 + $0x4a8] sm:$0xff]  ;;  %v4859_v4 = vcombine.low %v762_v53, %v770_v56 }
 0x1bd   : > { %3850 = vmatpush1.bf16.msra.mxu0 %v4459_v7  ;;  %v498_v0 = vld [vmem:[%s5434_s26 + $0x4e8] sm:$0xff] }
 0x1be   : > { %3851 = vmatprep.subr.bf16.mxu0 %v4444_v9  ;;  %v746_v1 = vld [vmem:[%s5434_s26 + $0xca8] sm:$0xff]  ;;  %v4588_v5 = vcombine.high %v490_v63, %v498_v0  ;;  %v4587_v11 = vcombine.low %v490_v63, %v498_v0  ;;  %v4766_v0 = vcombine.high %v667_v51, %v675_v52 }
 0x1bf   : > { %3891 = vmatpush1.bf16.msra.mxu1 %v4715_v8  ;;  %v754_v2 = vld [vmem:[%s5434_s26 + $0xce8] sm:$0xff] }
 0x1c0   : > { %3892 = vmatprep.subr.bf16.mxu1 %v4700_v10  ;;  %v4844_v6 = vcombine.high %v746_v1, %v754_v2  ;;  %v474_v7 = vld [vmem:[%s5434_s26 + $0x428] sm:$0xff]  ;;  %v4843_v12 = vcombine.low %v746_v1, %v754_v2  ;;  %v395_v1 = vld [vmem:[%s5434_s26 + $0x1b0] sm:$0xff] }
 0x1c1   : > { %3852 = vmatpush1.bf16.msra.mxu0 %v4443_v15  ;;  %v482_v8 = vld [vmem:[%s5434_s26 + $0x468] sm:$0xff]  ;;  %v459_v15 = vld [vmem:[%s5434_s26 + $0x3b0] sm:$0xff] }
 0x1c2   : > { %3853 = vmatprep.subr.bf16.mxu0 %v4684_v18  ;;  %v730_v9 = vld [vmem:[%s5434_s26 + $0xc28] sm:$0xff]  ;;  %v4572_v13 = vcombine.high %v474_v7, %v482_v8  ;;  %v715_v18 = vld [vmem:[%s5434_s26 + $0xbb0] sm:$0xff]  ;;  %v4571_v21 = vcombine.low %v474_v7, %v482_v8 }
 0x1c3   : > { %3893 = vmatpush1.bf16.msra.mxu1 %v4699_v16  ;;  %v738_v10 = vld [vmem:[%s5434_s26 + $0xc68] sm:$0xff]  ;;  %v467_v16 = vld [vmem:[%s5434_s26 + $0x3f0] sm:$0xff] }
 0x1c4   : > { %3894 = vmatprep.subr.bf16.mxu1 %v4940_v19  ;;  %v4828_v14 = vcombine.high %v730_v9, %v738_v10  ;;  %v723_v19 = vld [vmem:[%s5434_s26 + $0xbf0] sm:$0xff]  ;;  %v4827_v22 = vcombine.low %v730_v9, %v738_v10  ;;  %v4558_v23 = vcombine.high %v459_v15, %v467_v16  ;;  %v4557_v55 = vcombine.low %v459_v15, %v467_v16  ;;  %v328_v43 = vld [vmem:[%s5458_s29 + $0x28] sm:$0xff] }
 0x1c5   : > { %3854 = vmatpush2.bf16.msra.mxu0 %v4683_v25  ;;  %v4814_v24 = vcombine.high %v715_v18, %v723_v19  ;;  %v443_v25 = vld [vmem:[%s5434_s26 + $0x330] sm:$0xff]  ;;  %v4813_v28 = vcombine.low %v715_v18, %v723_v19 }
 0x1c6   : > { %3855 = vmatprep.subr.bf16.mxu0 %v4668_v26  ;;  %v699_v26 = vld [vmem:[%s5434_s26 + $0xb30] sm:$0xff] }
 0x1c7   : > { %3895 = vmatpush2.bf16.msra.mxu1 %v4939_v54  ;;  %v451_v54 = vld [vmem:[%s5434_s26 + $0x370] sm:$0xff] }
 0x1c8   : > { %3896 = vmatprep.subr.bf16.mxu1 %v4924_v27  ;;  %v707_v27 = vld [vmem:[%s5434_s26 + $0xb70] sm:$0xff]  ;;  %v4542_v29 = vcombine.high %v443_v25, %v451_v54  ;;  %v4541_v38 = vcombine.low %v443_v25, %v451_v54 }
 0x1c9   : > { %3856 = vmatpush2.bf16.msra.mxu0 %v4667_v31  ;;  %v4798_v30 = vcombine.high %v699_v26, %v707_v27  ;;  %v427_v31 = vld [vmem:[%s5434_s26 + $0x2b0] sm:$0xff] }
 0x1ca   : > { %3857 = vmatprep.subr.bf16.mxu0 %v4652_v33  ;;  %v403_v2 = vld [vmem:[%s5434_s26 + $0x1f0] sm:$0xff] }
 0x1cb   : > { %3897 = vmatpush2.bf16.msra.mxu1 %v4923_v32  ;;  %v435_v32 = vld [vmem:[%s5434_s26 + $0x2f0] sm:$0xff]  ;;  %v4494_v7 = vcombine.high %v395_v1, %v403_v2 }
 0x1cc   : > { %3898 = vmatprep.subr.bf16.mxu1 %v4908_v34  ;;  %v683_v34 = vld [vmem:[%s5434_s26 + $0xab0] sm:$0xff]  ;;  %v4525_v56 = vcombine.low %v427_v31, %v435_v32 }
 0x1cd   : > { %3858 = vmatpush2.bf16.msra.mxu0 %v4651_v39  ;;  %v4782_v45 = vcombine.high %v683_v34, %v691_v35  ;;  %v379_v9 = vld [vmem:[%s5434_s26 + $0x130] sm:$0xff] }
 0x1ce   : > { %3859 = vmatprep.subr.bf16.mxu0 %v4636_v41  ;;  %v4797_v41 = vcombine.low %v699_v26, %v707_v27  ;;  %v387_v10 = vld [vmem:[%s5434_s26 + $0x170] sm:$0xff] }
 0x1cf   : > { %3899 = vmatpush2.bf16.msra.mxu1 %v4907_v40  ;;  %v4478_v15 = vcombine.high %v379_v9, %v387_v10  ;;  %v363_v18 = vld [vmem:[%s5434_s26 + $0xb0] sm:$0xff] }
 0x1d0   : > { %3900 = vmatprep.subr.bf16.mxu1 %v4892_v42  ;;  %v4526_v42 = vcombine.high %v427_v31, %v435_v32  ;;  %v371_v19 = vld [vmem:[%s5434_s26 + $0xf0] sm:$0xff] }
 0x1d1   : > { %3860 = vmatpush2.bf16.msra.mxu0 %v4635_v47  ;;  %v419_v47 = vld [vmem:[%s5434_s26 + $0x270] sm:$0xff]  ;;  %v4462_v25 = vcombine.high %v363_v18, %v371_v19 }
 0x1d2   : > { %3861 = vmatprep.subr.bf16.mxu0 %v4620_v49  ;;  %v347_v26 = vld [vmem:[%s5434_s26 + $0x30] sm:$0xff] }
 0x1d3   : > { %3901 = vmatpush2.bf16.msra.mxu1 %v4891_v48  ;;  %v355_v27 = vld [vmem:[%s5434_s26 + $0x70] sm:$0xff] }
 0x1d4   : > { %3902 = vmatprep.subr.bf16.mxu1 %v4876_v50  ;;  %v4446_v31 = vcombine.high %v347_v26, %v355_v27 }
 0x1d5   : > { %3862 = vmatpush2.bf16.msra.mxu0 %v4619_v57 }
 0x1d6   : > { %3863 = vmatprep.subr.bf16.mxu0 %v4604_v61  ;;  %v4781_v61 = vcombine.low %v683_v34, %v691_v35  ;;  %v595_v34 = vld [vmem:[%s5434_s26 + $0x7f0] sm:$0xff] }
 0x1d7   : > { %3903 = vmatpush2.bf16.msra.mxu1 %v4875_v58  ;;  %v843_v35 = vld [vmem:[%s5434_s26 + $0xfb0] sm:$0xff] }
 0x1d8   : > { %3904 = vmatprep.subr.bf16.mxu1 %v4860_v62  ;;  %v4510_v62 = vcombine.high %v411_v46, %v419_v47 }
 0x1d9   : > { %3864 = vmatpush2.bf16.msra.mxu0 %v4603_v3  ;;  %v651_v3 = vld [vmem:[%s5434_s26 + $0x9b0] sm:$0xff] }
 0x1da   : > { %3865 = vmatprep.subr.bf16.mxu0 %v4588_v5  ;;  %v4509_v5 = vcombine.low %v411_v46, %v419_v47 }
 0x1db   : > { %3905 = vmatpush2.bf16.msra.mxu1 %v4859_v4  ;;  %v659_v4 = vld [vmem:[%s5434_s26 + $0x9f0] sm:$0xff] }
 0x1dc   : > { %3906 = vmatprep.subr.bf16.mxu1 %v4844_v6  ;;  %v4765_v6 = vcombine.low %v667_v51, %v675_v52  ;;  %v4750_v8 = vcombine.high %v651_v3, %v659_v4  ;;  %v811_v51 = vld [vmem:[%s5434_s26 + $0xeb0] sm:$0xff] }
 0x1dd   : > { %3866 = vmatpush2.bf16.msra.mxu0 %v4587_v11  ;;  %v635_v11 = vld [vmem:[%s5434_s26 + $0x930] sm:$0xff] }
 0x1de   : > { %3867 = vmatprep.subr.bf16.mxu0 %v4572_v13  ;;  %v4493_v13 = vcombine.low %v395_v1, %v403_v2  ;;  %v819_v52 = vld [vmem:[%s5434_s26 + $0xef0] sm:$0xff] }
 0x1df   : > { %3907 = vmatpush2.bf16.msra.mxu1 %v4843_v12  ;;  %v643_v12 = vld [vmem:[%s5434_s26 + $0x970] sm:$0xff]  ;;  %v4909_v2 = vcombine.low %v811_v51, %v819_v52 }
 0x1e0   : > { %3908 = vmatprep.subr.bf16.mxu1 %v4828_v14  ;;  %v4749_v14 = vcombine.low %v651_v3, %v659_v4  ;;  %v4734_v16 = vcombine.high %v635_v11, %v643_v12 }
 0x1e1   : > { %3868 = vmatpush2.bf16.msra.mxu0 %v4571_v21  ;;  %v619_v21 = vld [vmem:[%s5434_s26 + $0x8b0] sm:$0xff] }
 0x1e2   : > { %3919 = vmatprep.subr.bf16.mxu0 %v4558_v23  ;;  %v4477_v23 = vcombine.low %v379_v9, %v387_v10 }
 0x1e3   : > { %3909 = vmatpush2.bf16.msra.mxu1 %v4827_v22  ;;  %v627_v22 = vld [vmem:[%s5434_s26 + $0x8f0] sm:$0xff] }
 0x1e4   : > { %3960 = vmatprep.subr.bf16.mxu1 %v4814_v24  ;;  %v3625_v33 = vpop.f32.mrf.mxu0  ;;  %3870 = vmatmul.mubr.bf16.vlgmr.msra.gmra.mxu0 %v5565_v17  ;;  %v4733_v24 = vcombine.low %v635_v11, %v643_v12  ;;  %v4718_v54 = vcombine.high %v619_v21, %v627_v22 }
 0x1e5   : > { %3920 = vmatpush1.bf16.msra.mxu0 %v4557_v55  ;;  %3951 = vmatprep.mubr.bf16.mxu0 %v5515_v59  ;;  %v603_v55 = vld [vmem:[%s5434_s26 + $0x830] sm:$0xff] }
 0x1e6   : > { %v3666_v37 = vpop.f32.mrf.mxu1  ;;  %3911 = vmatmul.mubr.bf16.vlgmr.msra.gmra.mxu1 %v5571_v20  ;;  %v3627_v40 = vpop.f32.mrf.mxu0  ;;  %3921 = vmatprep.subr.bf16.mxu0 %v4542_v29  ;;  %v4461_v29 = vcombine.low %v363_v18, %v371_v19 }
 0x1e7   : > { %v3667_v39 = vadd.f32 %v3666_v37, %v3625_v33  ;;  %3961 = vmatpush1.bf16.msra.mxu1 %v4813_v28  ;;  %3992 = vmatprep.mubr.bf16.mxu1 %v5519_v60  ;;  %v611_v28 = vld [vmem:[%s5434_s26 + $0x870] sm:$0xff]  ;;  %v4445_v37 = vcombine.low %v347_v26, %v355_v27 }
 0x1e8   : > { %v3668_v44 = vpop.f32.mrf.mxu1  ;;  %3962 = vmatprep.subr.bf16.mxu1 %v4798_v30  ;;  %v3629_v50 = vpop.f32.mrf.mxu0  ;;  %v4717_v30 = vcombine.low %v619_v21, %v627_v22  ;;  %v4702_v32 = vcombine.high %v603_v55, %v611_v28  ;;  %v587_v33 = vld [vmem:[%s5434_s26 + $0x7b0] sm:$0xff] }
 0x1e9   : > { %v4087_v48 = vadd.f32 %v3667_v39, %v327_v36  ;;  %v3669_v49 = vadd.f32 %v3668_v44, %v3627_v40  ;;  %3922 = vmatpush1.bf16.msra.mxu0 %v4541_v38  ;;  %v851_v36 = vld [vmem:[%s5434_s26 + $0xff0] sm:$0xff]  ;;  %v4701_v38 = vcombine.low %v603_v55, %v611_v28  ;;  %v4686_v39 = vcombine.high %v587_v33, %v595_v34 }
 0x1ea   : > { %v3670_v53 = vpop.f32.mrf.mxu1  ;;  %v3630_v58 = vpop.f32.mrf.mxu0  ;;  %3923 = vmatprep.subr.bf16.mxu0 %v4526_v42  ;;  %v4942_v40 = vcombine.high %v843_v35, %v851_v36  ;;  %v579_v42 = vld [vmem:[%s5434_s26 + $0x770] sm:$0xff]  ;;  %v4941_v46 = vcombine.low %v843_v35, %v851_v36 }
 0x1eb   : > { %4103 = vst [vmem:[%s5458_s29 + $0x20] sm:$0xff] %v4087_v48  ;;  %v4088_v57 = vadd.f32 %v3669_v49, %v328_v43  ;;  %3963 = vmatpush1.bf16.msra.mxu1 %v4797_v41  ;;  %v571_v41 = vld [vmem:[%s5434_s26 + $0x730] sm:$0xff]  ;;  %v4910_v58 = vcombine.high %v811_v51, %v819_v52 }
 0x1ec   : > { %v3671_v63 = vpop.f32.mrf.mxu1  ;;  %3964 = vmatprep.subr.bf16.mxu1 %v4782_v45  ;;  %v827_v43 = vld [vmem:[%s5434_s26 + $0xf30] sm:$0xff]  ;;  %v4685_v45 = vcombine.low %v587_v33, %v595_v34  ;;  %v4670_v47 = vcombine.high %v571_v41, %v579_v42  ;;  %v4669_v53 = vcombine.low %v571_v41, %v579_v42 }
 0x1ed   : > { %4104 = vst [vmem:[%s5458_s29 + $0x28] sm:$0xff] %v4088_v57  ;;  %3924 = vmatpush1.bf16.msra.mxu0 %v4525_v56  ;;  %v835_v44 = vld [vmem:[%s5434_s26 + $0xf70] sm:$0xff] }
 0x1ee   : > { %3925 = vmatprep.subr.bf16.mxu0 %v4510_v62  ;;  %v4926_v48 = vcombine.high %v827_v43, %v835_v44  ;;  %v555_v49 = vld [vmem:[%s5434_s26 + $0x6b0] sm:$0xff]  ;;  %v4925_v56 = vcombine.low %v827_v43, %v835_v44 }
 0x1ef   : > { %3965 = vmatpush1.bf16.msra.mxu1 %v4781_v61  ;;  %v563_v50 = vld [vmem:[%s5434_s26 + $0x6f0] sm:$0xff] }
 0x1f0   : > { %3966 = vmatprep.subr.bf16.mxu1 %v4766_v0  ;;  %v4654_v57 = vcombine.high %v555_v49, %v563_v50  ;;  %v539_v61 = vld [vmem:[%s5434_s26 + $0x630] sm:$0xff]  ;;  %v4653_v1 = vcombine.low %v555_v49, %v563_v50 }
 0x1f1   : > { %3926 = vmatpush1.bf16.msra.mxu0 %v4509_v5  ;;  %v547_v62 = vld [vmem:[%s5434_s26 + $0x670] sm:$0xff] }
 0x1f2   : > { %3927 = vmatprep.subr.bf16.mxu0 %v4494_v7  ;;  %v795_v63 = vld [vmem:[%s5434_s26 + $0xe30] sm:$0xff]  ;;  %v4638_v3 = vcombine.high %v539_v61, %v547_v62  ;;  %v4637_v9 = vcombine.low %v539_v61, %v547_v62  ;;  %v692_v61 = vld [vmem:[%s5434_s26 + $0xaf8] sm:$0xff] }
 0x1f3   : > { %3967 = vmatpush1.bf16.msra.mxu1 %v4765_v6  ;;  %v803_v0 = vld [vmem:[%s5434_s26 + $0xe70] sm:$0xff] }
 0x1f4   : > { %3968 = vmatprep.subr.bf16.mxu1 %v4750_v8  ;;  %v4894_v4 = vcombine.high %v795_v63, %v803_v0  ;;  %v523_v5 = vld [vmem:[%s5434_s26 + $0x5b0] sm:$0xff]  ;;  %v4893_v10 = vcombine.low %v795_v63, %v803_v0 }
 0x1f5   : > { %3928 = vmatpush1.bf16.msra.mxu0 %v4493_v13  ;;  %v531_v6 = vld [vmem:[%s5434_s26 + $0x5f0] sm:$0xff] }
 0x1f6   : > { %3929 = vmatprep.subr.bf16.mxu0 %v4478_v15  ;;  %v779_v7 = vld [vmem:[%s5434_s26 + $0xdb0] sm:$0xff]  ;;  %v4622_v11 = vcombine.high %v523_v5, %v531_v6  ;;  %v4621_v18 = vcombine.low %v523_v5, %v531_v6  ;;  %v330_v5 = vld [vmem:[%s5458_s29 + $0x38] sm:$0xff] }
 0x1f7   : > { %3969 = vmatpush1.bf16.msra.mxu1 %v4749_v14  ;;  %v787_v8 = vld [vmem:[%s5434_s26 + $0xdf0] sm:$0xff] }
 0x1f8   : > { %3970 = vmatprep.subr.bf16.mxu1 %v4734_v16  ;;  %v4878_v12 = vcombine.high %v779_v7, %v787_v8  ;;  %v507_v13 = vld [vmem:[%s5434_s26 + $0x530] sm:$0xff]  ;;  %v4877_v19 = vcombine.low %v779_v7, %v787_v8  ;;  %v412_v8 = vld [vmem:[%s5434_s26 + $0x238] sm:$0xff] }
 0x1f9   : > { %3930 = vmatpush1.bf16.msra.mxu0 %v4477_v23  ;;  %v515_v14 = vld [vmem:[%s5434_s26 + $0x570] sm:$0xff] }
 0x1fa   : > { %3931 = vmatprep.subr.bf16.mxu0 %v4462_v25  ;;  %v763_v15 = vld [vmem:[%s5434_s26 + $0xd30] sm:$0xff]  ;;  %v4606_v21 = vcombine.high %v507_v13, %v515_v14  ;;  %v4605_v26 = vcombine.low %v507_v13, %v515_v14  ;;  %v668_v13 = vld [vmem:[%s5434_s26 + $0xa38] sm:$0xff] }
 0x1fb   : > { %3971 = vmatpush1.bf16.msra.mxu1 %v4733_v24  ;;  %v771_v16 = vld [vmem:[%s5434_s26 + $0xd70] sm:$0xff]  ;;  %v676_v14 = vld [vmem:[%s5434_s26 + $0xa78] sm:$0xff] }
 0x1fc   : > { %3972 = vmatprep.subr.bf16.mxu1 %v4718_v54  ;;  %v4862_v22 = vcombine.high %v763_v15, %v771_v16  ;;  %v491_v23 = vld [vmem:[%s5434_s26 + $0x4b0] sm:$0xff]  ;;  %v4861_v27 = vcombine.low %v763_v15, %v771_v16 }
 0x1fd   : > { %3932 = vmatpush1.bf16.msra.mxu0 %v4461_v29  ;;  %v499_v24 = vld [vmem:[%s5434_s26 + $0x4f0] sm:$0xff] }
 0x1fe   : > { %3933 = vmatprep.subr.bf16.mxu0 %v4446_v31  ;;  %v747_v25 = vld [vmem:[%s5434_s26 + $0xcb0] sm:$0xff]  ;;  %v4590_v55 = vcombine.high %v491_v23, %v499_v24  ;;  %v4589_v33 = vcombine.low %v491_v23, %v499_v24  ;;  %v4768_v23 = vcombine.high %v668_v13, %v676_v14  ;;  %v404_v24 = vld [vmem:[%s5434_s26 + $0x1f8] sm:$0xff] }
 0x1ff   : > { %3973 = vmatpush1.bf16.msra.mxu1 %v4717_v30  ;;  %v755_v54 = vld [vmem:[%s5434_s26 + $0xcf0] sm:$0xff] }
 0x200   : > { %3974 = vmatprep.subr.bf16.mxu1 %v4702_v32  ;;  %v4846_v28 = vcombine.high %v747_v25, %v755_v54  ;;  %v475_v29 = vld [vmem:[%s5434_s26 + $0x430] sm:$0xff]  ;;  %v4845_v34 = vcombine.low %v747_v25, %v755_v54  ;;  %v652_v25 = vld [vmem:[%s5434_s26 + $0x9b8] sm:$0xff] }
 0x201   : > { %3934 = vmatpush1.bf16.msra.mxu0 %v4445_v37  ;;  %v483_v30 = vld [vmem:[%s5434_s26 + $0x470] sm:$0xff]  ;;  %v460_v37 = vld [vmem:[%s5434_s26 + $0x3b8] sm:$0xff] }
 0x202   : > { %3935 = vmatprep.subr.bf16.mxu0 %v4686_v39  ;;  %v731_v31 = vld [vmem:[%s5434_s26 + $0xc30] sm:$0xff]  ;;  %v4574_v35 = vcombine.high %v475_v29, %v483_v30  ;;  %v716_v39 = vld [vmem:[%s5434_s26 + $0xbb8] sm:$0xff]  ;;  %v4573_v41 = vcombine.low %v475_v29, %v483_v30 }
 0x203   : > { %3975 = vmatpush1.bf16.msra.mxu1 %v4701_v38  ;;  %v739_v32 = vld [vmem:[%s5434_s26 + $0xc70] sm:$0xff]  ;;  %v468_v38 = vld [vmem:[%s5434_s26 + $0x3f8] sm:$0xff] }
 0x204   : > { %3976 = vmatprep.subr.bf16.mxu1 %v4942_v40  ;;  %v4830_v36 = vcombine.high %v731_v31, %v739_v32  ;;  %v724_v40 = vld [vmem:[%s5434_s26 + $0xbf8] sm:$0xff]  ;;  %v4829_v42 = vcombine.low %v731_v31, %v739_v32  ;;  %v4560_v43 = vcombine.high %v460_v37, %v468_v38  ;;  %v4559_v49 = vcombine.low %v460_v37, %v468_v38  ;;  %v329_v62 = vld [vmem:[%s5458_s29 + $0x30] sm:$0xff] }
 0x205   : > { %3936 = vmatpush2.bf16.msra.mxu0 %v4685_v45  ;;  %v4816_v44 = vcombine.high %v716_v39, %v724_v40  ;;  %v444_v45 = vld [vmem:[%s5434_s26 + $0x338] sm:$0xff]  ;;  %v4815_v50 = vcombine.low %v716_v39, %v724_v40 }
 0x206   : > { %3937 = vmatprep.subr.bf16.mxu0 %v4670_v47  ;;  %v700_v47 = vld [vmem:[%s5434_s26 + $0xb38] sm:$0xff] }
 0x207   : > { %3977 = vmatpush2.bf16.msra.mxu1 %v4941_v46  ;;  %v452_v46 = vld [vmem:[%s5434_s26 + $0x378] sm:$0xff] }
 0x208   : > { %3978 = vmatprep.subr.bf16.mxu1 %v4926_v48  ;;  %v708_v48 = vld [vmem:[%s5434_s26 + $0xb78] sm:$0xff]  ;;  %v4544_v51 = vcombine.high %v444_v45, %v452_v46  ;;  %v4543_v0 = vcombine.low %v444_v45, %v452_v46 }
 0x209   : > { %3938 = vmatpush2.bf16.msra.mxu0 %v4669_v53  ;;  %v4800_v52 = vcombine.high %v700_v47, %v708_v48  ;;  %v428_v53 = vld [vmem:[%s5434_s26 + $0x2b8] sm:$0xff] }
 0x20a   : > { %3939 = vmatprep.subr.bf16.mxu0 %v4654_v57  ;;  %v660_v54 = vld [vmem:[%s5434_s26 + $0x9f8] sm:$0xff] }
 0x20b   : > { %3979 = vmatpush2.bf16.msra.mxu1 %v4925_v56  ;;  %v436_v56 = vld [vmem:[%s5434_s26 + $0x2f8] sm:$0xff] }
 0x20c   : > { %3980 = vmatprep.subr.bf16.mxu1 %v4910_v58  ;;  %v684_v58 = vld [vmem:[%s5434_s26 + $0xab8] sm:$0xff]  ;;  %v4527_v16 = vcombine.low %v428_v53, %v436_v56 }
 0x20d   : > { %3940 = vmatpush2.bf16.msra.mxu0 %v4653_v1  ;;  %v4784_v7 = vcombine.high %v684_v58, %v692_v61  ;;  %v380_v29 = vld [vmem:[%s5434_s26 + $0x138] sm:$0xff] }
 0x20e   : > { %3941 = vmatprep.subr.bf16.mxu0 %v4638_v3  ;;  %v4799_v3 = vcombine.low %v700_v47, %v708_v48  ;;  %v388_v30 = vld [vmem:[%s5434_s26 + $0x178] sm:$0xff] }
 0x20f   : > { %3981 = vmatpush2.bf16.msra.mxu1 %v4909_v2  ;;  %v636_v31 = vld [vmem:[%s5434_s26 + $0x938] sm:$0xff] }
 0x210   : > { %3982 = vmatprep.subr.bf16.mxu1 %v4894_v4  ;;  %v4528_v4 = vcombine.high %v428_v53, %v436_v56  ;;  %v644_v32 = vld [vmem:[%s5434_s26 + $0x978] sm:$0xff] }
 0x211   : > { %3942 = vmatpush2.bf16.msra.mxu0 %v4637_v9  ;;  %v420_v9 = vld [vmem:[%s5434_s26 + $0x278] sm:$0xff] }
 0x212   : > { %3943 = vmatprep.subr.bf16.mxu0 %v4622_v11  ;;  %v364_v37 = vld [vmem:[%s5434_s26 + $0xb8] sm:$0xff] }
 0x213   : > { %3983 = vmatpush2.bf16.msra.mxu1 %v4893_v10  ;;  %v372_v38 = vld [vmem:[%s5434_s26 + $0xf8] sm:$0xff] }
 0x214   : > { %3984 = vmatprep.subr.bf16.mxu1 %v4878_v12  ;;  %v620_v39 = vld [vmem:[%s5434_s26 + $0x8b8] sm:$0xff] }
 0x215   : > { %3944 = vmatpush2.bf16.msra.mxu0 %v4621_v18  ;;  %v628_v40 = vld [vmem:[%s5434_s26 + $0x8f8] sm:$0xff] }
 0x216   : > { %3945 = vmatprep.subr.bf16.mxu0 %v4606_v21  ;;  %v4512_v21 = vcombine.high %v412_v8, %v420_v9  ;;  %v348_v45 = vld [vmem:[%s5434_s26 + $0x38] sm:$0xff] }
 0x217   : > { %3985 = vmatpush2.bf16.msra.mxu1 %v4877_v19  ;;  %v356_v46 = vld [vmem:[%s5434_s26 + $0x78] sm:$0xff] }
 0x218   : > { %3986 = vmatprep.subr.bf16.mxu1 %v4862_v22  ;;  %v604_v47 = vld [vmem:[%s5434_s26 + $0x838] sm:$0xff] }
 0x219   : > { %3946 = vmatpush2.bf16.msra.mxu0 %v4605_v26  ;;  %v4511_v26 = vcombine.low %v412_v8, %v420_v9  ;;  %v612_v48 = vld [vmem:[%s5434_s26 + $0x878] sm:$0xff] }
 0x21a   : > { %3947 = vmatprep.subr.bf16.mxu0 %v4590_v55  ;;  %v588_v53 = vld [vmem:[%s5434_s26 + $0x7b8] sm:$0xff] }
 0x21b   : > { %3987 = vmatpush2.bf16.msra.mxu1 %v4861_v27  ;;  %v4767_v27 = vcombine.low %v668_v13, %v676_v14  ;;  %v596_v56 = vld [vmem:[%s5434_s26 + $0x7f8] sm:$0xff] }
 0x21c   : > { %3988 = vmatprep.subr.bf16.mxu1 %v4846_v28  ;;  %v4752_v28 = vcombine.high %v652_v25, %v660_v54  ;;  %v556_v9 = vld [vmem:[%s5434_s26 + $0x6b8] sm:$0xff] }
 0x21d   : > { %3948 = vmatpush2.bf16.msra.mxu0 %v4589_v33 }
 0x21e   : > { %3949 = vmatprep.subr.bf16.mxu0 %v4574_v35  ;;  %v4480_v35 = vcombine.high %v380_v29, %v388_v30 }
 0x21f   : > { %3989 = vmatpush2.bf16.msra.mxu1 %v4845_v34  ;;  %v4751_v34 = vcombine.low %v652_v25, %v660_v54  ;;  %v524_v25 = vld [vmem:[%s5434_s26 + $0x5b8] sm:$0xff] }
 0x220   : > { %3990 = vmatprep.subr.bf16.mxu1 %v4830_v36  ;;  %v4736_v36 = vcombine.high %v636_v31, %v644_v32  ;;  %v532_v54 = vld [vmem:[%s5434_s26 + $0x5f8] sm:$0xff] }
 0x221   : > { %3950 = vmatpush2.bf16.msra.mxu0 %v4573_v41  ;;  %v4479_v41 = vcombine.low %v380_v29, %v388_v30  ;;  %v4624_v29 = vcombine.high %v524_v25, %v532_v54 }
 0x222   : > { %4001 = vmatprep.subr.bf16.mxu0 %v4560_v43  ;;  %v4464_v43 = vcombine.high %v364_v37, %v372_v38 }
 0x223   : > { %3991 = vmatpush2.bf16.msra.mxu1 %v4829_v42  ;;  %v4735_v42 = vcombine.low %v636_v31, %v644_v32  ;;  %v508_v31 = vld [vmem:[%s5434_s26 + $0x538] sm:$0xff] }
 0x224   : > { %4042 = vmatprep.subr.bf16.mxu1 %v4816_v44  ;;  %v3707_v57 = vpop.f32.mrf.mxu0  ;;  %3952 = vmatmul.mubr.bf16.vlgmr.msra.gmra.mxu0 %v5565_v17  ;;  %v4720_v44 = vcombine.high %v620_v39, %v628_v40  ;;  %v516_v32 = vld [vmem:[%s5434_s26 + $0x578] sm:$0xff] }
 0x225   : > { %4002 = vmatpush1.bf16.msra.mxu0 %v4559_v49  ;;  %4033 = vmatprep.mubr.bf16.mxu0 %v5515_v59  ;;  %v4783_v59 = vcombine.low %v684_v58, %v692_v61  ;;  %v4463_v49 = vcombine.low %v364_v37, %v372_v38  ;;  %v852_v58 = vld [vmem:[%s5434_s26 + $0xff8] sm:$0xff]  ;;  %v4447_v61 = vcombine.low %v348_v45, %v356_v46 }
 0x226   : > { %v3748_v63 = vpop.f32.mrf.mxu1  ;;  %3993 = vmatmul.mubr.bf16.vlgmr.msra.gmra.mxu1 %v5571_v20  ;;  %v3709_v2 = vpop.f32.mrf.mxu0  ;;  %4003 = vmatprep.subr.bf16.mxu0 %v4544_v51  ;;  %v4448_v51 = vcombine.high %v348_v45, %v356_v46  ;;  %v4608_v37 = vcombine.high %v508_v31, %v516_v32 }
 0x227   : > { %v3749_v1 = vadd.f32 %v3748_v63, %v3707_v57  ;;  %4043 = vmatpush1.bf16.msra.mxu1 %v4815_v50  ;;  %4074 = vmatprep.mubr.bf16.mxu1 %v5519_v60  ;;  %v396_v60 = vld [vmem:[%s5434_s26 + $0x1b8] sm:$0xff]  ;;  %v4719_v50 = vcombine.low %v620_v39, %v628_v40  ;;  %v4688_v63 = vcombine.high %v588_v53, %v596_v56 }
 0x228   : > { %v3750_v6 = vpop.f32.mrf.mxu1  ;;  %4044 = vmatprep.subr.bf16.mxu1 %v4800_v52  ;;  %v3711_v12 = vpop.f32.mrf.mxu0  ;;  %v4496_v55 = vcombine.high %v396_v60, %v404_v24  ;;  %v4495_v33 = vcombine.low %v396_v60, %v404_v24  ;;  %v4704_v52 = vcombine.high %v604_v47, %v612_v48  ;;  %v844_v57 = vld [vmem:[%s5434_s26 + $0xfb8] sm:$0xff] }
 0x229   : > { %v4089_v10 = vadd.f32 %v3749_v1, %v329_v62  ;;  %v3751_v11 = vadd.f32 %v3750_v6, %v3709_v2  ;;  %4004 = vmatpush1.bf16.msra.mxu0 %v4543_v0  ;;  %v4703_v62 = vcombine.low %v604_v47, %v612_v48  ;;  %v4944_v0 = vcombine.high %v844_v57, %v852_v58  ;;  %v572_v1 = vld [vmem:[%s5434_s26 + $0x738] sm:$0xff] }
 0x22a   : > { %v3752_v15 = vpop.f32.mrf.mxu1  ;;  %v3712_v19 = vpop.f32.mrf.mxu0  ;;  %4005 = vmatprep.subr.bf16.mxu0 %v4528_v4  ;;  %v580_v2 = vld [vmem:[%s5434_s26 + $0x778] sm:$0xff]  ;;  %v4943_v6 = vcombine.low %v844_v57, %v852_v58 }
 0x22b   : > { %4105 = vst [vmem:[%s5458_s29 + $0x30] sm:$0xff] %v4089_v10  ;;  %v4090_v18 = vadd.f32 %v3751_v11, %v330_v5  ;;  %4045 = vmatpush1.bf16.msra.mxu1 %v4799_v3  ;;  %v828_v3 = vld [vmem:[%s5434_s26 + $0xf38] sm:$0xff]  ;;  %v4687_v5 = vcombine.low %v588_v53, %v596_v56  ;;  %v4671_v13 = vcombine.low %v572_v1, %v580_v2 }
 0x22c   : > { %v3753_v22 = vpop.f32.mrf.mxu1  ;;  %4046 = vmatprep.subr.bf16.mxu1 %v4784_v7  ;;  %v836_v4 = vld [vmem:[%s5434_s26 + $0xf78] sm:$0xff]  ;;  %v4672_v7 = vcombine.high %v572_v1, %v580_v2  ;;  %v332_v2 = vld [vmem:[%s5458_s29 + $0x48] sm:$0xff] }
 0x22d   : > { %4106 = vst [vmem:[%s5458_s29 + $0x38] sm:$0xff] %v4090_v18  ;;  %4006 = vmatpush1.bf16.msra.mxu0 %v4527_v16  ;;  %v4928_v8 = vcombine.high %v828_v3, %v836_v4  ;;  %v564_v10 = vld [vmem:[%s5434_s26 + $0x6f8] sm:$0xff]  ;;  %v4927_v14 = vcombine.low %v828_v3, %v836_v4 }
 0x22e   : > { %4007 = vmatprep.subr.bf16.mxu0 %v4512_v21  ;;  %v812_v11 = vld [vmem:[%s5434_s26 + $0xeb8] sm:$0xff]  ;;  %v4656_v15 = vcombine.high %v556_v9, %v564_v10  ;;  %v4655_v22 = vcombine.low %v556_v9, %v564_v10 }
 0x22f   : > { %4047 = vmatpush1.bf16.msra.mxu1 %v4783_v59  ;;  %v820_v12 = vld [vmem:[%s5434_s26 + $0xef8] sm:$0xff] }
 0x230   : > { %4048 = vmatprep.subr.bf16.mxu1 %v4768_v23  ;;  %v4912_v16 = vcombine.high %v812_v11, %v820_v12  ;;  %v540_v18 = vld [vmem:[%s5434_s26 + $0x638] sm:$0xff]  ;;  %v4911_v23 = vcombine.low %v812_v11, %v820_v12  ;;  %v333_v11 = vld [vmem:[%s5458_s29 + $0x50] sm:$0xff] }
 0x231   : > { %4008 = vmatpush1.bf16.msra.mxu0 %v4511_v26  ;;  %v548_v19 = vld [vmem:[%s5434_s26 + $0x678] sm:$0xff] }
 0x232   : > { %4009 = vmatprep.subr.bf16.mxu0 %v4496_v55  ;;  %v796_v59 = vld [vmem:[%s5434_s26 + $0xe38] sm:$0xff]  ;;  %v4640_v60 = vcombine.high %v540_v18, %v548_v19  ;;  %v4639_v55 = vcombine.low %v540_v18, %v548_v19 }
 0x233   : > { %4049 = vmatpush1.bf16.msra.mxu1 %v4767_v27  ;;  %v804_v21 = vld [vmem:[%s5434_s26 + $0xe78] sm:$0xff] }
 0x234   : > { %4050 = vmatprep.subr.bf16.mxu1 %v4752_v28  ;;  %v4896_v24 = vcombine.high %v796_v59, %v804_v21  ;;  %v780_v26 = vld [vmem:[%s5434_s26 + $0xdb8] sm:$0xff]  ;;  %v4895_v28 = vcombine.low %v796_v59, %v804_v21 }
 0x235   : > { %4010 = vmatpush1.bf16.msra.mxu0 %v4495_v33  ;;  %v788_v27 = vld [vmem:[%s5434_s26 + $0xdf8] sm:$0xff] }
 0x236   : > { %4011 = vmatprep.subr.bf16.mxu0 %v4480_v35  ;;  %v4880_v30 = vcombine.high %v780_v26, %v788_v27  ;;  %v764_v33 = vld [vmem:[%s5434_s26 + $0xd38] sm:$0xff]  ;;  %v4623_v35 = vcombine.low %v524_v25, %v532_v54 }
 0x237   : > { %4051 = vmatpush1.bf16.msra.mxu1 %v4751_v34  ;;  %v772_v34 = vld [vmem:[%s5434_s26 + $0xd78] sm:$0xff] }
 0x238   : > { %4052 = vmatprep.subr.bf16.mxu1 %v4736_v36  ;;  %v4879_v36 = vcombine.low %v780_v26, %v788_v27  ;;  %v4864_v38 = vcombine.high %v764_v33, %v772_v34  ;;  %v492_v39 = vld [vmem:[%s5434_s26 + $0x4b8] sm:$0xff]  ;;  %v336_v27 = vld [vmem:[%s5458_s29 + $0x68] sm:$0xff] }
 0x239   : > { %4012 = vmatpush1.bf16.msra.mxu0 %v4479_v41  ;;  %v500_v40 = vld [vmem:[%s5434_s26 + $0x4f8] sm:$0xff] }
 0x23a   : > { %4013 = vmatprep.subr.bf16.mxu0 %v4464_v43  ;;  %v748_v41 = vld [vmem:[%s5434_s26 + $0xcb8] sm:$0xff]  ;;  %v4607_v43 = vcombine.low %v508_v31, %v516_v32  ;;  %v4592_v45 = vcombine.high %v492_v39, %v500_v40 }
 0x23b   : > { %4053 = vmatpush1.bf16.msra.mxu1 %v4735_v42  ;;  %v756_v42 = vld [vmem:[%s5434_s26 + $0xcf8] sm:$0xff] }
 0x23c   : > { %4054 = vmatprep.subr.bf16.mxu1 %v4720_v44  ;;  %v4863_v44 = vcombine.low %v764_v33, %v772_v34  ;;  %v4848_v46 = vcombine.high %v748_v41, %v756_v42  ;;  %v476_v47 = vld [vmem:[%s5434_s26 + $0x438] sm:$0xff] }
 0x23d   : > { %4014 = vmatpush1.bf16.msra.mxu0 %v4463_v49  ;;  %v484_v48 = vld [vmem:[%s5434_s26 + $0x478] sm:$0xff] }
 0x23e   : > { %4015 = vmatprep.subr.bf16.mxu0 %v4448_v51  ;;  %v732_v49 = vld [vmem:[%s5434_s26 + $0xc38] sm:$0xff]  ;;  %v4591_v51 = vcombine.low %v492_v39, %v500_v40  ;;  %v4576_v53 = vcombine.high %v476_v47, %v484_v48  ;;  %v4575_v57 = vcombine.low %v476_v47, %v484_v48 }
 0x23f   : > { %4055 = vmatpush1.bf16.msra.mxu1 %v4719_v50  ;;  %v740_v50 = vld [vmem:[%s5434_s26 + $0xc78] sm:$0xff] }
 0x240   : > { %4056 = vmatprep.subr.bf16.mxu1 %v4704_v52  ;;  %v4847_v52 = vcombine.low %v748_v41, %v756_v42  ;;  %v4832_v56 = vcombine.high %v732_v49, %v740_v50  ;;  %v4831_v58 = vcombine.low %v732_v49, %v740_v50  ;;  %v338_v40 = vld [vmem:[%s5458_s29 + $0x78] sm:$0xff] }
 0x241   : > { %4016 = vmatpush1.bf16.msra.mxu0 %v4447_v61 }
 0x242   : > { %4017 = vmatprep.subr.bf16.mxu0 %v4688_v63 }
 0x243   : > { %4057 = vmatpush1.bf16.msra.mxu1 %v4703_v62  ;;  %v331_v62 = vld [vmem:[%s5458_s29 + $0x40] sm:$0xff] }
 0x244   : > { %4058 = vmatprep.subr.bf16.mxu1 %v4944_v0 }
 0x245   : > { %4018 = vmatpush2.bf16.msra.mxu0 %v4687_v5 }
 0x246   : > { %4019 = vmatprep.subr.bf16.mxu0 %v4672_v7 }
 0x247   : > { %4059 = vmatpush2.bf16.msra.mxu1 %v4943_v6 }
 0x248   : > { %4060 = vmatprep.subr.bf16.mxu1 %v4928_v8 }
 0x249   : > { %4020 = vmatpush2.bf16.msra.mxu0 %v4671_v13 }
 0x24a   : > { %4021 = vmatprep.subr.bf16.mxu0 %v4656_v15 }
 0x24b   : > { %4061 = vmatpush2.bf16.msra.mxu1 %v4927_v14  ;;  %v334_v14 = vld [vmem:[%s5458_s29 + $0x58] sm:$0xff] }
 0x24c   : > { %4062 = vmatprep.subr.bf16.mxu1 %v4912_v16 }
 0x24d   : > { %4022 = vmatpush2.bf16.msra.mxu0 %v4655_v22 }
 0x24e   : > { %4023 = vmatprep.subr.bf16.mxu0 %v4640_v60 }
 0x24f   : > { %4063 = vmatpush2.bf16.msra.mxu1 %v4911_v23 }
 0x250   : > { %4064 = vmatprep.subr.bf16.mxu1 %v4896_v24  ;;  %v335_v24 = vld [vmem:[%s5458_s29 + $0x60] sm:$0xff] }
 0x251   : > { %4024 = vmatpush2.bf16.msra.mxu0 %v4639_v55 }
 0x252   : > { %4025 = vmatprep.subr.bf16.mxu0 %v4624_v29 }
 0x253   : > { %4065 = vmatpush2.bf16.msra.mxu1 %v4895_v28 }
 0x254   : > { %4066 = vmatprep.subr.bf16.mxu1 %v4880_v30 }
 0x255   : > { %4026 = vmatpush2.bf16.msra.mxu0 %v4623_v35 }
 0x256   : > { %4027 = vmatprep.subr.bf16.mxu0 %v4608_v37 }
 0x257   : > { %4067 = vmatpush2.bf16.msra.mxu1 %v4879_v36  ;;  %v337_v36 = vld [vmem:[%s5458_s29 + $0x70] sm:$0xff] }
 0x258   : > { %4068 = vmatprep.subr.bf16.mxu1 %v4864_v38 }
 0x259   : > { %4028 = vmatpush2.bf16.msra.mxu0 %v4607_v43 }
 0x25a   : > { %4029 = vmatprep.subr.bf16.mxu0 %v4592_v45 }
 0x25b   : > { %4069 = vmatpush2.bf16.msra.mxu1 %v4863_v44 }
 0x25c   : > { %4070 = vmatprep.subr.bf16.mxu1 %v4848_v46 }
 0x25d   : > { %4030 = vmatpush2.bf16.msra.mxu0 %v4591_v51 }
 0x25e   : > { %4031 = vmatprep.subr.bf16.mxu0 %v4576_v53 }
 0x25f   : > { %4071 = vmatpush2.bf16.msra.mxu1 %v4847_v52 }
 0x260   : > { %4072 = vmatprep.subr.bf16.mxu1 %v4832_v56 }
 0x261   : > { %4032 = vmatpush2.bf16.msra.mxu0 %v4575_v57 }
 0x263   : > { %4073 = vmatpush2.bf16.msra.mxu1 %v4831_v58 }
 0x264   : > { %v3789_v61 = vpop.f32.mrf.mxu0  ;;  %4034 = vmatmul.mubr.bf16.vlgmr.msra.gmra.mxu0 %v5565_v17 }
 0x266   : > { %v3830_v63 = vpop.f32.mrf.mxu1  ;;  %4075 = vmatmul.mubr.bf16.vlgmr.msra.gmra.mxu1 %v5571_v20  ;;  %v3791_v1 = vpop.f32.mrf.mxu0 }
 0x267   : > { %v3831_v0 = vadd.f32 %v3830_v63, %v3789_v61 }
 0x268   : > { %v3832_v3 = vpop.f32.mrf.mxu1  ;;  %v3793_v6 = vpop.f32.mrf.mxu0 }
 0x269   : > { %v4091_v4 = vadd.f32 %v3831_v0, %v331_v62  ;;  %v3833_v5 = vadd.f32 %v3832_v3, %v3791_v1 }
 0x26a   : > { %v3834_v7 = vpop.f32.mrf.mxu1  ;;  %v3794_v9 = vpop.f32.mrf.mxu0 }
 0x26b   : > { %4107 = vst [vmem:[%s5458_s29 + $0x40] sm:$0xff] %v4091_v4  ;;  %v4092_v8 = vadd.f32 %v3833_v5, %v332_v2 }
 0x26c   : > { %v3835_v17 = vpop.f32.mrf.mxu1 }
 0x26d   : > { %4108 = vst [vmem:[%s5458_s29 + $0x48] sm:$0xff] %v4092_v8 }
 0x2a4   : > { %v3871_v10 = vpop.f32.mrf.mxu0 }
 0x2a6   : > { %v3912_v20 = vpop.f32.mrf.mxu1  ;;  %v3873_v13 = vpop.f32.mrf.mxu0 }
 0x2a7   : > { %v3913_v12 = vadd.f32 %v3912_v20, %v3871_v10 }
 0x2a8   : > { %v3914_v15 = vpop.f32.mrf.mxu1  ;;  %v3875_v19 = vpop.f32.mrf.mxu0 }
 0x2a9   : > { %v4093_v16 = vadd.f32 %v3913_v12, %v333_v11  ;;  %v3915_v18 = vadd.f32 %v3914_v15, %v3873_v13 }
 0x2aa   : > { %v3916_v59 = vpop.f32.mrf.mxu1  ;;  %v3876_v22 = vpop.f32.mrf.mxu0 }
 0x2ab   : > { %4109 = vst [vmem:[%s5458_s29 + $0x50] sm:$0xff] %v4093_v16  ;;  %v4094_v21 = vadd.f32 %v3915_v18, %v334_v14 }
 0x2ac   : > { %v3917_v23 = vpop.f32.mrf.mxu1 }
 0x2ad   : > { %4110 = vst [vmem:[%s5458_s29 + $0x58] sm:$0xff] %v4094_v21 }
 0x2e4   : > { %v3953_v60 = vpop.f32.mrf.mxu0 }
 0x2e6   : > { %v3994_v25 = vpop.f32.mrf.mxu1  ;;  %v3955_v26 = vpop.f32.mrf.mxu0 }
 0x2e7   : > { %v3995_v54 = vadd.f32 %v3994_v25, %v3953_v60 }
 0x2e8   : > { %v3996_v55 = vpop.f32.mrf.mxu1  ;;  %v3957_v30 = vpop.f32.mrf.mxu0 }
 0x2e9   : > { %v4095_v28 = vadd.f32 %v3995_v54, %v335_v24  ;;  %v3997_v29 = vadd.f32 %v3996_v55, %v3955_v26 }
 0x2ea   : > { %v3998_v31 = vpop.f32.mrf.mxu1  ;;  %v3958_v33 = vpop.f32.mrf.mxu0 }
 0x2eb   : > { %4111 = vst [vmem:[%s5458_s29 + $0x60] sm:$0xff] %v4095_v28  ;;  %v4096_v32 = vadd.f32 %v3997_v29, %v336_v27 }
 0x2ec   : > { %v3999_v34 = vpop.f32.mrf.mxu1 }
 0x2ed   : > { %4112 = vst [vmem:[%s5458_s29 + $0x68] sm:$0xff] %v4096_v32 }
 0x324   : > { %v4035_v35 = vpop.f32.mrf.mxu0 }
 0x326   : > { %v4076_v37 = vpop.f32.mrf.mxu1  ;;  %v4037_v39 = vpop.f32.mrf.mxu0 }
 0x327   : > { %v4077_v38 = vadd.f32 %v4076_v37, %v4035_v35 }
 0x328   : > { %v4078_v41 = vpop.f32.mrf.mxu1  ;;  %v4039_v44 = vpop.f32.mrf.mxu0 }
 0x329   : > { %v4097_v42 = vadd.f32 %v4077_v38, %v337_v36  ;;  %v4079_v43 = vadd.f32 %v4078_v41, %v4037_v39  ;;  %4118 = sbr.rel (%p4945_p0) target bundleno = 854 (0x356), region = 48 }
 0x32a   : > { %v4080_v45 = vpop.f32.mrf.mxu1  ;;  %v4040_v47 = vpop.f32.mrf.mxu0 }
 0x32b   : > { %4113 = vst [vmem:[%s5458_s29 + $0x70] sm:$0xff] %v4097_v42  ;;  %v4098_v46 = vadd.f32 %v4079_v43, %v338_v40 }
 0x32c   : > { %v4081_v48 = vpop.f32.mrf.mxu1 }
 0x32d   : > { %4114 = vst [vmem:[%s5458_s29 + $0x78] sm:$0xff] %v4098_v46 }
 0x32e   : > { %v4139_v49 = vlaneseq  ;;  %v4135_v51 = vld [vmem:[%s239_s9] sm:$0xff]  ;;  %v4120_v61 = vld [vmem:[%s5458_s29 + $0x8] sm:$0xff]  ;;  %v4122_v6 = vld [vmem:[%s5458_s29 + $0x18] sm:$0xff] }
 0x32f   : > { %v4119_v52 = vld [vmem:[%s5458_s29] sm:$0xff]  ;;  %v4121_v62 = vld [vmem:[%s5458_s29 + $0x10] sm:$0xff]  ;;  %v4136_v10 = vld [vmem:[%s239_s9 + $0x8] sm:$0xff] }
 0x330   : > { %v4140_v50 = vshrl.u32 %v4139_v49, 7  ;;  %v4123_v8 = vld [vmem:[%s5458_s29 + $0x20] sm:$0xff]  ;;  %v4124_v13 = vld [vmem:[%s5458_s29 + $0x28] sm:$0xff]  ;;  %v4125_v16 = vld [vmem:[%s5458_s29 + $0x30] sm:$0xff] }
 0x331   : > { %v4126_v59 = vld [vmem:[%s5458_s29 + $0x38] sm:$0xff]  ;;  %v4127_v23 = vld [vmem:[%s5458_s29 + $0x40] sm:$0xff]  ;;  %v4128_v25 = vld [vmem:[%s5458_s29 + $0x48] sm:$0xff] }
 0x332   : > { %v4141_v53 = vsub.s32 0, %v4140_v50  ;;  %v4145_v56 = vsub.s32 1, %v4140_v50  ;;  %v4149_v57 = vsub.s32 2, %v4140_v50  ;;  %v4153_v58 = vsub.s32 3, %v4140_v50  ;;  %v4129_v27 = vld [vmem:[%s5458_s29 + $0x50] sm:$0xff]  ;;  %v4130_v29 = vld [vmem:[%s5458_s29 + $0x58] sm:$0xff] }
 0x333   : > { %v4157_v63 = vsub.s32 4, %v4140_v50  ;;  %v4161_v0 = vsub.s32 5, %v4140_v50  ;;  %v4165_v1 = vsub.s32 6, %v4140_v50  ;;  %v4169_v2 = vsub.s32 7, %v4140_v50  ;;  %v4131_v32 = vld [vmem:[%s5458_s29 + $0x60] sm:$0xff]  ;;  %v4132_v35 = vld [vmem:[%s5458_s29 + $0x68] sm:$0xff] }
 0x334   : > { %v4142_v3 = vrot.slane %v4135_v51, %v4141_v53  ;;  %v4146_v4 = vrot.slane %v4135_v51, %v4145_v56  ;;  %v4150_v5 = vrot.slane %v4135_v51, %v4149_v57  ;;  %v4154_v7 = vrot.slane %v4135_v51, %v4153_v58  ;;  %v4133_v38 = vld [vmem:[%s5458_s29 + $0x70] sm:$0xff]  ;;  %v4134_v41 = vld [vmem:[%s5458_s29 + $0x78] sm:$0xff] }
 0x335   : > { %v4158_v9 = vrot.slane %v4135_v51, %v4157_v63  ;;  %v4162_v17 = vrot.slane %v4135_v51, %v4161_v0  ;;  %v4166_v14 = vrot.slane %v4135_v51, %v4165_v1  ;;  %v4170_v18 = vrot.slane %v4135_v51, %v4169_v2 }
 0x336   : > { %v4219_v11 = vadd.f32 %v4142_v3, %v4119_v52  ;;  %v4220_v20 = vadd.f32 %v4146_v4, %v4120_v61  ;;  %v4221_v12 = vadd.f32 %v4150_v5, %v4121_v62  ;;  %v4222_v15 = vadd.f32 %v4154_v7, %v4122_v6 }
 0x337   : > { %v4223_v19 = vadd.f32 %v4158_v9, %v4123_v8  ;;  %v4174_v21 = vrot.slane %v4136_v10, %v4141_v53  ;;  %v4224_v22 = vadd.f32 %v4162_v17, %v4124_v13  ;;  %v4178_v60 = vrot.slane %v4136_v10, %v4145_v56 }
 0x338   : > { %5058 = vtanh.f32 %v4219_v11  ;;  %v4225_v24 = vadd.f32 %v4166_v14, %v4125_v16  ;;  %v4182_v54 = vrot.slane %v4136_v10, %v4149_v57  ;;  %v4226_v26 = vadd.f32 %v4170_v18, %v4126_v59 }
 0x339   : > { %5060 = vtanh.f32 %v4220_v20  ;;  %v4186_v55 = vrot.slane %v4136_v10, %v4153_v58  ;;  %v4227_v28 = vadd.f32 %v4174_v21, %v4127_v23  ;;  %v4190_v30 = vrot.slane %v4136_v10, %v4157_v63 }
 0x33a   : > { %5062 = vtanh.f32 %v4221_v12  ;;  %v4228_v31 = vadd.f32 %v4178_v60, %v4128_v25  ;;  %v4194_v33 = vrot.slane %v4136_v10, %v4161_v0  ;;  %v4229_v34 = vadd.f32 %v4182_v54, %v4129_v27 }
 0x33b   : > { %5064 = vtanh.f32 %v4222_v15  ;;  %v4198_v36 = vrot.slane %v4136_v10, %v4165_v1  ;;  %v4230_v37 = vadd.f32 %v4186_v55, %v4130_v29  ;;  %v4202_v39 = vrot.slane %v4136_v10, %v4169_v2 }
 0x33c   : > { %5066 = vtanh.f32 %v4223_v19  ;;  %v4231_v40 = vadd.f32 %v4190_v30, %v4131_v32  ;;  %v4232_v42 = vadd.f32 %v4194_v33, %v4132_v35 }
 0x33d   : > { %5068 = vtanh.f32 %v4224_v22  ;;  %v4233_v43 = vadd.f32 %v4198_v36, %v4133_v38  ;;  %v4234_v44 = vadd.f32 %v4202_v39, %v4134_v41 }
 0x33e   : > { %5070 = vtanh.f32 %v4225_v24 }
 0x33f   : > { %5072 = vtanh.f32 %v4226_v26 }
 0x340   : > { %5074 = vtanh.f32 %v4227_v28 }
 0x341   : > { %5076 = vtanh.f32 %v4228_v31 }
 0x342   : > { %5078 = vtanh.f32 %v4229_v34 }
 0x343   : > { %5080 = vtanh.f32 %v4230_v37 }
 0x344   : > { %5082 = vtanh.f32 %v4231_v40 }
 0x345   : > { %v5059_v45 = vpop.eup %5058  ;;  %5084 = vtanh.f32 %v4232_v42 }
 0x346   : > { %v5061_v46 = vpop.eup %5060  ;;  %4251 = vst [vmem:[%s5458_s29] sm:$0xff] %v5059_v45  ;;  %5086 = vtanh.f32 %v4233_v43 }
 0x347   : > { %v5063_v47 = vpop.eup %5062  ;;  %4252 = vst [vmem:[%s5458_s29 + $0x8] sm:$0xff] %v5061_v46  ;;  %5088 = vtanh.f32 %v4234_v44 }
 0x348   : > { %v5065_v48 = vpop.eup %5064  ;;  %4253 = vst [vmem:[%s5458_s29 + $0x10] sm:$0xff] %v5063_v47 }
 0x349   : > { %v5067_v49 = vpop.eup %5066  ;;  %4254 = vst [vmem:[%s5458_s29 + $0x18] sm:$0xff] %v5065_v48 }
 0x34a   : > { %v5069_v50 = vpop.eup %5068  ;;  %4255 = vst [vmem:[%s5458_s29 + $0x20] sm:$0xff] %v5067_v49 }
 0x34b   : > { %v5071_v51 = vpop.eup %5070  ;;  %4256 = vst [vmem:[%s5458_s29 + $0x28] sm:$0xff] %v5069_v50 }
 0x34c   : > { %v5073_v52 = vpop.eup %5072  ;;  %4257 = vst [vmem:[%s5458_s29 + $0x30] sm:$0xff] %v5071_v51 }
 0x34d   : > { %v5075_v53 = vpop.eup %5074  ;;  %4258 = vst [vmem:[%s5458_s29 + $0x38] sm:$0xff] %v5073_v52 }
 0x34e   : > { %v5077_v56 = vpop.eup %5076  ;;  %4259 = vst [vmem:[%s5458_s29 + $0x40] sm:$0xff] %v5075_v53 }
 0x34f   : > { %v5079_v57 = vpop.eup %5078  ;;  %4260 = vst [vmem:[%s5458_s29 + $0x48] sm:$0xff] %v5077_v56 }
 0x350   : > { %v5081_v58 = vpop.eup %5080  ;;  %4261 = vst [vmem:[%s5458_s29 + $0x50] sm:$0xff] %v5079_v57 }
 0x351   : > { %v5083_v61 = vpop.eup %5082  ;;  %4262 = vst [vmem:[%s5458_s29 + $0x58] sm:$0xff] %v5081_v58 }
 0x352   : > { %v5085_v62 = vpop.eup %5084  ;;  %4263 = vst [vmem:[%s5458_s29 + $0x60] sm:$0xff] %v5083_v61 }
 0x353   : > { %v5087_v63 = vpop.eup %5086  ;;  %4264 = vst [vmem:[%s5458_s29 + $0x68] sm:$0xff] %v5085_v62 }
 0x354   : > { %v5089_v0 = vpop.eup %5088  ;;  %4265 = vst [vmem:[%s5458_s29 + $0x70] sm:$0xff] %v5087_v63 }
 0x355   : > { %4266 = vst [vmem:[%s5458_s29 + $0x78] sm:$0xff] %v5089_v0 }
 0x356 PF: > { %s19_s22 = sadd.s32 1, %s5240_s22   ;;  %s6165_s10 = sld [smem:[#allocation8_spill]] }
 0x357   : > { %p16_p1 = scmp.ge.s32.totalorder %s19_s22, 8   ;;  %s6166_s26 = sld [smem:[#allocation9_spill]] }
 0x358   : > { %s6167_s12 = smov %s5204_s13  ;;  %s6168_s13 = smov %s5208_s14 }
 0x359   : > { %s6169_s14 = smov %s5408_s30  ;;  %s6170_s15 = smov %s5216_s16 }
 0x35a   : > { %s6171_s16 = smov %s5220_s17  ;;  %s6172_s17 = smov %s5413_s27 }
 0x35b   : > { %s6173_s18 = smov %s5232_s20  ;;  %s6174_s19 = smov %s5236_s21 }
 0x35c   : > { %s6175_s20 = smov %s6165_s10  ;;  %18 = sbr.rel (!%p16_p1) target bundleno = 11 (0xb), region = 96 }
 0x35d   : > { %s6176_s21 = smov %s6166_s26 }
 0x361   :  { %4297 = vsyncpa [#allocation3], 1 }
 0x362   :  { %4299 = vsyncpa [#allocation3 + $0x1], 1 }
 0x363   :  { %4300 = vsyncpa [#allocation5], 1 }
 0x364   :  { %4302 = vsyncpa [#allocation5 + $0x1], 1 }

// kernel: fwd.15
= control target key start
LH: loop header
LB: loop body
LE: loop exit
PB: predicated region body
PF: predicated region fallthrough
CT: control target
= control target key end

     0   :  { %s1387_s12 = smov 0   ;;  %s1389_s13 = smov 0   ;;  %s1707_s0 = inlined_call_operand.vmem [shape: bf16[80,1024], index: 0, kind: input, shape index: {}]   ;;  %s1708_s1 = inlined_call_operand.vmem [shape: bf16[1024,128], index: 1, kind: input, shape index: {}]   ;;  %s1709_s2 = inlined_call_operand.vmem [shape: f32[1,128], index: 2, kind: input, shape index: {}]   ;;  %s1710_s3 = inlined_call_operand.vmem [shape: f32[80,128], index: 3, kind: output, shape index: {}]  }
   0x1   :  { %s1391_s14 = smov 0   ;;  %s1393_s15 = smov 0  }
   0x2   :  { %s1395_s16 = smov 0  }
   0x3 LB: > { %s25_s17 = sadd.s32 1, %s1360_s15  ;;  %p48_p1 = scmp.ne.s32.totalorder %s1352_s13, %s1348_s12  ;;  %s1364_s16 = sphi %s1395_s16, %s13_s16   ;;  %s1360_s15 = sphi %s1393_s15, %s1714_s15   ;;  %s1356_s14 = sphi %s1391_s14, %s1713_s14   ;;  %s1352_s13 = sphi %s1389_s13, %s1712_s13   ;;  %s1348_s12 = sphi %s1387_s12, %s1711_s12  }
   0x4   : > { %p26_p0 = scmp.ge.s32.totalorder %s25_s17, 2  ;;  %p49_p2 = scmp.eq.s32.totalorder %s1364_s16, 0 }
   0x5   : > { %s41_s19 = sadd.s32 1, %s1352_s13  ;;  %p1043_p5 = scmp.ge.s32.totalorder %s1364_s16, 2 }
   0x6   : > { %s1716_s17 = smov (%p26_p0, %s25_s17), 0  ;;  %p50_p3 = por %p49_p2, %p48_p1 }
   0x7   : > { %s37_s18 = ssub.s32 %s1360_s15, %s1716_s17  ;;  %162 = sbr.rel (%p1043_p5) target bundleno = 26 (0x1a), region = 20 }
   0x8   : > { %p39_p4 = scmp.eq.s32.totalorder %s37_s18, 0 }
   0xa   : > { %s1422_s20 = scalar_select %p39_p4, %s1352_s13, %s41_s19  }
   0xc   : > { %165 = sbr.rel (!%p50_p3) target bundleno = 26 (0x1a), region = 24  ;;  %s167_s21 = sand.u32 (%p50_p3), 1, %s1352_s13  }
   0xd   : > { %s1108_s22 = sshll.u32 (%p50_p3), %s1360_s15, 4  ;;  %s1201_s23 = smul.u32 (%p50_p3), 160, %s167_s21 }
   0xe   : > { %s1430_s26 = scalar_lea.vmem (%p50_p3), %s1707_s0, %s1108_s22 }
   0xf   : > { %v188_v0 = vld [vmem:[%s1430_s26] sm:$0xff] (%p50_p3)  ;;  %v190_v1 = vld [vmem:[%s1430_s26 + $0x8] sm:$0xff] (%p50_p3)  ;;  %s1438_s27 = scalar_lea.vmem (%p50_p3), [#allocation2], %s1201_s23 }
  0x10   : > { %v192_v2 = vld [vmem:[%s1430_s26 + $0x20] sm:$0xff] (%p50_p3)  ;;  %v194_v3 = vld [vmem:[%s1430_s26 + $0x28] sm:$0xff] (%p50_p3)  ;;  %189 = vst [vmem:[%s1438_s27] sm:$0xff] (%p50_p3), %v188_v0  ;;  %191 = vst [vmem:[%s1438_s27 + $0x8] sm:$0xff] (%p50_p3), %v190_v1 }
  0x11   : > { %v196_v4 = vld [vmem:[%s1430_s26 + $0x40] sm:$0xff]  ;;  %v198_v5 = vld [vmem:[%s1430_s26 + $0x48] sm:$0xff]  ;;  %193 = vst [vmem:[%s1438_s27 + $0x10] sm:$0xff] %v192_v2  ;;  %195 = vst [vmem:[%s1438_s27 + $0x18] sm:$0xff] %v194_v3 }
  0x12   : > { %197 = vst [vmem:[%s1438_s27 + $0x20] sm:$0xff] %v196_v4  ;;  %199 = vst [vmem:[%s1438_s27 + $0x28] sm:$0xff] %v198_v5  ;;  %v200_v6 = vld [vmem:[%s1430_s26 + $0x60] sm:$0xff]  ;;  %v202_v7 = vld [vmem:[%s1430_s26 + $0x68] sm:$0xff] }
  0x13   : > { %v204_v8 = vld [vmem:[%s1430_s26 + $0x80] sm:$0xff]  ;;  %201 = vst [vmem:[%s1438_s27 + $0x30] sm:$0xff] %v200_v6  ;;  %203 = vst [vmem:[%s1438_s27 + $0x38] sm:$0xff] %v202_v7  ;;  %v206_v9 = vld [vmem:[%s1430_s26 + $0x88] sm:$0xff] }
  0x14   : > { %205 = vst [vmem:[%s1438_s27 + $0x40] sm:$0xff] %v204_v8  ;;  %v208_v10 = vld [vmem:[%s1430_s26 + $0xa0] sm:$0xff]  ;;  %v210_v11 = vld [vmem:[%s1430_s26 + $0xa8] sm:$0xff]  ;;  %207 = vst [vmem:[%s1438_s27 + $0x48] sm:$0xff] %v206_v9 }
  0x15   : > { %209 = vst [vmem:[%s1438_s27 + $0x50] sm:$0xff] %v208_v10  ;;  %211 = vst [vmem:[%s1438_s27 + $0x58] sm:$0xff] %v210_v11  ;;  %v212_v12 = vld [vmem:[%s1430_s26 + $0xc0] sm:$0xff]  ;;  %v214_v13 = vld [vmem:[%s1430_s26 + $0xc8] sm:$0xff] }
  0x16   : > { %v216_v14 = vld [vmem:[%s1430_s26 + $0xe0] sm:$0xff]  ;;  %213 = vst [vmem:[%s1438_s27 + $0x60] sm:$0xff] %v212_v12  ;;  %215 = vst [vmem:[%s1438_s27 + $0x68] sm:$0xff] %v214_v13  ;;  %v218_v15 = vld [vmem:[%s1430_s26 + $0xe8] sm:$0xff] }
  0x17   : > { %217 = vst [vmem:[%s1438_s27 + $0x70] sm:$0xff] %v216_v14  ;;  %v220_v16 = vld [vmem:[%s1430_s26 + $0x100] sm:$0xff]  ;;  %v222_v17 = vld [vmem:[%s1430_s26 + $0x108] sm:$0xff]  ;;  %219 = vst [vmem:[%s1438_s27 + $0x78] sm:$0xff] %v218_v15 }
  0x18   : > { %221 = vst [vmem:[%s1438_s27 + $0x80] sm:$0xff] %v220_v16  ;;  %223 = vst [vmem:[%s1438_s27 + $0x88] sm:$0xff] %v222_v17  ;;  %v224_v18 = vld [vmem:[%s1430_s26 + $0x120] sm:$0xff]  ;;  %v226_v19 = vld [vmem:[%s1430_s26 + $0x128] sm:$0xff] }
  0x19   : > { %225 = vst [vmem:[%s1438_s27 + $0x90] sm:$0xff] %v224_v18  ;;  %227 = vst [vmem:[%s1438_s27 + $0x98] sm:$0xff] %v226_v19 }
  0x1a PF: > { %p1046_p6 = scmp.ge.s32.totalorder %s1364_s16, 1  ;;  %p244_p7 = scmp.lt.s32.totalorder %s1364_s16, 3 }
  0x1c   : > { %p245_p8 = pnand %p1046_p6, %p244_p7 }
  0x1d   : > { %s251_s28 = sand.u32 (!%p245_p8), 1, %s1348_s12   ;;  %s1047_s29 = sshll.u32 (!%p245_p8), %s1356_s14, 6 }
  0x1e   : > { %248 = sbr.rel (%p245_p8) target bundleno = 347 (0x15b), region = 51  ;;  %p291_p9 = scmp.lt.s32.totalorder (!%p245_p8), %s1047_s29, 127 }
  0x1f   : > { %s1202_s30 = smul.u32 (!%p245_p8), 160, %s251_s28  ;;  %p1049_p10 = scmp.ne.s32.totalorder (!%p245_p8), %s1356_s14, 0 }
  0x21   : > { %s1483_s8 = scalar_lea.vmem (!%p245_p8), [#allocation2], %s1202_s30 }
  0x23   : > { %s1718_s29 = smov (!%p291_p9, %s1047_s29), 127  ;;  %315 = sbr.rel (%p1049_p10) target bundleno = 46 (0x2e), region = 59 }
  0x24   : > { %s1048_s4 = sshll.u32 %s1718_s29, 2 }
  0x25   : > { %s1481_s7 = scalar_lea.vmem %s1708_s1, %s1048_s4 }
  0x28   : > { %v1366_v20 = vmov 0.0  }
  0x29   : > { %316 = vst [vmem:[%s1710_s3] sm:$0xff] %v1366_v20  ;;  %317 = vst [vmem:[%s1710_s3 + $0x8] sm:$0xff] %v1366_v20 }
  0x2a   : > { %318 = vst [vmem:[%s1710_s3 + $0x10] sm:$0xff] %v1366_v20  ;;  %319 = vst [vmem:[%s1710_s3 + $0x18] sm:$0xff] %v1366_v20 }
  0x2b   : > { %320 = vst [vmem:[%s1710_s3 + $0x20] sm:$0xff] %v1366_v20  ;;  %321 = vst [vmem:[%s1710_s3 + $0x28] sm:$0xff] %v1366_v20 }
  0x2c   : > { %322 = vst [vmem:[%s1710_s3 + $0x30] sm:$0xff] %v1366_v20  ;;  %323 = vst [vmem:[%s1710_s3 + $0x38] sm:$0xff] %v1366_v20 }
  0x2d   : > { %324 = vst [vmem:[%s1710_s3 + $0x40] sm:$0xff] %v1366_v20  ;;  %325 = vst [vmem:[%s1710_s3 + $0x48] sm:$0xff] %v1366_v20 }
  0x2e PF: > { %v1244_v21 = vld [vmem:[%s1481_s7 + $0x78] sm:$0xff]   ;;  %v1248_v25 = vld [vmem:[%s1481_s7 + $0x70] sm:$0xff]   ;;  %v1252_v29 = vld [vmem:[%s1481_s7 + $0x68] sm:$0xff]   ;;  %p1102_p11 = scmp.ne.s32.totalorder %s1356_s14, 1 }
  0x2f   : > { %v1245_v22 = vld [vmem:[%s1481_s7 + $0xf8] sm:$0xff]   ;;  %1109 = vmatprep.subr.bf16.mxu0 %v1244_v21  ;;  %v1249_v26 = vld [vmem:[%s1481_s7 + $0xf0] sm:$0xff]   ;;  %v1253_v30 = vld [vmem:[%s1481_s7 + $0xe8] sm:$0xff]  }
  0x30   : > { %v1246_v23 = vld [vmem:[%s1481_s7 + $0x38] sm:$0xff]   ;;  %1155 = vmatprep.subr.bf16.mxu1 %v1245_v22  ;;  %v1250_v27 = vld [vmem:[%s1481_s7 + $0x30] sm:$0xff]   ;;  %v1254_v31 = vld [vmem:[%s1481_s7 + $0x28] sm:$0xff]  }
  0x31   : > { %v1247_v24 = vld [vmem:[%s1481_s7 + $0xb8] sm:$0xff]   ;;  %1110 = vmatpush3.bf16.msra.mxu0 %v1246_v23  ;;  %v1251_v28 = vld [vmem:[%s1481_s7 + $0xb0] sm:$0xff]   ;;  %v1255_v32 = vld [vmem:[%s1481_s7 + $0xa8] sm:$0xff]  }
  0x32   : > { %1156 = vmatpush3.bf16.msra.mxu1 %v1247_v24  ;;  %1111 = vmatprep.subr.bf16.mxu0 %v1248_v25  ;;  %v1256_v33 = vld [vmem:[%s1481_s7 + $0x60] sm:$0xff]   ;;  %v1260_v37 = vld [vmem:[%s1481_s7 + $0x58] sm:$0xff]   ;;  %v1264_v41 = vld [vmem:[%s1481_s7 + $0x50] sm:$0xff]  }
  0x33   : > { %1157 = vmatprep.subr.bf16.mxu1 %v1249_v26  ;;  %v1257_v34 = vld [vmem:[%s1481_s7 + $0xe0] sm:$0xff]   ;;  %v1261_v38 = vld [vmem:[%s1481_s7 + $0xd8] sm:$0xff]   ;;  %v1265_v42 = vld [vmem:[%s1481_s7 + $0xd0] sm:$0xff]  }
  0x34   : > { %v1258_v35 = vld [vmem:[%s1481_s7 + $0x20] sm:$0xff]   ;;  %v1262_v39 = vld [vmem:[%s1481_s7 + $0x18] sm:$0xff]   ;;  %v1266_v43 = vld [vmem:[%s1481_s7 + $0x10] sm:$0xff]  }
  0x35   : > { %1112 = vmatpush3.bf16.msra.mxu0 %v1250_v27  ;;  %v1259_v36 = vld [vmem:[%s1481_s7 + $0xa0] sm:$0xff]   ;;  %v1263_v40 = vld [vmem:[%s1481_s7 + $0x98] sm:$0xff]   ;;  %v1267_v44 = vld [vmem:[%s1481_s7 + $0x90] sm:$0xff]  }
  0x36   : > { %1158 = vmatpush3.bf16.msra.mxu1 %v1251_v28  ;;  %1113 = vmatprep.subr.bf16.mxu0 %v1252_v29  ;;  %v1268_v45 = vld [vmem:[%s1481_s7 + $0x48] sm:$0xff]   ;;  %v1272_v49 = vld [vmem:[%s1481_s7 + $0x40] sm:$0xff]  }
  0x37   : > { %1159 = vmatprep.subr.bf16.mxu1 %v1253_v30  ;;  %v1269_v46 = vld [vmem:[%s1481_s7 + $0xc8] sm:$0xff]   ;;  %v1273_v50 = vld [vmem:[%s1481_s7 + $0xc0] sm:$0xff]  }
  0x38   : > { %v1270_v47 = vld [vmem:[%s1481_s7 + $0x8] sm:$0xff]   ;;  %v1274_v51 = vld [vmem:[%s1481_s7] sm:$0xff]  }
  0x39   : > { %1114 = vmatpush3.bf16.msra.mxu0 %v1254_v31  ;;  %v1271_v48 = vld [vmem:[%s1481_s7 + $0x88] sm:$0xff]   ;;  %v1275_v52 = vld [vmem:[%s1481_s7 + $0x80] sm:$0xff]  }
  0x3a   : > { %1160 = vmatpush3.bf16.msra.mxu1 %v1255_v32  ;;  %1115 = vmatprep.subr.bf16.mxu0 %v1256_v33  ;;  %v1276_v53 = vld [vmem:[%s1483_s8] ss:$16 sps:$4 sm:$0xff]   ;;  %v1278_v54 = vld [vmem:[%s1483_s8 + $0x4] ss:$16 sps:$4 sm:$0xff]   ;;  %v1279_v55 = vld [vmem:[%s1483_s8 + $0x8] ss:$16 sps:$4 sm:$0xff]  }
  0x3b   : > { %1161 = vmatprep.subr.bf16.mxu1 %v1257_v34  ;;  %v1281_v56 = vld [vmem:[%s1483_s8 + $0xc] ss:$16 sps:$4 sm:$0xff]   ;;  %744 = vmatprep.mubr.bf16.mxu0 %v1278_v54  ;;  %v1282_v57 = vld [vmem:[%s1483_s8 + $0x24] ss:$16 sps:$4 sm:$0xff]   ;;  %v1286_v59 = vld [vmem:[%s1483_s8 + $0x20] ss:$16 sps:$4 sm:$0xff]  }
  0x3c   : > { %817 = vmatprep.mubr.bf16.mxu1 %v1281_v56  ;;  %v1284_v58 = vld [vmem:[%s1483_s8 + $0x2c] ss:$16 sps:$4 sm:$0xff]   ;;  %v1287_v60 = vld [vmem:[%s1483_s8 + $0x28] ss:$16 sps:$4 sm:$0xff]   ;;  %v1288_v61 = vld [vmem:[%s1483_s8 + $0x44] ss:$16 sps:$4 sm:$0xff]  }
  0x3d   : > { %1116 = vmatpush3.bf16.msra.mxu0 %v1258_v35  ;;  %v1290_v62 = vld [vmem:[%s1483_s8 + $0x4c] ss:$16 sps:$4 sm:$0xff]   ;;  %v1292_v63 = vld [vmem:[%s1483_s8 + $0x40] ss:$16 sps:$4 sm:$0xff]   ;;  %v1293_v0 = vld [vmem:[%s1483_s8 + $0x48] ss:$16 sps:$4 sm:$0xff]  }
  0x3e   : > { %1162 = vmatpush3.bf16.msra.mxu1 %v1259_v36  ;;  %1117 = vmatprep.subr.bf16.mxu0 %v1260_v37  ;;  %v1294_v1 = vld [vmem:[%s1483_s8 + $0x64] ss:$16 sps:$4 sm:$0xff]   ;;  %v1296_v2 = vld [vmem:[%s1483_s8 + $0x6c] ss:$16 sps:$4 sm:$0xff]   ;;  %v1298_v3 = vld [vmem:[%s1483_s8 + $0x60] ss:$16 sps:$4 sm:$0xff]  }
  0x3f   : > { %1163 = vmatprep.subr.bf16.mxu1 %v1261_v38  ;;  %v1299_v4 = vld [vmem:[%s1483_s8 + $0x68] ss:$16 sps:$4 sm:$0xff]   ;;  %v1300_v5 = vld [vmem:[%s1483_s8 + $0x84] ss:$16 sps:$4 sm:$0xff]   ;;  %v1302_v6 = vld [vmem:[%s1483_s8 + $0x8c] ss:$16 sps:$4 sm:$0xff]  }
  0x40   : > { %v1304_v7 = vld [vmem:[%s1483_s8 + $0x80] ss:$16 sps:$4 sm:$0xff]   ;;  %v1305_v8 = vld [vmem:[%s1483_s8 + $0x88] ss:$16 sps:$4 sm:$0xff]  }
  0x41   : > { %1118 = vmatpush3.bf16.msra.mxu0 %v1262_v39  ;;  %v326_v16 = vld [vmem:[%s1710_s3] sm:$0xff]  ;;  %v327_v25 = vld [vmem:[%s1710_s3 + $0x8] sm:$0xff]  ;;  %v328_v34 = vld [vmem:[%s1710_s3 + $0x10] sm:$0xff] }
  0x42   : > { %1164 = vmatpush3.bf16.msra.mxu1 %v1263_v40  ;;  %1119 = vmatprep.subr.bf16.mxu0 %v1264_v41 }
  0x43   : > { %1165 = vmatprep.subr.bf16.mxu1 %v1265_v42 }
  0x45   : > { %1120 = vmatpush3.bf16.msra.mxu0 %v1266_v43  ;;  %v329_v43 = vld [vmem:[%s1710_s3 + $0x18] sm:$0xff] }
  0x46   : > { %1166 = vmatpush3.bf16.msra.mxu1 %v1267_v44  ;;  %1121 = vmatprep.subr.bf16.mxu0 %v1268_v45 }
  0x47   : > { %1167 = vmatprep.subr.bf16.mxu1 %v1269_v46 }
  0x49   : > { %1122 = vmatpush3.bf16.msra.mxu0 %v1270_v47 }
  0x4a   : > { %1168 = vmatpush3.bf16.msra.mxu1 %v1271_v48  ;;  %1123 = vmatprep.subr.bf16.mxu0 %v1272_v49 }
  0x4b   : > { %1169 = vmatprep.subr.bf16.mxu1 %v1273_v50 }
  0x4d   : > { %1124 = vmatpush3.bf16.msra.mxu0 %v1274_v51 }
  0x4e   : > { %1170 = vmatpush3.bf16.msra.mxu1 %v1275_v52  ;;  %v330_v52 = vld [vmem:[%s1710_s3 + $0x20] sm:$0xff] }
  0x50   : > { %745 = vmatmul.mubr.bf16.vlgmr.msra.gmra.mxu0 %v1276_v53 }
  0x51   : > { %818 = vmatmul.mubr.bf16.vlgmr.msra.gmra.mxu1 %v1279_v55  ;;  %752 = vmatprep.mubr.bf16.mxu0 %v1282_v57 }
  0x52   : > { %825 = vmatprep.mubr.bf16.mxu1 %v1284_v58 }
  0x58   : > { %753 = vmatmul.mubr.bf16.gmra.mxu0 %v1286_v59 }
  0x59   : > { %826 = vmatmul.mubr.bf16.gmra.mxu1 %v1287_v60  ;;  %760 = vmatprep.mubr.bf16.mxu0 %v1288_v61  ;;  %v331_v61 = vld [vmem:[%s1710_s3 + $0x28] sm:$0xff] }
  0x5a   : > { %833 = vmatprep.mubr.bf16.mxu1 %v1290_v62 }
  0x60   : > { %761 = vmatmul.mubr.bf16.gmra.mxu0 %v1292_v63 }
  0x61   : > { %834 = vmatmul.mubr.bf16.gmra.mxu1 %v1293_v0  ;;  %768 = vmatprep.mubr.bf16.mxu0 %v1294_v1 }
  0x62   : > { %841 = vmatprep.mubr.bf16.mxu1 %v1296_v2 }
  0x68   : > { %769 = vmatmul.mubr.bf16.gmra.mxu0 %v1298_v3 }
  0x69   : > { %842 = vmatmul.mubr.bf16.gmra.mxu1 %v1299_v4  ;;  %776 = vmatprep.mubr.bf16.mxu0 %v1300_v5 }
  0x6a   : > { %849 = vmatprep.mubr.bf16.mxu1 %v1302_v6  ;;  %v332_v6 = vld [vmem:[%s1710_s3 + $0x30] sm:$0xff] }
  0x70   : > { %777 = vmatmul.mubr.bf16.gmra.mxu0 %v1304_v7 }
  0x71   : > { %850 = vmatmul.mubr.bf16.gmra.mxu1 %v1305_v8 }
 0x110   : > { %v1125_v9 = vpop.f32.mrf.mxu0 }
 0x111   : > { %v1171_v10 = vpop.f32.mrf.mxu1 }
 0x112   : > { %v1126_v11 = vpop.f32.mrf.mxu0 }
 0x113   : > { %v1127_v12 = vadd.f32 %v1126_v11, %v1125_v9  ;;  %v1172_v13 = vpop.f32.mrf.mxu1 }
 0x114   : > { %v1173_v14 = vadd.f32 %v1172_v13, %v1171_v10  ;;  %v1128_v15 = vpop.f32.mrf.mxu0 }
 0x115   : > { %v1174_v17 = vpop.f32.mrf.mxu1 }
 0x116   : > { %v820_v18 = vadd.f32 %v1173_v14, %v1127_v12  ;;  %v1129_v19 = vpop.f32.mrf.mxu0 }
 0x117   : > { %v1130_v20 = vadd.f32 %v1129_v19, %v1128_v15  ;;  %v1175_v21 = vpop.f32.mrf.mxu1  ;;  %v333_v15 = vld [vmem:[%s1710_s3 + $0x38] sm:$0xff] }
 0x118   : > { %v858_v22 = vadd.f32 %v820_v18, %v326_v16  ;;  %v1176_v23 = vadd.f32 %v1175_v21, %v1174_v17  ;;  %v1131_v24 = vpop.f32.mrf.mxu0 }
 0x119   : > { %v1177_v26 = vpop.f32.mrf.mxu1 }
 0x11a   : > { %868 = vst [vmem:[%s1710_s3] sm:$0xff] %v858_v22  ;;  %v823_v27 = vadd.f32 %v1176_v23, %v1130_v20  ;;  %v1132_v28 = vpop.f32.mrf.mxu0 }
 0x11b   : > { %v1133_v29 = vadd.f32 %v1132_v28, %v1131_v24  ;;  %v1178_v30 = vpop.f32.mrf.mxu1  ;;  %v334_v24 = vld [vmem:[%s1710_s3 + $0x40] sm:$0xff] }
 0x11c   : > { %v859_v31 = vadd.f32 %v823_v27, %v327_v25  ;;  %v1179_v32 = vadd.f32 %v1178_v30, %v1177_v26  ;;  %v1134_v33 = vpop.f32.mrf.mxu0 }
 0x11d   : > { %v1180_v35 = vpop.f32.mrf.mxu1 }
 0x11e   : > { %869 = vst [vmem:[%s1710_s3 + $0x8] sm:$0xff] %v859_v31  ;;  %v828_v36 = vadd.f32 %v1179_v32, %v1133_v29  ;;  %v1135_v37 = vpop.f32.mrf.mxu0  ;;  %v335_v32 = vld [vmem:[%s1710_s3 + $0x48] sm:$0xff] }
 0x11f   : > { %v1136_v38 = vadd.f32 %v1135_v37, %v1134_v33  ;;  %v1181_v39 = vpop.f32.mrf.mxu1 }
 0x120   : > { %v860_v40 = vadd.f32 %v828_v36, %v328_v34  ;;  %v1182_v41 = vadd.f32 %v1181_v39, %v1180_v35  ;;  %v1137_v42 = vpop.f32.mrf.mxu0 }
 0x121   : > { %v1183_v44 = vpop.f32.mrf.mxu1 }
 0x122   : > { %870 = vst [vmem:[%s1710_s3 + $0x10] sm:$0xff] %v860_v40  ;;  %v831_v45 = vadd.f32 %v1182_v41, %v1136_v38  ;;  %v1138_v46 = vpop.f32.mrf.mxu0 }
 0x123   : > { %v1139_v47 = vadd.f32 %v1138_v46, %v1137_v42  ;;  %v1184_v48 = vpop.f32.mrf.mxu1 }
 0x124   : > { %v861_v49 = vadd.f32 %v831_v45, %v329_v43  ;;  %v1185_v50 = vadd.f32 %v1184_v48, %v1183_v44  ;;  %v1140_v51 = vpop.f32.mrf.mxu0 }
 0x125   : > { %v1186_v53 = vpop.f32.mrf.mxu1 }
 0x126   : > { %871 = vst [vmem:[%s1710_s3 + $0x18] sm:$0xff] %v861_v49  ;;  %v836_v54 = vadd.f32 %v1185_v50, %v1139_v47  ;;  %v1141_v55 = vpop.f32.mrf.mxu0 }
 0x127   : > { %v1142_v56 = vadd.f32 %v1141_v55, %v1140_v51  ;;  %v1187_v57 = vpop.f32.mrf.mxu1 }
 0x128   : > { %v862_v58 = vadd.f32 %v836_v54, %v330_v52  ;;  %v1188_v59 = vadd.f32 %v1187_v57, %v1186_v53  ;;  %v1143_v60 = vpop.f32.mrf.mxu0 }
 0x129   : > { %v1189_v62 = vpop.f32.mrf.mxu1 }
 0x12a   : > { %872 = vst [vmem:[%s1710_s3 + $0x20] sm:$0xff] %v862_v58  ;;  %v839_v63 = vadd.f32 %v1188_v59, %v1142_v56  ;;  %v1144_v0 = vpop.f32.mrf.mxu0 }
 0x12b   : > { %v1145_v1 = vadd.f32 %v1144_v0, %v1143_v60  ;;  %v1190_v2 = vpop.f32.mrf.mxu1 }
 0x12c   : > { %v863_v3 = vadd.f32 %v839_v63, %v331_v61  ;;  %v1191_v4 = vadd.f32 %v1190_v2, %v1189_v62  ;;  %v1146_v5 = vpop.f32.mrf.mxu0 }
 0x12d   : > { %v1192_v7 = vpop.f32.mrf.mxu1 }
 0x12e   : > { %873 = vst [vmem:[%s1710_s3 + $0x28] sm:$0xff] %v863_v3  ;;  %v844_v8 = vadd.f32 %v1191_v4, %v1145_v1  ;;  %v1147_v9 = vpop.f32.mrf.mxu0 }
 0x12f   : > { %v1148_v10 = vadd.f32 %v1147_v9, %v1146_v5  ;;  %v1193_v11 = vpop.f32.mrf.mxu1 }
 0x130   : > { %v864_v12 = vadd.f32 %v844_v8, %v332_v6  ;;  %v1194_v13 = vadd.f32 %v1193_v11, %v1192_v7  ;;  %v1149_v14 = vpop.f32.mrf.mxu0 }
 0x131   : > { %v1195_v16 = vpop.f32.mrf.mxu1 }
 0x132   : > { %874 = vst [vmem:[%s1710_s3 + $0x30] sm:$0xff] %v864_v12  ;;  %v847_v17 = vadd.f32 %v1194_v13, %v1148_v10  ;;  %v1150_v18 = vpop.f32.mrf.mxu0 }
 0x133   : > { %v1151_v19 = vadd.f32 %v1150_v18, %v1149_v14  ;;  %v1196_v20 = vpop.f32.mrf.mxu1 }
 0x134   : > { %v865_v21 = vadd.f32 %v847_v17, %v333_v15  ;;  %v1197_v22 = vadd.f32 %v1196_v20, %v1195_v16  ;;  %v1152_v23 = vpop.f32.mrf.mxu0 }
 0x135   : > { %v1198_v25 = vpop.f32.mrf.mxu1 }
 0x136   : > { %875 = vst [vmem:[%s1710_s3 + $0x38] sm:$0xff] %v865_v21  ;;  %v852_v26 = vadd.f32 %v1197_v22, %v1151_v19  ;;  %v1153_v27 = vpop.f32.mrf.mxu0 }
 0x137   : > { %v1154_v28 = vadd.f32 %v1153_v27, %v1152_v23  ;;  %v1199_v29 = vpop.f32.mrf.mxu1 }
 0x138   : > { %v866_v30 = vadd.f32 %v852_v26, %v334_v24  ;;  %v1200_v31 = vadd.f32 %v1199_v29, %v1198_v25 }
 0x13a   : > { %876 = vst [vmem:[%s1710_s3 + $0x40] sm:$0xff] %v866_v30  ;;  %v855_v33 = vadd.f32 %v1200_v31, %v1154_v28  ;;  %881 = sbr.rel (%p1102_p11) target bundleno = 347 (0x15b), region = 63 }
 0x13c   : > { %v867_v34 = vadd.f32 %v855_v33, %v335_v32 }
 0x13e   : > { %877 = vst [vmem:[%s1710_s3 + $0x48] sm:$0xff] %v867_v34 }
 0x13f   : > { %v882_v35 = vld [vmem:[%s1710_s3] sm:$0xff]  ;;  %v883_v37 = vld [vmem:[%s1710_s3 + $0x8] sm:$0xff]  ;;  %v884_v40 = vld [vmem:[%s1710_s3 + $0x10] sm:$0xff] }
 0x140   : > { %v1103_v36 = vld [vmem:[%s1709_s2] ss:$0 sm:$0xff]  ;;  %v885_v41 = vld [vmem:[%s1710_s3 + $0x18] sm:$0xff]  ;;  %v887_v45 = vld [vmem:[%s1710_s3 + $0x28] sm:$0xff] }
 0x141   : > { %v899_v38 = vadd.f32 %v1103_v36, %v882_v35  ;;  %v900_v39 = vadd.f32 %v1103_v36, %v883_v37  ;;  %v886_v42 = vld [vmem:[%s1710_s3 + $0x20] sm:$0xff]  ;;  %v901_v43 = vadd.f32 %v1103_v36, %v884_v40  ;;  %v902_v44 = vadd.f32 %v1103_v36, %v885_v41  ;;  %v888_v46 = vld [vmem:[%s1710_s3 + $0x30] sm:$0xff]  ;;  %v889_v48 = vld [vmem:[%s1710_s3 + $0x38] sm:$0xff] }
 0x142   : > { %v903_v47 = vadd.f32 %v1103_v36, %v886_v42  ;;  %v904_v49 = vadd.f32 %v1103_v36, %v887_v45  ;;  %v890_v50 = vld [vmem:[%s1710_s3 + $0x40] sm:$0xff]  ;;  %v905_v51 = vadd.f32 %v1103_v36, %v888_v46  ;;  %v906_v53 = vadd.f32 %v1103_v36, %v889_v48 }
 0x143   : > { %1306 = vtanh.f32 %v899_v38  ;;  %v907_v54 = vadd.f32 %v1103_v36, %v890_v50 }
 0x144   : > { %1308 = vtanh.f32 %v900_v39 }
 0x145   : > { %1310 = vtanh.f32 %v901_v43  ;;  %v891_v52 = vld [vmem:[%s1710_s3 + $0x48] sm:$0xff] }
 0x146   : > { %1312 = vtanh.f32 %v902_v44  ;;  %v908_v55 = vadd.f32 %v1103_v36, %v891_v52 }
 0x147   : > { %1314 = vtanh.f32 %v903_v47 }
 0x148   : > { %1316 = vtanh.f32 %v904_v49 }
 0x149   : > { %1318 = vtanh.f32 %v905_v51 }
 0x14a   : > { %1320 = vtanh.f32 %v906_v53 }
 0x14b   : > { %1322 = vtanh.f32 %v907_v54 }
 0x14c   : > { %1324 = vtanh.f32 %v908_v55 }
 0x150   : > { %v1307_v56 = vpop.eup %1306 }
 0x151   : > { %v1309_v57 = vpop.eup %1308  ;;  %919 = vst [vmem:[%s1710_s3] sm:$0xff] %v1307_v56 }
 0x152   : > { %v1311_v58 = vpop.eup %1310  ;;  %920 = vst [vmem:[%s1710_s3 + $0x8] sm:$0xff] %v1309_v57 }
 0x153   : > { %v1313_v59 = vpop.eup %1312  ;;  %921 = vst [vmem:[%s1710_s3 + $0x10] sm:$0xff] %v1311_v58 }
 0x154   : > { %v1315_v60 = vpop.eup %1314  ;;  %922 = vst [vmem:[%s1710_s3 + $0x18] sm:$0xff] %v1313_v59 }
 0x155   : > { %v1317_v61 = vpop.eup %1316  ;;  %923 = vst [vmem:[%s1710_s3 + $0x20] sm:$0xff] %v1315_v60 }
 0x156   : > { %v1319_v62 = vpop.eup %1318  ;;  %924 = vst [vmem:[%s1710_s3 + $0x28] sm:$0xff] %v1317_v61 }
 0x157   : > { %v1321_v63 = vpop.eup %1320  ;;  %925 = vst [vmem:[%s1710_s3 + $0x30] sm:$0xff] %v1319_v62 }
 0x158   : > { %v1323_v0 = vpop.eup %1322  ;;  %926 = vst [vmem:[%s1710_s3 + $0x38] sm:$0xff] %v1321_v63 }
 0x159   : > { %v1325_v1 = vpop.eup %1324  ;;  %927 = vst [vmem:[%s1710_s3 + $0x40] sm:$0xff] %v1323_v0 }
 0x15a   : > { %928 = vst [vmem:[%s1710_s3 + $0x48] sm:$0xff] %v1325_v1 }
 0x15b PF: > { %s13_s16 = sadd.s32 1, %s1364_s16   ;;  %s1711_s12 = smov %s1352_s13 }
 0x15c   : > { %p10_p12 = scmp.ge.s32.totalorder %s13_s16, 4   ;;  %s1712_s13 = smov %s1422_s20 }
 0x15d   : > { %s1713_s14 = smov %s1360_s15  ;;  %s1714_s15 = smov %s1716_s17 }
 0x15e   :  { %12 = sbr.rel (!%p10_p12) target bundleno = 3 (0x3), region = 104 }

// kernel: fwd.16
= control target key start
LH: loop header
LB: loop body
LE: loop exit
PB: predicated region body
PF: predicated region fallthrough
CT: control target
= control target key end

     0   :  { %s1307_s12 = smov 0   ;;  %s1309_s13 = smov 0   ;;  %s1492_s0 = inlined_call_operand.vmem [shape: bf16[160,512], index: 0, kind: input, shape index: {}]   ;;  %s1493_s1 = inlined_call_operand.vmem [shape: bf16[512,128], index: 1, kind: input, shape index: {}]   ;;  %s1494_s2 = inlined_call_operand.vmem [shape: f32[1,128], index: 2, kind: input, shape index: {}]   ;;  %s1495_s3 = inlined_call_operand.vmem [shape: f32[160,128], index: 3, kind: output, shape index: {}]  }
   0x1   :  { %s1311_s14 = smov 0  }
   0x2 LB: > { %s32_s15 = sadd.s32 1, %s1281_s13  ;;  %p1004_p0 = scmp.ge.s32.totalorder %s1285_s14, 1  ;;  %s1285_s14 = sphi %s1311_s14, %s13_s14   ;;  %s1281_s13 = sphi %s1309_s13, %s1497_s13   ;;  %s1277_s12 = sphi %s1307_s12, %s1496_s12  }
   0x3   : > { %p34_p1 = scmp.ge.s32.totalorder %s32_s15, 2  ;;  %p191_p2 = scmp.lt.s32.totalorder %s1285_s14, 3 }
   0x5   : > { %s1499_s15 = smov (%p34_p1, %s32_s15), 0  ;;  %p192_p3 = pnand %p1004_p0, %p191_p2 }
   0x6   : > { %s234_s23 = smul.u32 (!%p192_p3), 10, %s1277_s12 }
   0x7   : > { %195 = sbr.rel (%p192_p3) target bundleno = 299 (0x12b), region = 32 }
   0x8   : > { %p236_p4 = scmp.lt.s32.totalorder (!%p192_p3), %s234_s23, 19 }
   0xc   : > { %v1181_v0 = vld [vmem:[%s1493_s1 + $0x78] sm:$0xff]   ;;  %v1185_v4 = vld [vmem:[%s1493_s1 + $0x70] sm:$0xff]   ;;  %v1189_v8 = vld [vmem:[%s1493_s1 + $0x68] sm:$0xff]   ;;  %s1501_s23 = smov (!%p236_p4, %s234_s23), 19 }
   0xd   : > { %v1182_v1 = vld [vmem:[%s1493_s1 + $0xf8] sm:$0xff]   ;;  %1064 = vmatprep.subr.bf16.mxu0 %v1181_v0  ;;  %v1186_v5 = vld [vmem:[%s1493_s1 + $0xf0] sm:$0xff]   ;;  %v1190_v9 = vld [vmem:[%s1493_s1 + $0xe8] sm:$0xff]   ;;  %s1063_s25 = sshll.u32 %s1501_s23, 4  ;;  %s1007_s17 = sshll.u32 %s1501_s23, 3 }
   0xe   : > { %v1183_v2 = vld [vmem:[%s1493_s1 + $0x38] sm:$0xff]   ;;  %1110 = vmatprep.subr.bf16.mxu1 %v1182_v1  ;;  %v1187_v6 = vld [vmem:[%s1493_s1 + $0x30] sm:$0xff]   ;;  %v1191_v10 = vld [vmem:[%s1493_s1 + $0x28] sm:$0xff]   ;;  %s1424_s6 = scalar_lea.vmem %s1492_s0, %s1063_s25  ;;  %s1465_s20 = scalar_lea.vmem %s1495_s3, %s1007_s17 }
   0xf   : > { %v1184_v3 = vld [vmem:[%s1493_s1 + $0xb8] sm:$0xff]   ;;  %1065 = vmatpush3.bf16.msra.mxu0 %v1183_v2  ;;  %v1188_v7 = vld [vmem:[%s1493_s1 + $0xb0] sm:$0xff]   ;;  %v1192_v11 = vld [vmem:[%s1493_s1 + $0xa8] sm:$0xff]  }
  0x10   : > { %1111 = vmatpush3.bf16.msra.mxu1 %v1184_v3  ;;  %1066 = vmatprep.subr.bf16.mxu0 %v1185_v4  ;;  %v1193_v12 = vld [vmem:[%s1493_s1 + $0x60] sm:$0xff]   ;;  %v1197_v16 = vld [vmem:[%s1493_s1 + $0x58] sm:$0xff]   ;;  %v1201_v20 = vld [vmem:[%s1493_s1 + $0x50] sm:$0xff]  }
  0x11   : > { %1112 = vmatprep.subr.bf16.mxu1 %v1186_v5  ;;  %v1194_v13 = vld [vmem:[%s1493_s1 + $0xe0] sm:$0xff]   ;;  %v1198_v17 = vld [vmem:[%s1493_s1 + $0xd8] sm:$0xff]   ;;  %v1202_v21 = vld [vmem:[%s1493_s1 + $0xd0] sm:$0xff]  }
  0x12   : > { %v1195_v14 = vld [vmem:[%s1493_s1 + $0x20] sm:$0xff]   ;;  %v1199_v18 = vld [vmem:[%s1493_s1 + $0x18] sm:$0xff]   ;;  %v1203_v22 = vld [vmem:[%s1493_s1 + $0x10] sm:$0xff]  }
  0x13   : > { %1067 = vmatpush3.bf16.msra.mxu0 %v1187_v6  ;;  %v1196_v15 = vld [vmem:[%s1493_s1 + $0xa0] sm:$0xff]   ;;  %v1200_v19 = vld [vmem:[%s1493_s1 + $0x98] sm:$0xff]   ;;  %v1204_v23 = vld [vmem:[%s1493_s1 + $0x90] sm:$0xff]  }
  0x14   : > { %1113 = vmatpush3.bf16.msra.mxu1 %v1188_v7  ;;  %1068 = vmatprep.subr.bf16.mxu0 %v1189_v8  ;;  %v1205_v24 = vld [vmem:[%s1493_s1 + $0x48] sm:$0xff]   ;;  %v1209_v28 = vld [vmem:[%s1493_s1 + $0x40] sm:$0xff]  }
  0x15   : > { %1114 = vmatprep.subr.bf16.mxu1 %v1190_v9  ;;  %v1206_v25 = vld [vmem:[%s1493_s1 + $0xc8] sm:$0xff]   ;;  %v1210_v29 = vld [vmem:[%s1493_s1 + $0xc0] sm:$0xff]  }
  0x16   : > { %v1207_v26 = vld [vmem:[%s1493_s1 + $0x8] sm:$0xff]   ;;  %v1211_v30 = vld [vmem:[%s1493_s1] sm:$0xff]  }
  0x17   : > { %1069 = vmatpush3.bf16.msra.mxu0 %v1191_v10  ;;  %v1208_v27 = vld [vmem:[%s1493_s1 + $0x88] sm:$0xff]   ;;  %v1212_v31 = vld [vmem:[%s1493_s1 + $0x80] sm:$0xff]  }
  0x18   : > { %1115 = vmatpush3.bf16.msra.mxu1 %v1192_v11  ;;  %1070 = vmatprep.subr.bf16.mxu0 %v1193_v12  ;;  %v1213_v32 = vld [vmem:[%s1424_s6] ss:$16 sps:$4 sm:$0xff]   ;;  %v1215_v33 = vld [vmem:[%s1424_s6 + $0x4] ss:$16 sps:$4 sm:$0xff]   ;;  %v1216_v34 = vld [vmem:[%s1424_s6 + $0x8] ss:$16 sps:$4 sm:$0xff]  }
  0x19   : > { %1116 = vmatprep.subr.bf16.mxu1 %v1194_v13  ;;  %v1218_v35 = vld [vmem:[%s1424_s6 + $0xc] ss:$16 sps:$4 sm:$0xff]   ;;  %700 = vmatprep.mubr.bf16.mxu0 %v1215_v33  ;;  %v1219_v36 = vld [vmem:[%s1424_s6 + $0x24] ss:$16 sps:$4 sm:$0xff]   ;;  %v1223_v38 = vld [vmem:[%s1424_s6 + $0x20] ss:$16 sps:$4 sm:$0xff]  }
  0x1a   : > { %773 = vmatprep.mubr.bf16.mxu1 %v1218_v35  ;;  %v1221_v37 = vld [vmem:[%s1424_s6 + $0x2c] ss:$16 sps:$4 sm:$0xff]   ;;  %v1224_v39 = vld [vmem:[%s1424_s6 + $0x28] ss:$16 sps:$4 sm:$0xff]   ;;  %v1225_v40 = vld [vmem:[%s1424_s6 + $0x44] ss:$16 sps:$4 sm:$0xff]  }
  0x1b   : > { %1071 = vmatpush3.bf16.msra.mxu0 %v1195_v14  ;;  %v1227_v41 = vld [vmem:[%s1424_s6 + $0x4c] ss:$16 sps:$4 sm:$0xff]   ;;  %v1229_v42 = vld [vmem:[%s1424_s6 + $0x40] ss:$16 sps:$4 sm:$0xff]   ;;  %v1230_v43 = vld [vmem:[%s1424_s6 + $0x48] ss:$16 sps:$4 sm:$0xff]  }
  0x1c   : > { %1117 = vmatpush3.bf16.msra.mxu1 %v1196_v15  ;;  %1072 = vmatprep.subr.bf16.mxu0 %v1197_v16  ;;  %v1231_v44 = vld [vmem:[%s1424_s6 + $0x64] ss:$16 sps:$4 sm:$0xff]   ;;  %v1233_v45 = vld [vmem:[%s1424_s6 + $0x6c] ss:$16 sps:$4 sm:$0xff]   ;;  %v1235_v46 = vld [vmem:[%s1424_s6 + $0x60] ss:$16 sps:$4 sm:$0xff]  }
  0x1d   : > { %1118 = vmatprep.subr.bf16.mxu1 %v1198_v17  ;;  %v1236_v47 = vld [vmem:[%s1424_s6 + $0x68] ss:$16 sps:$4 sm:$0xff]   ;;  %v1237_v48 = vld [vmem:[%s1424_s6 + $0x84] ss:$16 sps:$4 sm:$0xff]   ;;  %v1239_v49 = vld [vmem:[%s1424_s6 + $0x8c] ss:$16 sps:$4 sm:$0xff]  }
  0x1e   : > { %v1241_v50 = vld [vmem:[%s1424_s6 + $0x80] ss:$16 sps:$4 sm:$0xff]   ;;  %v1242_v51 = vld [vmem:[%s1424_s6 + $0x88] ss:$16 sps:$4 sm:$0xff]  }
  0x1f   : > { %1073 = vmatpush3.bf16.msra.mxu0 %v1199_v18  ;;  %v1455_v62 = vld [vmem:[%s1494_s2] ss:$0 sm:$0xff] }
  0x20   : > { %1119 = vmatpush3.bf16.msra.mxu1 %v1200_v19  ;;  %1074 = vmatprep.subr.bf16.mxu0 %v1201_v20 }
  0x21   : > { %1120 = vmatprep.subr.bf16.mxu1 %v1202_v21 }
  0x23   : > { %1075 = vmatpush3.bf16.msra.mxu0 %v1203_v22 }
  0x24   : > { %1121 = vmatpush3.bf16.msra.mxu1 %v1204_v23  ;;  %1076 = vmatprep.subr.bf16.mxu0 %v1205_v24 }
  0x25   : > { %1122 = vmatprep.subr.bf16.mxu1 %v1206_v25 }
  0x27   : > { %1077 = vmatpush3.bf16.msra.mxu0 %v1207_v26 }
  0x28   : > { %1123 = vmatpush3.bf16.msra.mxu1 %v1208_v27  ;;  %1078 = vmatprep.subr.bf16.mxu0 %v1209_v28 }
  0x29   : > { %1124 = vmatprep.subr.bf16.mxu1 %v1210_v29 }
  0x2b   : > { %1079 = vmatpush3.bf16.msra.mxu0 %v1211_v30 }
  0x2c   : > { %1125 = vmatpush3.bf16.msra.mxu1 %v1212_v31 }
  0x2e   : > { %701 = vmatmul.mubr.bf16.vlgmr.msra.gmra.mxu0 %v1213_v32 }
  0x2f   : > { %774 = vmatmul.mubr.bf16.vlgmr.msra.gmra.mxu1 %v1216_v34  ;;  %708 = vmatprep.mubr.bf16.mxu0 %v1219_v36 }
  0x30   : > { %781 = vmatprep.mubr.bf16.mxu1 %v1221_v37 }
  0x36   : > { %709 = vmatmul.mubr.bf16.gmra.mxu0 %v1223_v38 }
  0x37   : > { %782 = vmatmul.mubr.bf16.gmra.mxu1 %v1224_v39  ;;  %716 = vmatprep.mubr.bf16.mxu0 %v1225_v40 }
  0x38   : > { %789 = vmatprep.mubr.bf16.mxu1 %v1227_v41 }
  0x3e   : > { %717 = vmatmul.mubr.bf16.gmra.mxu0 %v1229_v42 }
  0x3f   : > { %790 = vmatmul.mubr.bf16.gmra.mxu1 %v1230_v43  ;;  %724 = vmatprep.mubr.bf16.mxu0 %v1231_v44 }
  0x40   : > { %797 = vmatprep.mubr.bf16.mxu1 %v1233_v45 }
  0x46   : > { %725 = vmatmul.mubr.bf16.gmra.mxu0 %v1235_v46 }
  0x47   : > { %798 = vmatmul.mubr.bf16.gmra.mxu1 %v1236_v47  ;;  %732 = vmatprep.mubr.bf16.mxu0 %v1237_v48 }
  0x48   : > { %805 = vmatprep.mubr.bf16.mxu1 %v1239_v49 }
  0x4e   : > { %733 = vmatmul.mubr.bf16.gmra.mxu0 %v1241_v50 }
  0x4f   : > { %806 = vmatmul.mubr.bf16.gmra.mxu1 %v1242_v51 }
  0xee   : > { %v1080_v52 = vpop.f32.mrf.mxu0 }
  0xef   : > { %v1126_v53 = vpop.f32.mrf.mxu1 }
  0xf0   : > { %v1081_v54 = vpop.f32.mrf.mxu0 }
  0xf1   : > { %v1082_v55 = vadd.f32 %v1081_v54, %v1080_v52  ;;  %v1127_v56 = vpop.f32.mrf.mxu1 }
  0xf2   : > { %v1128_v57 = vadd.f32 %v1127_v56, %v1126_v53  ;;  %v1083_v58 = vpop.f32.mrf.mxu0 }
  0xf3   : > { %v1129_v59 = vpop.f32.mrf.mxu1 }
  0xf4   : > { %v776_v60 = vadd.f32 %v1128_v57, %v1082_v55  ;;  %v1084_v61 = vpop.f32.mrf.mxu0 }
  0xf5   : > { %v1085_v63 = vadd.f32 %v1084_v61, %v1083_v58  ;;  %v1130_v0 = vpop.f32.mrf.mxu1 }
  0xf6   : > { %v1131_v1 = vadd.f32 %v1130_v0, %v1129_v59  ;;  %v1086_v2 = vpop.f32.mrf.mxu0  ;;  %v854_v4 = vadd.f32 %v1455_v62, %v776_v60 }
  0xf7   : > { %v1132_v3 = vpop.f32.mrf.mxu1 }
  0xf8   : > { %v779_v5 = vadd.f32 %v1131_v1, %v1085_v63  ;;  %v1087_v6 = vpop.f32.mrf.mxu0  ;;  %1243 = vtanh.f32 %v854_v4 }
  0xf9   : > { %v1088_v7 = vadd.f32 %v1087_v6, %v1086_v2  ;;  %v1133_v8 = vpop.f32.mrf.mxu1 }
  0xfa   : > { %v1134_v9 = vadd.f32 %v1133_v8, %v1132_v3  ;;  %v1089_v10 = vpop.f32.mrf.mxu0  ;;  %v855_v12 = vadd.f32 %v1455_v62, %v779_v5 }
  0xfb   : > { %v1135_v11 = vpop.f32.mrf.mxu1 }
  0xfc   : > { %v784_v13 = vadd.f32 %v1134_v9, %v1088_v7  ;;  %v1090_v14 = vpop.f32.mrf.mxu0  ;;  %1245 = vtanh.f32 %v855_v12 }
  0xfd   : > { %v1091_v15 = vadd.f32 %v1090_v14, %v1089_v10  ;;  %v1136_v16 = vpop.f32.mrf.mxu1 }
  0xfe   : > { %v1137_v17 = vadd.f32 %v1136_v16, %v1135_v11  ;;  %v1092_v18 = vpop.f32.mrf.mxu0  ;;  %v856_v20 = vadd.f32 %v1455_v62, %v784_v13 }
  0xff   : > { %v1138_v19 = vpop.f32.mrf.mxu1 }
 0x100   : > { %v787_v21 = vadd.f32 %v1137_v17, %v1091_v15  ;;  %v1093_v22 = vpop.f32.mrf.mxu0  ;;  %1247 = vtanh.f32 %v856_v20 }
 0x101   : > { %v1094_v23 = vadd.f32 %v1093_v22, %v1092_v18  ;;  %v1139_v24 = vpop.f32.mrf.mxu1 }
 0x102   : > { %v1140_v25 = vadd.f32 %v1139_v24, %v1138_v19  ;;  %v1095_v26 = vpop.f32.mrf.mxu0  ;;  %v857_v28 = vadd.f32 %v1455_v62, %v787_v21 }
 0x103   : > { %v1141_v27 = vpop.f32.mrf.mxu1 }
 0x104   : > { %v792_v29 = vadd.f32 %v1140_v25, %v1094_v23  ;;  %v1096_v30 = vpop.f32.mrf.mxu0  ;;  %1249 = vtanh.f32 %v857_v28 }
 0x105   : > { %v1097_v31 = vadd.f32 %v1096_v30, %v1095_v26  ;;  %v1142_v32 = vpop.f32.mrf.mxu1  ;;  %v1244_v35 = vpop.eup %1243 }
 0x106   : > { %v1143_v33 = vadd.f32 %v1142_v32, %v1141_v27  ;;  %v1098_v34 = vpop.f32.mrf.mxu0  ;;  %874 = vst [vmem:[%s1465_s20] sm:$0xff] %v1244_v35  ;;  %v858_v37 = vadd.f32 %v1455_v62, %v792_v29 }
 0x107   : > { %v1144_v36 = vpop.f32.mrf.mxu1 }
 0x108   : > { %v795_v38 = vadd.f32 %v1143_v33, %v1097_v31  ;;  %v1099_v39 = vpop.f32.mrf.mxu0  ;;  %1251 = vtanh.f32 %v858_v37 }
 0x109   : > { %v1100_v40 = vadd.f32 %v1099_v39, %v1098_v34  ;;  %v1145_v41 = vpop.f32.mrf.mxu1  ;;  %v1246_v44 = vpop.eup %1245 }
 0x10a   : > { %v1146_v42 = vadd.f32 %v1145_v41, %v1144_v36  ;;  %v1101_v43 = vpop.f32.mrf.mxu0  ;;  %875 = vst [vmem:[%s1465_s20 + $0x8] sm:$0xff] %v1246_v44  ;;  %v859_v46 = vadd.f32 %v1455_v62, %v795_v38 }
 0x10b   : > { %v1147_v45 = vpop.f32.mrf.mxu1 }
 0x10c   : > { %v800_v47 = vadd.f32 %v1146_v42, %v1100_v40  ;;  %v1102_v48 = vpop.f32.mrf.mxu0  ;;  %1253 = vtanh.f32 %v859_v46 }
 0x10d   : > { %v1103_v49 = vadd.f32 %v1102_v48, %v1101_v43  ;;  %v1148_v50 = vpop.f32.mrf.mxu1  ;;  %v1248_v53 = vpop.eup %1247 }
 0x10e   : > { %v1149_v51 = vadd.f32 %v1148_v50, %v1147_v45  ;;  %v1104_v52 = vpop.f32.mrf.mxu0  ;;  %876 = vst [vmem:[%s1465_s20 + $0x10] sm:$0xff] %v1248_v53  ;;  %v860_v55 = vadd.f32 %v1455_v62, %v800_v47 }
 0x10f   : > { %v1150_v54 = vpop.f32.mrf.mxu1 }
 0x110   : > { %v803_v56 = vadd.f32 %v1149_v51, %v1103_v49  ;;  %v1105_v57 = vpop.f32.mrf.mxu0  ;;  %1255 = vtanh.f32 %v860_v55 }
 0x111   : > { %v1106_v58 = vadd.f32 %v1105_v57, %v1104_v52  ;;  %v1151_v59 = vpop.f32.mrf.mxu1  ;;  %v1250_v63 = vpop.eup %1249 }
 0x112   : > { %v1152_v60 = vadd.f32 %v1151_v59, %v1150_v54  ;;  %v1107_v61 = vpop.f32.mrf.mxu0  ;;  %877 = vst [vmem:[%s1465_s20 + $0x18] sm:$0xff] %v1250_v63  ;;  %v861_v1 = vadd.f32 %v1455_v62, %v803_v56 }
 0x113   : > { %v1153_v0 = vpop.f32.mrf.mxu1 }
 0x114   : > { %v808_v2 = vadd.f32 %v1152_v60, %v1106_v58  ;;  %v1108_v3 = vpop.f32.mrf.mxu0  ;;  %1257 = vtanh.f32 %v861_v1 }
 0x115   : > { %v1109_v4 = vadd.f32 %v1108_v3, %v1107_v61  ;;  %v1154_v5 = vpop.f32.mrf.mxu1  ;;  %v1252_v7 = vpop.eup %1251 }
 0x116   : > { %v1155_v6 = vadd.f32 %v1154_v5, %v1153_v0  ;;  %878 = vst [vmem:[%s1465_s20 + $0x20] sm:$0xff] %v1252_v7  ;;  %v862_v8 = vadd.f32 %v1455_v62, %v808_v2 }
 0x118   : > { %v811_v9 = vadd.f32 %v1155_v6, %v1109_v4  ;;  %1259 = vtanh.f32 %v862_v8 }
 0x119   : > { %v1254_v10 = vpop.eup %1253 }
 0x11a   : > { %879 = vst [vmem:[%s1465_s20 + $0x28] sm:$0xff] %v1254_v10  ;;  %v863_v11 = vadd.f32 %v1455_v62, %v811_v9 }
 0x11c   : > { %1261 = vtanh.f32 %v863_v11 }
 0x11d   : > { %v1256_v12 = vpop.eup %1255 }
 0x11e   : > { %880 = vst [vmem:[%s1465_s20 + $0x30] sm:$0xff] %v1256_v12 }
 0x121   : > { %v1258_v13 = vpop.eup %1257 }
 0x122   : > { %881 = vst [vmem:[%s1465_s20 + $0x38] sm:$0xff] %v1258_v13 }
 0x125   : > { %v1260_v14 = vpop.eup %1259 }
 0x126   : > { %882 = vst [vmem:[%s1465_s20 + $0x40] sm:$0xff] %v1260_v14 }
 0x129   : > { %v1262_v15 = vpop.eup %1261 }
 0x12a   : > { %883 = vst [vmem:[%s1465_s20 + $0x48] sm:$0xff] %v1262_v15 }
 0x12b PF: > { %s13_s14 = sadd.s32 1, %s1285_s14   ;;  %s1496_s12 = smov %s1281_s13 }
 0x12c   : > { %p10_p5 = scmp.ge.s32.totalorder %s13_s14, 4   ;;  %s1497_s13 = smov %s1499_s15 }
 0x12e   :  { %12 = sbr.rel (!%p10_p5) target bundleno = 2 (0x2), region = 76 }

// kernel: fwd.17
= control target key start
LH: loop header
LB: loop body
LE: loop exit
PB: predicated region body
PF: predicated region fallthrough
CT: control target
= control target key end

     0   :  { %s1061_s12 = smov 0   ;;  %s1063_s13 = smov 0   ;;  %s1200_s0 = inlined_call_operand.vmem [shape: bf16[336,256], index: 0, kind: input, shape index: {}]   ;;  %s1201_s1 = inlined_call_operand.vmem [shape: bf16[256,128], index: 1, kind: input, shape index: {}]   ;;  %s1202_s2 = inlined_call_operand.vmem [shape: f32[1,128], index: 2, kind: input, shape index: {}]   ;;  %s1203_s3 = inlined_call_operand.vmem [shape: f32[336,128], index: 3, kind: output, shape index: {}]  }
   0x1   :  { %s1065_s14 = smov 0  }
   0x2 LB: > { %s32_s15 = sadd.s32 1, %s1035_s13  ;;  %p815_p0 = scmp.ge.s32.totalorder %s1039_s14, 1  ;;  %s1039_s14 = sphi %s1065_s14, %s13_s14   ;;  %s1035_s13 = sphi %s1063_s13, %s1205_s13   ;;  %s1031_s12 = sphi %s1061_s12, %s1204_s12  }
   0x3   : > { %p34_p1 = scmp.ge.s32.totalorder %s32_s15, 3  ;;  %p191_p2 = scmp.lt.s32.totalorder %s1039_s14, 4 }
   0x5   : > { %s1207_s15 = smov (%p34_p1, %s32_s15), 0  ;;  %p192_p3 = pnand %p815_p0, %p191_p2 }
   0x6   : > { %s234_s18 = smul.u32 (!%p192_p3), 14, %s1031_s12 }
   0x7   : > { %195 = sbr.rel (%p192_p3) target bundleno = 287 (0x11f), region = 32 }
   0x8   : > { %p236_p4 = scmp.lt.s32.totalorder (!%p192_p3), %s234_s18, 41 }
   0xc   : > { %v952_v0 = vld [vmem:[%s1201_s1 + $0x78] sm:$0xff]   ;;  %v954_v2 = vld [vmem:[%s1201_s1 + $0x70] sm:$0xff]   ;;  %v956_v4 = vld [vmem:[%s1201_s1 + $0x68] sm:$0xff]   ;;  %s1209_s18 = smov (!%p236_p4, %s234_s18), 41 }
   0xd   : > { %v953_v1 = vld [vmem:[%s1201_s1 + $0x38] sm:$0xff]   ;;  %853 = vmatprep.subr.bf16.mxu0 %v952_v0  ;;  %911 = vmatprep.subr.bf16.mxu1 %v952_v0  ;;  %v955_v3 = vld [vmem:[%s1201_s1 + $0x30] sm:$0xff]   ;;  %v957_v5 = vld [vmem:[%s1201_s1 + $0x28] sm:$0xff]   ;;  %s852_s6 = sshll.u32 %s1209_s18, 3 }
   0xe   : > { %854 = vmatpush3.bf16.msra.mxu0 %v953_v1  ;;  %919 = vmatpush3.bf16.msra.mxu1 %v953_v1  ;;  %v958_v6 = vld [vmem:[%s1201_s1 + $0x60] sm:$0xff]   ;;  %v960_v8 = vld [vmem:[%s1201_s1 + $0x58] sm:$0xff]   ;;  %s1114_s11 = scalar_lea.vmem %s1200_s0, %s852_s6  ;;  %v962_v10 = vld [vmem:[%s1201_s1 + $0x50] sm:$0xff]   ;;  %s1169_s8 = scalar_lea.vmem %s1203_s3, %s852_s6 }
   0xf   : > { %855 = vmatprep.subr.bf16.mxu0 %v954_v2  ;;  %912 = vmatprep.subr.bf16.mxu1 %v954_v2  ;;  %v959_v7 = vld [vmem:[%s1201_s1 + $0x20] sm:$0xff]   ;;  %v961_v9 = vld [vmem:[%s1201_s1 + $0x18] sm:$0xff]   ;;  %v963_v13 = vld [vmem:[%s1201_s1 + $0x10] sm:$0xff]  }
  0x10   : > { %v970_v11 = vld [vmem:[%s1114_s11 + $0x4] ss:$8 sps:$4 sm:$0xff]   ;;  %v968_v18 = vld [vmem:[%s1114_s11] ss:$8 sps:$4 sm:$0xff]   ;;  %v974_v20 = vld [vmem:[%s1114_s11 + $0x14] ss:$8 sps:$4 sm:$0xff]  }
  0x11   : > { %v973_v12 = vld [vmem:[%s1114_s11 + $0x44] ss:$8 sps:$4 sm:$0xff]   ;;  %544 = vmatprep.mubr.bf16.mxu0 %v970_v11  ;;  %v971_v19 = vld [vmem:[%s1114_s11 + $0x40] ss:$8 sps:$4 sm:$0xff]   ;;  %v977_v21 = vld [vmem:[%s1114_s11 + $0x54] ss:$8 sps:$4 sm:$0xff]  }
  0x12   : > { %856 = vmatpush3.bf16.msra.mxu0 %v955_v3  ;;  %920 = vmatpush3.bf16.msra.mxu1 %v955_v3  ;;  %v964_v14 = vld [vmem:[%s1201_s1 + $0x48] sm:$0xff]   ;;  %v966_v16 = vld [vmem:[%s1201_s1 + $0x40] sm:$0xff]   ;;  %v976_v22 = vld [vmem:[%s1114_s11 + $0x10] ss:$8 sps:$4 sm:$0xff]  }
  0x13   : > { %857 = vmatprep.subr.bf16.mxu0 %v956_v4  ;;  %913 = vmatprep.subr.bf16.mxu1 %v956_v4  ;;  %v965_v15 = vld [vmem:[%s1201_s1 + $0x8] sm:$0xff]   ;;  %v967_v17 = vld [vmem:[%s1201_s1] sm:$0xff]   ;;  %v979_v23 = vld [vmem:[%s1114_s11 + $0x50] ss:$8 sps:$4 sm:$0xff]  }
  0x14   : > { %576 = vmatprep.mubr.bf16.mxu1 %v973_v12  ;;  %v980_v24 = vld [vmem:[%s1114_s11 + $0x24] ss:$8 sps:$4 sm:$0xff]   ;;  %v982_v26 = vld [vmem:[%s1114_s11 + $0x20] ss:$8 sps:$4 sm:$0xff]   ;;  %v986_v28 = vld [vmem:[%s1114_s11 + $0x34] ss:$8 sps:$4 sm:$0xff]  }
  0x15   : > { %v983_v25 = vld [vmem:[%s1114_s11 + $0x64] ss:$8 sps:$4 sm:$0xff]   ;;  %v985_v27 = vld [vmem:[%s1114_s11 + $0x60] ss:$8 sps:$4 sm:$0xff]   ;;  %v988_v29 = vld [vmem:[%s1114_s11 + $0x30] ss:$8 sps:$4 sm:$0xff]  }
  0x16   : > { %858 = vmatpush3.bf16.msra.mxu0 %v957_v5  ;;  %921 = vmatpush3.bf16.msra.mxu1 %v957_v5  ;;  %v1154_v36 = vld [vmem:[%s1202_s2] ss:$0 sm:$0xff] }
  0x17   : > { %859 = vmatprep.subr.bf16.mxu0 %v958_v6  ;;  %914 = vmatprep.subr.bf16.mxu1 %v958_v6 }
  0x1a   : > { %860 = vmatpush3.bf16.msra.mxu0 %v959_v7  ;;  %922 = vmatpush3.bf16.msra.mxu1 %v959_v7 }
  0x1b   : > { %861 = vmatprep.subr.bf16.mxu0 %v960_v8  ;;  %915 = vmatprep.subr.bf16.mxu1 %v960_v8 }
  0x1e   : > { %862 = vmatpush3.bf16.msra.mxu0 %v961_v9  ;;  %923 = vmatpush3.bf16.msra.mxu1 %v961_v9 }
  0x1f   : > { %863 = vmatprep.subr.bf16.mxu0 %v962_v10  ;;  %916 = vmatprep.subr.bf16.mxu1 %v962_v10 }
  0x22   : > { %864 = vmatpush3.bf16.msra.mxu0 %v963_v13  ;;  %924 = vmatpush3.bf16.msra.mxu1 %v963_v13 }
  0x23   : > { %865 = vmatprep.subr.bf16.mxu0 %v964_v14  ;;  %917 = vmatprep.subr.bf16.mxu1 %v964_v14 }
  0x26   : > { %866 = vmatpush3.bf16.msra.mxu0 %v965_v15  ;;  %925 = vmatpush3.bf16.msra.mxu1 %v965_v15 }
  0x27   : > { %867 = vmatprep.subr.bf16.mxu0 %v966_v16  ;;  %918 = vmatprep.subr.bf16.mxu1 %v966_v16 }
  0x2a   : > { %868 = vmatpush3.bf16.msra.mxu0 %v967_v17  ;;  %926 = vmatpush3.bf16.msra.mxu1 %v967_v17 }
  0x2d   : > { %545 = vmatmul.mubr.bf16.vlgmr.msra.gmra.mxu0 %v968_v18  ;;  %577 = vmatmul.mubr.bf16.vlgmr.msra.gmra.mxu1 %v971_v19 }
  0x2e   : > { %552 = vmatprep.mubr.bf16.mxu0 %v974_v20  ;;  %584 = vmatprep.mubr.bf16.mxu1 %v977_v21 }
  0x35   : > { %553 = vmatmul.mubr.bf16.gmra.mxu0 %v976_v22  ;;  %585 = vmatmul.mubr.bf16.gmra.mxu1 %v979_v23 }
  0x36   : > { %560 = vmatprep.mubr.bf16.mxu0 %v980_v24  ;;  %592 = vmatprep.mubr.bf16.mxu1 %v983_v25 }
  0x3d   : > { %561 = vmatmul.mubr.bf16.gmra.mxu0 %v982_v26  ;;  %593 = vmatmul.mubr.bf16.gmra.mxu1 %v985_v27 }
  0x3e   : > { %568 = vmatprep.mubr.bf16.mxu0 %v986_v28 }
  0x45   : > { %569 = vmatmul.mubr.bf16.gmra.mxu0 %v988_v29 }
  0xed   : > { %v869_v30 = vpop.f32.mrf.mxu0  ;;  %v893_v31 = vpop.f32.mrf.mxu1 }
  0xef   : > { %v870_v32 = vpop.f32.mrf.mxu0  ;;  %v894_v33 = vpop.f32.mrf.mxu1 }
  0xf0   : > { %v871_v34 = vadd.f32 %v870_v32, %v869_v30  ;;  %v895_v35 = vadd.f32 %v894_v33, %v893_v31 }
  0xf1   : > { %v872_v37 = vpop.f32.mrf.mxu0  ;;  %v896_v38 = vpop.f32.mrf.mxu1 }
  0xf2   : > { %v653_v41 = vadd.f32 %v871_v34, %v1154_v36  ;;  %v661_v42 = vadd.f32 %v895_v35, %v1154_v36 }
  0xf3   : > { %v873_v39 = vpop.f32.mrf.mxu0  ;;  %v897_v40 = vpop.f32.mrf.mxu1 }
  0xf4   : > { %v874_v43 = vadd.f32 %v873_v39, %v872_v37  ;;  %v898_v44 = vadd.f32 %v897_v40, %v896_v38  ;;  %989 = vtanh.f32 %v653_v41 }
  0xf5   : > { %v875_v45 = vpop.f32.mrf.mxu0  ;;  %v899_v46 = vpop.f32.mrf.mxu1  ;;  %991 = vtanh.f32 %v661_v42 }
  0xf6   : > { %v654_v49 = vadd.f32 %v874_v43, %v1154_v36  ;;  %v662_v50 = vadd.f32 %v898_v44, %v1154_v36 }
  0xf7   : > { %v876_v47 = vpop.f32.mrf.mxu0  ;;  %v900_v48 = vpop.f32.mrf.mxu1 }
  0xf8   : > { %v877_v51 = vadd.f32 %v876_v47, %v875_v45  ;;  %v901_v52 = vadd.f32 %v900_v48, %v899_v46  ;;  %993 = vtanh.f32 %v654_v49 }
  0xf9   : > { %v878_v53 = vpop.f32.mrf.mxu0  ;;  %v902_v54 = vpop.f32.mrf.mxu1  ;;  %995 = vtanh.f32 %v662_v50 }
  0xfa   : > { %v655_v57 = vadd.f32 %v877_v51, %v1154_v36  ;;  %v663_v58 = vadd.f32 %v901_v52, %v1154_v36 }
  0xfb   : > { %v879_v55 = vpop.f32.mrf.mxu0  ;;  %v903_v56 = vpop.f32.mrf.mxu1 }
  0xfc   : > { %v880_v59 = vadd.f32 %v879_v55, %v878_v53  ;;  %v904_v60 = vadd.f32 %v903_v56, %v902_v54  ;;  %997 = vtanh.f32 %v655_v57 }
  0xfd   : > { %v881_v61 = vpop.f32.mrf.mxu0  ;;  %v905_v62 = vpop.f32.mrf.mxu1  ;;  %999 = vtanh.f32 %v663_v58 }
  0xfe   : > { %v656_v1 = vadd.f32 %v880_v59, %v1154_v36  ;;  %v664_v2 = vadd.f32 %v904_v60, %v1154_v36 }
  0xff   : > { %v882_v63 = vpop.f32.mrf.mxu0  ;;  %v906_v0 = vpop.f32.mrf.mxu1 }
 0x100   : > { %v883_v3 = vadd.f32 %v882_v63, %v881_v61  ;;  %v907_v4 = vadd.f32 %v906_v0, %v905_v62  ;;  %1001 = vtanh.f32 %v656_v1 }
 0x101   : > { %v884_v5 = vpop.f32.mrf.mxu0  ;;  %v908_v6 = vpop.f32.mrf.mxu1  ;;  %1003 = vtanh.f32 %v664_v2 }
 0x102   : > { %v990_v7 = vpop.eup %989  ;;  %v657_v11 = vadd.f32 %v883_v3, %v1154_v36  ;;  %v665_v12 = vadd.f32 %v907_v4, %v1154_v36 }
 0x103   : > { %v885_v8 = vpop.f32.mrf.mxu0  ;;  %v909_v9 = vpop.f32.mrf.mxu1  ;;  %681 = vst [vmem:[%s1169_s8] sm:$0xff] %v990_v7 }
 0x104   : > { %v992_v10 = vpop.eup %991  ;;  %v886_v13 = vadd.f32 %v885_v8, %v884_v5  ;;  %v910_v14 = vadd.f32 %v909_v9, %v908_v6  ;;  %1005 = vtanh.f32 %v657_v11 }
 0x105   : > { %689 = vst [vmem:[%s1169_s8 + $0x40] sm:$0xff] %v992_v10  ;;  %v887_v15 = vpop.f32.mrf.mxu0  ;;  %v994_v16 = vpop.eup %993  ;;  %1007 = vtanh.f32 %v665_v12 }
 0x106   : > { %v996_v18 = vpop.eup %995  ;;  %682 = vst [vmem:[%s1169_s8 + $0x8] sm:$0xff] %v994_v16  ;;  %v658_v19 = vadd.f32 %v886_v13, %v1154_v36  ;;  %v666_v20 = vadd.f32 %v910_v14, %v1154_v36 }
 0x107   : > { %v888_v17 = vpop.f32.mrf.mxu0  ;;  %690 = vst [vmem:[%s1169_s8 + $0x48] sm:$0xff] %v996_v18 }
 0x108   : > { %v889_v21 = vadd.f32 %v888_v17, %v887_v15  ;;  %1009 = vtanh.f32 %v658_v19 }
 0x109   : > { %v890_v22 = vpop.f32.mrf.mxu0  ;;  %v998_v23 = vpop.eup %997  ;;  %1011 = vtanh.f32 %v666_v20 }
 0x10a   : > { %v1000_v25 = vpop.eup %999  ;;  %683 = vst [vmem:[%s1169_s8 + $0x10] sm:$0xff] %v998_v23  ;;  %v659_v26 = vadd.f32 %v889_v21, %v1154_v36 }
 0x10b   : > { %v891_v24 = vpop.f32.mrf.mxu0  ;;  %691 = vst [vmem:[%s1169_s8 + $0x50] sm:$0xff] %v1000_v25 }
 0x10c   : > { %v892_v27 = vadd.f32 %v891_v24, %v890_v22  ;;  %1013 = vtanh.f32 %v659_v26 }
 0x10d   : > { %v1002_v28 = vpop.eup %1001 }
 0x10e   : > { %v1004_v29 = vpop.eup %1003  ;;  %684 = vst [vmem:[%s1169_s8 + $0x18] sm:$0xff] %v1002_v28  ;;  %v660_v30 = vadd.f32 %v892_v27, %v1154_v36 }
 0x10f   : > { %692 = vst [vmem:[%s1169_s8 + $0x58] sm:$0xff] %v1004_v29 }
 0x110   : > { %1015 = vtanh.f32 %v660_v30 }
 0x111   : > { %v1006_v31 = vpop.eup %1005 }
 0x112   : > { %v1008_v32 = vpop.eup %1007  ;;  %685 = vst [vmem:[%s1169_s8 + $0x20] sm:$0xff] %v1006_v31 }
 0x113   : > { %693 = vst [vmem:[%s1169_s8 + $0x60] sm:$0xff] %v1008_v32 }
 0x115   : > { %v1010_v33 = vpop.eup %1009 }
 0x116   : > { %v1012_v34 = vpop.eup %1011  ;;  %686 = vst [vmem:[%s1169_s8 + $0x28] sm:$0xff] %v1010_v33 }
 0x117   : > { %694 = vst [vmem:[%s1169_s8 + $0x68] sm:$0xff] %v1012_v34 }
 0x119   : > { %v1014_v35 = vpop.eup %1013 }
 0x11a   : > { %687 = vst [vmem:[%s1169_s8 + $0x30] sm:$0xff] %v1014_v35 }
 0x11d   : > { %v1016_v37 = vpop.eup %1015 }
 0x11e   : > { %688 = vst [vmem:[%s1169_s8 + $0x38] sm:$0xff] %v1016_v37 }
 0x11f PF: > { %s13_s14 = sadd.s32 1, %s1039_s14   ;;  %s1204_s12 = smov %s1035_s13 }
 0x120   : > { %p10_p5 = scmp.ge.s32.totalorder %s13_s14, 5   ;;  %s1205_s13 = smov %s1207_s15 }
 0x122   :  { %12 = sbr.rel (!%p10_p5) target bundleno = 2 (0x2), region = 76 }

</bundles_post_ra>
